<compile_context>
chip_gen: v6e
topology: v6e:2x2x1
jax: 0.10.0
libtpu: 0.0.40
codegen_flags: <defaults>
</compile_context>

<pallas_src>
import functools

import jax
import jax.numpy as jnp
from jax import lax
from jax.experimental import pallas as pl
from jax.experimental.pallas import tpu as pltpu

EPS = 1e-5   # torch BatchNorm default eps
TN = 1024    # max lane tile (flattened-spatial dim) for the conv kernels


def _round_up(n, m):
    return (n + m - 1) // m * m


# ----------------------------- Pallas kernels ------------------------------

def fc_stack_kernel(x_ref, w1_ref, b1_ref, g1_ref, be1_ref,
                    w2_ref, b2_ref, g2_ref, be2_ref, o_ref):
    # relu(BN1d(x@w1+b1)) -> relu(BN1d(.@w2+b2)); bf16 matmul operands, f32 math.
    def bn_relu(h, g, be):
        mean = jnp.mean(h, axis=0, keepdims=True)
        var = jnp.mean((h - mean) ** 2, axis=0, keepdims=True)   # biased, train-mode BN
        return jnp.maximum((h - mean) * lax.rsqrt(var + EPS) * g + be, 0.0)

    h1 = jnp.dot(x_ref[...], w1_ref[...], preferred_element_type=jnp.float32) + b1_ref[...]
    a1 = bn_relu(h1, g1_ref[...], be1_ref[...])
    h2 = jnp.dot(a1.astype(jnp.bfloat16), w2_ref[...],
                 preferred_element_type=jnp.float32) + b2_ref[...]
    o_ref[...] = bn_relu(h2, g2_ref[...], be2_ref[...]).astype(jnp.bfloat16)


def conv_bn_fused_kernel(w_ref, p_ref, g_ref, b_ref, gm_ref, o_ref,
                         y_sc, s1_sc, s2_sc, *, count, relu):
    # grid = (2, num_tiles).  phase 0: conv-as-matmul (s^2 output phases packed as
    # extra rows) into a resident bf16 VMEM scratch + per-row f32 sum / sumsq.
    # phase 1: group stats per channel, BatchNorm(+ReLU), write bf16 output.
    ph = pl.program_id(0)
    k = pl.program_id(1)

    @pl.when((ph == 0) & (k == 0))
    def _():
        s1_sc[...] = jnp.zeros_like(s1_sc)
        s2_sc[...] = jnp.zeros_like(s2_sc)

    @pl.when(ph == 0)
    def _():
        # (R, KKC) bf16 @ (KKC, TN) bf16 -> f32 accumulation on the MXU.
        y = jnp.dot(w_ref[...], p_ref[...], preferred_element_type=jnp.float32)
        y_sc[k] = y.astype(jnp.bfloat16)
        s1_sc[...] += jnp.sum(y, axis=1, keepdims=True)
        s2_sc[...] += jnp.sum(y * y, axis=1, keepdims=True)

    @pl.when(ph == 1)
    def _():
        inv = 1.0 / count
        # per-channel totals: rows of the same channel (across its s^2 phase rows)
        # are summed by the constant 0/1 grouping matrix gm (R x R).
        mean = jnp.dot(gm_ref[...], s1_sc[...], preferred_element_type=jnp.float32) * inv
        ex2 = jnp.dot(gm_ref[...], s2_sc[...], preferred_element_type=jnp.float32) * inv
        var = jnp.maximum(ex2 - mean * mean, 0.0)          # clamp cancellation
        scale = g_ref[...] * lax.rsqrt(var + EPS)
        shift = b_ref[...] - mean * scale
        v = y_sc[k].astype(jnp.float32) * scale + shift
        if relu:
            v = jnp.maximum(v, 0.0)
        o_ref[...] = v.astype(jnp.bfloat16)


def resize_kernel(img_ref, rh_ref, rwt_ref, o_ref):
    # Separable bilinear resize as two 128-aligned matmuls: out = Rh @ img @ Rw^T
    tmp = jnp.dot(rh_ref[...], img_ref[0], preferred_element_type=jnp.float32)
    o_ref[0] = jnp.dot(tmp.astype(jnp.bfloat16), rwt_ref[...],
                       preferred_element_type=jnp.float32)


# ------------------------------- wrappers -----------------------------------

def fc_stack(x, params):
    B = x.shape[0]
    Dout = params["fc2_w"].shape[1]
    return pl.pallas_call(
        fc_stack_kernel,
        out_shape=jax.ShapeDtypeStruct((B, Dout), jnp.bfloat16),
    )(x.astype(jnp.bfloat16),
      params["fc1_w"].astype(jnp.bfloat16), params["fc1_b"],
      params["bn1_g"], params["bn1_b"],
      params["fc2_w"].astype(jnp.bfloat16), params["fc2_b"],
      params["bn2_g"], params["bn2_b"])


def conv_transpose_bn(x_cm, wt, gamma, beta, *, stride, relu):
    """Fused ConvTranspose2d(padding=0) + train-mode BatchNorm2d (+ReLU).

    Uses the stride-phase (sub-pixel) decomposition: the s^2 output phases are
    packed as extra output-channel rows of ONE stride-1 correlation, so no
    zero-dilated input is ever materialized.

    x_cm : (Cin, B, H, W) channel-major activations (bf16/f32)
    wt   : (Cin, Cout, K, K) torch ConvTranspose2d weight layout (f32)
    returns (Cout, B, OH, OW) channel-major, bf16
    """
    Cin, B, H, W = x_cm.shape
    Cout, K = wt.shape[1], wt.shape[2]
    s = stride
    Mh = -(-K // s)                      # ceil(K/s): taps per phase per axis
    A, Aw = H + Mh - 1, W + Mh - 1       # per-phase output extent
    OH, OW = (H - 1) * s + K, (W - 1) * s + K
    R = Cout * s * s                     # packed output rows (co, p, q)
    pad = Mh - 1

    # Patch matrix: rows (m', n', ci), columns (b, a, bb).  Only real input data,
    # padded by Mh-1 zeros per side -- no s^2 dilation zeros.
    # TODO(synk): assemble the (KKC, TN) patch tiles inside the kernel (pl.ds slices
    # of the padded activation) to also skip this small XLA-side im2col round trip.
    xp = jnp.pad(x_cm.astype(jnp.bfloat16),
                 ((0, 0), (0, 0), (pad, pad), (pad, pad)))
    cols = [xp[:, :, mp:mp + A, nq:nq + Aw] for mp in range(Mh) for nq in range(Mh)]
    N = B * A * Aw
    p = jnp.stack(cols, axis=0).reshape(Mh * Mh * Cin, N)

    # Packed weights: row (co, p, q), column (m', n', ci) =
    #   wt[ci, co, p + s*(Mh-1-m'), q + s*(Mh-1-n')] (zero if the tap exceeds K).
    blocks = []
    for pr in range(s):
        for qr in range(s):
            taps = []
            for mp in range(Mh):
                for nq in range(Mh):
                    kh = pr + s * (Mh - 1 - mp)
                    kw = qr + s * (Mh - 1 - nq)
                    if kh < K and kw < K:
                        taps.append(wt[:, :, kh, kw].T)                  # (Cout, Cin)
                    else:
                        taps.append(jnp.zeros((Cout, Cin), wt.dtype))
            blocks.append(jnp.concatenate(taps, axis=1))                 # (Cout, KKC)
    w2 = jnp.stack(blocks, axis=1).reshape(R, Mh * Mh * Cin)

    # keep the bf16 contraction dim 16-aligned (no-op for these layers)
    KKC = w2.shape[1]
    if KKC % 16:
        padk = 16 - KKC % 16
        p = jnp.pad(p, ((0, padk), (0, 0)))
        w2 = jnp.pad(w2, ((0, 0), (0, padk)))
        KKC += padk
    w2 = w2.astype(jnp.bfloat16)

    # per-layer lane tile: no 44% padding for small layers, pipelining where N is big
    tn = min(TN, _round_up(N, 128))
    npad = _round_up(N, tn)
    p = jnp.pad(p, ((0, 0), (0, npad - N)))      # zero cols contribute 0 to stats
    num_tiles = npad // tn

    g_rows = jnp.repeat(gamma, s * s, axis=0)    # (R, 1) per-row gamma/beta
    b_rows = jnp.repeat(beta, s * s, axis=0)
    gmat = jnp.kron(jnp.eye(Cout, dtype=jnp.float32),
                    jnp.ones((s * s, s * s), jnp.float32))   # channel grouping (R, R)

    count = float(B * OH * OW)                   # real output positions per channel
    grid = (2, num_tiles)                        # phase 0: conv+stats, phase 1: BN

    # p is only consumed in phase 0; pin its block to the LAST phase-0 block during
    # phase 1 so the phase transition does not trigger an extra DMA.
    p_index = lambda ph, k: (0, k * (1 - ph) + (num_tiles - 1) * ph)

    # explicit VMEM budget: resident y scratch + double-buffered p/out blocks + misc
    est = (num_tiles * R * tn * 2 + 2 * KKC * tn * 2 + 2 * R * tn * 2
           + 2 * R * KKC * 2 + 4 * R * (R + 2) + (1 << 20))
    vmem_limit = int(min(56 << 20, max(16 << 20, 2 * est)))

    out = pl.pallas_call(
        functools.partial(conv_bn_fused_kernel, count=count, relu=relu),
        grid=grid,
        in_specs=[pl.BlockSpec((R, KKC), lambda ph, k: (0, 0)),
                  pl.BlockSpec((KKC, tn), p_index),
                  pl.BlockSpec((R, 1), lambda ph, k: (0, 0)),
                  pl.BlockSpec((R, 1), lambda ph, k: (0, 0)),
                  pl.BlockSpec((R, R), lambda ph, k: (0, 0))],
        out_specs=pl.BlockSpec((R, tn), lambda ph, k: (0, k * ph)),
        out_shape=jax.ShapeDtypeStruct((R, npad), jnp.bfloat16),
        scratch_shapes=[pltpu.VMEM((num_tiles, R, tn), jnp.bfloat16),  # resident y
                        pltpu.VMEM((R, 1), jnp.float32),               # per-row sum
                        pltpu.VMEM((R, 1), jnp.float32)],              # per-row sumsq
        compiler_params=pltpu.CompilerParams(
            dimension_semantics=("arbitrary", "arbitrary"),
            vmem_limit_bytes=vmem_limit),
    )(w2, p, g_rows, b_rows, gmat)

    # De-interleave the packed phases (pixel shuffle) and crop; stays channel-major.
    z = out[:, :N].reshape(Cout, s, s, B, A, Aw)
    z = z.transpose(0, 3, 4, 1, 5, 2).reshape(Cout, B, A * s, Aw * s)
    return z[:, :, :OH, :OW]                     # (Cout, B, OH, OW) bf16


def _bilinear_matrix(in_size, out_size):
    # matches F.interpolate(mode='bilinear', align_corners=False)
    scale = in_size / out_size
    i = jnp.arange(out_size, dtype=jnp.float32)
    src = jnp.maximum((i + 0.5) * scale - 0.5, 0.0)
    x0 = jnp.floor(src)
    lam = src - x0
    x0i = jnp.clip(x0.astype(jnp.int32), 0, in_size - 1)
    x1i = jnp.clip(x0i + 1, 0, in_size - 1)
    rows = jnp.arange(out_size)
    m = jnp.zeros((out_size, in_size), jnp.float32)
    m = m.at[rows, x0i].add(1.0 - lam)
    m = m.at[rows, x1i].add(lam)
    return m


def bilinear_resize_cm(x_cm, out_h, out_w):
    # x_cm: (C, B, H, W) channel-major bf16 -> (B, C, out_h, out_w) NCHW f32
    C, B, H, W = x_cm.shape
    Hp, Wp = _round_up(H, 128), _round_up(W, 128)
    OWp = _round_up(out_w, 128)
    rh = jnp.pad(_bilinear_matrix(H, out_h),
                 ((0, 0), (0, Hp - H))).astype(jnp.bfloat16)               # (out_h, Hp)
    rwt = jnp.pad(_bilinear_matrix(W, out_w).T,
                  ((0, Wp - W), (0, OWp - out_w))).astype(jnp.bfloat16)    # (Wp, OWp)
    planes = jnp.pad(x_cm.astype(jnp.bfloat16).reshape(C * B, H, W),
                     ((0, 0), (0, Hp - H), (0, Wp - W)))
    out = pl.pallas_call(
        resize_kernel,
        grid=(C * B,),
        in_specs=[pl.BlockSpec((1, Hp, Wp), lambda i: (i, 0, 0)),
                  pl.BlockSpec((out_h, Hp), lambda i: (0, 0)),
                  pl.BlockSpec((Wp, OWp), lambda i: (0, 0))],
        out_specs=pl.BlockSpec((1, out_h, OWp), lambda i: (i, 0, 0)),
        out_shape=jax.ShapeDtypeStruct((C * B, out_h, OWp), jnp.float32),
        compiler_params=pltpu.CompilerParams(dimension_semantics=("parallel",)),
    )(planes, rh, rwt)
    out = out[:, :, :out_w].reshape(C, B, out_h, out_w)
    return out.transpose(1, 0, 2, 3)


# ------------------------------ params / model ------------------------------

def init_params(key):
    ks = jax.random.split(key, 20)

    def u(k, shape, fan_in):
        s = 1.0 / float(fan_in) ** 0.5
        return jax.random.uniform(k, shape, jnp.float32, -s, s)

    def bn(kg, kb, shape):
        g = 1.0 + 0.1 * jax.random.normal(kg, shape, jnp.float32)
        b = 0.1 * jax.random.normal(kb, shape, jnp.float32)
        return g, b

    p = {}
    p["fc1_w"] = u(ks[0], (200, 512), 200)
    p["fc1_b"] = u(ks[1], (1, 512), 200)
    p["bn1_g"], p["bn1_b"] = bn(ks[2], ks[3], (1, 512))
    p["fc2_w"] = u(ks[4], (512, 2048), 512)
    p["fc2_b"] = u(ks[5], (1, 2048), 512)
    p["bn2_g"], p["bn2_b"] = bn(ks[6], ks[7], (1, 2048))
    p["ct1_w"] = u(ks[8], (32, 16, 3, 3), 32 * 9)          # (Cin,Cout,K,K)
    p["ct1_g"], p["ct1_b"] = bn(ks[9], ks[10], (16, 1))
    p["ct2_w"] = u(ks[11], (16, 8, 5, 5), 16 * 25)
    p["ct2_g"], p["ct2_b"] = bn(ks[12], ks[13], (8, 1))
    p["ct3_w"] = u(ks[14], (8, 3, 5, 5), 8 * 25)
    p["ct3_g"], p["ct3_b"] = bn(ks[15], ks[16], (3, 1))
    return p


def decoder_forward(params, x):
    h = fc_stack(x, params)                                  # (B, 2048) bf16
    B = h.shape[0]
    # torch .view(-1, 32, 8, 8) is NCHW; switch once to channel-major for the convs.
    x_cm = h.reshape(B, 32, 8, 8).transpose(1, 0, 2, 3)      # (32, B, 8, 8), tiny
    x_cm = conv_transpose_bn(x_cm, params["ct1_w"], params["ct1_g"], params["ct1_b"],
                             stride=2, relu=True)            # (16, B, 17, 17)
    x_cm = conv_transpose_bn(x_cm, params["ct2_w"], params["ct2_g"], params["ct2_b"],
                             stride=2, relu=True)            # (8, B, 37, 37)
    x_cm = conv_transpose_bn(x_cm, params["ct3_w"], params["ct3_g"], params["ct3_b"],
                             stride=3, relu=False)           # (3, B, 113, 113)
    return bilinear_resize_cm(x_cm, 224, 224)                # (B, 3, 224, 224) f32


if __name__ == "__main__":
    key = jax.random.PRNGKey(0)
    pkey, xkey = jax.random.split(key)
    params = init_params(pkey)
    x = jax.random.normal(xkey, (2, 200), jnp.float32)

    out = jax.jit(decoder_forward)(params, x)
    out = jax.block_until_ready(out)

    assert out.shape == (2, 3, 224, 224), out.shape
    assert bool(jnp.isfinite(out).all())
    print("KERNEL_OK")
</pallas_src>

<mosaic_0001>
module attributes {stable_mosaic.version = 11 : i64} {
  func.func private @main(%arg0: i32) attributes {dimension_semantics = [#tpu.dimension_semantics<core_parallel>], iteration_bounds = array<i64: 2>, tpu.core_type = #tpu.core_type<sc_scalar_subcore>, window_params = []} {
    return
  }
}

module attributes {stable_mosaic.version = 11 : i64} {
  func.func private @main(%arg0: i32) attributes {dimension_semantics = [#tpu.dimension_semantics<core_parallel>], iteration_bounds = array<i64: 2>, tpu.core_type = #tpu.core_type<sc_scalar_subcore>, window_params = []} {
    return
  }
}

module attributes {stable_mosaic.version = 11 : i64} {
  func.func @fc_stack_kernel(%arg0: memref<2x200xbf16, #tpu.memory_space<vmem>>, %arg1: memref<200x512xbf16, #tpu.memory_space<vmem>>, %arg2: memref<1x512xf32, #tpu.memory_space<vmem>>, %arg3: memref<1x512xf32, #tpu.memory_space<vmem>>, %arg4: memref<1x512xf32, #tpu.memory_space<vmem>>, %arg5: memref<512x2048xbf16, #tpu.memory_space<vmem>>, %arg6: memref<1x2048xf32, #tpu.memory_space<vmem>>, %arg7: memref<1x2048xf32, #tpu.memory_space<vmem>>, %arg8: memref<1x2048xf32, #tpu.memory_space<vmem>>, %arg9: memref<2x2048xbf16, #tpu.memory_space<vmem>>) attributes {dimension_semantics = [], scalar_prefetch = 0 : i64, scratch_operands = 0 : i64, tpu.core_type = #tpu.core_type<tc>} {
    %c0 = arith.constant 0 : index
    %c0_0 = arith.constant 0 : index
    %0 = vector.load %arg0[%c0, %c0_0] : memref<2x200xbf16, #tpu.memory_space<vmem>>, vector<2x200xbf16>
    %c0_1 = arith.constant 0 : index
    %c0_2 = arith.constant 0 : index
    %1 = vector.load %arg1[%c0_1, %c0_2] : memref<200x512xbf16, #tpu.memory_space<vmem>>, vector<200x512xbf16>
    %cst = arith.constant dense<0.000000e+00> : vector<2x512xf32>
    %2 = tpu.matmul %0, %1, %cst {dimension_numbers = #tpu.dot_dimension_numbers<[1], [0], [0], [1], [0, 0, 1, 1], [], []>} : vector<2x200xbf16>, vector<200x512xbf16>, vector<2x512xf32> -> vector<2x512xf32>
    %c0_3 = arith.constant 0 : index
    %c0_4 = arith.constant 0 : index
    %3 = vector.load %arg2[%c0_3, %c0_4] : memref<1x512xf32, #tpu.memory_space<vmem>>, vector<1x512xf32>
    %4 = vector.broadcast %3 : vector<1x512xf32> to vector<2x512xf32>
    %5 = arith.addf %2, %4 : vector<2x512xf32>
    %c0_5 = arith.constant 0 : index
    %c0_6 = arith.constant 0 : index
    %6 = vector.load %arg3[%c0_5, %c0_6] : memref<1x512xf32, #tpu.memory_space<vmem>>, vector<1x512xf32>
    %c0_7 = arith.constant 0 : index
    %c0_8 = arith.constant 0 : index
    %7 = vector.load %arg4[%c0_7, %c0_8] : memref<1x512xf32, #tpu.memory_space<vmem>>, vector<1x512xf32>
    %cst_9 = arith.constant dense<0.000000e+00> : vector<512xf32>
    %8 = vector.multi_reduction <add>, %5, %cst_9 [0] : vector<2x512xf32> to vector<512xf32>
    %9 = vector.shape_cast %8 : vector<512xf32> to vector<1x512xf32>
    %cst_10 = arith.constant 2.000000e+00 : f32
    %10 = vector.broadcast %cst_10 : f32 to vector<1x512xf32>
    %11 = arith.divf %9, %10 : vector<1x512xf32>
    %12 = vector.broadcast %11 : vector<1x512xf32> to vector<2x512xf32>
    %13 = arith.subf %5, %12 : vector<2x512xf32>
    %14 = arith.mulf %13, %13 : vector<2x512xf32>
    %cst_11 = arith.constant dense<0.000000e+00> : vector<512xf32>
    %15 = vector.multi_reduction <add>, %14, %cst_11 [0] : vector<2x512xf32> to vector<512xf32>
    %16 = vector.shape_cast %15 : vector<512xf32> to vector<1x512xf32>
    %cst_12 = arith.constant 2.000000e+00 : f32
    %17 = vector.broadcast %cst_12 : f32 to vector<1x512xf32>
    %18 = arith.divf %16, %17 : vector<1x512xf32>
    %19 = vector.broadcast %11 : vector<1x512xf32> to vector<2x512xf32>
    %20 = arith.subf %5, %19 : vector<2x512xf32>
    %cst_13 = arith.constant 9.99999974E-6 : f32
    %21 = vector.broadcast %cst_13 : f32 to vector<1x512xf32>
    %22 = arith.addf %18, %21 : vector<1x512xf32>
    %23 = math.rsqrt %22 : vector<1x512xf32>
    %24 = vector.broadcast %23 : vector<1x512xf32> to vector<2x512xf32>
    %25 = arith.mulf %20, %24 : vector<2x512xf32>
    %26 = vector.broadcast %6 : vector<1x512xf32> to vector<2x512xf32>
    %27 = arith.mulf %25, %26 : vector<2x512xf32>
    %28 = vector.broadcast %7 : vector<1x512xf32> to vector<2x512xf32>
    %29 = arith.addf %27, %28 : vector<2x512xf32>
    %cst_14 = arith.constant 0.000000e+00 : f32
    %30 = vector.broadcast %cst_14 : f32 to vector<2x512xf32>
    %31 = arith.maximumf %29, %30 : vector<2x512xf32>
    %32 = arith.truncf %31 : vector<2x512xf32> to vector<2x512xbf16>
    %c0_15 = arith.constant 0 : index
    %c0_16 = arith.constant 0 : index
    %33 = vector.load %arg5[%c0_15, %c0_16] : memref<512x2048xbf16, #tpu.memory_space<vmem>>, vector<512x2048xbf16>
    %cst_17 = arith.constant dense<0.000000e+00> : vector<2x2048xf32>
    %34 = tpu.matmul %32, %33, %cst_17 {dimension_numbers = #tpu.dot_dimension_numbers<[1], [0], [0], [1], [0, 0, 1, 1], [], []>} : vector<2x512xbf16>, vector<512x2048xbf16>, vector<2x2048xf32> -> vector<2x2048xf32>
    %c0_18 = arith.constant 0 : index
    %c0_19 = arith.constant 0 : index
    %35 = vector.load %arg6[%c0_18, %c0_19] : memref<1x2048xf32, #tpu.memory_space<vmem>>, vector<1x2048xf32>
    %36 = vector.broadcast %35 : vector<1x2048xf32> to vector<2x2048xf32>
    %37 = arith.addf %34, %36 : vector<2x2048xf32>
    %c0_20 = arith.constant 0 : index
    %c0_21 = arith.constant 0 : index
    %38 = vector.load %arg7[%c0_20, %c0_21] : memref<1x2048xf32, #tpu.memory_space<vmem>>, vector<1x2048xf32>
    %c0_22 = arith.constant 0 : index
    %c0_23 = arith.constant 0 : index
    %39 = vector.load %arg8[%c0_22, %c0_23] : memref<1x2048xf32, #tpu.memory_space<vmem>>, vector<1x2048xf32>
    %cst_24 = arith.constant dense<0.000000e+00> : vector<2048xf32>
    %40 = vector.multi_reduction <add>, %37, %cst_24 [0] : vector<2x2048xf32> to vector<2048xf32>
    %41 = vector.shape_cast %40 : vector<2048xf32> to vector<1x2048xf32>
    %cst_25 = arith.constant 2.000000e+00 : f32
    %42 = vector.broadcast %cst_25 : f32 to vector<1x2048xf32>
    %43 = arith.divf %41, %42 : vector<1x2048xf32>
    %44 = vector.broadcast %43 : vector<1x2048xf32> to vector<2x2048xf32>
    %45 = arith.subf %37, %44 : vector<2x2048xf32>
    %46 = arith.mulf %45, %45 : vector<2x2048xf32>
    %cst_26 = arith.constant dense<0.000000e+00> : vector<2048xf32>
    %47 = vector.multi_reduction <add>, %46, %cst_26 [0] : vector<2x2048xf32> to vector<2048xf32>
    %48 = vector.shape_cast %47 : vector<2048xf32> to vector<1x2048xf32>
    %cst_27 = arith.constant 2.000000e+00 : f32
    %49 = vector.broadcast %cst_27 : f32 to vector<1x2048xf32>
    %50 = arith.divf %48, %49 : vector<1x2048xf32>
    %51 = vector.broadcast %43 : vector<1x2048xf32> to vector<2x2048xf32>
    %52 = arith.subf %37, %51 : vector<2x2048xf32>
    %cst_28 = arith.constant 9.99999974E-6 : f32
    %53 = vector.broadcast %cst_28 : f32 to vector<1x2048xf32>
    %54 = arith.addf %50, %53 : vector<1x2048xf32>
    %55 = math.rsqrt %54 : vector<1x2048xf32>
    %56 = vector.broadcast %55 : vector<1x2048xf32> to vector<2x2048xf32>
    %57 = arith.mulf %52, %56 : vector<2x2048xf32>
    %58 = vector.broadcast %38 : vector<1x2048xf32> to vector<2x2048xf32>
    %59 = arith.mulf %57, %58 : vector<2x2048xf32>
    %60 = vector.broadcast %39 : vector<1x2048xf32> to vector<2x2048xf32>
    %61 = arith.addf %59, %60 : vector<2x2048xf32>
    %cst_29 = arith.constant 0.000000e+00 : f32
    %62 = vector.broadcast %cst_29 : f32 to vector<2x2048xf32>
    %63 = arith.maximumf %61, %62 : vector<2x2048xf32>
    %64 = arith.truncf %63 : vector<2x2048xf32> to vector<2x2048xbf16>
    %c0_30 = arith.constant 0 : index
    %c0_31 = arith.constant 0 : index
    %65 = vector.load %arg9[%c0_30, %c0_31] : memref<2x2048xbf16, #tpu.memory_space<vmem>>, vector<2x2048xbf16>
    tpu.vector_store %arg9[%c0_30, %c0_31], %64 {strides = array<i32>} : memref<2x2048xbf16, #tpu.memory_space<vmem>>, vector<2x2048xbf16>,
    return
  }
}

module attributes {stable_mosaic.version = 11 : i64} {
  func.func @conv_bn_fused_kernel(%arg0: i32, %arg1: i32, %arg2: memref<64x128xbf16, #tpu.memory_space<vmem>>, %arg3: memref<128x256xbf16, #tpu.memory_space<vmem>>, %arg4: memref<64x1xf32, #tpu.memory_space<vmem>>, %arg5: memref<64x1xf32, #tpu.memory_space<vmem>>, %arg6: memref<64x64xf32, #tpu.memory_space<vmem>>, %arg7: memref<64x256xbf16, #tpu.memory_space<vmem>>, %arg8: memref<1x64x256xbf16, #tpu.memory_space<vmem>>, %arg9: memref<64x1xf32, #tpu.memory_space<vmem>>, %arg10: memref<64x1xf32, #tpu.memory_space<vmem>>) attributes {dimension_semantics = [#tpu.dimension_semantics<arbitrary>, #tpu.dimension_semantics<arbitrary>], iteration_bounds = array<i64: 2, 1>, scalar_prefetch = 0 : i64, scratch_operands = 3 : i64, tpu.core_type = #tpu.core_type<tc>, window_params = [{pipeline_mode = #tpu.pipeline_mode<synchronous>, transform_indices = @transform_0, window_bounds = array<i64: 64, 128>}, {transform_indices = @transform_1, window_bounds = array<i64: 128, 256>}, {pipeline_mode = #tpu.pipeline_mode<synchronous>, transform_indices = @transform_2, window_bounds = array<i64: 64, 1>}, {pipeline_mode = #tpu.pipeline_mode<synchronous>, transform_indices = @transform_3, window_bounds = array<i64: 64, 1>}, {pipeline_mode = #tpu.pipeline_mode<synchronous>, transform_indices = @transform_4, window_bounds = array<i64: 64, 64>}, {transform_indices = @transform_5, window_bounds = array<i64: 64, 256>}]} {
    %c0_i32 = arith.constant 0 : i32
    %0 = arith.cmpi eq, %arg0, %c0_i32 : i32
    %c0_i32_0 = arith.constant 0 : i32
    %1 = arith.cmpi eq, %arg1, %c0_i32_0 : i32
    %2 = arith.andi %0, %1 : i1
    %3 = arith.extui %2 : i1 to i32
    %c0_i32_1 = arith.constant 0 : i32
    %4 = arith.cmpi ne, %3, %c0_i32_1 : i32
    scf.if %4 {
      %cst = arith.constant 0.000000e+00 : f32
      %11 = vector.broadcast %cst : f32 to vector<64x1xf32>
      %c0 = arith.constant 0 : index
      %c0_5 = arith.constant 0 : index
      %12 = vector.load %arg9[%c0, %c0_5] : memref<64x1xf32, #tpu.memory_space<vmem>>, vector<64x1xf32>
      tpu.vector_store %arg9[%c0, %c0_5], %11 {strides = array<i32>} : memref<64x1xf32, #tpu.memory_space<vmem>>, vector<64x1xf32>,
      %cst_6 = arith.constant 0.000000e+00 : f32
      %13 = vector.broadcast %cst_6 : f32 to vector<64x1xf32>
      %c0_7 = arith.constant 0 : index
      %c0_8 = arith.constant 0 : index
      %14 = vector.load %arg10[%c0_7, %c0_8] : memref<64x1xf32, #tpu.memory_space<vmem>>, vector<64x1xf32>
      tpu.vector_store %arg10[%c0_7, %c0_8], %13 {strides = array<i32>} : memref<64x1xf32, #tpu.memory_space<vmem>>, vector<64x1xf32>,
    } else {
    }
    %c0_i32_2 = arith.constant 0 : i32
    %5 = arith.cmpi eq, %arg0, %c0_i32_2 : i32
    %6 = arith.extui %5 : i1 to i32
    %c0_i32_3 = arith.constant 0 : i32
    %7 = arith.cmpi ne, %6, %c0_i32_3 : i32
    scf.if %7 {
      %c0 = arith.constant 0 : index
      %c0_5 = arith.constant 0 : index
      %11 = vector.load %arg2[%c0, %c0_5] : memref<64x128xbf16, #tpu.memory_space<vmem>>, vector<64x128xbf16>
      %c0_6 = arith.constant 0 : index
      %c0_7 = arith.constant 0 : index
      %12 = vector.load %arg3[%c0_6, %c0_7] : memref<128x256xbf16, #tpu.memory_space<vmem>>, vector<128x256xbf16>
      %cst = arith.constant dense<0.000000e+00> : vector<64x256xf32>
      %13 = tpu.matmul %11, %12, %cst {dimension_numbers = #tpu.dot_dimension_numbers<[1], [0], [0], [1], [0, 0, 1, 1], [], []>} : vector<64x128xbf16>, vector<128x256xbf16>, vector<64x256xf32> -> vector<64x256xf32>
      %14 = arith.truncf %13 : vector<64x256xf32> to vector<64x256xbf16>
      %15 = arith.index_cast %arg1 : i32 to index
      %c0_8 = arith.constant 0 : index
      %c0_9 = arith.constant 0 : index
      %16 = vector.load %arg8[%15, %c0_8, %c0_9] : memref<1x64x256xbf16, #tpu.memory_space<vmem>>, vector<1x64x256xbf16>
      %17 = vector.shape_cast %16 : vector<1x64x256xbf16> to vector<64x256xbf16>
      %18 = vector.shape_cast %14 : vector<64x256xbf16> to vector<1x64x256xbf16>
      tpu.vector_store %arg8[%15, %c0_8, %c0_9], %18 {strides = array<i32>} : memref<1x64x256xbf16, #tpu.memory_space<vmem>>, vector<1x64x256xbf16>,
      %c0_10 = arith.constant 0 : index
      %c0_11 = arith.constant 0 : index
      %19 = vector.load %arg9[%c0_10, %c0_11] : memref<64x1xf32, #tpu.memory_space<vmem>>, vector<64x1xf32>
      %cst_12 = arith.constant dense<0.000000e+00> : vector<64xf32>
      %20 = vector.multi_reduction <add>, %13, %cst_12 [1] : vector<64x256xf32> to vector<64xf32>
      %21 = vector.shape_cast %20 : vector<64xf32> to vector<64x1xf32>
      %22 = arith.addf %19, %21 : vector<64x1xf32>
      %c0_13 = arith.constant 0 : index
      %c0_14 = arith.constant 0 : index
      %23 = vector.load %arg9[%c0_13, %c0_14] : memref<64x1xf32, #tpu.memory_space<vmem>>, vector<64x1xf32>
      tpu.vector_store %arg9[%c0_13, %c0_14], %22 {strides = array<i32>} : memref<64x1xf32, #tpu.memory_space<vmem>>, vector<64x1xf32>,
      %c0_15 = arith.constant 0 : index
      %c0_16 = arith.constant 0 : index
      %24 = vector.load %arg10[%c0_15, %c0_16] : memref<64x1xf32, #tpu.memory_space<vmem>>, vector<64x1xf32>
      %25 = arith.mulf %13, %13 : vector<64x256xf32>
      %cst_17 = arith.constant dense<0.000000e+00> : vector<64xf32>
      %26 = vector.multi_reduction <add>, %25, %cst_17 [1] : vector<64x256xf32> to vector<64xf32>
      %27 = vector.shape_cast %26 : vector<64xf32> to vector<64x1xf32>
      %28 = arith.addf %24, %27 : vector<64x1xf32>
      %c0_18 = arith.constant 0 : index
      %c0_19 = arith.constant 0 : index
      %29 = vector.load %arg10[%c0_18, %c0_19] : memref<64x1xf32, #tpu.memory_space<vmem>>, vector<64x1xf32>
      tpu.vector_store %arg10[%c0_18, %c0_19], %28 {strides = array<i32>} : memref<64x1xf32, #tpu.memory_space<vmem>>, vector<64x1xf32>,
    } else {
    }
    %c1_i32 = arith.constant 1 : i32
    %8 = arith.cmpi eq, %arg0, %c1_i32 : i32
    %9 = arith.extui %8 : i1 to i32
    %c0_i32_4 = arith.constant 0 : i32
    %10 = arith.cmpi ne, %9, %c0_i32_4 : i32
    scf.if %10 {
      %c0 = arith.constant 0 : index
      %c0_5 = arith.constant 0 : index
      %11 = vector.load %arg6[%c0, %c0_5] : memref<64x64xf32, #tpu.memory_space<vmem>>, vector<64x64xf32>
      %c0_6 = arith.constant 0 : index
      %c0_7 = arith.constant 0 : index
      %12 = vector.load %arg9[%c0_6, %c0_7] : memref<64x1xf32, #tpu.memory_space<vmem>>, vector<64x1xf32>
      %cst = arith.constant dense<0.000000e+00> : vector<64x1xf32>
      %13 = tpu.matmul %11, %12, %cst {dimension_numbers = #tpu.dot_dimension_numbers<[1], [0], [0], [1], [0, 0, 1, 1], [], []>} : vector<64x64xf32>, vector<64x1xf32>, vector<64x1xf32> -> vector<64x1xf32>
      %cst_8 = arith.constant 0.00173010386 : f32
      %14 = vector.broadcast %cst_8 : f32 to vector<64x1xf32>
      %15 = arith.mulf %13, %14 : vector<64x1xf32>
      %c0_9 = arith.constant 0 : index
      %c0_10 = arith.constant 0 : index
      %16 = vector.load %arg6[%c0_9, %c0_10] : memref<64x64xf32, #tpu.memory_space<vmem>>, vector<64x64xf32>
      %c0_11 = arith.constant 0 : index
      %c0_12 = arith.constant 0 : index
      %17 = vector.load %arg10[%c0_11, %c0_12] : memref<64x1xf32, #tpu.memory_space<vmem>>, vector<64x1xf32>
      %cst_13 = arith.constant dense<0.000000e+00> : vector<64x1xf32>
      %18 = tpu.matmul %16, %17, %cst_13 {dimension_numbers = #tpu.dot_dimension_numbers<[1], [0], [0], [1], [0, 0, 1, 1], [], []>} : vector<64x64xf32>, vector<64x1xf32>, vector<64x1xf32> -> vector<64x1xf32>
      %cst_14 = arith.constant 0.00173010386 : f32
      %19 = vector.broadcast %cst_14 : f32 to vector<64x1xf32>
      %20 = arith.mulf %18, %19 : vector<64x1xf32>
      %21 = arith.mulf %15, %15 : vector<64x1xf32>
      %22 = arith.subf %20, %21 : vector<64x1xf32>
      %cst_15 = arith.constant 0.000000e+00 : f32
      %23 = vector.broadcast %cst_15 : f32 to vector<64x1xf32>
      %24 = arith.maximumf %22, %23 : vector<64x1xf32>
      %c0_16 = arith.constant 0 : index
      %c0_17 = arith.constant 0 : index
      %25 = vector.load %arg4[%c0_16, %c0_17] : memref<64x1xf32, #tpu.memory_space<vmem>>, vector<64x1xf32>
      %cst_18 = arith.constant 9.99999974E-6 : f32
      %26 = vector.broadcast %cst_18 : f32 to vector<64x1xf32>
      %27 = arith.addf %24, %26 : vector<64x1xf32>
      %28 = math.rsqrt %27 : vector<64x1xf32>
      %29 = arith.mulf %25, %28 : vector<64x1xf32>
      %c0_19 = arith.constant 0 : index
      %c0_20 = arith.constant 0 : index
      %30 = vector.load %arg5[%c0_19, %c0_20] : memref<64x1xf32, #tpu.memory_space<vmem>>, vector<64x1xf32>
      %31 = arith.mulf %15, %29 : vector<64x1xf32>
      %32 = arith.subf %30, %31 : vector<64x1xf32>
      %33 = arith.index_cast %arg1 : i32 to index
      %c0_21 = arith.constant 0 : index
      %c0_22 = arith.constant 0 : index
      %34 = vector.load %arg8[%33, %c0_21, %c0_22] : memref<1x64x256xbf16, #tpu.memory_space<vmem>>, vector<1x64x256xbf16>
      %35 = vector.shape_cast %34 : vector<1x64x256xbf16> to vector<64x256xbf16>
      %36 = arith.extf %35 : vector<64x256xbf16> to vector<64x256xf32>
      %37 = vector.broadcast %29 : vector<64x1xf32> to vector<64x256xf32>
      %38 = arith.mulf %36, %37 : vector<64x256xf32>
      %39 = vector.broadcast %32 : vector<64x1xf32> to vector<64x256xf32>
      %40 = arith.addf %38, %39 : vector<64x256xf32>
      %cst_23 = arith.constant 0.000000e+00 : f32
      %41 = vector.broadcast %cst_23 : f32 to vector<64x256xf32>
      %42 = arith.maximumf %40, %41 : vector<64x256xf32>
      %43 = arith.truncf %42 : vector<64x256xf32> to vector<64x256xbf16>
      %c0_24 = arith.constant 0 : index
      %c0_25 = arith.constant 0 : index
      %44 = vector.load %arg7[%c0_24, %c0_25] : memref<64x256xbf16, #tpu.memory_space<vmem>>, vector<64x256xbf16>
      tpu.vector_store %arg7[%c0_24, %c0_25], %43 {strides = array<i32>} : memref<64x256xbf16, #tpu.memory_space<vmem>>, vector<64x256xbf16>,
    } else {
    }
    return
  }
  func.func @transform_0(%arg0: i32, %arg1: i32) -> (i32, i32) {
    %c0_i32 = arith.constant 0 : i32
    %c0_i32_0 = arith.constant 0 : i32
    %c0_i32_1 = arith.constant 0 : i32
    return %c0_i32, %c0_i32_0 : i32, i32
  }
  func.func @transform_1(%arg0: i32, %arg1: i32) -> (i32, i32) {
    %c1_i32 = arith.constant 1 : i32
    %0 = arith.subi %c1_i32, %arg0 : i32
    %1 = arith.muli %arg1, %0 : i32
    %c0_i32 = arith.constant 0 : i32
    %2 = arith.muli %c0_i32, %arg0 : i32
    %3 = arith.addi %1, %2 : i32
    %c0_i32_0 = arith.constant 0 : i32
    %c0_i32_1 = arith.constant 0 : i32
    return %c0_i32_0, %3 : i32, i32
  }
  func.func @transform_2(%arg0: i32, %arg1: i32) -> (i32, i32) {
    %c0_i32 = arith.constant 0 : i32
    %c0_i32_0 = arith.constant 0 : i32
    %c0_i32_1 = arith.constant 0 : i32
    return %c0_i32, %c0_i32_0 : i32, i32
  }
  func.func @transform_3(%arg0: i32, %arg1: i32) -> (i32, i32) {
    %c0_i32 = arith.constant 0 : i32
    %c0_i32_0 = arith.constant 0 : i32
    %c0_i32_1 = arith.constant 0 : i32
    return %c0_i32, %c0_i32_0 : i32, i32
  }
  func.func @transform_4(%arg0: i32, %arg1: i32) -> (i32, i32) {
    %c0_i32 = arith.constant 0 : i32
    %c0_i32_0 = arith.constant 0 : i32
    %c0_i32_1 = arith.constant 0 : i32
    return %c0_i32, %c0_i32_0 : i32, i32
  }
  func.func @transform_5(%arg0: i32, %arg1: i32) -> (i32, i32) {
    %0 = arith.muli %arg1, %arg0 : i32
    %c0_i32 = arith.constant 0 : i32
    %c0_i32_0 = arith.constant 0 : i32
    return %c0_i32, %0 : i32, i32
  }
}

module attributes {stable_mosaic.version = 11 : i64} {
  func.func @conv_bn_fused_kernel(%arg0: i32, %arg1: i32, %arg2: memref<32x144xbf16, #tpu.memory_space<vmem>>, %arg3: memref<144x768xbf16, #tpu.memory_space<vmem>>, %arg4: memref<32x1xf32, #tpu.memory_space<vmem>>, %arg5: memref<32x1xf32, #tpu.memory_space<vmem>>, %arg6: memref<32x32xf32, #tpu.memory_space<vmem>>, %arg7: memref<32x768xbf16, #tpu.memory_space<vmem>>, %arg8: memref<1x32x768xbf16, #tpu.memory_space<vmem>>, %arg9: memref<32x1xf32, #tpu.memory_space<vmem>>, %arg10: memref<32x1xf32, #tpu.memory_space<vmem>>) attributes {dimension_semantics = [#tpu.dimension_semantics<arbitrary>, #tpu.dimension_semantics<arbitrary>], iteration_bounds = array<i64: 2, 1>, scalar_prefetch = 0 : i64, scratch_operands = 3 : i64, tpu.core_type = #tpu.core_type<tc>, window_params = [{pipeline_mode = #tpu.pipeline_mode<synchronous>, transform_indices = @transform_0, window_bounds = array<i64: 32, 144>}, {transform_indices = @transform_1, window_bounds = array<i64: 144, 768>}, {pipeline_mode = #tpu.pipeline_mode<synchronous>, transform_indices = @transform_2, window_bounds = array<i64: 32, 1>}, {pipeline_mode = #tpu.pipeline_mode<synchronous>, transform_indices = @transform_3, window_bounds = array<i64: 32, 1>}, {pipeline_mode = #tpu.pipeline_mode<synchronous>, transform_indices = @transform_4, window_bounds = array<i64: 32, 32>}, {transform_indices = @transform_5, window_bounds = array<i64: 32, 768>}]} {
    %c0_i32 = arith.constant 0 : i32
    %0 = arith.cmpi eq, %arg0, %c0_i32 : i32
    %c0_i32_0 = arith.constant 0 : i32
    %1 = arith.cmpi eq, %arg1, %c0_i32_0 : i32
    %2 = arith.andi %0, %1 : i1
    %3 = arith.extui %2 : i1 to i32
    %c0_i32_1 = arith.constant 0 : i32
    %4 = arith.cmpi ne, %3, %c0_i32_1 : i32
    scf.if %4 {
      %cst = arith.constant 0.000000e+00 : f32
      %11 = vector.broadcast %cst : f32 to vector<32x1xf32>
      %c0 = arith.constant 0 : index
      %c0_5 = arith.constant 0 : index
      %12 = vector.load %arg9[%c0, %c0_5] : memref<32x1xf32, #tpu.memory_space<vmem>>, vector<32x1xf32>
      tpu.vector_store %arg9[%c0, %c0_5], %11 {strides = array<i32>} : memref<32x1xf32, #tpu.memory_space<vmem>>, vector<32x1xf32>,
      %cst_6 = arith.constant 0.000000e+00 : f32
      %13 = vector.broadcast %cst_6 : f32 to vector<32x1xf32>
      %c0_7 = arith.constant 0 : index
      %c0_8 = arith.constant 0 : index
      %14 = vector.load %arg10[%c0_7, %c0_8] : memref<32x1xf32, #tpu.memory_space<vmem>>, vector<32x1xf32>
      tpu.vector_store %arg10[%c0_7, %c0_8], %13 {strides = array<i32>} : memref<32x1xf32, #tpu.memory_space<vmem>>, vector<32x1xf32>,
    } else {
    }
    %c0_i32_2 = arith.constant 0 : i32
    %5 = arith.cmpi eq, %arg0, %c0_i32_2 : i32
    %6 = arith.extui %5 : i1 to i32
    %c0_i32_3 = arith.constant 0 : i32
    %7 = arith.cmpi ne, %6, %c0_i32_3 : i32
    scf.if %7 {
      %c0 = arith.constant 0 : index
      %c0_5 = arith.constant 0 : index
      %11 = vector.load %arg2[%c0, %c0_5] : memref<32x144xbf16, #tpu.memory_space<vmem>>, vector<32x144xbf16>
      %c0_6 = arith.constant 0 : index
      %c0_7 = arith.constant 0 : index
      %12 = vector.load %arg3[%c0_6, %c0_7] : memref<144x768xbf16, #tpu.memory_space<vmem>>, vector<144x768xbf16>
      %cst = arith.constant dense<0.000000e+00> : vector<32x768xf32>
      %13 = tpu.matmul %11, %12, %cst {dimension_numbers = #tpu.dot_dimension_numbers<[1], [0], [0], [1], [0, 0, 1, 1], [], []>} : vector<32x144xbf16>, vector<144x768xbf16>, vector<32x768xf32> -> vector<32x768xf32>
      %14 = arith.truncf %13 : vector<32x768xf32> to vector<32x768xbf16>
      %15 = arith.index_cast %arg1 : i32 to index
      %c0_8 = arith.constant 0 : index
      %c0_9 = arith.constant 0 : index
      %16 = vector.load %arg8[%15, %c0_8, %c0_9] : memref<1x32x768xbf16, #tpu.memory_space<vmem>>, vector<1x32x768xbf16>
      %17 = vector.shape_cast %16 : vector<1x32x768xbf16> to vector<32x768xbf16>
      %18 = vector.shape_cast %14 : vector<32x768xbf16> to vector<1x32x768xbf16>
      tpu.vector_store %arg8[%15, %c0_8, %c0_9], %18 {strides = array<i32>} : memref<1x32x768xbf16, #tpu.memory_space<vmem>>, vector<1x32x768xbf16>,
      %c0_10 = arith.constant 0 : index
      %c0_11 = arith.constant 0 : index
      %19 = vector.load %arg9[%c0_10, %c0_11] : memref<32x1xf32, #tpu.memory_space<vmem>>, vector<32x1xf32>
      %cst_12 = arith.constant dense<0.000000e+00> : vector<32xf32>
      %20 = vector.multi_reduction <add>, %13, %cst_12 [1] : vector<32x768xf32> to vector<32xf32>
      %21 = vector.shape_cast %20 : vector<32xf32> to vector<32x1xf32>
      %22 = arith.addf %19, %21 : vector<32x1xf32>
      %c0_13 = arith.constant 0 : index
      %c0_14 = arith.constant 0 : index
      %23 = vector.load %arg9[%c0_13, %c0_14] : memref<32x1xf32, #tpu.memory_space<vmem>>, vector<32x1xf32>
      tpu.vector_store %arg9[%c0_13, %c0_14], %22 {strides = array<i32>} : memref<32x1xf32, #tpu.memory_space<vmem>>, vector<32x1xf32>,
      %c0_15 = arith.constant 0 : index
      %c0_16 = arith.constant 0 : index
      %24 = vector.load %arg10[%c0_15, %c0_16] : memref<32x1xf32, #tpu.memory_space<vmem>>, vector<32x1xf32>
      %25 = arith.mulf %13, %13 : vector<32x768xf32>
      %cst_17 = arith.constant dense<0.000000e+00> : vector<32xf32>
      %26 = vector.multi_reduction <add>, %25, %cst_17 [1] : vector<32x768xf32> to vector<32xf32>
      %27 = vector.shape_cast %26 : vector<32xf32> to vector<32x1xf32>
      %28 = arith.addf %24, %27 : vector<32x1xf32>
      %c0_18 = arith.constant 0 : index
      %c0_19 = arith.constant 0 : index
      %29 = vector.load %arg10[%c0_18, %c0_19] : memref<32x1xf32, #tpu.memory_space<vmem>>, vector<32x1xf32>
      tpu.vector_store %arg10[%c0_18, %c0_19], %28 {strides = array<i32>} : memref<32x1xf32, #tpu.memory_space<vmem>>, vector<32x1xf32>,
    } else {
    }
    %c1_i32 = arith.constant 1 : i32
    %8 = arith.cmpi eq, %arg0, %c1_i32 : i32
    %9 = arith.extui %8 : i1 to i32
    %c0_i32_4 = arith.constant 0 : i32
    %10 = arith.cmpi ne, %9, %c0_i32_4 : i32
    scf.if %10 {
      %c0 = arith.constant 0 : index
      %c0_5 = arith.constant 0 : index
      %11 = vector.load %arg6[%c0, %c0_5] : memref<32x32xf32, #tpu.memory_space<vmem>>, vector<32x32xf32>
      %c0_6 = arith.constant 0 : index
      %c0_7 = arith.constant 0 : index
      %12 = vector.load %arg9[%c0_6, %c0_7] : memref<32x1xf32, #tpu.memory_space<vmem>>, vector<32x1xf32>
      %cst = arith.constant dense<0.000000e+00> : vector<32x1xf32>
      %13 = tpu.matmul %11, %12, %cst {dimension_numbers = #tpu.dot_dimension_numbers<[1], [0], [0], [1], [0, 0, 1, 1], [], []>} : vector<32x32xf32>, vector<32x1xf32>, vector<32x1xf32> -> vector<32x1xf32>
      %cst_8 = arith.constant 3.65230109E-4 : f32
      %14 = vector.broadcast %cst_8 : f32 to vector<32x1xf32>
      %15 = arith.mulf %13, %14 : vector<32x1xf32>
      %c0_9 = arith.constant 0 : index
      %c0_10 = arith.constant 0 : index
      %16 = vector.load %arg6[%c0_9, %c0_10] : memref<32x32xf32, #tpu.memory_space<vmem>>, vector<32x32xf32>
      %c0_11 = arith.constant 0 : index
      %c0_12 = arith.constant 0 : index
      %17 = vector.load %arg10[%c0_11, %c0_12] : memref<32x1xf32, #tpu.memory_space<vmem>>, vector<32x1xf32>
      %cst_13 = arith.constant dense<0.000000e+00> : vector<32x1xf32>
      %18 = tpu.matmul %16, %17, %cst_13 {dimension_numbers = #tpu.dot_dimension_numbers<[1], [0], [0], [1], [0, 0, 1, 1], [], []>} : vector<32x32xf32>, vector<32x1xf32>, vector<32x1xf32> -> vector<32x1xf32>
      %cst_14 = arith.constant 3.65230109E-4 : f32
      %19 = vector.broadcast %cst_14 : f32 to vector<32x1xf32>
      %20 = arith.mulf %18, %19 : vector<32x1xf32>
      %21 = arith.mulf %15, %15 : vector<32x1xf32>
      %22 = arith.subf %20, %21 : vector<32x1xf32>
      %cst_15 = arith.constant 0.000000e+00 : f32
      %23 = vector.broadcast %cst_15 : f32 to vector<32x1xf32>
      %24 = arith.maximumf %22, %23 : vector<32x1xf32>
      %c0_16 = arith.constant 0 : index
      %c0_17 = arith.constant 0 : index
      %25 = vector.load %arg4[%c0_16, %c0_17] : memref<32x1xf32, #tpu.memory_space<vmem>>, vector<32x1xf32>
      %cst_18 = arith.constant 9.99999974E-6 : f32
      %26 = vector.broadcast %cst_18 : f32 to vector<32x1xf32>
      %27 = arith.addf %24, %26 : vector<32x1xf32>
      %28 = math.rsqrt %27 : vector<32x1xf32>
      %29 = arith.mulf %25, %28 : vector<32x1xf32>
      %c0_19 = arith.constant 0 : index
      %c0_20 = arith.constant 0 : index
      %30 = vector.load %arg5[%c0_19, %c0_20] : memref<32x1xf32, #tpu.memory_space<vmem>>, vector<32x1xf32>
      %31 = arith.mulf %15, %29 : vector<32x1xf32>
      %32 = arith.subf %30, %31 : vector<32x1xf32>
      %33 = arith.index_cast %arg1 : i32 to index
      %c0_21 = arith.constant 0 : index
      %c0_22 = arith.constant 0 : index
      %34 = vector.load %arg8[%33, %c0_21, %c0_22] : memref<1x32x768xbf16, #tpu.memory_space<vmem>>, vector<1x32x768xbf16>
      %35 = vector.shape_cast %34 : vector<1x32x768xbf16> to vector<32x768xbf16>
      %36 = arith.extf %35 : vector<32x768xbf16> to vector<32x768xf32>
      %37 = vector.broadcast %29 : vector<32x1xf32> to vector<32x768xf32>
      %38 = arith.mulf %36, %37 : vector<32x768xf32>
      %39 = vector.broadcast %32 : vector<32x1xf32> to vector<32x768xf32>
      %40 = arith.addf %38, %39 : vector<32x768xf32>
      %cst_23 = arith.constant 0.000000e+00 : f32
      %41 = vector.broadcast %cst_23 : f32 to vector<32x768xf32>
      %42 = arith.maximumf %40, %41 : vector<32x768xf32>
      %43 = arith.truncf %42 : vector<32x768xf32> to vector<32x768xbf16>
      %c0_24 = arith.constant 0 : index
      %c0_25 = arith.constant 0 : index
      %44 = vector.load %arg7[%c0_24, %c0_25] : memref<32x768xbf16, #tpu.memory_space<vmem>>, vector<32x768xbf16>
      tpu.vector_store %arg7[%c0_24, %c0_25], %43 {strides = array<i32>} : memref<32x768xbf16, #tpu.memory_space<vmem>>, vector<32x768xbf16>,
    } else {
    }
    return
  }
  func.func @transform_0(%arg0: i32, %arg1: i32) -> (i32, i32) {
    %c0_i32 = arith.constant 0 : i32
    %c0_i32_0 = arith.constant 0 : i32
    %c0_i32_1 = arith.constant 0 : i32
    return %c0_i32, %c0_i32_0 : i32, i32
  }
  func.func @transform_1(%arg0: i32, %arg1: i32) -> (i32, i32) {
    %c1_i32 = arith.constant 1 : i32
    %0 = arith.subi %c1_i32, %arg0 : i32
    %1 = arith.muli %arg1, %0 : i32
    %c0_i32 = arith.constant 0 : i32
    %2 = arith.muli %c0_i32, %arg0 : i32
    %3 = arith.addi %1, %2 : i32
    %c0_i32_0 = arith.constant 0 : i32
    %c0_i32_1 = arith.constant 0 : i32
    return %c0_i32_0, %3 : i32, i32
  }
  func.func @transform_2(%arg0: i32, %arg1: i32) -> (i32, i32) {
    %c0_i32 = arith.constant 0 : i32
    %c0_i32_0 = arith.constant 0 : i32
    %c0_i32_1 = arith.constant 0 : i32
    return %c0_i32, %c0_i32_0 : i32, i32
  }
  func.func @transform_3(%arg0: i32, %arg1: i32) -> (i32, i32) {
    %c0_i32 = arith.constant 0 : i32
    %c0_i32_0 = arith.constant 0 : i32
    %c0_i32_1 = arith.constant 0 : i32
    return %c0_i32, %c0_i32_0 : i32, i32
  }
  func.func @transform_4(%arg0: i32, %arg1: i32) -> (i32, i32) {
    %c0_i32 = arith.constant 0 : i32
    %c0_i32_0 = arith.constant 0 : i32
    %c0_i32_1 = arith.constant 0 : i32
    return %c0_i32, %c0_i32_0 : i32, i32
  }
  func.func @transform_5(%arg0: i32, %arg1: i32) -> (i32, i32) {
    %0 = arith.muli %arg1, %arg0 : i32
    %c0_i32 = arith.constant 0 : i32
    %c0_i32_0 = arith.constant 0 : i32
    return %c0_i32, %0 : i32, i32
  }
}

module attributes {stable_mosaic.version = 11 : i64} {
  func.func @conv_bn_fused_kernel(%arg0: i32, %arg1: i32, %arg2: memref<27x32xbf16, #tpu.memory_space<vmem>>, %arg3: memref<32x1024xbf16, #tpu.memory_space<vmem>>, %arg4: memref<27x1xf32, #tpu.memory_space<vmem>>, %arg5: memref<27x1xf32, #tpu.memory_space<vmem>>, %arg6: memref<27x27xf32, #tpu.memory_space<vmem>>, %arg7: memref<27x1024xbf16, #tpu.memory_space<vmem>>, %arg8: memref<3x27x1024xbf16, #tpu.memory_space<vmem>>, %arg9: memref<27x1xf32, #tpu.memory_space<vmem>>, %arg10: memref<27x1xf32, #tpu.memory_space<vmem>>) attributes {dimension_semantics = [#tpu.dimension_semantics<arbitrary>, #tpu.dimension_semantics<arbitrary>], iteration_bounds = array<i64: 2, 3>, scalar_prefetch = 0 : i64, scratch_operands = 3 : i64, tpu.core_type = #tpu.core_type<tc>, window_params = [{pipeline_mode = #tpu.pipeline_mode<synchronous>, transform_indices = @transform_0, window_bounds = array<i64: 27, 32>}, {transform_indices = @transform_1, window_bounds = array<i64: 32, 1024>}, {pipeline_mode = #tpu.pipeline_mode<synchronous>, transform_indices = @transform_2, window_bounds = array<i64: 27, 1>}, {pipeline_mode = #tpu.pipeline_mode<synchronous>, transform_indices = @transform_3, window_bounds = array<i64: 27, 1>}, {pipeline_mode = #tpu.pipeline_mode<synchronous>, transform_indices = @transform_4, window_bounds = array<i64: 27, 27>}, {transform_indices = @transform_5, window_bounds = array<i64: 27, 1024>}]} {
    %c0_i32 = arith.constant 0 : i32
    %0 = arith.cmpi eq, %arg0, %c0_i32 : i32
    %c0_i32_0 = arith.constant 0 : i32
    %1 = arith.cmpi eq, %arg1, %c0_i32_0 : i32
    %2 = arith.andi %0, %1 : i1
    %3 = arith.extui %2 : i1 to i32
    %c0_i32_1 = arith.constant 0 : i32
    %4 = arith.cmpi ne, %3, %c0_i32_1 : i32
    scf.if %4 {
      %cst = arith.constant 0.000000e+00 : f32
      %11 = vector.broadcast %cst : f32 to vector<27x1xf32>
      %c0 = arith.constant 0 : index
      %c0_5 = arith.constant 0 : index
      %12 = vector.load %arg9[%c0, %c0_5] : memref<27x1xf32, #tpu.memory_space<vmem>>, vector<27x1xf32>
      tpu.vector_store %arg9[%c0, %c0_5], %11 {strides = array<i32>} : memref<27x1xf32, #tpu.memory_space<vmem>>, vector<27x1xf32>,
      %cst_6 = arith.constant 0.000000e+00 : f32
      %13 = vector.broadcast %cst_6 : f32 to vector<27x1xf32>
      %c0_7 = arith.constant 0 : index
      %c0_8 = arith.constant 0 : index
      %14 = vector.load %arg10[%c0_7, %c0_8] : memref<27x1xf32, #tpu.memory_space<vmem>>, vector<27x1xf32>
      tpu.vector_store %arg10[%c0_7, %c0_8], %13 {strides = array<i32>} : memref<27x1xf32, #tpu.memory_space<vmem>>, vector<27x1xf32>,
    } else {
    }
    %c0_i32_2 = arith.constant 0 : i32
    %5 = arith.cmpi eq, %arg0, %c0_i32_2 : i32
    %6 = arith.extui %5 : i1 to i32
    %c0_i32_3 = arith.constant 0 : i32
    %7 = arith.cmpi ne, %6, %c0_i32_3 : i32
    scf.if %7 {
      %c0 = arith.constant 0 : index
      %c0_5 = arith.constant 0 : index
      %11 = vector.load %arg2[%c0, %c0_5] : memref<27x32xbf16, #tpu.memory_space<vmem>>, vector<27x32xbf16>
      %c0_6 = arith.constant 0 : index
      %c0_7 = arith.constant 0 : index
      %12 = vector.load %arg3[%c0_6, %c0_7] : memref<32x1024xbf16, #tpu.memory_space<vmem>>, vector<32x1024xbf16>
      %cst = arith.constant dense<0.000000e+00> : vector<27x1024xf32>
      %13 = tpu.matmul %11, %12, %cst {dimension_numbers = #tpu.dot_dimension_numbers<[1], [0], [0], [1], [0, 0, 1, 1], [], []>} : vector<27x32xbf16>, vector<32x1024xbf16>, vector<27x1024xf32> -> vector<27x1024xf32>
      %14 = arith.truncf %13 : vector<27x1024xf32> to vector<27x1024xbf16>
      %15 = arith.index_cast %arg1 : i32 to index
      %c0_8 = arith.constant 0 : index
      %c0_9 = arith.constant 0 : index
      %16 = vector.load %arg8[%15, %c0_8, %c0_9] : memref<3x27x1024xbf16, #tpu.memory_space<vmem>>, vector<1x27x1024xbf16>
      %17 = vector.shape_cast %16 : vector<1x27x1024xbf16> to vector<27x1024xbf16>
      %18 = vector.shape_cast %14 : vector<27x1024xbf16> to vector<1x27x1024xbf16>
      tpu.vector_store %arg8[%15, %c0_8, %c0_9], %18 {strides = array<i32>} : memref<3x27x1024xbf16, #tpu.memory_space<vmem>>, vector<1x27x1024xbf16>,
      %c0_10 = arith.constant 0 : index
      %c0_11 = arith.constant 0 : index
      %19 = vector.load %arg9[%c0_10, %c0_11] : memref<27x1xf32, #tpu.memory_space<vmem>>, vector<27x1xf32>
      %cst_12 = arith.constant dense<0.000000e+00> : vector<27xf32>
      %20 = vector.multi_reduction <add>, %13, %cst_12 [1] : vector<27x1024xf32> to vector<27xf32>
      %21 = vector.shape_cast %20 : vector<27xf32> to vector<27x1xf32>
      %22 = arith.addf %19, %21 : vector<27x1xf32>
      %c0_13 = arith.constant 0 : index
      %c0_14 = arith.constant 0 : index
      %23 = vector.load %arg9[%c0_13, %c0_14] : memref<27x1xf32, #tpu.memory_space<vmem>>, vector<27x1xf32>
      tpu.vector_store %arg9[%c0_13, %c0_14], %22 {strides = array<i32>} : memref<27x1xf32, #tpu.memory_space<vmem>>, vector<27x1xf32>,
      %c0_15 = arith.constant 0 : index
      %c0_16 = arith.constant 0 : index
      %24 = vector.load %arg10[%c0_15, %c0_16] : memref<27x1xf32, #tpu.memory_space<vmem>>, vector<27x1xf32>
      %25 = arith.mulf %13, %13 : vector<27x1024xf32>
      %cst_17 = arith.constant dense<0.000000e+00> : vector<27xf32>
      %26 = vector.multi_reduction <add>, %25, %cst_17 [1] : vector<27x1024xf32> to vector<27xf32>
      %27 = vector.shape_cast %26 : vector<27xf32> to vector<27x1xf32>
      %28 = arith.addf %24, %27 : vector<27x1xf32>
      %c0_18 = arith.constant 0 : index
      %c0_19 = arith.constant 0 : index
      %29 = vector.load %arg10[%c0_18, %c0_19] : memref<27x1xf32, #tpu.memory_space<vmem>>, vector<27x1xf32>
      tpu.vector_store %arg10[%c0_18, %c0_19], %28 {strides = array<i32>} : memref<27x1xf32, #tpu.memory_space<vmem>>, vector<27x1xf32>,
    } else {
    }
    %c1_i32 = arith.constant 1 : i32
    %8 = arith.cmpi eq, %arg0, %c1_i32 : i32
    %9 = arith.extui %8 : i1 to i32
    %c0_i32_4 = arith.constant 0 : i32
    %10 = arith.cmpi ne, %9, %c0_i32_4 : i32
    scf.if %10 {
      %c0 = arith.constant 0 : index
      %c0_5 = arith.constant 0 : index
      %11 = vector.load %arg6[%c0, %c0_5] : memref<27x27xf32, #tpu.memory_space<vmem>>, vector<27x27xf32>
      %c0_6 = arith.constant 0 : index
      %c0_7 = arith.constant 0 : index
      %12 = vector.load %arg9[%c0_6, %c0_7] : memref<27x1xf32, #tpu.memory_space<vmem>>, vector<27x1xf32>
      %cst = arith.constant dense<0.000000e+00> : vector<27x1xf32>
      %13 = tpu.matmul %11, %12, %cst {dimension_numbers = #tpu.dot_dimension_numbers<[1], [0], [0], [1], [0, 0, 1, 1], [], []>} : vector<27x27xf32>, vector<27x1xf32>, vector<27x1xf32> -> vector<27x1xf32>
      %cst_8 = arith.constant 3.9157334E-5 : f32
      %14 = vector.broadcast %cst_8 : f32 to vector<27x1xf32>
      %15 = arith.mulf %13, %14 : vector<27x1xf32>
      %c0_9 = arith.constant 0 : index
      %c0_10 = arith.constant 0 : index
      %16 = vector.load %arg6[%c0_9, %c0_10] : memref<27x27xf32, #tpu.memory_space<vmem>>, vector<27x27xf32>
      %c0_11 = arith.constant 0 : index
      %c0_12 = arith.constant 0 : index
      %17 = vector.load %arg10[%c0_11, %c0_12] : memref<27x1xf32, #tpu.memory_space<vmem>>, vector<27x1xf32>
      %cst_13 = arith.constant dense<0.000000e+00> : vector<27x1xf32>
      %18 = tpu.matmul %16, %17, %cst_13 {dimension_numbers = #tpu.dot_dimension_numbers<[1], [0], [0], [1], [0, 0, 1, 1], [], []>} : vector<27x27xf32>, vector<27x1xf32>, vector<27x1xf32> -> vector<27x1xf32>
      %cst_14 = arith.constant 3.9157334E-5 : f32
      %19 = vector.broadcast %cst_14 : f32 to vector<27x1xf32>
      %20 = arith.mulf %18, %19 : vector<27x1xf32>
      %21 = arith.mulf %15, %15 : vector<27x1xf32>
      %22 = arith.subf %20, %21 : vector<27x1xf32>
      %cst_15 = arith.constant 0.000000e+00 : f32
      %23 = vector.broadcast %cst_15 : f32 to vector<27x1xf32>
      %24 = arith.maximumf %22, %23 : vector<27x1xf32>
      %c0_16 = arith.constant 0 : index
      %c0_17 = arith.constant 0 : index
      %25 = vector.load %arg4[%c0_16, %c0_17] : memref<27x1xf32, #tpu.memory_space<vmem>>, vector<27x1xf32>
      %cst_18 = arith.constant 9.99999974E-6 : f32
      %26 = vector.broadcast %cst_18 : f32 to vector<27x1xf32>
      %27 = arith.addf %24, %26 : vector<27x1xf32>
      %28 = math.rsqrt %27 : vector<27x1xf32>
      %29 = arith.mulf %25, %28 : vector<27x1xf32>
      %c0_19 = arith.constant 0 : index
      %c0_20 = arith.constant 0 : index
      %30 = vector.load %arg5[%c0_19, %c0_20] : memref<27x1xf32, #tpu.memory_space<vmem>>, vector<27x1xf32>
      %31 = arith.mulf %15, %29 : vector<27x1xf32>
      %32 = arith.subf %30, %31 : vector<27x1xf32>
      %33 = arith.index_cast %arg1 : i32 to index
      %c0_21 = arith.constant 0 : index
      %c0_22 = arith.constant 0 : index
      %34 = vector.load %arg8[%33, %c0_21, %c0_22] : memref<3x27x1024xbf16, #tpu.memory_space<vmem>>, vector<1x27x1024xbf16>
      %35 = vector.shape_cast %34 : vector<1x27x1024xbf16> to vector<27x1024xbf16>
      %36 = arith.extf %35 : vector<27x1024xbf16> to vector<27x1024xf32>
      %37 = vector.broadcast %29 : vector<27x1xf32> to vector<27x1024xf32>
      %38 = arith.mulf %36, %37 : vector<27x1024xf32>
      %39 = vector.broadcast %32 : vector<27x1xf32> to vector<27x1024xf32>
      %40 = arith.addf %38, %39 : vector<27x1024xf32>
      %41 = arith.truncf %40 : vector<27x1024xf32> to vector<27x1024xbf16>
      %c0_23 = arith.constant 0 : index
      %c0_24 = arith.constant 0 : index
      %42 = vector.load %arg7[%c0_23, %c0_24] : memref<27x1024xbf16, #tpu.memory_space<vmem>>, vector<27x1024xbf16>
      tpu.vector_store %arg7[%c0_23, %c0_24], %41 {strides = array<i32>} : memref<27x1024xbf16, #tpu.memory_space<vmem>>, vector<27x1024xbf16>,
    } else {
    }
    return
  }
  func.func @transform_0(%arg0: i32, %arg1: i32) -> (i32, i32) {
    %c0_i32 = arith.constant 0 : i32
    %c0_i32_0 = arith.constant 0 : i32
    %c0_i32_1 = arith.constant 0 : i32
    return %c0_i32, %c0_i32_0 : i32, i32
  }
  func.func @transform_1(%arg0: i32, %arg1: i32) -> (i32, i32) {
    %c1_i32 = arith.constant 1 : i32
    %0 = arith.subi %c1_i32, %arg0 : i32
    %1 = arith.muli %arg1, %0 : i32
    %c2_i32 = arith.constant 2 : i32
    %2 = arith.muli %c2_i32, %arg0 : i32
    %3 = arith.addi %1, %2 : i32
    %c0_i32 = arith.constant 0 : i32
    %c0_i32_0 = arith.constant 0 : i32
    return %c0_i32, %3 : i32, i32
  }
  func.func @transform_2(%arg0: i32, %arg1: i32) -> (i32, i32) {
    %c0_i32 = arith.constant 0 : i32
    %c0_i32_0 = arith.constant 0 : i32
    %c0_i32_1 = arith.constant 0 : i32
    return %c0_i32, %c0_i32_0 : i32, i32
  }
  func.func @transform_3(%arg0: i32, %arg1: i32) -> (i32, i32) {
    %c0_i32 = arith.constant 0 : i32
    %c0_i32_0 = arith.constant 0 : i32
    %c0_i32_1 = arith.constant 0 : i32
    return %c0_i32, %c0_i32_0 : i32, i32
  }
  func.func @transform_4(%arg0: i32, %arg1: i32) -> (i32, i32) {
    %c0_i32 = arith.constant 0 : i32
    %c0_i32_0 = arith.constant 0 : i32
    %c0_i32_1 = arith.constant 0 : i32
    return %c0_i32, %c0_i32_0 : i32, i32
  }
  func.func @transform_5(%arg0: i32, %arg1: i32) -> (i32, i32) {
    %0 = arith.muli %arg1, %arg0 : i32
    %c0_i32 = arith.constant 0 : i32
    %c0_i32_0 = arith.constant 0 : i32
    return %c0_i32, %0 : i32, i32
  }
}

module attributes {stable_mosaic.version = 11 : i64} {
  func.func @resize_kernel(%arg0: i32, %arg1: memref<1x128x128xbf16, #tpu.memory_space<vmem>>, %arg2: memref<224x128xbf16, #tpu.memory_space<vmem>>, %arg3: memref<128x256xbf16, #tpu.memory_space<vmem>>, %arg4: memref<1x224x256xf32, #tpu.memory_space<vmem>>) attributes {dimension_semantics = [#tpu.dimension_semantics<parallel>], iteration_bounds = array<i64: 6>, scalar_prefetch = 0 : i64, scratch_operands = 0 : i64, tpu.core_type = #tpu.core_type<tc>, window_params = [{transform_indices = @transform_0, window_bounds = array<i64: 1, 128, 128>}, {pipeline_mode = #tpu.pipeline_mode<synchronous>, transform_indices = @transform_1, window_bounds = array<i64: 224, 128>}, {pipeline_mode = #tpu.pipeline_mode<synchronous>, transform_indices = @transform_2, window_bounds = array<i64: 128, 256>}, {transform_indices = @transform_3, window_bounds = array<i64: 1, 224, 256>}]} {
    %c0 = arith.constant 0 : index
    %c0_0 = arith.constant 0 : index
    %0 = vector.load %arg2[%c0, %c0_0] : memref<224x128xbf16, #tpu.memory_space<vmem>>, vector<224x128xbf16>
    %c0_1 = arith.constant 0 : index
    %c0_2 = arith.constant 0 : index
    %c0_3 = arith.constant 0 : index
    %1 = vector.load %arg1[%c0_1, %c0_2, %c0_3] : memref<1x128x128xbf16, #tpu.memory_space<vmem>>, vector<1x128x128xbf16>
    %2 = vector.shape_cast %1 : vector<1x128x128xbf16> to vector<128x128xbf16>
    %cst = arith.constant dense<0.000000e+00> : vector<224x128xf32>
    %3 = tpu.matmul %0, %2, %cst {dimension_numbers = #tpu.dot_dimension_numbers<[1], [0], [0], [1], [0, 0, 1, 1], [], []>} : vector<224x128xbf16>, vector<128x128xbf16>, vector<224x128xf32> -> vector<224x128xf32>
    %4 = arith.truncf %3 : vector<224x128xf32> to vector<224x128xbf16>
    %c0_4 = arith.constant 0 : index
    %c0_5 = arith.constant 0 : index
    %5 = vector.load %arg3[%c0_4, %c0_5] : memref<128x256xbf16, #tpu.memory_space<vmem>>, vector<128x256xbf16>
    %cst_6 = arith.constant dense<0.000000e+00> : vector<224x256xf32>
    %6 = tpu.matmul %4, %5, %cst_6 {dimension_numbers = #tpu.dot_dimension_numbers<[1], [0], [0], [1], [0, 0, 1, 1], [], []>} : vector<224x128xbf16>, vector<128x256xbf16>, vector<224x256xf32> -> vector<224x256xf32>
    %c0_7 = arith.constant 0 : index
    %c0_8 = arith.constant 0 : index
    %c0_9 = arith.constant 0 : index
    %7 = vector.load %arg4[%c0_7, %c0_8, %c0_9] : memref<1x224x256xf32, #tpu.memory_space<vmem>>, vector<1x224x256xf32>
    %8 = vector.shape_cast %7 : vector<1x224x256xf32> to vector<224x256xf32>
    %9 = vector.shape_cast %6 : vector<224x256xf32> to vector<1x224x256xf32>
    tpu.vector_store %arg4[%c0_7, %c0_8, %c0_9], %9 {strides = array<i32>} : memref<1x224x256xf32, #tpu.memory_space<vmem>>, vector<1x224x256xf32>,
    return
  }
  func.func @transform_0(%arg0: i32) -> (i32, i32, i32) {
    %c0_i32 = arith.constant 0 : i32
    %c0_i32_0 = arith.constant 0 : i32
    %c0_i32_1 = arith.constant 0 : i32
    return %arg0, %c0_i32, %c0_i32_0 : i32, i32, i32
  }
  func.func @transform_1(%arg0: i32) -> (i32, i32) {
    %c0_i32 = arith.constant 0 : i32
    %c0_i32_0 = arith.constant 0 : i32
    %c0_i32_1 = arith.constant 0 : i32
    return %c0_i32, %c0_i32_0 : i32, i32
  }
  func.func @transform_2(%arg0: i32) -> (i32, i32) {
    %c0_i32 = arith.constant 0 : i32
    %c0_i32_0 = arith.constant 0 : i32
    %c0_i32_1 = arith.constant 0 : i32
    return %c0_i32, %c0_i32_0 : i32, i32
  }
  func.func @transform_3(%arg0: i32) -> (i32, i32, i32) {
    %c0_i32 = arith.constant 0 : i32
    %c0_i32_0 = arith.constant 0 : i32
    %c0_i32_1 = arith.constant 0 : i32
    return %arg0, %c0_i32, %c0_i32_0 : i32, i32, i32
  }
}

</mosaic_0001>

<bundles_post_ra>
// kernel: decoder_forward.5
= control target key start
LH: loop header
LB: loop body
LE: loop exit
PB: predicated region body
PF: predicated region fallthrough
CT: control target
= control target key end

     0   :  { %v86_v30 = vlaneseq  ;;  %v5824_v31 = vmov 1966171168   ;;  %vm384_vm0 = vcmask 1043456   ;;  %vm380_vm1 = vcmask 588800   ;;  %s7972_s1 = inlined_call_operand.vmem [shape: bf16[200,512], index: 1, kind: input, shape index: {}]   ;;  %s7973_s0 = inlined_call_operand.vmem [shape: bf16[2,200], index: 0, kind: input, shape index: {}]   ;;  %s7974_s5 = inlined_call_operand.vmem [shape: bf16[512,2048], index: 5, kind: input, shape index: {}]   ;;  %s7975_s2 = inlined_call_operand.vmem [shape: f32[1,512], index: 2, kind: input, shape index: {}]   ;;  %s7976_s3 = inlined_call_operand.vmem [shape: f32[1,512], index: 3, kind: input, shape index: {}]   ;;  %s7977_s4 = inlined_call_operand.vmem [shape: f32[1,512], index: 4, kind: input, shape index: {}]   ;;  %s7978_s6 = inlined_call_operand.vmem [shape: f32[1,2048], index: 6, kind: input, shape index: {}]   ;;  %s7979_s7 = inlined_call_operand.vmem [shape: f32[1,2048], index: 7, kind: input, shape index: {}]   ;;  %s7980_s8 = inlined_call_operand.vmem [shape: f32[1,2048], index: 8, kind: input, shape index: {}]   ;;  %s7981_s9 = inlined_call_operand.vmem [shape: bf16[2,2048], index: 9, kind: output, shape index: {}]  }
   0x1   :  { %v5705_v0 = vld [vmem:[%s7972_s1 + $0xe4] ss:$16 sps:$4 sm:$0xff]   ;;  %v5707_v1 = vld [vmem:[%s7972_s1 + $0xec] ss:$16 sps:$4 sm:$0xff]   ;;  %v5709_v2 = vld [vmem:[%s7972_s1 + $0xe0] ss:$16 sps:$4 sm:$0xff]   ;;  %v116_v32 = vunpack.c.l.s4 %v5824_v31 }
   0x2   :  { %397 = vmatprep.subr.bf16.mxu0 %v5705_v0  ;;  %v5710_v3 = vld [vmem:[%s7972_s1 + $0xe8] ss:$16 sps:$4 sm:$0xff]   ;;  %438 = vmatprep.subr.bf16.mxu1 %v5707_v1  ;;  %v5711_v4 = vld [vmem:[%s7972_s1 + $0xc4] ss:$16 sps:$4 sm:$0xff]   ;;  %v5713_v5 = vld [vmem:[%s7972_s1 + $0xcc] ss:$16 sps:$4 sm:$0xff]  }
   0x3   :  { %398 = vmatpush1.bf16.msra.mxu0 %v5709_v2  ;;  %439 = vmatpush1.bf16.msra.mxu1 %v5710_v3  ;;  %v5715_v6 = vld [vmem:[%s7972_s1 + $0xc0] ss:$16 sps:$4 sm:$0xff]   ;;  %v5716_v7 = vld [vmem:[%s7972_s1 + $0xc8] ss:$16 sps:$4 sm:$0xff]   ;;  %v5717_v8 = vld [vmem:[%s7972_s1 + $0xa4] ss:$16 sps:$4 sm:$0xff]   ;;  %v117_v39 = vunpack.c.0.s8 %v116_v32 }
   0x4   :  { %399 = vmatprep.subr.bf16.mxu0 %v5711_v4  ;;  %440 = vmatprep.subr.bf16.mxu1 %v5713_v5  ;;  %v5719_v9 = vld [vmem:[%s7972_s1 + $0xac] ss:$16 sps:$4 sm:$0xff]   ;;  %v5721_v10 = vld [vmem:[%s7972_s1 + $0xa0] ss:$16 sps:$4 sm:$0xff]   ;;  %v5722_v11 = vld [vmem:[%s7972_s1 + $0xa8] ss:$16 sps:$4 sm:$0xff]  }
   0x5   :  { %v5723_v12 = vld [vmem:[%s7972_s1 + $0x84] ss:$16 sps:$4 sm:$0xff]   ;;  %v5725_v13 = vld [vmem:[%s7972_s1 + $0x8c] ss:$16 sps:$4 sm:$0xff]   ;;  %v5727_v14 = vld [vmem:[%s7972_s1 + $0x80] ss:$16 sps:$4 sm:$0xff]  }
   0x6   :  { %v5728_v15 = vld [vmem:[%s7972_s1 + $0x88] ss:$16 sps:$4 sm:$0xff]   ;;  %v5729_v16 = vld [vmem:[%s7972_s1 + $0x64] ss:$16 sps:$4 sm:$0xff]   ;;  %v5731_v17 = vld [vmem:[%s7972_s1 + $0x6c] ss:$16 sps:$4 sm:$0xff]  }
   0x7   :  { %400 = vmatpush1.bf16.msra.mxu0 %v5715_v6  ;;  %441 = vmatpush1.bf16.msra.mxu1 %v5716_v7  ;;  %v5733_v18 = vld [vmem:[%s7972_s1 + $0x60] ss:$16 sps:$4 sm:$0xff]   ;;  %v5734_v19 = vld [vmem:[%s7972_s1 + $0x68] ss:$16 sps:$4 sm:$0xff]   ;;  %v5735_v20 = vld [vmem:[%s7972_s1 + $0x44] ss:$16 sps:$4 sm:$0xff]  }
   0x8   :  { %401 = vmatprep.subr.bf16.mxu0 %v5717_v8  ;;  %442 = vmatprep.subr.bf16.mxu1 %v5719_v9  ;;  %v5737_v21 = vld [vmem:[%s7972_s1 + $0x4c] ss:$16 sps:$4 sm:$0xff]   ;;  %v5739_v22 = vld [vmem:[%s7972_s1 + $0x40] ss:$16 sps:$4 sm:$0xff]   ;;  %v5740_v23 = vld [vmem:[%s7972_s1 + $0x48] ss:$16 sps:$4 sm:$0xff]  }
   0x9   :  { %v5741_v24 = vld [vmem:[%s7972_s1 + $0x24] ss:$16 sps:$4 sm:$0xff]   ;;  %v5743_v25 = vld [vmem:[%s7972_s1 + $0x2c] ss:$16 sps:$4 sm:$0xff]   ;;  %v5745_v26 = vld [vmem:[%s7972_s1 + $0x20] ss:$16 sps:$4 sm:$0xff]  }
   0xa   :  { %v5746_v27 = vld [vmem:[%s7972_s1 + $0x28] ss:$16 sps:$4 sm:$0xff]   ;;  %v5747_v28 = vld [vmem:[%s7972_s1 + $0x4] ss:$16 sps:$4 sm:$0xff]   ;;  %v5749_v29 = vld [vmem:[%s7972_s1 + $0xc] ss:$16 sps:$4 sm:$0xff]  }
   0xb   :  { %402 = vmatpush1.bf16.msra.mxu0 %v5721_v10  ;;  %443 = vmatpush1.bf16.msra.mxu1 %v5722_v11  ;;  %v82_v33 = vld [vmem:[%s7972_s1 + $0x180] sm:$0xff]  ;;  %v83_v34 = vld [vmem:[%s7972_s1 + $0x188] sm:$0xff]  ;;  %v5977_v38 = vshrl.u32 %v86_v30, 7  ;;  %vm481_vm2 = vcmask 1041408  }
   0xc   :  { %403 = vmatprep.subr.bf16.mxu0 %v5723_v12  ;;  %444 = vmatprep.subr.bf16.mxu1 %v5725_v13  ;;  %v5751_v35 = vld [vmem:[%s7972_s1] ss:$16 sps:$4 sm:$0xff]   ;;  %v5752_v36 = vld [vmem:[%s7972_s1 + $0x8] ss:$16 sps:$4 sm:$0xff]   ;;  %v5177_v37 = vcombine.high %v82_v33, %v82_v33  ;;  %v5179_v40 = vcombine.high %v83_v34, %v83_v34  ;;  %v5176_v41 = vcombine.low %v82_v33, %v82_v33  ;;  %v5757_v43 = vld [vmem:[%s7972_s1 + $0x164] ss:$16 sps:$4 sm:$0xff]  }
   0xd   :  { %v5178_v42 = vcombine.low %v83_v34, %v83_v34  ;;  %v5759_v44 = vld [vmem:[%s7972_s1 + $0x16c] ss:$16 sps:$4 sm:$0xff]   ;;  %v5986_v45 = vsub.s32 %v117_v39, %v5977_v38  ;;  %v5127_v48 = vld.sshfl [vmem:[%s7973_s0] sm:$0x11 pattern:$0x75316420] }
   0xe   :  { %v386_v46 = vsel %vm384_vm0, %v5176_v41, 0  ;;  %v114_v49 = vcombine.high %v5127_v48, %v5127_v48  ;;  %v5761_v50 = vld [vmem:[%s7972_s1 + $0x160] ss:$16 sps:$4 sm:$0xff]   ;;  %v5762_v51 = vld [vmem:[%s7972_s1 + $0x168] ss:$16 sps:$4 sm:$0xff]  }
   0xf   :  { %404 = vmatpush1.bf16.msra.mxu0 %v5727_v14  ;;  %445 = vmatpush1.bf16.msra.mxu1 %v5728_v15  ;;  %v392_v47 = vsel %vm384_vm0, %v5178_v42, 0  ;;  %v5763_v53 = vld [vmem:[%s7972_s1 + $0x144] ss:$16 sps:$4 sm:$0xff]   ;;  %v5765_v54 = vld [vmem:[%s7972_s1 + $0x14c] ss:$16 sps:$4 sm:$0xff]   ;;  %v121_v1 = vrot.slane %v5127_v48, %v5986_v45 }
  0x10   :  { %405 = vmatprep.subr.bf16.mxu0 %v5729_v16  ;;  %446 = vmatprep.subr.bf16.mxu1 %v5731_v17  ;;  %v128_v52 = vrot.slane %v114_v49, %v5986_v45  ;;  %v5767_v55 = vld [vmem:[%s7972_s1 + $0x140] ss:$16 sps:$4 sm:$0xff]   ;;  %v5768_v56 = vld [vmem:[%s7972_s1 + $0x148] ss:$16 sps:$4 sm:$0xff]   ;;  %v5769_v57 = vld [vmem:[%s7972_s1 + $0x124] ss:$16 sps:$4 sm:$0xff]  }
  0x11   :  { %v5771_v58 = vld [vmem:[%s7972_s1 + $0x12c] ss:$16 sps:$4 sm:$0xff]   ;;  %v5773_v59 = vld [vmem:[%s7972_s1 + $0x120] ss:$16 sps:$4 sm:$0xff]   ;;  %v5774_v60 = vld [vmem:[%s7972_s1 + $0x128] ss:$16 sps:$4 sm:$0xff]  }
  0x12   :  { %5181 = vmatprep.mubr.msk.bf16.mxu0 %vm380_vm1, %v128_v52  ;;  %5183 = vmatprep.mubr.msk.bf16.mxu1 %vm380_vm1, %v128_v52  ;;  %v5775_v61 = vld [vmem:[%s7972_s1 + $0x104] ss:$16 sps:$4 sm:$0xff]   ;;  %v5777_v62 = vld [vmem:[%s7972_s1 + $0x10c] ss:$16 sps:$4 sm:$0xff]   ;;  %v5779_v63 = vld [vmem:[%s7972_s1 + $0x100] ss:$16 sps:$4 sm:$0xff]  }
  0x13   :  { %406 = vmatpush1.bf16.msra.mxu0 %v5733_v18  ;;  %447 = vmatpush1.bf16.msra.mxu1 %v5734_v19  ;;  %v5780_v0 = vld [vmem:[%s7972_s1 + $0x108] ss:$16 sps:$4 sm:$0xff]   ;;  %v737_v2 = vld [vmem:[%s7974_s5 + $0x380] sm:$0xff] }
  0x14   :  { %407 = vmatprep.subr.bf16.mxu0 %v5735_v20  ;;  %448 = vmatprep.subr.bf16.mxu1 %v5737_v21  ;;  %v745_v3 = vld [vmem:[%s7974_s5 + $0x3c0] sm:$0xff] }
  0x15   :  { %v993_v4 = vld [vmem:[%s7974_s5 + $0xb80] sm:$0xff]  ;;  %v5297_v5 = vcombine.high %v737_v2, %v745_v3  ;;  %v5296_v7 = vcombine.low %v737_v2, %v745_v3 }
  0x16   :  { %v1001_v6 = vld [vmem:[%s7974_s5 + $0xbc0] sm:$0xff] }
  0x17   :  { %408 = vmatpush1.bf16.msra.mxu0 %v5739_v22  ;;  %449 = vmatpush1.bf16.msra.mxu1 %v5740_v23  ;;  %v5552_v8 = vcombine.low %v993_v4, %v1001_v6  ;;  %v5553_v9 = vcombine.high %v993_v4, %v1001_v6  ;;  %v721_v10 = vld [vmem:[%s7974_s5 + $0x300] sm:$0xff] }
  0x18   :  { %409 = vmatprep.subr.bf16.mxu0 %v5741_v24  ;;  %450 = vmatprep.subr.bf16.mxu1 %v5743_v25  ;;  %v729_v11 = vld [vmem:[%s7974_s5 + $0x340] sm:$0xff] }
  0x19   :  { %v977_v12 = vld [vmem:[%s7974_s5 + $0xb00] sm:$0xff]  ;;  %v5281_v13 = vcombine.high %v721_v10, %v729_v11  ;;  %v5280_v15 = vcombine.low %v721_v10, %v729_v11 }
  0x1a   :  { %v985_v14 = vld [vmem:[%s7974_s5 + $0xb40] sm:$0xff] }
  0x1b   :  { %410 = vmatpush1.bf16.msra.mxu0 %v5745_v26  ;;  %451 = vmatpush1.bf16.msra.mxu1 %v5746_v27  ;;  %v5536_v16 = vcombine.low %v977_v12, %v985_v14  ;;  %v5537_v17 = vcombine.high %v977_v12, %v985_v14  ;;  %v705_v18 = vld [vmem:[%s7974_s5 + $0x280] sm:$0xff] }
  0x1c   :  { %411 = vmatprep.subr.bf16.mxu0 %v5747_v28  ;;  %452 = vmatprep.subr.bf16.mxu1 %v5749_v29  ;;  %v713_v19 = vld [vmem:[%s7974_s5 + $0x2c0] sm:$0xff] }
  0x1d   :  { %v961_v20 = vld [vmem:[%s7974_s5 + $0xa80] sm:$0xff]  ;;  %v5265_v21 = vcombine.high %v705_v18, %v713_v19  ;;  %v5264_v23 = vcombine.low %v705_v18, %v713_v19 }
  0x1e   :  { %v969_v22 = vld [vmem:[%s7974_s5 + $0xac0] sm:$0xff] }
  0x1f   :  { %412 = vmatpush1.bf16.msra.mxu0 %v5751_v35  ;;  %453 = vmatpush1.bf16.msra.mxu1 %v5752_v36  ;;  %v5520_v24 = vcombine.low %v961_v20, %v969_v22  ;;  %v5521_v25 = vcombine.high %v961_v20, %v969_v22  ;;  %v689_v26 = vld [vmem:[%s7974_s5 + $0x200] sm:$0xff] }
  0x20   :  { %5180 = vmatprep.subr.msk.bf16.mxu0 %vm384_vm0, %v5177_v37  ;;  %5182 = vmatprep.subr.msk.bf16.mxu1 %vm384_vm0, %v5179_v40  ;;  %v697_v27 = vld [vmem:[%s7974_s5 + $0x240] sm:$0xff] }
  0x21   :  { %v945_v28 = vld [vmem:[%s7974_s5 + $0xa00] sm:$0xff]  ;;  %v5249_v29 = vcombine.high %v689_v26, %v697_v27  ;;  %v5248_v31 = vcombine.low %v689_v26, %v697_v27 }
  0x22   :  { %v953_v30 = vld [vmem:[%s7974_s5 + $0xa40] sm:$0xff] }
  0x23   :  { %420 = vmatpush2.bf16.msra.mxu0 %v386_v46  ;;  %461 = vmatpush2.bf16.msra.mxu1 %v392_v47  ;;  %v5504_v32 = vcombine.low %v945_v28, %v953_v30  ;;  %v5505_v33 = vcombine.high %v945_v28, %v953_v30  ;;  %v673_v34 = vld [vmem:[%s7974_s5 + $0x180] sm:$0xff] }
  0x24   :  { %421 = vmatprep.subr.bf16.mxu0 %v5757_v43  ;;  %462 = vmatprep.subr.bf16.mxu1 %v5759_v44  ;;  %v681_v35 = vld [vmem:[%s7974_s5 + $0x1c0] sm:$0xff] }
  0x25   :  { %v929_v36 = vld [vmem:[%s7974_s5 + $0x980] sm:$0xff]  ;;  %v5233_v37 = vcombine.high %v673_v34, %v681_v35  ;;  %v5232_v40 = vcombine.low %v673_v34, %v681_v35 }
  0x26   :  { %v937_v39 = vld [vmem:[%s7974_s5 + $0x9c0] sm:$0xff] }
  0x27   :  { %422 = vmatpush2.bf16.msra.mxu0 %v5761_v50  ;;  %463 = vmatpush2.bf16.msra.mxu1 %v5762_v51  ;;  %v5488_v41 = vcombine.low %v929_v36, %v937_v39  ;;  %v5489_v42 = vcombine.high %v929_v36, %v937_v39  ;;  %v657_v43 = vld [vmem:[%s7974_s5 + $0x100] sm:$0xff] }
  0x28   :  { %423 = vmatprep.subr.bf16.mxu0 %v5763_v53  ;;  %464 = vmatprep.subr.bf16.mxu1 %v5765_v54  ;;  %v665_v44 = vld [vmem:[%s7974_s5 + $0x140] sm:$0xff] }
  0x29   :  { %v913_v46 = vld [vmem:[%s7974_s5 + $0x900] sm:$0xff]  ;;  %v5217_v47 = vcombine.high %v657_v43, %v665_v44  ;;  %v5216_v49 = vcombine.low %v657_v43, %v665_v44 }
  0x2a   :  { %v921_v48 = vld [vmem:[%s7974_s5 + $0x940] sm:$0xff] }
  0x2b   :  { %424 = vmatpush2.bf16.msra.mxu0 %v5767_v55  ;;  %465 = vmatpush2.bf16.msra.mxu1 %v5768_v56  ;;  %v5472_v50 = vcombine.low %v913_v46, %v921_v48  ;;  %v5473_v51 = vcombine.high %v913_v46, %v921_v48  ;;  %v641_v52 = vld [vmem:[%s7974_s5 + $0x80] sm:$0xff] }
  0x2c   :  { %425 = vmatprep.subr.bf16.mxu0 %v5769_v57  ;;  %466 = vmatprep.subr.bf16.mxu1 %v5771_v58  ;;  %v649_v53 = vld [vmem:[%s7974_s5 + $0xc0] sm:$0xff] }
  0x2d   :  { %v897_v54 = vld [vmem:[%s7974_s5 + $0x880] sm:$0xff]  ;;  %v5201_v55 = vcombine.high %v641_v52, %v649_v53  ;;  %v5200_v57 = vcombine.low %v641_v52, %v649_v53 }
  0x2e   :  { %v905_v56 = vld [vmem:[%s7974_s5 + $0x8c0] sm:$0xff] }
  0x2f   :  { %426 = vmatpush2.bf16.msra.mxu0 %v5773_v59  ;;  %467 = vmatpush2.bf16.msra.mxu1 %v5774_v60  ;;  %v5456_v58 = vcombine.low %v897_v54, %v905_v56  ;;  %v5457_v59 = vcombine.high %v897_v54, %v905_v56  ;;  %v625_v60 = vld [vmem:[%s7974_s5] sm:$0xff] }
  0x30   :  { %427 = vmatprep.subr.bf16.mxu0 %v5775_v61  ;;  %468 = vmatprep.subr.bf16.mxu1 %v5777_v62  ;;  %v633_v61 = vld [vmem:[%s7974_s5 + $0x40] sm:$0xff] }
  0x31   :  { %v881_v62 = vld [vmem:[%s7974_s5 + $0x800] sm:$0xff] }
  0x32   :  { %v865_v4 = vld [vmem:[%s7974_s5 + $0x780] sm:$0xff] }
  0x33   :  { %428 = vmatpush2.bf16.msra.mxu0 %v5779_v63  ;;  %469 = vmatpush2.bf16.msra.mxu1 %v5780_v0  ;;  %v5185_v63 = vcombine.high %v625_v60, %v633_v61  ;;  %v889_v0 = vld [vmem:[%s7974_s5 + $0x840] sm:$0xff] }
  0x34   :  { %3781 = vmatprep.subr.bf16.mxu0 %v5297_v5  ;;  %3822 = vmatprep.subr.bf16.mxu1 %v5553_v9  ;;  %v5440_v2 = vcombine.low %v881_v62, %v889_v0  ;;  %v5441_v3 = vcombine.high %v881_v62, %v889_v0  ;;  %v873_v5 = vld [vmem:[%s7974_s5 + $0x7c0] sm:$0xff] }
  0x35   :  { %v1121_v6 = vld [vmem:[%s7974_s5 + $0xf80] sm:$0xff]  ;;  %v5424_v9 = vcombine.low %v865_v4, %v873_v5 }
  0x36   :  { %430 = vmatmul.mubr.bf16.vlgmr.msra.gmra.mxu0 %v121_v1  ;;  %471 = vmatmul.mubr.bf16.vlgmr.msra.gmra.mxu1 %v121_v1  ;;  %v5184_v1 = vcombine.low %v625_v60, %v633_v61  ;;  %v849_v12 = vld [vmem:[%s7974_s5 + $0x700] sm:$0xff] }
  0x37   :  { %3782 = vmatpush1.bf16.msra.mxu0 %v5296_v7  ;;  %3823 = vmatpush1.bf16.msra.mxu1 %v5552_v8  ;;  %v5425_v7 = vcombine.high %v865_v4, %v873_v5  ;;  %v1129_v8 = vld [vmem:[%s7974_s5 + $0xfc0] sm:$0xff] }
  0x38   :  { %3783 = vmatprep.subr.bf16.mxu0 %v5281_v13  ;;  %3824 = vmatprep.subr.bf16.mxu1 %v5537_v17  ;;  %v5680_v10 = vcombine.low %v1121_v6, %v1129_v8  ;;  %v5681_v11 = vcombine.high %v1121_v6, %v1129_v8  ;;  %v857_v13 = vld [vmem:[%s7974_s5 + $0x740] sm:$0xff]  ;;  %v6230_v6 = vld [vmem:[%s7974_s5 + $0x388] sm:$0xff] }
  0x39   :  { %v1105_v14 = vld [vmem:[%s7974_s5 + $0xf00] sm:$0xff]  ;;  %v5408_v17 = vcombine.low %v849_v12, %v857_v13  ;;  %v6240_v8 = vld [vmem:[%s7974_s5 + $0xb88] sm:$0xff] }
  0x3a   :  { %v833_v20 = vld [vmem:[%s7974_s5 + $0x680] sm:$0xff] }
  0x3b   :  { %3784 = vmatpush1.bf16.msra.mxu0 %v5280_v15  ;;  %3825 = vmatpush1.bf16.msra.mxu1 %v5536_v16  ;;  %v5409_v15 = vcombine.high %v849_v12, %v857_v13  ;;  %v1113_v16 = vld [vmem:[%s7974_s5 + $0xf40] sm:$0xff] }
  0x3c   :  { %3785 = vmatprep.subr.bf16.mxu0 %v5265_v21  ;;  %3826 = vmatprep.subr.bf16.mxu1 %v5521_v25  ;;  %v5664_v18 = vcombine.low %v1105_v14, %v1113_v16  ;;  %v5665_v19 = vcombine.high %v1105_v14, %v1113_v16  ;;  %v841_v21 = vld [vmem:[%s7974_s5 + $0x6c0] sm:$0xff]  ;;  %v6256_v14 = vsub.s32 0, %v5977_v38 }
  0x3d   :  { %v1089_v22 = vld [vmem:[%s7974_s5 + $0xe80] sm:$0xff]  ;;  %v5392_v25 = vcombine.low %v833_v20, %v841_v21 }
  0x3e   :  { %v817_v28 = vld [vmem:[%s7974_s5 + $0x600] sm:$0xff] }
  0x3f   :  { %3786 = vmatpush1.bf16.msra.mxu0 %v5264_v23  ;;  %3827 = vmatpush1.bf16.msra.mxu1 %v5520_v24  ;;  %v5393_v23 = vcombine.high %v833_v20, %v841_v21  ;;  %v1097_v24 = vld [vmem:[%s7974_s5 + $0xec0] sm:$0xff] }
  0x40   :  { %3787 = vmatprep.subr.bf16.mxu0 %v5249_v29  ;;  %3828 = vmatprep.subr.bf16.mxu1 %v5505_v33  ;;  %v5648_v26 = vcombine.low %v1089_v22, %v1097_v24  ;;  %v5649_v27 = vcombine.high %v1089_v22, %v1097_v24  ;;  %v825_v29 = vld [vmem:[%s7974_s5 + $0x640] sm:$0xff] }
  0x41   :  { %v1073_v30 = vld [vmem:[%s7974_s5 + $0xe00] sm:$0xff]  ;;  %v5376_v33 = vcombine.low %v817_v28, %v825_v29 }
  0x42   :  { %v801_v36 = vld [vmem:[%s7974_s5 + $0x580] sm:$0xff] }
  0x43   :  { %3788 = vmatpush1.bf16.msra.mxu0 %v5248_v31  ;;  %3829 = vmatpush1.bf16.msra.mxu1 %v5504_v32  ;;  %v5377_v31 = vcombine.high %v817_v28, %v825_v29  ;;  %v1081_v32 = vld [vmem:[%s7974_s5 + $0xe40] sm:$0xff] }
  0x44   :  { %3789 = vmatprep.subr.bf16.mxu0 %v5233_v37  ;;  %3830 = vmatprep.subr.bf16.mxu1 %v5489_v42  ;;  %v5632_v34 = vcombine.low %v1073_v30, %v1081_v32  ;;  %v5633_v35 = vcombine.high %v1073_v30, %v1081_v32  ;;  %v809_v37 = vld [vmem:[%s7974_s5 + $0x5c0] sm:$0xff] }
  0x45   :  { %v1057_v39 = vld [vmem:[%s7974_s5 + $0xd80] sm:$0xff]  ;;  %v5360_v42 = vcombine.low %v801_v36, %v809_v37 }
  0x46   :  { %v785_v46 = vld [vmem:[%s7974_s5 + $0x500] sm:$0xff] }
  0x47   :  { %3790 = vmatpush1.bf16.msra.mxu0 %v5232_v40  ;;  %3831 = vmatpush1.bf16.msra.mxu1 %v5488_v41  ;;  %v5361_v40 = vcombine.high %v801_v36, %v809_v37  ;;  %v1065_v41 = vld [vmem:[%s7974_s5 + $0xdc0] sm:$0xff] }
  0x48   :  { %3791 = vmatprep.subr.bf16.mxu0 %v5217_v47  ;;  %3832 = vmatprep.subr.bf16.mxu1 %v5473_v51  ;;  %v5616_v43 = vcombine.low %v1057_v39, %v1065_v41  ;;  %v5617_v44 = vcombine.high %v1057_v39, %v1065_v41  ;;  %v793_v47 = vld [vmem:[%s7974_s5 + $0x540] sm:$0xff] }
  0x49   :  { %v1041_v48 = vld [vmem:[%s7974_s5 + $0xd00] sm:$0xff]  ;;  %v5344_v51 = vcombine.low %v785_v46, %v793_v47 }
  0x4a   :  { %v769_v54 = vld [vmem:[%s7974_s5 + $0x480] sm:$0xff] }
  0x4b   :  { %3792 = vmatpush1.bf16.msra.mxu0 %v5216_v49  ;;  %3833 = vmatpush1.bf16.msra.mxu1 %v5472_v50  ;;  %v5345_v49 = vcombine.high %v785_v46, %v793_v47  ;;  %v1049_v50 = vld [vmem:[%s7974_s5 + $0xd40] sm:$0xff] }
  0x4c   :  { %3793 = vmatprep.subr.bf16.mxu0 %v5201_v55  ;;  %3834 = vmatprep.subr.bf16.mxu1 %v5457_v59  ;;  %v5600_v52 = vcombine.low %v1041_v48, %v1049_v50  ;;  %v5601_v53 = vcombine.high %v1041_v48, %v1049_v50  ;;  %v777_v55 = vld [vmem:[%s7974_s5 + $0x4c0] sm:$0xff] }
  0x4d   :  { %v1025_v56 = vld [vmem:[%s7974_s5 + $0xc80] sm:$0xff]  ;;  %v5328_v59 = vcombine.low %v769_v54, %v777_v55 }
  0x4e   :  { %v753_v62 = vld [vmem:[%s7974_s5 + $0x400] sm:$0xff] }
  0x4f   :  { %3794 = vmatpush1.bf16.msra.mxu0 %v5200_v57  ;;  %3835 = vmatpush1.bf16.msra.mxu1 %v5456_v58  ;;  %v5329_v57 = vcombine.high %v769_v54, %v777_v55  ;;  %v1033_v58 = vld [vmem:[%s7974_s5 + $0xcc0] sm:$0xff] }
  0x50   :  { %3795 = vmatprep.subr.bf16.mxu0 %v5185_v63  ;;  %3836 = vmatprep.subr.bf16.mxu1 %v5441_v3  ;;  %v5584_v60 = vcombine.low %v1025_v56, %v1033_v58  ;;  %v5585_v61 = vcombine.high %v1025_v56, %v1033_v58  ;;  %v761_v63 = vld [vmem:[%s7974_s5 + $0x440] sm:$0xff] }
  0x51   :  { %v1009_v0 = vld [vmem:[%s7974_s5 + $0xc00] sm:$0xff]  ;;  %v5312_v3 = vcombine.low %v753_v62, %v761_v63 }
  0x52   :  { %v84_v16 = vld [vmem:[%s7975_s2] sm:$0xf] }
  0x53   :  { %3796 = vmatpush1.bf16.msra.mxu0 %v5184_v1  ;;  %3837 = vmatpush1.bf16.msra.mxu1 %v5440_v2  ;;  %v5313_v1 = vcombine.high %v753_v62, %v761_v63  ;;  %v1017_v2 = vld [vmem:[%s7974_s5 + $0xc40] sm:$0xff] }
  0x54   :  { %3797 = vmatprep.subr.bf16.mxu0 %v5425_v7  ;;  %3838 = vmatprep.subr.bf16.mxu1 %v5681_v11  ;;  %v5568_v4 = vcombine.low %v1009_v0, %v1017_v2  ;;  %v5569_v5 = vcombine.high %v1009_v0, %v1017_v2  ;;  %v6235_v7 = vld [vmem:[%s7974_s5 + $0x3c8] sm:$0xff] }
  0x55   :  { %v5298_v11 = vcombine.low %v6230_v6, %v6235_v7 }
  0x57   :  { %3798 = vmatpush2.bf16.msra.mxu0 %v5424_v9  ;;  %3839 = vmatpush2.bf16.msra.mxu1 %v5680_v10  ;;  %v5299_v9 = vcombine.high %v6230_v6, %v6235_v7  ;;  %v6247_v10 = vld [vmem:[%s7974_s5 + $0xbc8] sm:$0xff] }
  0x58   :  { %3799 = vmatprep.subr.bf16.mxu0 %v5409_v15  ;;  %3840 = vmatprep.subr.bf16.mxu1 %v5665_v19  ;;  %v5554_v12 = vcombine.low %v6240_v8, %v6247_v10  ;;  %v5555_v13 = vcombine.high %v6240_v8, %v6247_v10  ;;  %v6259_v15 = vsub.s32 2, %v5977_v38  ;;  %v89_v19 = vrot.slane %v84_v16, %v6256_v14  ;;  %v698_v6 = vld [vmem:[%s7974_s5 + $0x248] sm:$0xff] }
  0x59   :  { %v946_v7 = vld [vmem:[%s7974_s5 + $0xa08] sm:$0xff] }
  0x5a   :  { %v97_v20 = vrot.slane %v84_v16, %v6259_v15  ;;  %v954_v8 = vld [vmem:[%s7974_s5 + $0xa48] sm:$0xff] }
  0x5b   :  { %3800 = vmatpush2.bf16.msra.mxu0 %v5408_v17  ;;  %3841 = vmatpush2.bf16.msra.mxu1 %v5664_v18  ;;  %v6265_v17 = vsub.s32 1, %v5977_v38  ;;  %v6268_v18 = vsub.s32 3, %v5977_v38 }
  0x5c   :  { %3801 = vmatprep.subr.bf16.mxu0 %v5393_v23  ;;  %3842 = vmatprep.subr.bf16.mxu1 %v5649_v27 }
  0x5d   :  { %v93_v21 = vrot.slane %v84_v16, %v6265_v17  ;;  %v101_v22 = vrot.slane %v84_v16, %v6268_v18 }
  0x5f   :  { %3802 = vmatpush2.bf16.msra.mxu0 %v5392_v25  ;;  %3843 = vmatpush2.bf16.msra.mxu1 %v5648_v26 }
  0x60   :  { %3803 = vmatprep.subr.bf16.mxu0 %v5377_v31  ;;  %3844 = vmatprep.subr.bf16.mxu1 %v5633_v35 }
  0x63   :  { %3804 = vmatpush2.bf16.msra.mxu0 %v5376_v33  ;;  %3845 = vmatpush2.bf16.msra.mxu1 %v5632_v34 }
  0x64   :  { %3805 = vmatprep.subr.bf16.mxu0 %v5361_v40  ;;  %3846 = vmatprep.subr.bf16.mxu1 %v5617_v44 }
  0x67   :  { %3806 = vmatpush2.bf16.msra.mxu0 %v5360_v42  ;;  %3847 = vmatpush2.bf16.msra.mxu1 %v5616_v43 }
  0x68   :  { %3807 = vmatprep.subr.bf16.mxu0 %v5345_v49  ;;  %3848 = vmatprep.subr.bf16.mxu1 %v5601_v53 }
  0x6b   :  { %3808 = vmatpush2.bf16.msra.mxu0 %v5344_v51  ;;  %3849 = vmatpush2.bf16.msra.mxu1 %v5600_v52 }
  0x6c   :  { %3809 = vmatprep.subr.bf16.mxu0 %v5329_v57  ;;  %3850 = vmatprep.subr.bf16.mxu1 %v5585_v61 }
  0x6f   :  { %3810 = vmatpush2.bf16.msra.mxu0 %v5328_v59  ;;  %3851 = vmatpush2.bf16.msra.mxu1 %v5584_v60 }
  0x70   :  { %3811 = vmatprep.subr.bf16.mxu0 %v5313_v1  ;;  %3852 = vmatprep.subr.bf16.mxu1 %v5569_v5 }
  0x73   :  { %3812 = vmatpush2.bf16.msra.mxu0 %v5312_v3  ;;  %3853 = vmatpush2.bf16.msra.mxu1 %v5568_v4 }
  0x74   :  { %3863 = vmatprep.subr.bf16.mxu0 %v5299_v9  ;;  %3904 = vmatprep.subr.bf16.mxu1 %v5555_v13 }
  0xf6   :  { %v431_v23 = vpop.f32.mrf.mxu0  ;;  %v472_v24 = vpop.f32.mrf.mxu1 }
  0xf7   :  { %v432_v25 = vadd.f32 %v431_v23, %v89_v19  ;;  %v473_v26 = vadd.f32 %v472_v24, %v97_v20 }
  0xf8   :  { %v433_v27 = vpop.f32.mrf.mxu0  ;;  %v474_v28 = vpop.f32.mrf.mxu1 }
  0xf9   :  { %v482_v29 = vsel %vm481_vm2, %v432_v25, 0.0  ;;  %v496_v30 = vsel %vm481_vm2, %v473_v26, 0.0  ;;  %v434_v31 = vadd.f32 %v433_v27, %v93_v21  ;;  %v475_v32 = vadd.f32 %v474_v28, %v101_v22 }
  0xfa   :  { %v483_v33 = vrot.slane %v482_v29, 4  ;;  %v497_v34 = vrot.slane %v496_v30, 4  ;;  %v435_v35 = vpop.f32.mrf.mxu0  ;;  %v476_v36 = vpop.f32.mrf.mxu1 }
  0xfb   :  { %v489_v37 = vsel %vm481_vm2, %v434_v31, 0.0  ;;  %v503_v39 = vsel %vm481_vm2, %v475_v32, 0.0 }
  0xfc   :  { %v484_v40 = vadd.f32 %v483_v33, %v482_v29  ;;  %v498_v41 = vadd.f32 %v497_v34, %v496_v30  ;;  %v490_v42 = vrot.slane %v489_v37, 4  ;;  %v504_v43 = vrot.slane %v503_v39, 4  ;;  %v436_v44 = vpop.f32.mrf.mxu0  ;;  %v477_v46 = vpop.f32.mrf.mxu1 }
  0xfe   :  { %v485_v47 = vrot.slane %v484_v40, 2  ;;  %v499_v48 = vrot.slane %v498_v41, 2  ;;  %v491_v49 = vadd.f32 %v490_v42, %v489_v37  ;;  %v505_v50 = vadd.f32 %v504_v43, %v503_v39 }
 0x100   :  { %v486_v51 = vadd.f32 %v485_v47, %v484_v40  ;;  %v500_v52 = vadd.f32 %v499_v48, %v498_v41  ;;  %v492_v53 = vrot.slane %v491_v49, 2  ;;  %v506_v54 = vrot.slane %v505_v50, 2 }
 0x102   :  { %v487_v55 = vrot.slane %v486_v51, 1  ;;  %v501_v56 = vrot.slane %v500_v52, 1  ;;  %v493_v57 = vadd.f32 %v492_v53, %v491_v49  ;;  %v507_v58 = vadd.f32 %v506_v54, %v505_v50 }
 0x104   :  { %v488_v59 = vadd.f32 %v487_v55, %v486_v51  ;;  %v502_v60 = vadd.f32 %v501_v56, %v500_v52  ;;  %v494_v61 = vrot.slane %v493_v57, 1  ;;  %v508_v62 = vrot.slane %v507_v58, 1 }
 0x106   :  { %v511_v63 = vmul.f32 0.5, %v488_v59  ;;  %v513_v0 = vmul.f32 0.5, %v502_v60  ;;  %v495_v1 = vadd.f32 %v494_v61, %v493_v57  ;;  %v509_v2 = vadd.f32 %v508_v62, %v507_v58  ;;  %v479_v61 = vld [vmem:[%s7976_s3] sm:$0xf] }
 0x107   :  { %v480_v62 = vld [vmem:[%s7977_s4] sm:$0xf] }
 0x108   :  { %v515_v3 = vsub.f32 %v432_v25, %v511_v63  ;;  %v517_v4 = vsub.f32 %v473_v26, %v513_v0  ;;  %v512_v5 = vmul.f32 0.5, %v495_v1  ;;  %v514_v9 = vmul.f32 0.5, %v509_v2 }
 0x109   :  { %v571_v63 = vrot.slane %v479_v61, %v6256_v14  ;;  %v579_v1 = vrot.slane %v479_v61, %v6259_v15 }
 0x10a   :  { %v519_v13 = vmul.f32 %v515_v3, %v515_v3  ;;  %v521_v16 = vmul.f32 %v517_v4, %v517_v4  ;;  %v516_v19 = vsub.f32 %v434_v31, %v512_v5  ;;  %v6278_v20 = vsub.f32 %v475_v32, %v514_v9 }
 0x10b   :  { %v596_v9 = vrot.slane %v480_v62, %v6256_v14 }
 0x10c   :  { %v523_v21 = vsel %vm481_vm2, %v519_v13, 0.0  ;;  %v537_v22 = vsel %vm481_vm2, %v521_v16, 0.0  ;;  %v520_v23 = vmul.f32 %v516_v19, %v516_v19  ;;  %v522_v24 = vmul.f32 %v6278_v20, %v6278_v20 }
 0x10d   :  { %v524_v27 = vrot.slane %v523_v21, 4  ;;  %v538_v28 = vrot.slane %v537_v22, 4  ;;  %v575_v13 = vrot.slane %v479_v61, %v6265_v17 }
 0x10e   :  { %v530_v25 = vsel %vm481_vm2, %v520_v23, 0.0  ;;  %v544_v26 = vsel %vm481_vm2, %v522_v24, 0.0  ;;  %v583_v23 = vrot.slane %v479_v61, %v6268_v18  ;;  %v930_v61 = vld [vmem:[%s7974_s5 + $0x988] sm:$0xff] }
 0x10f   :  { %v525_v29 = vadd.f32 %v524_v27, %v523_v21  ;;  %v539_v30 = vadd.f32 %v538_v28, %v537_v22  ;;  %v531_v33 = vrot.slane %v530_v25, 4  ;;  %v545_v31 = vrot.slane %v544_v26, 4 }
 0x110   :  { %v604_v22 = vrot.slane %v480_v62, %v6259_v15 }
 0x111   :  { %v526_v32 = vrot.slane %v525_v29, 2  ;;  %v540_v34 = vrot.slane %v539_v30, 2  ;;  %v532_v35 = vadd.f32 %v531_v33, %v530_v25  ;;  %v546_v36 = vadd.f32 %v545_v31, %v544_v26 }
 0x112   :  { %v600_v25 = vrot.slane %v480_v62, %v6265_v17 }
 0x113   :  { %v527_v37 = vadd.f32 %v526_v32, %v525_v29  ;;  %v541_v39 = vadd.f32 %v540_v34, %v539_v30  ;;  %v533_v40 = vrot.slane %v532_v35, 2  ;;  %v547_v41 = vrot.slane %v546_v36, 2 }
 0x115   :  { %v528_v42 = vrot.slane %v527_v37, 1  ;;  %v542_v43 = vrot.slane %v541_v39, 1  ;;  %v534_v44 = vadd.f32 %v533_v40, %v532_v35  ;;  %v548_v46 = vadd.f32 %v547_v41, %v546_v36  ;;  %v978_v41 = vld [vmem:[%s7974_s5 + $0xb08] sm:$0xff] }
 0x117   :  { %v529_v47 = vadd.f32 %v528_v42, %v527_v37  ;;  %v543_v48 = vadd.f32 %v542_v43, %v541_v39  ;;  %v535_v49 = vrot.slane %v534_v44, 1  ;;  %v549_v50 = vrot.slane %v548_v46, 1  ;;  %v986_v42 = vld [vmem:[%s7974_s5 + $0xb48] sm:$0xff] }
 0x119   :  { %v551_v51 = vmul.f32 0.5, %v529_v47  ;;  %v553_v52 = vmul.f32 0.5, %v543_v48  ;;  %v536_v53 = vadd.f32 %v535_v49, %v534_v44  ;;  %v550_v54 = vadd.f32 %v549_v50, %v548_v46  ;;  %v706_v48 = vld [vmem:[%s7974_s5 + $0x288] sm:$0xff] }
 0x11a   :  { %v714_v49 = vld [vmem:[%s7974_s5 + $0x2c8] sm:$0xff]  ;;  %v5539_v50 = vcombine.high %v978_v41, %v986_v42 }
 0x11b   :  { %v555_v55 = vadd.f32 1e-05, %v551_v51  ;;  %v557_v56 = vadd.f32 1e-05, %v553_v52  ;;  %v552_v57 = vmul.f32 0.5, %v536_v53  ;;  %v554_v58 = vmul.f32 0.5, %v550_v54 }
 0x11c   :  { %v962_v51 = vld [vmem:[%s7974_s5 + $0xa88] sm:$0xff]  ;;  %v5538_v54 = vcombine.low %v978_v41, %v986_v42  ;;  %v5266_v10 = vcombine.low %v706_v48, %v714_v49 }
 0x11d   :  { %5781 = vrsqrt.f32 %v555_v55  ;;  %v556_v59 = vadd.f32 1e-05, %v552_v57  ;;  %v558_v60 = vadd.f32 1e-05, %v554_v58  ;;  %v970_v52 = vld [vmem:[%s7974_s5 + $0xac8] sm:$0xff]  ;;  %v5267_v55 = vcombine.high %v706_v48, %v714_v49 }
 0x11e   :  { %5783 = vrsqrt.f32 %v557_v56  ;;  %v5523_v56 = vcombine.high %v962_v51, %v970_v52  ;;  %v690_v57 = vld [vmem:[%s7974_s5 + $0x208] sm:$0xff]  ;;  %v5507_v58 = vcombine.high %v946_v7, %v954_v8 }
 0x11f   :  { %5785 = vrsqrt.f32 %v556_v59  ;;  %v674_v59 = vld [vmem:[%s7974_s5 + $0x188] sm:$0xff] }
 0x120   :  { %5787 = vrsqrt.f32 %v558_v60  ;;  %v682_v60 = vld [vmem:[%s7974_s5 + $0x1c8] sm:$0xff] }
 0x121   :  { %v1122_v41 = vld [vmem:[%s7974_s5 + $0xf88] sm:$0xff] }
 0x122   :  { %v1130_v42 = vld [vmem:[%s7974_s5 + $0xfc8] sm:$0xff] }
 0x12a   :  { %v5782_v0 = vpop.eup %5781 }
 0x12b   :  { %v5784_v2 = vpop.eup %5783  ;;  %v563_v5 = vmul.f32 %v5782_v0, %v515_v3  ;;  %v608_v3 = vrot.slane %v480_v62, %v6268_v18  ;;  %v938_v62 = vld [vmem:[%s7974_s5 + $0x9c8] sm:$0xff]  ;;  %v5506_v0 = vcombine.low %v946_v7, %v954_v8 }
 0x12c   :  { %v5786_v16 = vpop.eup %5785  ;;  %v565_v21 = vmul.f32 %v5784_v2, %v517_v4  ;;  %v5491_v2 = vcombine.high %v930_v61, %v938_v62  ;;  %v834_v7 = vld [vmem:[%s7974_s5 + $0x688] sm:$0xff] }
 0x12d   :  { %v5788_v24 = vpop.eup %5787  ;;  %v588_v27 = vmul.f32 %v571_v63, %v563_v5  ;;  %v564_v28 = vmul.f32 %v5786_v16, %v516_v19  ;;  %v722_v19 = vld [vmem:[%s7974_s5 + $0x308] sm:$0xff]  ;;  %v5250_v63 = vcombine.low %v690_v57, %v698_v6 }
 0x12e   :  { %v590_v26 = vmul.f32 %v579_v1, %v565_v21  ;;  %v566_v29 = vmul.f32 %v5788_v24, %v6278_v20  ;;  %v730_v20 = vld [vmem:[%s7974_s5 + $0x348] sm:$0xff]  ;;  %v5235_v1 = vcombine.high %v674_v59, %v682_v60  ;;  %v5234_v21 = vcombine.low %v674_v59, %v682_v60 }
 0x12f   :  { %v613_v30 = vadd.f32 %v596_v9, %v588_v27  ;;  %v589_v33 = vmul.f32 %v575_v13, %v564_v28  ;;  %v5283_v47 = vcombine.high %v722_v19, %v730_v20  ;;  %v5282_v53 = vcombine.low %v722_v19, %v730_v20  ;;  %v658_v5 = vld [vmem:[%s7974_s5 + $0x108] sm:$0xff] }
 0x130   :  { %v615_v31 = vadd.f32 %v604_v22, %v590_v26  ;;  %v591_v32 = vmul.f32 %v583_v23, %v566_v29  ;;  %v666_v9 = vld [vmem:[%s7974_s5 + $0x148] sm:$0xff]  ;;  %v5490_v22 = vcombine.low %v930_v61, %v938_v62 }
 0x131   :  { %v614_v34 = vadd.f32 %v600_v25, %v589_v33  ;;  %v617_v4 = vmax.f32 %v613_v30, 0.0  ;;  %v914_v13 = vld [vmem:[%s7974_s5 + $0x908] sm:$0xff]  ;;  %v5219_v23 = vcombine.high %v658_v5, %v666_v9  ;;  %v5218_v29 = vcombine.low %v658_v5, %v666_v9 }
 0x132   :  { %v616_v35 = vadd.f32 %v608_v3, %v591_v32  ;;  %v619_v36 = vmax.f32 %v615_v31, 0.0  ;;  %v922_v16 = vld [vmem:[%s7974_s5 + $0x948] sm:$0xff] }
 0x133   :  { %v618_v37 = vmax.f32 %v614_v34, 0.0  ;;  %v6315_v43 = vpack.c.bf16 %v617_v4, %v617_v4  ;;  %v5475_v24 = vcombine.high %v914_v13, %v922_v16  ;;  %v642_v27 = vld [vmem:[%s7974_s5 + $0x88] sm:$0xff]  ;;  %v5474_v3 = vcombine.low %v914_v13, %v922_v16 }
 0x134   :  { %v620_v39 = vmax.f32 %v616_v35, 0.0  ;;  %v6319_v46 = vpack.c.bf16 %v619_v36, %v619_v36  ;;  %v650_v28 = vld [vmem:[%s7974_s5 + $0xc8] sm:$0xff] }
 0x135   :  { %v6307_v40 = vpack.c.bf16 %v618_v37, %v618_v37  ;;  %v898_v25 = vld [vmem:[%s7974_s5 + $0x888] sm:$0xff]  ;;  %v5203_v30 = vcombine.high %v642_v27, %v650_v28  ;;  %v5202_v35 = vcombine.low %v642_v27, %v650_v28 }
 0x136   :  { %v6317_v44 = vpack.c.bf16 %v620_v39, %v620_v39  ;;  %v906_v26 = vld [vmem:[%s7974_s5 + $0x8c8] sm:$0xff] }
 0x137   :  { %3813 = vmatprep.mubr.bf16.mxu0 %v6307_v40  ;;  %v5459_v33 = vcombine.high %v898_v25, %v906_v26  ;;  %v626_v31 = vld [vmem:[%s7974_s5 + $0x8] sm:$0xff]  ;;  %v5458_v36 = vcombine.low %v898_v25, %v906_v26 }
 0x138   :  { %3854 = vmatprep.mubr.bf16.mxu1 %v6317_v44  ;;  %3814 = vmatmul.mubr.bf16.vlgmr.msra.gmra.mxu0 %v6315_v43  ;;  %v634_v32 = vld [vmem:[%s7974_s5 + $0x48] sm:$0xff] }
 0x139   :  { %3855 = vmatmul.mubr.bf16.vlgmr.msra.gmra.mxu1 %v6319_v46  ;;  %3864 = vmatpush1.bf16.msra.mxu0 %v5298_v11  ;;  %v5522_v11 = vcombine.low %v962_v51, %v970_v52  ;;  %v882_v34 = vld [vmem:[%s7974_s5 + $0x808] sm:$0xff]  ;;  %v5187_v37 = vcombine.high %v626_v31, %v634_v32 }
 0x13a   :  { %3905 = vmatpush1.bf16.msra.mxu1 %v5554_v12  ;;  %3895 = vmatprep.mubr.bf16.mxu0 %v6307_v40  ;;  %v5251_v12 = vcombine.high %v690_v57, %v698_v6  ;;  %v890_v4 = vld [vmem:[%s7974_s5 + $0x848] sm:$0xff] }
 0x13b   :  { %3936 = vmatprep.mubr.bf16.mxu1 %v6317_v44  ;;  %3865 = vmatprep.subr.bf16.mxu0 %v5283_v47  ;;  %v5443_v39 = vcombine.high %v882_v34, %v890_v4  ;;  %v866_v19 = vld [vmem:[%s7974_s5 + $0x788] sm:$0xff]  ;;  %v5186_v47 = vcombine.low %v626_v31, %v634_v32  ;;  %v5442_v48 = vcombine.low %v882_v34, %v890_v4 }
 0x13c   :  { %3906 = vmatprep.subr.bf16.mxu1 %v5539_v50  ;;  %v874_v20 = vld [vmem:[%s7974_s5 + $0x7c8] sm:$0xff]  ;;  %v5683_v50 = vcombine.high %v1122_v41, %v1130_v42 }
 0x13d   :  { %3866 = vmatpush1.bf16.msra.mxu0 %v5282_v53  ;;  %v5427_v49 = vcombine.high %v866_v19, %v874_v20  ;;  %v850_v51 = vld [vmem:[%s7974_s5 + $0x708] sm:$0xff] }
 0x13e   :  { %3907 = vmatpush1.bf16.msra.mxu1 %v5538_v54  ;;  %3867 = vmatprep.subr.bf16.mxu0 %v5267_v55  ;;  %v858_v52 = vld [vmem:[%s7974_s5 + $0x748] sm:$0xff]  ;;  %v5426_v55 = vcombine.low %v866_v19, %v874_v20 }
 0x13f   :  { %3908 = vmatprep.subr.bf16.mxu1 %v5523_v56  ;;  %v1106_v53 = vld [vmem:[%s7974_s5 + $0xf08] sm:$0xff]  ;;  %v5682_v56 = vcombine.low %v1122_v41, %v1130_v42  ;;  %v5411_v57 = vcombine.high %v850_v51, %v858_v52 }
 0x140   :  { %v1114_v54 = vld [vmem:[%s7974_s5 + $0xf48] sm:$0xff] }
 0x141   :  { %3868 = vmatpush1.bf16.msra.mxu0 %v5266_v10  ;;  %v5667_v6 = vcombine.high %v1106_v53, %v1114_v54  ;;  %v842_v8 = vld [vmem:[%s7974_s5 + $0x6c8] sm:$0xff] }
 0x142   :  { %3909 = vmatpush1.bf16.msra.mxu1 %v5522_v11  ;;  %3869 = vmatprep.subr.bf16.mxu0 %v5251_v12  ;;  %v1090_v10 = vld [vmem:[%s7974_s5 + $0xe88] sm:$0xff]  ;;  %v5410_v12 = vcombine.low %v850_v51, %v858_v52  ;;  %v5395_v59 = vcombine.high %v834_v7, %v842_v8 }
 0x143   :  { %3910 = vmatprep.subr.bf16.mxu1 %v5507_v58  ;;  %v1098_v11 = vld [vmem:[%s7974_s5 + $0xec8] sm:$0xff]  ;;  %v5666_v58 = vcombine.low %v1106_v53, %v1114_v54  ;;  %v739_v53 = vld [vmem:[%s7974_s5 + $0x390] sm:$0xff] }
 0x144   :  { %v5651_v60 = vcombine.high %v1090_v10, %v1098_v11  ;;  %v818_v61 = vld [vmem:[%s7974_s5 + $0x608] sm:$0xff]  ;;  %v747_v54 = vld [vmem:[%s7974_s5 + $0x3d0] sm:$0xff] }
 0x145   :  { %3870 = vmatpush1.bf16.msra.mxu0 %v5250_v63  ;;  %v826_v62 = vld [vmem:[%s7974_s5 + $0x648] sm:$0xff] }
 0x146   :  { %3911 = vmatpush1.bf16.msra.mxu1 %v5506_v0  ;;  %3871 = vmatprep.subr.bf16.mxu0 %v5235_v1  ;;  %v1074_v63 = vld [vmem:[%s7974_s5 + $0xe08] sm:$0xff]  ;;  %v5394_v1 = vcombine.low %v834_v7, %v842_v8  ;;  %v5379_v5 = vcombine.high %v818_v61, %v826_v62  ;;  %v5301_v7 = vcombine.high %v739_v53, %v747_v54 }
 0x147   :  { %3912 = vmatprep.subr.bf16.mxu1 %v5491_v2  ;;  %v1082_v0 = vld [vmem:[%s7974_s5 + $0xe48] sm:$0xff]  ;;  %v5650_v2 = vcombine.low %v1090_v10, %v1098_v11  ;;  %v723_v10 = vld [vmem:[%s7974_s5 + $0x310] sm:$0xff] }
 0x148   :  { %v5635_v9 = vcombine.high %v1074_v63, %v1082_v0  ;;  %v802_v13 = vld [vmem:[%s7974_s5 + $0x588] sm:$0xff]  ;;  %v731_v11 = vld [vmem:[%s7974_s5 + $0x350] sm:$0xff] }
 0x149   :  { %3872 = vmatpush1.bf16.msra.mxu0 %v5234_v21  ;;  %v810_v16 = vld [vmem:[%s7974_s5 + $0x5c8] sm:$0xff] }
 0x14a   :  { %3913 = vmatpush1.bf16.msra.mxu1 %v5490_v22  ;;  %3873 = vmatprep.subr.bf16.mxu0 %v5219_v23  ;;  %v1058_v21 = vld [vmem:[%s7974_s5 + $0xd88] sm:$0xff]  ;;  %v5378_v23 = vcombine.low %v818_v61, %v826_v62  ;;  %v5363_v27 = vcombine.high %v802_v13, %v810_v16  ;;  %v5285_v61 = vcombine.high %v723_v10, %v731_v11  ;;  %v707_v62 = vld [vmem:[%s7974_s5 + $0x290] sm:$0xff] }
 0x14b   :  { %3914 = vmatprep.subr.bf16.mxu1 %v5475_v24  ;;  %v1066_v22 = vld [vmem:[%s7974_s5 + $0xdc8] sm:$0xff]  ;;  %v5634_v24 = vcombine.low %v1074_v63, %v1082_v0  ;;  %v715_v63 = vld [vmem:[%s7974_s5 + $0x2d0] sm:$0xff] }
 0x14c   :  { %v5619_v28 = vcombine.high %v1058_v21, %v1066_v22  ;;  %v786_v25 = vld [vmem:[%s7974_s5 + $0x508] sm:$0xff] }
 0x14d   :  { %3874 = vmatpush1.bf16.msra.mxu0 %v5218_v29  ;;  %v794_v26 = vld [vmem:[%s7974_s5 + $0x548] sm:$0xff] }
 0x14e   :  { %3915 = vmatpush1.bf16.msra.mxu1 %v5474_v3  ;;  %3875 = vmatprep.subr.bf16.mxu0 %v5203_v30  ;;  %v1042_v29 = vld [vmem:[%s7974_s5 + $0xd08] sm:$0xff]  ;;  %v5362_v30 = vcombine.low %v802_v13, %v810_v16  ;;  %v5347_v31 = vcombine.high %v786_v25, %v794_v26  ;;  %v5269_v13 = vcombine.high %v707_v62, %v715_v63 }
 0x14f   :  { %3916 = vmatprep.subr.bf16.mxu1 %v5459_v33  ;;  %v1050_v3 = vld [vmem:[%s7974_s5 + $0xd48] sm:$0xff]  ;;  %v5618_v33 = vcombine.low %v1058_v21, %v1066_v22  ;;  %v691_v21 = vld [vmem:[%s7974_s5 + $0x210] sm:$0xff] }
 0x150   :  { %v5603_v32 = vcombine.high %v1042_v29, %v1050_v3  ;;  %v770_v34 = vld [vmem:[%s7974_s5 + $0x488] sm:$0xff]  ;;  %v699_v22 = vld [vmem:[%s7974_s5 + $0x250] sm:$0xff] }
 0x151   :  { %3876 = vmatpush1.bf16.msra.mxu0 %v5202_v35  ;;  %v778_v4 = vld [vmem:[%s7974_s5 + $0x4c8] sm:$0xff] }
 0x152   :  { %3917 = vmatpush1.bf16.msra.mxu1 %v5458_v36  ;;  %3877 = vmatprep.subr.bf16.mxu0 %v5187_v37  ;;  %v1026_v35 = vld [vmem:[%s7974_s5 + $0xc88] sm:$0xff]  ;;  %v5346_v37 = vcombine.low %v786_v25, %v794_v26  ;;  %v5331_v19 = vcombine.high %v770_v34, %v778_v4  ;;  %v5253_v25 = vcombine.high %v691_v21, %v699_v22 }
 0x153   :  { %3918 = vmatprep.subr.bf16.mxu1 %v5443_v39  ;;  %v1034_v36 = vld [vmem:[%s7974_s5 + $0xcc8] sm:$0xff]  ;;  %v5602_v39 = vcombine.low %v1042_v29, %v1050_v3  ;;  %v675_v29 = vld [vmem:[%s7974_s5 + $0x190] sm:$0xff] }
 0x154   :  { %v5587_v20 = vcombine.high %v1026_v35, %v1034_v36  ;;  %v754_v41 = vld [vmem:[%s7974_s5 + $0x408] sm:$0xff]  ;;  %v683_v3 = vld [vmem:[%s7974_s5 + $0x1d0] sm:$0xff] }
 0x155   :  { %3878 = vmatpush1.bf16.msra.mxu0 %v5186_v47  ;;  %v762_v42 = vld [vmem:[%s7974_s5 + $0x448] sm:$0xff] }
 0x156   :  { %3919 = vmatpush1.bf16.msra.mxu1 %v5442_v48  ;;  %3879 = vmatprep.subr.bf16.mxu0 %v5427_v49  ;;  %v1010_v47 = vld [vmem:[%s7974_s5 + $0xc08] sm:$0xff]  ;;  %v5330_v49 = vcombine.low %v770_v34, %v778_v4  ;;  %v5315_v51 = vcombine.high %v754_v41, %v762_v42  ;;  %v5237_v34 = vcombine.high %v675_v29, %v683_v3 }
 0x157   :  { %3920 = vmatprep.subr.bf16.mxu1 %v5683_v50  ;;  %v1018_v48 = vld [vmem:[%s7974_s5 + $0xc48] sm:$0xff]  ;;  %v5586_v50 = vcombine.low %v1026_v35, %v1034_v36  ;;  %v659_v35 = vld [vmem:[%s7974_s5 + $0x110] sm:$0xff] }
 0x158   :  { %v5571_v52 = vcombine.high %v1010_v47, %v1018_v48  ;;  %v667_v36 = vld [vmem:[%s7974_s5 + $0x150] sm:$0xff] }
 0x159   :  { %3880 = vmatpush2.bf16.msra.mxu0 %v5426_v55  ;;  %v995_v55 = vld [vmem:[%s7974_s5 + $0xb90] sm:$0xff] }
 0x15a   :  { %3921 = vmatpush2.bf16.msra.mxu1 %v5682_v56  ;;  %3881 = vmatprep.subr.bf16.mxu0 %v5411_v57  ;;  %v1003_v56 = vld [vmem:[%s7974_s5 + $0xbd0] sm:$0xff]  ;;  %v5314_v57 = vcombine.low %v754_v41, %v762_v42  ;;  %v5221_v41 = vcombine.high %v659_v35, %v667_v36 }
 0x15b   :  { %3922 = vmatprep.subr.bf16.mxu1 %v5667_v6  ;;  %v5570_v6 = vcombine.low %v1010_v47, %v1018_v48  ;;  %v5557_v8 = vcombine.high %v995_v55, %v1003_v56  ;;  %v643_v47 = vld [vmem:[%s7974_s5 + $0x90] sm:$0xff] }
 0x15c   :  { %v651_v48 = vld [vmem:[%s7974_s5 + $0xd0] sm:$0xff] }
 0x15d   :  { %3882 = vmatpush2.bf16.msra.mxu0 %v5410_v12  ;;  %v5300_v12 = vcombine.low %v739_v53, %v747_v54  ;;  %v5205_v53 = vcombine.high %v643_v47, %v651_v48 }
 0x15e   :  { %3923 = vmatpush2.bf16.msra.mxu1 %v5666_v58  ;;  %3883 = vmatprep.subr.bf16.mxu0 %v5395_v59  ;;  %v979_v58 = vld [vmem:[%s7974_s5 + $0xb10] sm:$0xff] }
 0x15f   :  { %3924 = vmatprep.subr.bf16.mxu1 %v5651_v60  ;;  %v987_v59 = vld [vmem:[%s7974_s5 + $0xb50] sm:$0xff]  ;;  %v5556_v60 = vcombine.low %v995_v55, %v1003_v56 }
 0x160   :  { %v5541_v0 = vcombine.high %v979_v58, %v987_v59  ;;  %v627_v55 = vld [vmem:[%s7974_s5 + $0x10] sm:$0xff] }
 0x161   :  { %3884 = vmatpush2.bf16.msra.mxu0 %v5394_v1  ;;  %v963_v1 = vld [vmem:[%s7974_s5 + $0xa90] sm:$0xff] }
 0x162   :  { %3925 = vmatpush2.bf16.msra.mxu1 %v5650_v2  ;;  %3885 = vmatprep.subr.bf16.mxu0 %v5379_v5  ;;  %v971_v2 = vld [vmem:[%s7974_s5 + $0xad0] sm:$0xff]  ;;  %v5284_v5 = vcombine.low %v723_v10, %v731_v11 }
 0x163   :  { %3926 = vmatprep.subr.bf16.mxu1 %v5635_v9  ;;  %v5540_v9 = vcombine.low %v979_v58, %v987_v59  ;;  %v5525_v16 = vcombine.high %v963_v1, %v971_v2  ;;  %v635_v56 = vld [vmem:[%s7974_s5 + $0x50] sm:$0xff] }
 0x164   :  { %v5189_v10 = vcombine.high %v627_v55, %v635_v56  ;;  %v875_v58 = vld [vmem:[%s7974_s5 + $0x7d0] sm:$0xff] }
 0x165   :  { %3886 = vmatpush2.bf16.msra.mxu0 %v5378_v23  ;;  %v947_v23 = vld [vmem:[%s7974_s5 + $0xa10] sm:$0xff] }
 0x166   :  { %3927 = vmatpush2.bf16.msra.mxu1 %v5634_v24  ;;  %3887 = vmatprep.subr.bf16.mxu0 %v5363_v27  ;;  %v955_v24 = vld [vmem:[%s7974_s5 + $0xa50] sm:$0xff]  ;;  %v5268_v27 = vcombine.low %v707_v62, %v715_v63 }
 0x167   :  { %3928 = vmatprep.subr.bf16.mxu1 %v5619_v28  ;;  %v5524_v28 = vcombine.low %v963_v1, %v971_v2  ;;  %v5509_v26 = vcombine.high %v947_v23, %v955_v24  ;;  %v1123_v59 = vld [vmem:[%s7974_s5 + $0xf90] sm:$0xff] }
 0x168   :  { %v851_v1 = vld [vmem:[%s7974_s5 + $0x710] sm:$0xff] }
 0x169   :  { %3888 = vmatpush2.bf16.msra.mxu0 %v5362_v30  ;;  %v931_v30 = vld [vmem:[%s7974_s5 + $0x990] sm:$0xff] }
 0x16a   :  { %3929 = vmatpush2.bf16.msra.mxu1 %v5618_v33  ;;  %3889 = vmatprep.subr.bf16.mxu0 %v5347_v31  ;;  %v939_v33 = vld [vmem:[%s7974_s5 + $0x9d0] sm:$0xff]  ;;  %v5252_v31 = vcombine.low %v691_v21, %v699_v22 }
 0x16b   :  { %3930 = vmatprep.subr.bf16.mxu1 %v5603_v32  ;;  %v5508_v32 = vcombine.low %v947_v23, %v955_v24  ;;  %v5493_v4 = vcombine.high %v931_v30, %v939_v33  ;;  %v859_v2 = vld [vmem:[%s7974_s5 + $0x750] sm:$0xff] }
 0x16c   :  { %v5413_v21 = vcombine.high %v851_v1, %v859_v2  ;;  %v835_v23 = vld [vmem:[%s7974_s5 + $0x690] sm:$0xff] }
 0x16d   :  { %3890 = vmatpush2.bf16.msra.mxu0 %v5346_v37  ;;  %v915_v37 = vld [vmem:[%s7974_s5 + $0x910] sm:$0xff] }
 0x16e   :  { %3931 = vmatpush2.bf16.msra.mxu1 %v5602_v39  ;;  %3891 = vmatprep.subr.bf16.mxu0 %v5331_v19  ;;  %v923_v39 = vld [vmem:[%s7974_s5 + $0x950] sm:$0xff]  ;;  %v5236_v19 = vcombine.low %v675_v29, %v683_v3 }
 0x16f   :  { %3932 = vmatprep.subr.bf16.mxu1 %v5587_v20  ;;  %v5492_v20 = vcombine.low %v931_v30, %v939_v33  ;;  %v5477_v42 = vcombine.high %v915_v37, %v923_v39  ;;  %v843_v24 = vld [vmem:[%s7974_s5 + $0x6d0] sm:$0xff] }
 0x170   :  { %v5397_v29 = vcombine.high %v835_v23, %v843_v24  ;;  %v819_v30 = vld [vmem:[%s7974_s5 + $0x610] sm:$0xff] }
 0x171   :  { %3892 = vmatpush2.bf16.msra.mxu0 %v5330_v49  ;;  %v899_v49 = vld [vmem:[%s7974_s5 + $0x890] sm:$0xff] }
 0x172   :  { %3933 = vmatpush2.bf16.msra.mxu1 %v5586_v50  ;;  %3893 = vmatprep.subr.bf16.mxu0 %v5315_v51  ;;  %v907_v50 = vld [vmem:[%s7974_s5 + $0x8d0] sm:$0xff]  ;;  %v5220_v51 = vcombine.low %v659_v35, %v667_v36 }
 0x173   :  { %3934 = vmatprep.subr.bf16.mxu1 %v5571_v52  ;;  %v5476_v52 = vcombine.low %v915_v37, %v923_v39  ;;  %v5461_v54 = vcombine.high %v899_v49, %v907_v50  ;;  %v827_v33 = vld [vmem:[%s7974_s5 + $0x650] sm:$0xff] }
 0x174   :  { %v5381_v35 = vcombine.high %v819_v30, %v827_v33  ;;  %v803_v37 = vld [vmem:[%s7974_s5 + $0x590] sm:$0xff] }
 0x175   :  { %3894 = vmatpush2.bf16.msra.mxu0 %v5314_v57  ;;  %v883_v57 = vld [vmem:[%s7974_s5 + $0x810] sm:$0xff] }
 0x176   :  { %3935 = vmatpush2.bf16.msra.mxu1 %v5570_v6  ;;  %3945 = vmatprep.subr.bf16.mxu0 %v5301_v7  ;;  %v891_v6 = vld [vmem:[%s7974_s5 + $0x850] sm:$0xff]  ;;  %v5204_v7 = vcombine.low %v643_v47, %v651_v48 }
 0x177   :  { %3986 = vmatprep.subr.bf16.mxu1 %v5557_v8  ;;  %v5460_v8 = vcombine.low %v899_v49, %v907_v50  ;;  %v5445_v11 = vcombine.high %v883_v57, %v891_v6  ;;  %v5444_v62 = vcombine.low %v883_v57, %v891_v6  ;;  %v811_v39 = vld [vmem:[%s7974_s5 + $0x5d0] sm:$0xff] }
 0x178   :  { %3896 = vmatmul.mubr.bf16.vlgmr.msra.gmra.mxu0 %v6315_v43  ;;  %v5365_v47 = vcombine.high %v803_v37, %v811_v39  ;;  %v787_v49 = vld [vmem:[%s7974_s5 + $0x510] sm:$0xff] }
 0x179   :  { %3937 = vmatmul.mubr.bf16.vlgmr.msra.gmra.mxu1 %v6319_v46  ;;  %3946 = vmatpush1.bf16.msra.mxu0 %v5300_v12  ;;  %v867_v12 = vld [vmem:[%s7974_s5 + $0x790] sm:$0xff] }
 0x17a   :  { %3977 = vmatprep.mubr.bf16.mxu0 %v6307_v40  ;;  %3987 = vmatpush1.bf16.msra.mxu1 %v5556_v60  ;;  %v1131_v60 = vld [vmem:[%s7974_s5 + $0xfd0] sm:$0xff]  ;;  %v5429_v63 = vcombine.high %v867_v12, %v875_v58 }
 0x17b   :  { %4018 = vmatprep.mubr.bf16.mxu1 %v6317_v44  ;;  %3947 = vmatprep.subr.bf16.mxu0 %v5285_v61  ;;  %v5188_v61 = vcombine.low %v627_v55, %v635_v56  ;;  %v795_v50 = vld [vmem:[%s7974_s5 + $0x550] sm:$0xff] }
 0x17c   :  { %3988 = vmatprep.subr.bf16.mxu1 %v5541_v0  ;;  %v5685_v0 = vcombine.high %v1123_v59, %v1131_v60  ;;  %v5349_v55 = vcombine.high %v787_v49, %v795_v50  ;;  %v771_v57 = vld [vmem:[%s7974_s5 + $0x490] sm:$0xff] }
 0x17d   :  { %3948 = vmatpush1.bf16.msra.mxu0 %v5284_v5  ;;  %v1107_v5 = vld [vmem:[%s7974_s5 + $0xf10] sm:$0xff] }
 0x17e   :  { %3989 = vmatpush1.bf16.msra.mxu1 %v5540_v9  ;;  %3949 = vmatprep.subr.bf16.mxu0 %v5269_v13  ;;  %v1115_v9 = vld [vmem:[%s7974_s5 + $0xf50] sm:$0xff]  ;;  %v5428_v13 = vcombine.low %v867_v12, %v875_v58 }
 0x17f   :  { %3990 = vmatprep.subr.bf16.mxu1 %v5525_v16  ;;  %v5684_v16 = vcombine.low %v1123_v59, %v1131_v60  ;;  %v5669_v22 = vcombine.high %v1107_v5, %v1115_v9  ;;  %v779_v6 = vld [vmem:[%s7974_s5 + $0x4d0] sm:$0xff] }
 0x180   :  { %v5333_v12 = vcombine.high %v771_v57, %v779_v6  ;;  %v755_v59 = vld [vmem:[%s7974_s5 + $0x410] sm:$0xff] }
 0x181   :  { %3950 = vmatpush1.bf16.msra.mxu0 %v5268_v27  ;;  %v1091_v27 = vld [vmem:[%s7974_s5 + $0xe90] sm:$0xff] }
 0x182   :  { %3991 = vmatpush1.bf16.msra.mxu1 %v5524_v28  ;;  %3951 = vmatprep.subr.bf16.mxu0 %v5253_v25  ;;  %v1099_v28 = vld [vmem:[%s7974_s5 + $0xed0] sm:$0xff]  ;;  %v5412_v25 = vcombine.low %v851_v1, %v859_v2 }
 0x183   :  { %3992 = vmatprep.subr.bf16.mxu1 %v5509_v26  ;;  %v5668_v26 = vcombine.low %v1107_v5, %v1115_v9  ;;  %v5653_v3 = vcombine.high %v1091_v27, %v1099_v28  ;;  %v763_v60 = vld [vmem:[%s7974_s5 + $0x450] sm:$0xff]  ;;  %v740_v5 = vld [vmem:[%s7974_s5 + $0x398] sm:$0xff] }
 0x184   :  { %v5317_v1 = vcombine.high %v755_v59, %v763_v60  ;;  %v748_v9 = vld [vmem:[%s7974_s5 + $0x3d8] sm:$0xff] }
 0x185   :  { %3952 = vmatpush1.bf16.msra.mxu0 %v5252_v31  ;;  %v1075_v31 = vld [vmem:[%s7974_s5 + $0xe10] sm:$0xff] }
 0x186   :  { %3993 = vmatpush1.bf16.msra.mxu1 %v5508_v32  ;;  %3953 = vmatprep.subr.bf16.mxu0 %v5237_v34  ;;  %v1083_v32 = vld [vmem:[%s7974_s5 + $0xe50] sm:$0xff]  ;;  %v5396_v34 = vcombine.low %v835_v23, %v843_v24  ;;  %v5303_v23 = vcombine.high %v740_v5, %v748_v9 }
 0x187   :  { %3994 = vmatprep.subr.bf16.mxu1 %v5493_v4  ;;  %v5652_v4 = vcombine.low %v1091_v27, %v1099_v28  ;;  %v5637_v36 = vcombine.high %v1075_v31, %v1083_v32  ;;  %v724_v27 = vld [vmem:[%s7974_s5 + $0x318] sm:$0xff] }
 0x188   :  { %v732_v28 = vld [vmem:[%s7974_s5 + $0x358] sm:$0xff] }
 0x189   :  { %3954 = vmatpush1.bf16.msra.mxu0 %v5236_v19  ;;  %v1059_v19 = vld [vmem:[%s7974_s5 + $0xd90] sm:$0xff] }
 0x18a   :  { %3995 = vmatpush1.bf16.msra.mxu1 %v5492_v20  ;;  %3955 = vmatprep.subr.bf16.mxu0 %v5221_v41  ;;  %v1067_v20 = vld [vmem:[%s7974_s5 + $0xdd0] sm:$0xff]  ;;  %v5380_v41 = vcombine.low %v819_v30, %v827_v33  ;;  %v5287_v30 = vcombine.high %v724_v27, %v732_v28  ;;  %v708_v33 = vld [vmem:[%s7974_s5 + $0x298] sm:$0xff] }
 0x18b   :  { %3996 = vmatprep.subr.bf16.mxu1 %v5477_v42  ;;  %v5636_v42 = vcombine.low %v1075_v31, %v1083_v32  ;;  %v5621_v48 = vcombine.high %v1059_v19, %v1067_v20  ;;  %v716_v31 = vld [vmem:[%s7974_s5 + $0x2d8] sm:$0xff] }
 0x18d   :  { %3956 = vmatpush1.bf16.msra.mxu0 %v5220_v51  ;;  %v1043_v51 = vld [vmem:[%s7974_s5 + $0xd10] sm:$0xff] }
 0x18e   :  { %3997 = vmatpush1.bf16.msra.mxu1 %v5476_v52  ;;  %3957 = vmatprep.subr.bf16.mxu0 %v5205_v53  ;;  %v1051_v52 = vld [vmem:[%s7974_s5 + $0xd50] sm:$0xff]  ;;  %v5364_v53 = vcombine.low %v803_v37, %v811_v39  ;;  %v5271_v37 = vcombine.high %v708_v33, %v716_v31 }
 0x18f   :  { %3998 = vmatprep.subr.bf16.mxu1 %v5461_v54  ;;  %v5620_v54 = vcombine.low %v1059_v19, %v1067_v20  ;;  %v5605_v56 = vcombine.high %v1043_v51, %v1051_v52  ;;  %v692_v19 = vld [vmem:[%s7974_s5 + $0x218] sm:$0xff] }
 0x190   :  { %v700_v20 = vld [vmem:[%s7974_s5 + $0x258] sm:$0xff] }
 0x191   :  { %3958 = vmatpush1.bf16.msra.mxu0 %v5204_v7  ;;  %v1027_v7 = vld [vmem:[%s7974_s5 + $0xc90] sm:$0xff] }
 0x192   :  { %3999 = vmatpush1.bf16.msra.mxu1 %v5460_v8  ;;  %3959 = vmatprep.subr.bf16.mxu0 %v5189_v10  ;;  %v1035_v8 = vld [vmem:[%s7974_s5 + $0xcd0] sm:$0xff]  ;;  %v5348_v10 = vcombine.low %v787_v49, %v795_v50  ;;  %v5255_v49 = vcombine.high %v692_v19, %v700_v20 }
 0x193   :  { %4000 = vmatprep.subr.bf16.mxu1 %v5445_v11  ;;  %v5604_v11 = vcombine.low %v1043_v51, %v1051_v52  ;;  %v5589_v58 = vcombine.high %v1027_v7, %v1035_v8  ;;  %v676_v51 = vld [vmem:[%s7974_s5 + $0x198] sm:$0xff] }
 0x194   :  { %v684_v52 = vld [vmem:[%s7974_s5 + $0x1d8] sm:$0xff] }
 0x195   :  { %3960 = vmatpush1.bf16.msra.mxu0 %v5188_v61  ;;  %v1011_v61 = vld [vmem:[%s7974_s5 + $0xc10] sm:$0xff] }
 0x196   :  { %4001 = vmatpush1.bf16.msra.mxu1 %v5444_v62  ;;  %3961 = vmatprep.subr.bf16.mxu0 %v5429_v63  ;;  %v1019_v62 = vld [vmem:[%s7974_s5 + $0xc50] sm:$0xff]  ;;  %v5332_v63 = vcombine.low %v771_v57, %v779_v6  ;;  %v5239_v57 = vcombine.high %v676_v51, %v684_v52 }
 0x197   :  { %4002 = vmatprep.subr.bf16.mxu1 %v5685_v0  ;;  %v5588_v0 = vcombine.low %v1027_v7, %v1035_v8  ;;  %v5573_v2 = vcombine.high %v1011_v61, %v1019_v62  ;;  %v660_v7 = vld [vmem:[%s7974_s5 + $0x118] sm:$0xff] }
 0x198   :  { %v668_v8 = vld [vmem:[%s7974_s5 + $0x158] sm:$0xff] }
 0x199   :  { %3962 = vmatpush2.bf16.msra.mxu0 %v5428_v13  ;;  %v996_v13 = vld [vmem:[%s7974_s5 + $0xb98] sm:$0xff] }
 0x19a   :  { %4003 = vmatpush2.bf16.msra.mxu1 %v5684_v16  ;;  %3963 = vmatprep.subr.bf16.mxu0 %v5413_v21  ;;  %v1004_v16 = vld [vmem:[%s7974_s5 + $0xbd8] sm:$0xff]  ;;  %v5316_v21 = vcombine.low %v755_v59, %v763_v60  ;;  %v5223_v59 = vcombine.high %v660_v7, %v668_v8 }
 0x19b   :  { %4004 = vmatprep.subr.bf16.mxu1 %v5669_v22  ;;  %v5572_v22 = vcombine.low %v1011_v61, %v1019_v62  ;;  %v5559_v24 = vcombine.high %v996_v13, %v1004_v16  ;;  %v644_v61 = vld [vmem:[%s7974_s5 + $0x98] sm:$0xff] }
 0x19c   :  { %v652_v62 = vld [vmem:[%s7974_s5 + $0xd8] sm:$0xff] }
 0x19d   :  { %3964 = vmatpush2.bf16.msra.mxu0 %v5412_v25  ;;  %v5302_v25 = vcombine.low %v740_v5, %v748_v9  ;;  %v5207_v5 = vcombine.high %v644_v61, %v652_v62 }
 0x19e   :  { %4005 = vmatpush2.bf16.msra.mxu1 %v5668_v26  ;;  %3965 = vmatprep.subr.bf16.mxu0 %v5397_v29  ;;  %v980_v26 = vld [vmem:[%s7974_s5 + $0xb18] sm:$0xff] }
 0x19f   :  { %4006 = vmatprep.subr.bf16.mxu1 %v5653_v3  ;;  %v988_v29 = vld [vmem:[%s7974_s5 + $0xb58] sm:$0xff]  ;;  %v5558_v3 = vcombine.low %v996_v13, %v1004_v16 }
 0x1a0   :  { %v5543_v32 = vcombine.high %v980_v26, %v988_v29  ;;  %v628_v13 = vld [vmem:[%s7974_s5 + $0x18] sm:$0xff] }
 0x1a1   :  { %3966 = vmatpush2.bf16.msra.mxu0 %v5396_v34  ;;  %v964_v34 = vld [vmem:[%s7974_s5 + $0xa98] sm:$0xff] }
 0x1a2   :  { %4007 = vmatpush2.bf16.msra.mxu1 %v5652_v4  ;;  %3967 = vmatprep.subr.bf16.mxu0 %v5381_v35  ;;  %v972_v4 = vld [vmem:[%s7974_s5 + $0xad8] sm:$0xff]  ;;  %v5286_v35 = vcombine.low %v724_v27, %v732_v28 }
 0x1a3   :  { %4008 = vmatprep.subr.bf16.mxu1 %v5637_v36  ;;  %v5542_v36 = vcombine.low %v980_v26, %v988_v29  ;;  %v5527_v39 = vcombine.high %v964_v34, %v972_v4  ;;  %v636_v16 = vld [vmem:[%s7974_s5 + $0x58] sm:$0xff] }
 0x1a4   :  { %v5191_v27 = vcombine.high %v628_v13, %v636_v16  ;;  %v876_v26 = vld [vmem:[%s7974_s5 + $0x7d8] sm:$0xff] }
 0x1a5   :  { %3968 = vmatpush2.bf16.msra.mxu0 %v5380_v41  ;;  %v948_v41 = vld [vmem:[%s7974_s5 + $0xa18] sm:$0xff] }
 0x1a6   :  { %4009 = vmatpush2.bf16.msra.mxu1 %v5636_v42  ;;  %3969 = vmatprep.subr.bf16.mxu0 %v5365_v47  ;;  %v956_v42 = vld [vmem:[%s7974_s5 + $0xa58] sm:$0xff]  ;;  %v5270_v47 = vcombine.low %v708_v33, %v716_v31 }
 0x1a7   :  { %4010 = vmatprep.subr.bf16.mxu1 %v5621_v48  ;;  %v5526_v48 = vcombine.low %v964_v34, %v972_v4  ;;  %v5511_v50 = vcombine.high %v948_v41, %v956_v42  ;;  %v1124_v29 = vld [vmem:[%s7974_s5 + $0xf98] sm:$0xff] }
 0x1a8   :  { %v852_v34 = vld [vmem:[%s7974_s5 + $0x718] sm:$0xff] }
 0x1a9   :  { %3970 = vmatpush2.bf16.msra.mxu0 %v5364_v53  ;;  %v932_v53 = vld [vmem:[%s7974_s5 + $0x998] sm:$0xff] }
 0x1aa   :  { %4011 = vmatpush2.bf16.msra.mxu1 %v5620_v54  ;;  %3971 = vmatprep.subr.bf16.mxu0 %v5349_v55  ;;  %v940_v54 = vld [vmem:[%s7974_s5 + $0x9d8] sm:$0xff]  ;;  %v5254_v55 = vcombine.low %v692_v19, %v700_v20 }
 0x1ab   :  { %4012 = vmatprep.subr.bf16.mxu1 %v5605_v56  ;;  %v5510_v56 = vcombine.low %v948_v41, %v956_v42  ;;  %v5495_v6 = vcombine.high %v932_v53, %v940_v54  ;;  %v860_v4 = vld [vmem:[%s7974_s5 + $0x758] sm:$0xff] }
 0x1ac   :  { %v5415_v19 = vcombine.high %v852_v34, %v860_v4  ;;  %v836_v41 = vld [vmem:[%s7974_s5 + $0x698] sm:$0xff] }
 0x1ad   :  { %3972 = vmatpush2.bf16.msra.mxu0 %v5348_v10  ;;  %v916_v10 = vld [vmem:[%s7974_s5 + $0x918] sm:$0xff] }
 0x1ae   :  { %4013 = vmatpush2.bf16.msra.mxu1 %v5604_v11  ;;  %3973 = vmatprep.subr.bf16.mxu0 %v5333_v12  ;;  %v924_v11 = vld [vmem:[%s7974_s5 + $0x958] sm:$0xff]  ;;  %v5238_v12 = vcombine.low %v676_v51, %v684_v52 }
 0x1af   :  { %4014 = vmatprep.subr.bf16.mxu1 %v5589_v58  ;;  %v5494_v58 = vcombine.low %v932_v53, %v940_v54  ;;  %v5479_v60 = vcombine.high %v916_v10, %v924_v11  ;;  %v844_v42 = vld [vmem:[%s7974_s5 + $0x6d8] sm:$0xff] }
 0x1b0   :  { %v5399_v51 = vcombine.high %v836_v41, %v844_v42  ;;  %v820_v53 = vld [vmem:[%s7974_s5 + $0x618] sm:$0xff] }
 0x1b1   :  { %3974 = vmatpush2.bf16.msra.mxu0 %v5332_v63  ;;  %v900_v63 = vld [vmem:[%s7974_s5 + $0x898] sm:$0xff] }
 0x1b2   :  { %4015 = vmatpush2.bf16.msra.mxu1 %v5588_v0  ;;  %3975 = vmatprep.subr.bf16.mxu0 %v5317_v1  ;;  %v908_v0 = vld [vmem:[%s7974_s5 + $0x8d8] sm:$0xff]  ;;  %v5222_v1 = vcombine.low %v660_v7, %v668_v8 }
 0x1b3   :  { %4016 = vmatprep.subr.bf16.mxu1 %v5573_v2  ;;  %v5478_v2 = vcombine.low %v916_v10, %v924_v11  ;;  %v5463_v9 = vcombine.high %v900_v63, %v908_v0  ;;  %v828_v54 = vld [vmem:[%s7974_s5 + $0x658] sm:$0xff] }
 0x1b4   :  { %v5383_v7 = vcombine.high %v820_v53, %v828_v54  ;;  %v804_v10 = vld [vmem:[%s7974_s5 + $0x598] sm:$0xff] }
 0x1b5   :  { %3976 = vmatpush2.bf16.msra.mxu0 %v5316_v21  ;;  %v884_v21 = vld [vmem:[%s7974_s5 + $0x818] sm:$0xff] }
 0x1b6   :  { %4017 = vmatpush2.bf16.msra.mxu1 %v5572_v22  ;;  %4027 = vmatprep.subr.bf16.mxu0 %v5303_v23  ;;  %v892_v22 = vld [vmem:[%s7974_s5 + $0x858] sm:$0xff]  ;;  %v5206_v23 = vcombine.low %v644_v61, %v652_v62 }
 0x1b7   :  { %4068 = vmatprep.subr.bf16.mxu1 %v5559_v24  ;;  %v5462_v24 = vcombine.low %v900_v63, %v908_v0  ;;  %v5447_v28 = vcombine.high %v884_v21, %v892_v22  ;;  %v5446_v33 = vcombine.low %v884_v21, %v892_v22  ;;  %v812_v11 = vld [vmem:[%s7974_s5 + $0x5d8] sm:$0xff] }
 0x1b8   :  { %3978 = vmatmul.mubr.bf16.vlgmr.msra.gmra.mxu0 %v6315_v43  ;;  %v5367_v61 = vcombine.high %v804_v10, %v812_v11  ;;  %v788_v63 = vld [vmem:[%s7974_s5 + $0x518] sm:$0xff] }
 0x1b9   :  { %4019 = vmatmul.mubr.bf16.vlgmr.msra.gmra.mxu1 %v6319_v46  ;;  %4028 = vmatpush1.bf16.msra.mxu0 %v5302_v25  ;;  %v868_v25 = vld [vmem:[%s7974_s5 + $0x798] sm:$0xff] }
 0x1ba   :  { %4059 = vmatprep.mubr.bf16.mxu0 %v6307_v40  ;;  %4069 = vmatpush1.bf16.msra.mxu1 %v5558_v3  ;;  %v1132_v3 = vld [vmem:[%s7974_s5 + $0xfd8] sm:$0xff]  ;;  %v5431_v31 = vcombine.high %v868_v25, %v876_v26 }
 0x1bb   :  { %4100 = vmatprep.mubr.bf16.mxu1 %v6317_v44  ;;  %4029 = vmatprep.subr.bf16.mxu0 %v5287_v30  ;;  %v5190_v30 = vcombine.low %v628_v13, %v636_v16  ;;  %v796_v0 = vld [vmem:[%s7974_s5 + $0x558] sm:$0xff] }
 0x1bc   :  { %4070 = vmatprep.subr.bf16.mxu1 %v5543_v32  ;;  %v5687_v32 = vcombine.high %v1124_v29, %v1132_v3  ;;  %v5351_v13 = vcombine.high %v788_v63, %v796_v0  ;;  %v772_v21 = vld [vmem:[%s7974_s5 + $0x498] sm:$0xff] }
 0x1bd   :  { %4030 = vmatpush1.bf16.msra.mxu0 %v5286_v35  ;;  %v1108_v35 = vld [vmem:[%s7974_s5 + $0xf18] sm:$0xff] }
 0x1be   :  { %4071 = vmatpush1.bf16.msra.mxu1 %v5542_v36  ;;  %4031 = vmatprep.subr.bf16.mxu0 %v5271_v37  ;;  %v1116_v36 = vld [vmem:[%s7974_s5 + $0xf58] sm:$0xff]  ;;  %v5430_v37 = vcombine.low %v868_v25, %v876_v26 }
 0x1bf   :  { %4072 = vmatprep.subr.bf16.mxu1 %v5527_v39  ;;  %v5686_v39 = vcombine.low %v1124_v29, %v1132_v3  ;;  %v5671_v20 = vcombine.high %v1108_v35, %v1116_v36  ;;  %v780_v22 = vld [vmem:[%s7974_s5 + $0x4d8] sm:$0xff] }
 0x1c0   :  { %v5335_v25 = vcombine.high %v772_v21, %v780_v22  ;;  %v756_v29 = vld [vmem:[%s7974_s5 + $0x418] sm:$0xff] }
 0x1c1   :  { %4032 = vmatpush1.bf16.msra.mxu0 %v5270_v47  ;;  %v1092_v47 = vld [vmem:[%s7974_s5 + $0xe98] sm:$0xff] }
 0x1c2   :  { %4073 = vmatpush1.bf16.msra.mxu1 %v5526_v48  ;;  %4033 = vmatprep.subr.bf16.mxu0 %v5255_v49  ;;  %v1100_v48 = vld [vmem:[%s7974_s5 + $0xed8] sm:$0xff]  ;;  %v5414_v49 = vcombine.low %v852_v34, %v860_v4 }
 0x1c3   :  { %4074 = vmatprep.subr.bf16.mxu1 %v5511_v50  ;;  %v5670_v50 = vcombine.low %v1108_v35, %v1116_v36  ;;  %v5655_v52 = vcombine.high %v1092_v47, %v1100_v48  ;;  %v764_v3 = vld [vmem:[%s7974_s5 + $0x458] sm:$0xff]  ;;  %v741_v35 = vld [vmem:[%s7974_s5 + $0x3a0] sm:$0xff] }
 0x1c4   :  { %v5319_v34 = vcombine.high %v756_v29, %v764_v3  ;;  %v749_v36 = vld [vmem:[%s7974_s5 + $0x3e0] sm:$0xff] }
 0x1c5   :  { %4034 = vmatpush1.bf16.msra.mxu0 %v5254_v55  ;;  %v1076_v55 = vld [vmem:[%s7974_s5 + $0xe18] sm:$0xff] }
 0x1c6   :  { %4075 = vmatpush1.bf16.msra.mxu1 %v5510_v56  ;;  %4035 = vmatprep.subr.bf16.mxu0 %v5239_v57  ;;  %v1084_v56 = vld [vmem:[%s7974_s5 + $0xe58] sm:$0xff]  ;;  %v5398_v57 = vcombine.low %v836_v41, %v844_v42  ;;  %v5305_v41 = vcombine.high %v741_v35, %v749_v36  ;;  %v6908_v42 = vld [vmem:[%s7978_s6] sm:$0xff] }
 0x1c7   :  { %4076 = vmatprep.subr.bf16.mxu1 %v5495_v6  ;;  %v5654_v6 = vcombine.low %v1092_v47, %v1100_v48  ;;  %v5639_v8 = vcombine.high %v1076_v55, %v1084_v56  ;;  %v725_v48 = vld [vmem:[%s7974_s5 + $0x320] sm:$0xff] }
 0x1c9   :  { %4036 = vmatpush1.bf16.msra.mxu0 %v5238_v12  ;;  %v1060_v12 = vld [vmem:[%s7974_s5 + $0xd98] sm:$0xff] }
 0x1ca   :  { %4077 = vmatpush1.bf16.msra.mxu1 %v5494_v58  ;;  %4037 = vmatprep.subr.bf16.mxu0 %v5223_v59  ;;  %v1068_v58 = vld [vmem:[%s7974_s5 + $0xdd8] sm:$0xff]  ;;  %v5382_v59 = vcombine.low %v820_v53, %v828_v54  ;;  %v989_v53 = vld [vmem:[%s7974_s5 + $0xb60] sm:$0xff] }
 0x1cb   :  { %4078 = vmatprep.subr.bf16.mxu1 %v5479_v60  ;;  %v5638_v60 = vcombine.low %v1076_v55, %v1084_v56  ;;  %v5623_v62 = vcombine.high %v1060_v12, %v1068_v58  ;;  %v1148_v55 = vrot.slane %v6908_v42, %v6265_v17 }
 0x1cd   :  { %4038 = vmatpush1.bf16.msra.mxu0 %v5222_v1  ;;  %v1044_v1 = vld [vmem:[%s7974_s5 + $0xd18] sm:$0xff] }
 0x1ce   :  { %4079 = vmatpush1.bf16.msra.mxu1 %v5478_v2  ;;  %4039 = vmatprep.subr.bf16.mxu0 %v5207_v5  ;;  %v1052_v2 = vld [vmem:[%s7974_s5 + $0xd58] sm:$0xff]  ;;  %v5366_v5 = vcombine.low %v804_v10, %v812_v11  ;;  %v965_v10 = vld [vmem:[%s7974_s5 + $0xaa0] sm:$0xff] }
 0x1cf   :  { %4080 = vmatprep.subr.bf16.mxu1 %v5463_v9  ;;  %v5622_v9 = vcombine.low %v1060_v12, %v1068_v58  ;;  %v5607_v16 = vcombine.high %v1044_v1, %v1052_v2  ;;  %v973_v11 = vld [vmem:[%s7974_s5 + $0xae0] sm:$0xff] }
 0x1d1   :  { %4040 = vmatpush1.bf16.msra.mxu0 %v5206_v23  ;;  %v1028_v23 = vld [vmem:[%s7974_s5 + $0xc98] sm:$0xff] }
 0x1d2   :  { %4081 = vmatpush1.bf16.msra.mxu1 %v5462_v24  ;;  %4041 = vmatprep.subr.bf16.mxu0 %v5191_v27  ;;  %v1036_v24 = vld [vmem:[%s7974_s5 + $0xcd8] sm:$0xff]  ;;  %v5350_v27 = vcombine.low %v788_v63, %v796_v0 }
 0x1d3   :  { %4082 = vmatprep.subr.bf16.mxu1 %v5447_v28  ;;  %v5606_v28 = vcombine.low %v1044_v1, %v1052_v2  ;;  %v5591_v26 = vcombine.high %v1028_v23, %v1036_v24  ;;  %v5529_v2 = vcombine.high %v965_v10, %v973_v11 }
 0x1d5   :  { %4042 = vmatpush1.bf16.msra.mxu0 %v5190_v30  ;;  %v1012_v30 = vld [vmem:[%s7974_s5 + $0xc18] sm:$0xff] }
 0x1d6   :  { %4083 = vmatpush1.bf16.msra.mxu1 %v5446_v33  ;;  %4043 = vmatprep.subr.bf16.mxu0 %v5431_v31  ;;  %v1020_v33 = vld [vmem:[%s7974_s5 + $0xc58] sm:$0xff]  ;;  %v5334_v31 = vcombine.low %v772_v21, %v780_v22  ;;  %v957_v21 = vld [vmem:[%s7974_s5 + $0xa60] sm:$0xff] }
 0x1d7   :  { %4084 = vmatprep.subr.bf16.mxu1 %v5687_v32  ;;  %v5590_v32 = vcombine.low %v1028_v23, %v1036_v24  ;;  %v5575_v4 = vcombine.high %v1012_v30, %v1020_v33 }
 0x1d9   :  { %4044 = vmatpush2.bf16.msra.mxu0 %v5430_v37  ;;  %v997_v37 = vld [vmem:[%s7974_s5 + $0xba0] sm:$0xff] }
 0x1da   :  { %4085 = vmatpush2.bf16.msra.mxu1 %v5686_v39  ;;  %4045 = vmatprep.subr.bf16.mxu0 %v5415_v19  ;;  %v1005_v39 = vld [vmem:[%s7974_s5 + $0xbe0] sm:$0xff]  ;;  %v5318_v19 = vcombine.low %v756_v29, %v764_v3 }
 0x1db   :  { %4086 = vmatprep.subr.bf16.mxu1 %v5671_v20  ;;  %v5574_v20 = vcombine.low %v1012_v30, %v1020_v33  ;;  %v5561_v47 = vcombine.high %v997_v37, %v1005_v39  ;;  %v5560_v54 = vcombine.low %v997_v37, %v1005_v39 }
 0x1dd   :  { %4046 = vmatpush2.bf16.msra.mxu0 %v5414_v49  ;;  %v733_v49 = vld [vmem:[%s7974_s5 + $0x360] sm:$0xff] }
 0x1de   :  { %4087 = vmatpush2.bf16.msra.mxu1 %v5670_v50  ;;  %4047 = vmatprep.subr.bf16.mxu0 %v5399_v51  ;;  %v5304_v50 = vcombine.low %v741_v35, %v749_v36  ;;  %v1144_v51 = vrot.slane %v6908_v42, %v6256_v14  ;;  %v5289_v56 = vcombine.high %v725_v48, %v733_v49  ;;  %v933_v35 = vld [vmem:[%s7974_s5 + $0x9a0] sm:$0xff] }
 0x1df   :  { %4088 = vmatprep.subr.bf16.mxu1 %v5655_v52  ;;  %v981_v52 = vld [vmem:[%s7974_s5 + $0xb20] sm:$0xff] }
 0x1e0   :  { %v941_v36 = vld [vmem:[%s7974_s5 + $0x9e0] sm:$0xff] }
 0x1e1   :  { %4048 = vmatpush2.bf16.msra.mxu0 %v5398_v57  ;;  %v709_v57 = vld [vmem:[%s7974_s5 + $0x2a0] sm:$0xff] }
 0x1e2   :  { %4089 = vmatpush2.bf16.msra.mxu1 %v5654_v6  ;;  %4049 = vmatprep.subr.bf16.mxu0 %v5383_v7  ;;  %v717_v6 = vld [vmem:[%s7974_s5 + $0x2e0] sm:$0xff] }
 0x1e3   :  { %4090 = vmatprep.subr.bf16.mxu1 %v5639_v8  ;;  %v5545_v8 = vcombine.high %v981_v52, %v989_v53 }
 0x1e5   :  { %4050 = vmatpush2.bf16.msra.mxu0 %v5382_v59  ;;  %v5288_v59 = vcombine.low %v725_v48, %v733_v49  ;;  %v661_v48 = vld [vmem:[%s7974_s5 + $0x120] sm:$0xff] }
 0x1e6   :  { %4091 = vmatpush2.bf16.msra.mxu1 %v5638_v60  ;;  %4051 = vmatprep.subr.bf16.mxu0 %v5367_v61  ;;  %v5544_v61 = vcombine.low %v981_v52, %v989_v53  ;;  %v669_v49 = vld [vmem:[%s7974_s5 + $0x160] sm:$0xff] }
 0x1e7   :  { %4092 = vmatprep.subr.bf16.mxu1 %v5623_v62  ;;  %v5273_v62 = vcombine.high %v709_v57, %v717_v6  ;;  %v917_v52 = vld [vmem:[%s7974_s5 + $0x920] sm:$0xff] }
 0x1e8   :  { %v925_v53 = vld [vmem:[%s7974_s5 + $0x960] sm:$0xff] }
 0x1e9   :  { %4052 = vmatpush2.bf16.msra.mxu0 %v5366_v5  ;;  %v693_v5 = vld [vmem:[%s7974_s5 + $0x220] sm:$0xff] }
 0x1ea   :  { %4093 = vmatpush2.bf16.msra.mxu1 %v5622_v9  ;;  %4053 = vmatprep.subr.bf16.mxu0 %v5351_v13  ;;  %v701_v9 = vld [vmem:[%s7974_s5 + $0x260] sm:$0xff] }
 0x1eb   :  { %4094 = vmatprep.subr.bf16.mxu1 %v5607_v16  ;;  %v949_v16 = vld [vmem:[%s7974_s5 + $0xa20] sm:$0xff]  ;;  %v5257_v29 = vcombine.high %v693_v5, %v701_v9  ;;  %v5256_v37 = vcombine.low %v693_v5, %v701_v9 }
 0x1ec   :  { %v5513_v33 = vcombine.high %v949_v16, %v957_v21  ;;  %v629_v5 = vld [vmem:[%s7974_s5 + $0x20] sm:$0xff] }
 0x1ed   :  { %4054 = vmatpush2.bf16.msra.mxu0 %v5350_v27  ;;  %v5272_v27 = vcombine.low %v709_v57, %v717_v6  ;;  %v5496_v57 = vcombine.low %v933_v35, %v941_v36  ;;  %v5225_v6 = vcombine.high %v661_v48, %v669_v49  ;;  %v637_v9 = vld [vmem:[%s7974_s5 + $0x60] sm:$0xff] }
 0x1ee   :  { %4095 = vmatpush2.bf16.msra.mxu1 %v5606_v28  ;;  %4055 = vmatprep.subr.bf16.mxu0 %v5335_v25 }
 0x1ef   :  { %4096 = vmatprep.subr.bf16.mxu1 %v5591_v26  ;;  %v5528_v26 = vcombine.low %v965_v10, %v973_v11  ;;  %v653_v10 = vld [vmem:[%s7974_s5 + $0xe0] sm:$0xff] }
 0x1f1   :  { %4056 = vmatpush2.bf16.msra.mxu0 %v5334_v31  ;;  %v677_v31 = vld [vmem:[%s7974_s5 + $0x1a0] sm:$0xff] }
 0x1f2   :  { %4097 = vmatpush2.bf16.msra.mxu1 %v5590_v32  ;;  %4057 = vmatprep.subr.bf16.mxu0 %v5319_v34  ;;  %v685_v32 = vld [vmem:[%s7974_s5 + $0x1e0] sm:$0xff] }
 0x1f3   :  { %4098 = vmatprep.subr.bf16.mxu1 %v5575_v4 }
 0x1f5   :  { %4058 = vmatpush2.bf16.msra.mxu0 %v5318_v19 }
 0x1f6   :  { %4099 = vmatpush2.bf16.msra.mxu1 %v5574_v20  ;;  %4109 = vmatprep.subr.bf16.mxu0 %v5305_v41  ;;  %v5512_v20 = vcombine.low %v949_v16, %v957_v21  ;;  %v5241_v41 = vcombine.high %v677_v31, %v685_v32  ;;  %v885_v21 = vld [vmem:[%s7974_s5 + $0x820] sm:$0xff] }
 0x1f7   :  { %4150 = vmatprep.subr.bf16.mxu1 %v5561_v47  ;;  %v5497_v47 = vcombine.high %v933_v35, %v941_v36 }
 0x1f8   :  { %4060 = vmatmul.mubr.bf16.vlgmr.msra.gmra.mxu0 %v6315_v43  ;;  %v3815_v7 = vpop.f32.mrf.mxu0 }
 0x1f9   :  { %4101 = vmatmul.mubr.bf16.vlgmr.msra.gmra.mxu1 %v6319_v46  ;;  %v3816_v12 = vadd.f32 %v3815_v7, %v1144_v51  ;;  %v3856_v58 = vpop.f32.mrf.mxu1  ;;  %4110 = vmatpush1.bf16.msra.mxu0 %v5304_v50  ;;  %v5481_v7 = vcombine.high %v917_v52, %v925_v53 }
 0x1fa   :  { %4141 = vmatprep.mubr.bf16.mxu0 %v6307_v40  ;;  %4151 = vmatpush1.bf16.msra.mxu1 %v5560_v54  ;;  %v3817_v60 = vpop.f32.mrf.mxu0  ;;  %v5240_v54 = vcombine.low %v677_v31, %v685_v32  ;;  %v1133_v31 = vld [vmem:[%s7974_s5 + $0xfe0] sm:$0xff] }
 0x1fb   :  { %v6941_v63 = vadd.f32 %v3856_v58, %v3816_v12  ;;  %4182 = vmatprep.mubr.bf16.mxu1 %v6317_v44  ;;  %v3818_v0 = vadd.f32 %v3817_v60, %v1148_v55  ;;  %v3858_v1 = vpop.f32.mrf.mxu1  ;;  %4111 = vmatprep.subr.bf16.mxu0 %v5289_v56  ;;  %v901_v58 = vld [vmem:[%s7974_s5 + $0x8a0] sm:$0xff]  ;;  %v5224_v60 = vcombine.low %v661_v48, %v669_v49 }
 0x1fc   :  { %4152 = vmatprep.subr.bf16.mxu1 %v5545_v8  ;;  %v3819_v13 = vpop.f32.mrf.mxu0  ;;  %v645_v8 = vld [vmem:[%s7974_s5 + $0xa0] sm:$0xff] }
 0x1fd   :  { %v4441_v22 = vsel %vm481_vm2, %v6941_v63, 0.0  ;;  %v6958_v23 = vadd.f32 %v3858_v1, %v3818_v0  ;;  %v3860_v24 = vpop.f32.mrf.mxu1  ;;  %4112 = vmatpush1.bf16.msra.mxu0 %v5288_v59  ;;  %v909_v59 = vld [vmem:[%s7974_s5 + $0x8e0] sm:$0xff]  ;;  %v5480_v0 = vcombine.low %v917_v52, %v925_v53  ;;  %v5209_v1 = vcombine.high %v645_v8, %v653_v10 }
 0x1fe   :  { %v4442_v28 = vrot.slane %v4441_v22, 4  ;;  %4153 = vmatpush1.bf16.msra.mxu1 %v5544_v61  ;;  %v3820_v25 = vpop.f32.mrf.mxu0  ;;  %4113 = vmatprep.subr.bf16.mxu0 %v5273_v62  ;;  %v5208_v24 = vcombine.low %v645_v8, %v653_v10  ;;  %v1117_v48 = vld [vmem:[%s7974_s5 + $0xf60] sm:$0xff] }
 0x1ff   :  { %v4448_v3 = vsel %vm481_vm2, %v6958_v23, 0.0  ;;  %v3861_v30 = vpop.f32.mrf.mxu1  ;;  %4154 = vmatprep.subr.bf16.mxu1 %v5529_v2  ;;  %v5465_v2 = vcombine.high %v901_v58, %v909_v59  ;;  %v1101_v8 = vld [vmem:[%s7974_s5 + $0xee0] sm:$0xff] }
 0x200   :  { %v4443_v34 = vadd.f32 %v4442_v28, %v4441_v22  ;;  %v4449_v4 = vrot.slane %v4448_v3, 4  ;;  %v893_v22 = vld [vmem:[%s7974_s5 + $0x860] sm:$0xff] }
 0x201   :  { %4114 = vmatpush1.bf16.msra.mxu0 %v5272_v27  ;;  %v5464_v27 = vcombine.low %v901_v58, %v909_v59  ;;  %v5448_v35 = vcombine.low %v885_v21, %v893_v22 }
 0x202   :  { %v4444_v39 = vrot.slane %v4443_v34, 2  ;;  %v4450_v19 = vadd.f32 %v4449_v4, %v4448_v3  ;;  %4155 = vmatpush1.bf16.msra.mxu1 %v5528_v26  ;;  %4115 = vmatprep.subr.bf16.mxu0 %v5257_v29  ;;  %v5449_v26 = vcombine.high %v885_v21, %v893_v22  ;;  %v869_v29 = vld [vmem:[%s7974_s5 + $0x7a0] sm:$0xff] }
 0x203   :  { %4156 = vmatprep.subr.bf16.mxu1 %v5513_v33  ;;  %v877_v3 = vld [vmem:[%s7974_s5 + $0x7e0] sm:$0xff] }
 0x204   :  { %v4445_v50 = vadd.f32 %v4444_v39, %v4443_v34  ;;  %v4451_v51 = vrot.slane %v4450_v19, 2  ;;  %v5192_v34 = vcombine.low %v629_v5, %v637_v9  ;;  %v5433_v36 = vcombine.high %v869_v29, %v877_v3 }
 0x205   :  { %4116 = vmatpush1.bf16.msra.mxu0 %v5256_v37 }
 0x206   :  { %v4446_v55 = vrot.slane %v4445_v50, 1  ;;  %v4452_v56 = vadd.f32 %v4451_v51, %v4450_v19  ;;  %4157 = vmatpush1.bf16.msra.mxu1 %v5512_v20  ;;  %4117 = vmatprep.subr.bf16.mxu0 %v5241_v41  ;;  %v853_v20 = vld [vmem:[%s7974_s5 + $0x720] sm:$0xff]  ;;  %v5432_v51 = vcombine.low %v869_v29, %v877_v3 }
 0x207   :  { %4158 = vmatprep.subr.bf16.mxu1 %v5497_v47  ;;  %v861_v41 = vld [vmem:[%s7974_s5 + $0x760] sm:$0xff] }
 0x208   :  { %v4447_v11 = vadd.f32 %v4446_v55, %v4445_v50  ;;  %v4453_v12 = vrot.slane %v4452_v56, 1  ;;  %v1109_v47 = vld [vmem:[%s7974_s5 + $0xf20] sm:$0xff]  ;;  %v5417_v53 = vcombine.high %v853_v20, %v861_v41 }
 0x209   :  { %4118 = vmatpush1.bf16.msra.mxu0 %v5240_v54  ;;  %v5672_v58 = vcombine.low %v1109_v47, %v1117_v48  ;;  %v813_v29 = vld [vmem:[%s7974_s5 + $0x5e0] sm:$0xff] }
 0x20a   :  { %v4553_v61 = vmul.f32 0.5, %v4447_v11  ;;  %v4454_v62 = vadd.f32 %v4453_v12, %v4452_v56  ;;  %4159 = vmatpush1.bf16.msra.mxu1 %v5496_v57  ;;  %4119 = vmatprep.subr.bf16.mxu0 %v5225_v6  ;;  %v5673_v56 = vcombine.high %v1109_v47, %v1117_v48  ;;  %v837_v57 = vld [vmem:[%s7974_s5 + $0x6a0] sm:$0xff]  ;;  %v5416_v12 = vcombine.low %v853_v20, %v861_v41 }
 0x20b   :  { %4160 = vmatprep.subr.bf16.mxu1 %v5481_v7  ;;  %v845_v6 = vld [vmem:[%s7974_s5 + $0x6e0] sm:$0xff] }
 0x20c   :  { %v7005_v13 = vsub.f32 %v6941_v63, %v4553_v61  ;;  %v4554_v16 = vmul.f32 0.5, %v4454_v62  ;;  %v5193_v63 = vcombine.high %v629_v5, %v637_v9  ;;  %v1093_v7 = vld [vmem:[%s7974_s5 + $0xea0] sm:$0xff]  ;;  %v5401_v59 = vcombine.high %v837_v57, %v845_v6 }
 0x20d   :  { %4120 = vmatpush1.bf16.msra.mxu0 %v5224_v60  ;;  %v5657_v62 = vcombine.high %v1093_v7, %v1101_v8  ;;  %v1085_v5 = vld [vmem:[%s7974_s5 + $0xe60] sm:$0xff]  ;;  %v5400_v21 = vcombine.low %v837_v57, %v845_v6  ;;  %v5656_v22 = vcombine.low %v1093_v7, %v1101_v8 }
 0x20e   :  { %v4585_v28 = vmul.f32 %v7005_v13, %v7005_v13  ;;  %v7016_v25 = vsub.f32 %v6958_v23, %v4554_v16  ;;  %4161 = vmatpush1.bf16.msra.mxu1 %v5480_v0  ;;  %4121 = vmatprep.subr.bf16.mxu0 %v5209_v1  ;;  %v1125_v23 = vld [vmem:[%s7974_s5 + $0xfa0] sm:$0xff] }
 0x20f   :  { %4162 = vmatprep.subr.bf16.mxu1 %v5465_v2  ;;  %v5689_v19 = vcombine.high %v1125_v23, %v1133_v31  ;;  %v5688_v52 = vcombine.low %v1125_v23, %v1133_v31  ;;  %v821_v0 = vld [vmem:[%s7974_s5 + $0x620] sm:$0xff] }
 0x210   :  { %v4601_v30 = vsel %vm481_vm2, %v4585_v28, 0.0  ;;  %v4586_v33 = vmul.f32 %v7016_v25, %v7016_v25  ;;  %v829_v1 = vld [vmem:[%s7974_s5 + $0x660] sm:$0xff] }
 0x211   :  { %v4602_v32 = vrot.slane %v4601_v30, 4  ;;  %4122 = vmatpush1.bf16.msra.mxu0 %v5208_v24  ;;  %v1077_v2 = vld [vmem:[%s7974_s5 + $0xe20] sm:$0xff]  ;;  %v5385_v24 = vcombine.high %v821_v0, %v829_v1  ;;  %v5384_v23 = vcombine.low %v821_v0, %v829_v1  ;;  %v742_v1 = vld [vmem:[%s7974_s5 + $0x3a8] sm:$0xff] }
 0x212   :  { %v4608_v4 = vsel %vm481_vm2, %v4586_v33, 0.0  ;;  %4163 = vmatpush1.bf16.msra.mxu1 %v5464_v27  ;;  %4123 = vmatprep.subr.bf16.mxu0 %v5193_v63  ;;  %v5641_v63 = vcombine.high %v1077_v2, %v1085_v5  ;;  %v1061_v3 = vld [vmem:[%s7974_s5 + $0xda0] sm:$0xff]  ;;  %v5640_v31 = vcombine.low %v1077_v2, %v1085_v5  ;;  %v750_v2 = vld [vmem:[%s7974_s5 + $0x3e8] sm:$0xff] }
 0x213   :  { %v4603_v37 = vadd.f32 %v4602_v32, %v4601_v30  ;;  %v4609_v39 = vrot.slane %v4608_v4, 4  ;;  %4164 = vmatprep.subr.bf16.mxu1 %v5449_v26  ;;  %v805_v26 = vld [vmem:[%s7974_s5 + $0x5a0] sm:$0xff] }
 0x214   :  { %v1069_v30 = vld [vmem:[%s7974_s5 + $0xde0] sm:$0xff]  ;;  %v5369_v32 = vcombine.high %v805_v26, %v813_v29 }
 0x215   :  { %v4604_v49 = vrot.slane %v4603_v37, 2  ;;  %v4610_v50 = vadd.f32 %v4609_v39, %v4608_v4  ;;  %4124 = vmatpush1.bf16.msra.mxu0 %v5192_v34  ;;  %v5625_v34 = vcombine.high %v1061_v3, %v1069_v30  ;;  %v789_v4 = vld [vmem:[%s7974_s5 + $0x520] sm:$0xff]  ;;  %v5368_v39 = vcombine.low %v805_v26, %v813_v29 }
 0x216   :  { %4165 = vmatpush1.bf16.msra.mxu1 %v5448_v35  ;;  %4125 = vmatprep.subr.bf16.mxu0 %v5433_v36  ;;  %v797_v35 = vld [vmem:[%s7974_s5 + $0x560] sm:$0xff] }
 0x217   :  { %v4605_v54 = vadd.f32 %v4604_v49, %v4603_v37  ;;  %v4611_v55 = vrot.slane %v4610_v50, 2  ;;  %4166 = vmatprep.subr.bf16.mxu1 %v5689_v19  ;;  %v1045_v36 = vld [vmem:[%s7974_s5 + $0xd20] sm:$0xff]  ;;  %v5624_v19 = vcombine.low %v1061_v3, %v1069_v30  ;;  %v5353_v20 = vcombine.high %v789_v4, %v797_v35  ;;  %v726_v3 = vld [vmem:[%s7974_s5 + $0x328] sm:$0xff] }
 0x218   :  { %v1053_v37 = vld [vmem:[%s7974_s5 + $0xd60] sm:$0xff] }
 0x219   :  { %v4606_v10 = vrot.slane %v4605_v54, 1  ;;  %v4612_v11 = vadd.f32 %v4611_v55, %v4610_v50  ;;  %4126 = vmatpush2.bf16.msra.mxu0 %v5432_v51  ;;  %v5609_v41 = vcombine.high %v1045_v36, %v1053_v37  ;;  %v773_v47 = vld [vmem:[%s7974_s5 + $0x4a0] sm:$0xff]  ;;  %v5352_v51 = vcombine.low %v789_v4, %v797_v35 }
 0x21a   :  { %4167 = vmatpush2.bf16.msra.mxu1 %v5688_v52  ;;  %4127 = vmatprep.subr.bf16.mxu0 %v5417_v53  ;;  %v781_v48 = vld [vmem:[%s7974_s5 + $0x4e0] sm:$0xff]  ;;  %v5608_v53 = vcombine.low %v1045_v36, %v1053_v37  ;;  %v1156_v36 = vrot.slane %v6908_v42, %v6268_v18 }
 0x21b   :  { %v4607_v60 = vadd.f32 %v4606_v10, %v4605_v54  ;;  %v4613_v61 = vrot.slane %v4612_v11, 1  ;;  %4168 = vmatprep.subr.bf16.mxu1 %v5673_v56  ;;  %v1029_v49 = vld [vmem:[%s7974_s5 + $0xca0] sm:$0xff]  ;;  %v5337_v54 = vcombine.high %v773_v47, %v781_v48 }
 0x21c   :  { %v1037_v50 = vld [vmem:[%s7974_s5 + $0xce0] sm:$0xff] }
 0x21d   :  { %v4713_v9 = vmul.f32 0.5, %v4607_v60  ;;  %v4614_v16 = vadd.f32 %v4613_v61, %v4612_v11  ;;  %4128 = vmatpush2.bf16.msra.mxu0 %v5416_v12  ;;  %v7109_v52 = vld [vmem:[%s7979_s7] sm:$0xff]  ;;  %v5593_v55 = vcombine.high %v1029_v49, %v1037_v50  ;;  %v5336_v11 = vcombine.low %v773_v47, %v781_v48  ;;  %v966_v47 = vld [vmem:[%s7974_s5 + $0xaa8] sm:$0xff] }
 0x21e   :  { %4169 = vmatpush2.bf16.msra.mxu1 %v5672_v58  ;;  %4129 = vmatprep.subr.bf16.mxu0 %v5401_v59  ;;  %v757_v56 = vld [vmem:[%s7974_s5 + $0x420] sm:$0xff]  ;;  %v4782_v10 = vrot.slane %v7109_v52, %v6256_v14  ;;  %v5592_v58 = vcombine.low %v1029_v49, %v1037_v50 }
 0x21f   :  { %v4729_v27 = vadd.f32 1e-05, %v4713_v9  ;;  %v4714_v28 = vmul.f32 0.5, %v4614_v16  ;;  %4170 = vmatprep.subr.bf16.mxu1 %v5657_v62  ;;  %v765_v57 = vld [vmem:[%s7974_s5 + $0x460] sm:$0xff]  ;;  %v4786_v62 = vrot.slane %v7109_v52, %v6265_v17  ;;  %v1006_v9 = vld [vmem:[%s7974_s5 + $0xbe8] sm:$0xff] }
 0x220   :  { %v7120_v6 = vld [vmem:[%s7980_s8] sm:$0xff]  ;;  %v5321_v59 = vcombine.high %v757_v56, %v765_v57 }
 0x221   :  { %5789 = vrsqrt.f32 %v4729_v27  ;;  %v4730_v33 = vadd.f32 1e-05, %v4714_v28  ;;  %4130 = vmatpush2.bf16.msra.mxu0 %v5400_v21  ;;  %v1013_v7 = vld [vmem:[%s7974_s5 + $0xc20] sm:$0xff]  ;;  %v4880_v61 = vrot.slane %v7120_v6, %v6256_v14  ;;  %v5307_v28 = vcombine.high %v742_v1, %v750_v2 }
 0x222   :  { %4171 = vmatpush2.bf16.msra.mxu1 %v5656_v22  ;;  %4131 = vmatprep.subr.bf16.mxu0 %v5385_v24  ;;  %v1021_v8 = vld [vmem:[%s7974_s5 + $0xc60] sm:$0xff]  ;;  %v4884_v22 = vrot.slane %v7120_v6, %v6265_v17  ;;  %v5320_v24 = vcombine.low %v757_v56, %v765_v57 }
 0x223   :  { %5791 = vrsqrt.f32 %v4730_v33  ;;  %4172 = vmatprep.subr.bf16.mxu1 %v5641_v63  ;;  %v5577_v0 = vcombine.high %v1013_v7, %v1021_v8  ;;  %v5576_v27 = vcombine.low %v1013_v7, %v1021_v8  ;;  %v1152_v33 = vrot.slane %v6908_v42, %v6259_v15  ;;  %v974_v42 = vld [vmem:[%s7974_s5 + $0xae8] sm:$0xff] }
 0x224   :  { %v5531_v8 = vcombine.high %v966_v47, %v974_v42 }
 0x225   :  { %4132 = vmatpush2.bf16.msra.mxu0 %v5384_v23  ;;  %v5306_v23 = vcombine.low %v742_v1, %v750_v2 }
 0x226   :  { %4173 = vmatpush2.bf16.msra.mxu1 %v5640_v31  ;;  %4133 = vmatprep.subr.bf16.mxu0 %v5369_v32  ;;  %v982_v31 = vld [vmem:[%s7974_s5 + $0xb28] sm:$0xff] }
 0x227   :  { %4174 = vmatprep.subr.bf16.mxu1 %v5625_v34  ;;  %v990_v32 = vld [vmem:[%s7974_s5 + $0xb68] sm:$0xff] }
 0x229   :  { %4134 = vmatpush2.bf16.msra.mxu0 %v5368_v39  ;;  %v710_v39 = vld [vmem:[%s7974_s5 + $0x2a8] sm:$0xff] }
 0x22a   :  { %4175 = vmatpush2.bf16.msra.mxu1 %v5624_v19  ;;  %4135 = vmatprep.subr.bf16.mxu0 %v5353_v20  ;;  %v718_v19 = vld [vmem:[%s7974_s5 + $0x2e8] sm:$0xff] }
 0x22b   :  { %4176 = vmatprep.subr.bf16.mxu1 %v5609_v41  ;;  %v5547_v41 = vcombine.high %v982_v31, %v990_v32 }
 0x22d   :  { %4136 = vmatpush2.bf16.msra.mxu0 %v5352_v51 }
 0x22e   :  { %v5790_v12 = vpop.eup %5789  ;;  %4177 = vmatpush2.bf16.msra.mxu1 %v5608_v53  ;;  %4137 = vmatprep.subr.bf16.mxu0 %v5337_v54  ;;  %v5546_v54 = vcombine.low %v982_v31, %v990_v32  ;;  %v662_v31 = vld [vmem:[%s7974_s5 + $0x128] sm:$0xff] }
 0x22f   :  { %v4761_v60 = vmul.f32 %v5790_v12, %v7005_v13  ;;  %4178 = vmatprep.subr.bf16.mxu1 %v5593_v55  ;;  %v998_v13 = vld [vmem:[%s7974_s5 + $0xba8] sm:$0xff]  ;;  %v5275_v55 = vcombine.high %v710_v39, %v718_v19 }
 0x230   :  { %v5792_v5 = vpop.eup %5791  ;;  %v5563_v29 = vcombine.high %v998_v13, %v1006_v9  ;;  %v5562_v34 = vcombine.low %v998_v13, %v1006_v9  ;;  %v670_v32 = vld [vmem:[%s7974_s5 + $0x168] sm:$0xff] }
 0x231   :  { %v4859_v16 = vmul.f32 %v4782_v10, %v4761_v60  ;;  %v4762_v21 = vmul.f32 %v5792_v5, %v7016_v25  ;;  %4138 = vmatpush2.bf16.msra.mxu0 %v5336_v11  ;;  %v734_v25 = vld [vmem:[%s7974_s5 + $0x368] sm:$0xff]  ;;  %v5530_v5 = vcombine.low %v966_v47, %v974_v42 }
 0x232   :  { %4179 = vmatpush2.bf16.msra.mxu1 %v5592_v58  ;;  %4139 = vmatprep.subr.bf16.mxu0 %v5321_v59  ;;  %v5291_v37 = vcombine.high %v726_v3, %v734_v25  ;;  %v5290_v51 = vcombine.low %v726_v3, %v734_v25  ;;  %v694_v10 = vld [vmem:[%s7974_s5 + $0x228] sm:$0xff] }
 0x233   :  { %v4957_v63 = vadd.f32 %v4880_v61, %v4859_v16  ;;  %v4860_v26 = vmul.f32 %v4786_v62, %v4762_v21  ;;  %4180 = vmatprep.subr.bf16.mxu1 %v5577_v0  ;;  %v702_v11 = vld [vmem:[%s7974_s5 + $0x268] sm:$0xff]  ;;  %v5274_v0 = vcombine.low %v710_v39, %v718_v19 }
 0x234   :  { %v950_v58 = vld [vmem:[%s7974_s5 + $0xa28] sm:$0xff]  ;;  %v5259_v13 = vcombine.high %v694_v10, %v702_v11 }
 0x235   :  { %v4958_v30 = vadd.f32 %v4884_v22, %v4860_v26  ;;  %4140 = vmatpush2.bf16.msra.mxu0 %v5320_v24  ;;  %v4973_v4 = vmax.f32 %v4957_v63, 0.0  ;;  %v958_v59 = vld [vmem:[%s7974_s5 + $0xa68] sm:$0xff] }
 0x236   :  { %4181 = vmatpush2.bf16.msra.mxu1 %v5576_v27  ;;  %4191 = vmatprep.subr.bf16.mxu0 %v5307_v28  ;;  %v5515_v21 = vcombine.high %v950_v58, %v958_v59  ;;  %v678_v22 = vld [vmem:[%s7974_s5 + $0x1a8] sm:$0xff] }
 0x237   :  { %v4974_v35 = vmax.f32 %v4958_v30, 0.0  ;;  %4232 = vmatprep.subr.bf16.mxu1 %v5563_v29  ;;  %v686_v24 = vld [vmem:[%s7974_s5 + $0x1e8] sm:$0xff]  ;;  %v5258_v29 = vcombine.low %v694_v10, %v702_v11  ;;  %v5514_v30 = vcombine.low %v950_v58, %v958_v59 }
 0x238   :  { %v3897_v20 = vpop.f32.mrf.mxu0  ;;  %4142 = vmatmul.mubr.bf16.vlgmr.msra.gmra.mxu0 %v6315_v43  ;;  %v934_v63 = vld [vmem:[%s7974_s5 + $0x9a8] sm:$0xff] }
 0x239   :  { %v7179_v48 = vpack.c.bf16 %v4974_v35, %v4973_v4  ;;  %v3898_v49 = vadd.f32 %v3897_v20, %v1152_v33  ;;  %v3938_v50 = vpop.f32.mrf.mxu1  ;;  %4183 = vmatmul.mubr.bf16.vlgmr.msra.gmra.mxu1 %v6319_v46  ;;  %4192 = vmatpush1.bf16.msra.mxu0 %v5306_v23  ;;  %v942_v26 = vld [vmem:[%s7974_s5 + $0x9e8] sm:$0xff]  ;;  %v5243_v33 = vcombine.high %v678_v22, %v686_v24 }
 0x23a   :  { %4223 = vmatprep.mubr.bf16.mxu0 %v6307_v40  ;;  %4233 = vmatpush1.bf16.msra.mxu1 %v5562_v34  ;;  %v3899_v53 = vpop.f32.mrf.mxu0  ;;  %v5499_v23 = vcombine.high %v934_v63, %v942_v26  ;;  %v918_v35 = vld [vmem:[%s7974_s5 + $0x928] sm:$0xff]  ;;  %v5498_v20 = vcombine.low %v934_v63, %v942_v26 }
 0x23b   :  { %v7183_v56 = vadd.f32 %v3938_v50, %v3898_v49  ;;  %4264 = vmatprep.mubr.bf16.mxu1 %v6317_v44  ;;  %v3900_v57 = vadd.f32 %v3899_v53, %v1156_v36  ;;  %v3940_v7 = vpop.f32.mrf.mxu1  ;;  %4193 = vmatprep.subr.bf16.mxu0 %v5291_v37  ;;  %v926_v36 = vld [vmem:[%s7974_s5 + $0x968] sm:$0xff]  ;;  %v5242_v37 = vcombine.low %v678_v22, %v686_v24 }
 0x23c   :  { %v3901_v12 = vpop.f32.mrf.mxu0  ;;  %4234 = vmatprep.subr.bf16.mxu1 %v5547_v41  ;;  %v5227_v41 = vcombine.high %v662_v31, %v670_v32  ;;  %v5483_v47 = vcombine.high %v918_v35, %v926_v36  ;;  %v646_v42 = vld [vmem:[%s7974_s5 + $0xa8] sm:$0xff] }
 0x23d   :  { %v4455_v60 = vsel %vm481_vm2, %v7183_v56, 0.0  ;;  %v7200_v61 = vadd.f32 %v3940_v7, %v3900_v57  ;;  %v3942_v62 = vpop.f32.mrf.mxu1  ;;  %4194 = vmatpush1.bf16.msra.mxu0 %v5290_v51  ;;  %v654_v49 = vld [vmem:[%s7974_s5 + $0xe8] sm:$0xff] }
 0x23e   :  { %v4456_v1 = vrot.slane %v4455_v60, 4  ;;  %4235 = vmatpush1.bf16.msra.mxu1 %v5546_v54  ;;  %v3902_v2 = vpop.f32.mrf.mxu0  ;;  %4195 = vmatprep.subr.bf16.mxu0 %v5275_v55  ;;  %v902_v53 = vld [vmem:[%s7974_s5 + $0x8a8] sm:$0xff]  ;;  %v5226_v55 = vcombine.low %v662_v31, %v670_v32  ;;  %v5211_v10 = vcombine.high %v646_v42, %v654_v49 }
 0x23f   :  { %v4462_v9 = vsel %vm481_vm2, %v7200_v61, 0.0  ;;  %v3943_v16 = vpop.f32.mrf.mxu1  ;;  %4236 = vmatprep.subr.bf16.mxu1 %v5531_v8  ;;  %v910_v54 = vld [vmem:[%s7974_s5 + $0x8e8] sm:$0xff]  ;;  %v5482_v8 = vcombine.low %v918_v35, %v926_v36 }
 0x240   :  { %v4457_v27 = vadd.f32 %v4456_v1, %v4455_v60  ;;  %v4463_v28 = vrot.slane %v4462_v9, 4  ;;  %v5467_v11 = vcombine.high %v902_v53, %v910_v54  ;;  %v630_v12 = vld [vmem:[%s7974_s5 + $0x28] sm:$0xff]  ;;  %v5210_v1 = vcombine.low %v646_v42, %v654_v49 }
 0x241   :  { %4196 = vmatpush1.bf16.msra.mxu0 %v5274_v0  ;;  %v638_v58 = vld [vmem:[%s7974_s5 + $0x68] sm:$0xff]  ;;  %v5466_v2 = vcombine.low %v902_v53, %v910_v54 }
 0x242   :  { %v4458_v3 = vrot.slane %v4457_v27, 2  ;;  %v4464_v25 = vadd.f32 %v4463_v28, %v4462_v9  ;;  %4237 = vmatpush1.bf16.msra.mxu1 %v5530_v5  ;;  %4197 = vmatprep.subr.bf16.mxu0 %v5259_v13  ;;  %v886_v62 = vld [vmem:[%s7974_s5 + $0x828] sm:$0xff]  ;;  %v5194_v63 = vcombine.low %v630_v12, %v638_v58 }
 0x243   :  { %4238 = vmatprep.subr.bf16.mxu1 %v5515_v21  ;;  %v894_v0 = vld [vmem:[%s7974_s5 + $0x868] sm:$0xff] }
 0x244   :  { %v4459_v34 = vadd.f32 %v4458_v3, %v4457_v27  ;;  %v4465_v4 = vrot.slane %v4464_v25, 2  ;;  %v5451_v9 = vcombine.high %v886_v62, %v894_v0  ;;  %v870_v16 = vld [vmem:[%s7974_s5 + $0x7a8] sm:$0xff] }
 0x245   :  { %4198 = vmatpush1.bf16.msra.mxu0 %v5258_v29  ;;  %v878_v21 = vld [vmem:[%s7974_s5 + $0x7e8] sm:$0xff]  ;;  %v5450_v29 = vcombine.low %v886_v62, %v894_v0 }
 0x246   :  { %v4460_v39 = vrot.slane %v4459_v34, 1  ;;  %v4466_v19 = vadd.f32 %v4465_v4, %v4464_v25  ;;  %4239 = vmatpush1.bf16.msra.mxu1 %v5514_v30  ;;  %4199 = vmatprep.subr.bf16.mxu0 %v5243_v33  ;;  %v1134_v27 = vld [vmem:[%s7974_s5 + $0xfe8] sm:$0xff]  ;;  %v5435_v3 = vcombine.high %v870_v16, %v878_v21  ;;  %v5434_v36 = vcombine.low %v870_v16, %v878_v21 }
 0x247   :  { %4240 = vmatprep.subr.bf16.mxu1 %v5499_v23  ;;  %v854_v23 = vld [vmem:[%s7974_s5 + $0x728] sm:$0xff] }
 0x248   :  { %v4461_v50 = vadd.f32 %v4460_v39, %v4459_v34  ;;  %v4467_v51 = vrot.slane %v4466_v19, 1  ;;  %v862_v31 = vld [vmem:[%s7974_s5 + $0x768] sm:$0xff] }
 0x249   :  { %4200 = vmatpush1.bf16.msra.mxu0 %v5242_v37  ;;  %v1110_v32 = vld [vmem:[%s7974_s5 + $0xf28] sm:$0xff]  ;;  %v5419_v39 = vcombine.high %v854_v23, %v862_v31  ;;  %v5418_v54 = vcombine.low %v854_v23, %v862_v31 }
 0x24a   :  { %v4555_v57 = vmul.f32 0.5, %v4461_v50  ;;  %v4468_v7 = vadd.f32 %v4467_v51, %v4466_v19  ;;  %4241 = vmatpush1.bf16.msra.mxu1 %v5498_v20  ;;  %4201 = vmatprep.subr.bf16.mxu0 %v5227_v41  ;;  %v1118_v34 = vld [vmem:[%s7974_s5 + $0xf68] sm:$0xff] }
 0x24b   :  { %4242 = vmatprep.subr.bf16.mxu1 %v5483_v47  ;;  %v5675_v41 = vcombine.high %v1110_v32, %v1118_v34  ;;  %v838_v47 = vld [vmem:[%s7974_s5 + $0x6a8] sm:$0xff] }
 0x24c   :  { %v7247_v59 = vsub.f32 %v7183_v56, %v4555_v57  ;;  %v4556_v60 = vmul.f32 0.5, %v4468_v7  ;;  %v5195_v56 = vcombine.high %v630_v12, %v638_v58  ;;  %v846_v42 = vld [vmem:[%s7974_s5 + $0x6e8] sm:$0xff] }
 0x24d   :  { %4202 = vmatpush1.bf16.msra.mxu0 %v5226_v55  ;;  %v1094_v49 = vld [vmem:[%s7974_s5 + $0xea8] sm:$0xff]  ;;  %v5674_v55 = vcombine.low %v1110_v32, %v1118_v34  ;;  %v5403_v57 = vcombine.high %v838_v47, %v846_v42 }
 0x24e   :  { %v4587_v5 = vmul.f32 %v7247_v59, %v7247_v59  ;;  %v7258_v13 = vsub.f32 %v7200_v61, %v4556_v60  ;;  %4243 = vmatpush1.bf16.msra.mxu1 %v5482_v8  ;;  %4203 = vmatprep.subr.bf16.mxu0 %v5211_v10  ;;  %v1126_v61 = vld [vmem:[%s7974_s5 + $0xfa8] sm:$0xff] }
 0x24f   :  { %4244 = vmatprep.subr.bf16.mxu1 %v5467_v11  ;;  %v5691_v33 = vcombine.high %v1126_v61, %v1134_v27  ;;  %v5690_v37 = vcombine.low %v1126_v61, %v1134_v27  ;;  %v1102_v50 = vld [vmem:[%s7974_s5 + $0xee8] sm:$0xff] }
 0x250   :  { %v4615_v22 = vsel %vm481_vm2, %v4587_v5, 0.0  ;;  %v4588_v24 = vmul.f32 %v7258_v13, %v7258_v13  ;;  %v5659_v10 = vcombine.high %v1094_v49, %v1102_v50  ;;  %v822_v11 = vld [vmem:[%s7974_s5 + $0x628] sm:$0xff] }
 0x251   :  { %v4616_v28 = vrot.slane %v4615_v22, 4  ;;  %4204 = vmatpush1.bf16.msra.mxu0 %v5210_v1  ;;  %v830_v12 = vld [vmem:[%s7974_s5 + $0x668] sm:$0xff]  ;;  %v5402_v1 = vcombine.low %v838_v47, %v846_v42 }
 0x252   :  { %v4622_v26 = vsel %vm481_vm2, %v4588_v24, 0.0  ;;  %4245 = vmatpush1.bf16.msra.mxu1 %v5466_v2  ;;  %4205 = vmatprep.subr.bf16.mxu0 %v5195_v56  ;;  %v1078_v58 = vld [vmem:[%s7974_s5 + $0xe28] sm:$0xff]  ;;  %v5658_v2 = vcombine.low %v1094_v49, %v1102_v50  ;;  %v5387_v5 = vcombine.high %v822_v11, %v830_v12 }
 0x253   :  { %v4617_v25 = vadd.f32 %v4616_v28, %v4615_v22  ;;  %v4623_v30 = vrot.slane %v4622_v26, 4  ;;  %4246 = vmatprep.subr.bf16.mxu1 %v5451_v9  ;;  %v1086_v60 = vld [vmem:[%s7974_s5 + $0xe68] sm:$0xff]  ;;  %v5386_v28 = vcombine.low %v822_v11, %v830_v12  ;;  %v743_v12 = vld [vmem:[%s7974_s5 + $0x3b0] sm:$0xff] }
 0x254   :  { %v5643_v16 = vcombine.high %v1078_v58, %v1086_v60  ;;  %v806_v21 = vld [vmem:[%s7974_s5 + $0x5a8] sm:$0xff] }
 0x255   :  { %v4618_v4 = vrot.slane %v4617_v25, 2  ;;  %v4624_v35 = vadd.f32 %v4623_v30, %v4622_v26  ;;  %4206 = vmatpush1.bf16.msra.mxu0 %v5194_v63  ;;  %v814_v22 = vld [vmem:[%s7974_s5 + $0x5e8] sm:$0xff]  ;;  %v5642_v63 = vcombine.low %v1078_v58, %v1086_v60  ;;  %v751_v58 = vld [vmem:[%s7974_s5 + $0x3f0] sm:$0xff] }
 0x256   :  { %4247 = vmatpush1.bf16.msra.mxu1 %v5450_v29  ;;  %4207 = vmatprep.subr.bf16.mxu0 %v5435_v3  ;;  %v1062_v24 = vld [vmem:[%s7974_s5 + $0xda8] sm:$0xff]  ;;  %v5371_v26 = vcombine.high %v806_v21, %v814_v22  ;;  %v5370_v23 = vcombine.low %v806_v21, %v814_v22  ;;  %v7386_v22 = vsub.s32 5, %v5977_v38 }
 0x257   :  { %v4619_v19 = vadd.f32 %v4618_v4, %v4617_v25  ;;  %v4625_v20 = vrot.slane %v4624_v35, 2  ;;  %4248 = vmatprep.subr.bf16.mxu1 %v5691_v33  ;;  %v1070_v61 = vld [vmem:[%s7974_s5 + $0xde8] sm:$0xff] }
 0x258   :  { %v5627_v29 = vcombine.high %v1062_v24, %v1070_v61  ;;  %v790_v3 = vld [vmem:[%s7974_s5 + $0x528] sm:$0xff]  ;;  %v5626_v31 = vcombine.low %v1062_v24, %v1070_v61  ;;  %v735_v24 = vld [vmem:[%s7974_s5 + $0x370] sm:$0xff] }
 0x259   :  { %v4620_v51 = vrot.slane %v4619_v19, 1  ;;  %v4626_v53 = vadd.f32 %v4625_v20, %v4624_v35  ;;  %4208 = vmatpush2.bf16.msra.mxu0 %v5434_v36  ;;  %v798_v25 = vld [vmem:[%s7974_s5 + $0x568] sm:$0xff] }
 0x25a   :  { %4249 = vmatpush2.bf16.msra.mxu1 %v5690_v37  ;;  %4209 = vmatprep.subr.bf16.mxu0 %v5419_v39  ;;  %v1046_v30 = vld [vmem:[%s7974_s5 + $0xd28] sm:$0xff]  ;;  %v5355_v32 = vcombine.high %v790_v3, %v798_v25  ;;  %v5354_v39 = vcombine.low %v790_v3, %v798_v25  ;;  %v711_v25 = vld [vmem:[%s7974_s5 + $0x2b0] sm:$0xff] }
 0x25b   :  { %v4621_v7 = vadd.f32 %v4620_v51, %v4619_v19  ;;  %v4627_v8 = vrot.slane %v4626_v53, 1  ;;  %4250 = vmatprep.subr.bf16.mxu1 %v5675_v41  ;;  %v1054_v33 = vld [vmem:[%s7974_s5 + $0xd68] sm:$0xff]  ;;  %v4790_v51 = vrot.slane %v7109_v52, %v6259_v15 }
 0x25c   :  { %v5611_v34 = vcombine.high %v1046_v30, %v1054_v33  ;;  %v774_v4 = vld [vmem:[%s7974_s5 + $0x4a8] sm:$0xff]  ;;  %v5610_v19 = vcombine.low %v1046_v30, %v1054_v33 }
 0x25d   :  { %v4715_v62 = vmul.f32 0.5, %v4621_v7  ;;  %v4628_v0 = vadd.f32 %v4627_v8, %v4626_v53  ;;  %4210 = vmatpush2.bf16.msra.mxu0 %v5418_v54  ;;  %v782_v35 = vld [vmem:[%s7974_s5 + $0x4e8] sm:$0xff]  ;;  %v4888_v8 = vrot.slane %v7120_v6, %v6259_v15 }
 0x25e   :  { %4251 = vmatpush2.bf16.msra.mxu1 %v5674_v55  ;;  %4211 = vmatprep.subr.bf16.mxu0 %v5403_v57  ;;  %v1030_v36 = vld [vmem:[%s7974_s5 + $0xca8] sm:$0xff]  ;;  %v5339_v20 = vcombine.high %v774_v4, %v782_v35  ;;  %v5338_v53 = vcombine.low %v774_v4, %v782_v35  ;;  %v975_v4 = vld [vmem:[%s7974_s5 + $0xaf0] sm:$0xff] }
 0x25f   :  { %v4731_v56 = vadd.f32 1e-05, %v4715_v62  ;;  %v4716_v9 = vmul.f32 0.5, %v4628_v0  ;;  %4252 = vmatprep.subr.bf16.mxu1 %v5659_v10  ;;  %v1038_v37 = vld [vmem:[%s7974_s5 + $0xce8] sm:$0xff]  ;;  %v4794_v10 = vrot.slane %v7109_v52, %v6268_v18  ;;  %v999_v62 = vld [vmem:[%s7974_s5 + $0xbb0] sm:$0xff] }
 0x260   :  { %v5595_v41 = vcombine.high %v1030_v36, %v1038_v37  ;;  %v758_v47 = vld [vmem:[%s7974_s5 + $0x428] sm:$0xff]  ;;  %v5594_v55 = vcombine.low %v1030_v36, %v1038_v37  ;;  %v1007_v52 = vld [vmem:[%s7974_s5 + $0xbf0] sm:$0xff] }
 0x261   :  { %5793 = vrsqrt.f32 %v4731_v56  ;;  %v4732_v27 = vadd.f32 1e-05, %v4716_v9  ;;  %4212 = vmatpush2.bf16.msra.mxu0 %v5402_v1  ;;  %v766_v42 = vld [vmem:[%s7974_s5 + $0x468] sm:$0xff]  ;;  %v5565_v21 = vcombine.high %v999_v62, %v1007_v52  ;;  %v5564_v3 = vcombine.low %v999_v62, %v1007_v52 }
 0x262   :  { %4253 = vmatpush2.bf16.msra.mxu1 %v5658_v2  ;;  %4213 = vmatprep.subr.bf16.mxu0 %v5387_v5  ;;  %v1014_v49 = vld [vmem:[%s7974_s5 + $0xc28] sm:$0xff]  ;;  %v5323_v57 = vcombine.high %v758_v47, %v766_v42  ;;  %v5322_v2 = vcombine.low %v758_v47, %v766_v42  ;;  %v7383_v5 = vsub.s32 4, %v5977_v38  ;;  %v5031_v47 = vrot.slane %v7179_v48, %v5986_v45  ;;  %v703_v48 = vld [vmem:[%s7974_s5 + $0x270] sm:$0xff] }
 0x263   :  { %5795 = vrsqrt.f32 %v4732_v27  ;;  %4254 = vmatprep.subr.bf16.mxu1 %v5643_v16  ;;  %v1022_v50 = vld [vmem:[%s7974_s5 + $0xc68] sm:$0xff]  ;;  %v7397_v27 = vld [vmem:[%s7978_s6] sm:$0xff] }
 0x264   :  { %v5579_v11 = vcombine.high %v1014_v49, %v1022_v50  ;;  %v5578_v56 = vcombine.low %v1014_v49, %v1022_v50 }
 0x265   :  { %4214 = vmatpush2.bf16.msra.mxu0 %v5386_v28  ;;  %v1160_v28 = vrot.slane %v7397_v27, %v7383_v5 }
 0x266   :  { %4255 = vmatpush2.bf16.msra.mxu1 %v5642_v63  ;;  %4215 = vmatprep.subr.bf16.mxu0 %v5371_v26  ;;  %v5308_v63 = vcombine.low %v743_v12, %v751_v58  ;;  %v983_v26 = vld [vmem:[%s7974_s5 + $0xb30] sm:$0xff] }
 0x267   :  { %4256 = vmatprep.subr.bf16.mxu1 %v5627_v29  ;;  %v991_v29 = vld [vmem:[%s7974_s5 + $0xb70] sm:$0xff] }
 0x268   :  { %v5549_v37 = vcombine.high %v983_v26, %v991_v29 }
 0x269   :  { %4216 = vmatpush2.bf16.msra.mxu0 %v5370_v23  ;;  %v1164_v23 = vrot.slane %v7397_v27, %v7386_v22 }
 0x26a   :  { %4257 = vmatpush2.bf16.msra.mxu1 %v5626_v31  ;;  %4217 = vmatprep.subr.bf16.mxu0 %v5355_v32  ;;  %v719_v32 = vld [vmem:[%s7974_s5 + $0x2f0] sm:$0xff] }
 0x26b   :  { %4258 = vmatprep.subr.bf16.mxu1 %v5611_v34  ;;  %v967_v34 = vld [vmem:[%s7974_s5 + $0xab0] sm:$0xff]  ;;  %v5277_v49 = vcombine.high %v711_v25, %v719_v32 }
 0x26c   :  { %v5533_v50 = vcombine.high %v967_v34, %v975_v4 }
 0x26d   :  { %4218 = vmatpush2.bf16.msra.mxu0 %v5354_v39 }
 0x26e   :  { %v5794_v54 = vpop.eup %5793  ;;  %4259 = vmatpush2.bf16.msra.mxu1 %v5610_v19  ;;  %4219 = vmatprep.subr.bf16.mxu0 %v5339_v20 }
 0x26f   :  { %v4763_v7 = vmul.f32 %v5794_v54, %v7247_v59  ;;  %4260 = vmatprep.subr.bf16.mxu1 %v5595_v41  ;;  %v4892_v59 = vrot.slane %v7120_v6, %v6268_v18  ;;  %v5309_v6 = vcombine.high %v743_v12, %v751_v58  ;;  %v5548_v41 = vcombine.low %v983_v26, %v991_v29 }
 0x270   :  { %v5796_v60 = vpop.eup %5795 }
 0x271   :  { %v4861_v0 = vmul.f32 %v4790_v51, %v4763_v7  ;;  %v4764_v1 = vmul.f32 %v5796_v60, %v7258_v13  ;;  %4220 = vmatpush2.bf16.msra.mxu0 %v5338_v53  ;;  %v727_v13 = vld [vmem:[%s7974_s5 + $0x330] sm:$0xff] }
 0x272   :  { %4261 = vmatpush2.bf16.msra.mxu1 %v5594_v55  ;;  %4221 = vmatprep.subr.bf16.mxu0 %v5323_v57  ;;  %v5293_v31 = vcombine.high %v727_v13, %v735_v24  ;;  %v5292_v36 = vcombine.low %v727_v13, %v735_v24  ;;  %v695_v57 = vld [vmem:[%s7974_s5 + $0x230] sm:$0xff] }
 0x273   :  { %v4959_v9 = vadd.f32 %v4888_v8, %v4861_v0  ;;  %v4862_v16 = vmul.f32 %v4794_v10, %v4764_v1  ;;  %4262 = vmatprep.subr.bf16.mxu1 %v5579_v11  ;;  %v951_v8 = vld [vmem:[%s7974_s5 + $0xa30] sm:$0xff]  ;;  %v5532_v0 = vcombine.low %v967_v34, %v975_v4  ;;  %v5261_v1 = vcombine.high %v695_v57, %v703_v48 }
 0x274   :  { %v959_v10 = vld [vmem:[%s7974_s5 + $0xa70] sm:$0xff] }
 0x275   :  { %v4960_v61 = vadd.f32 %v4892_v59, %v4862_v16  ;;  %4222 = vmatpush2.bf16.msra.mxu0 %v5322_v2  ;;  %v4975_v30 = vmax.f32 %v4959_v9, 0.0  ;;  %v5276_v59 = vcombine.low %v711_v25, %v719_v32  ;;  %v679_v9 = vld [vmem:[%s7974_s5 + $0x1b0] sm:$0xff]  ;;  %v5516_v29 = vcombine.low %v951_v8, %v959_v10 }
 0x276   :  { %4263 = vmatpush2.bf16.msra.mxu1 %v5578_v56  ;;  %4273 = vmatprep.subr.bf16.mxu0 %v5309_v6  ;;  %v5517_v6 = vcombine.high %v951_v8, %v959_v10  ;;  %v687_v16 = vld [vmem:[%s7974_s5 + $0x1f0] sm:$0xff] }
 0x277   :  { %v4976_v33 = vmax.f32 %v4960_v61, 0.0  ;;  %4314 = vmatprep.subr.bf16.mxu1 %v5565_v21  ;;  %v935_v24 = vld [vmem:[%s7974_s5 + $0x9b0] sm:$0xff]  ;;  %v5244_v4 = vcombine.low %v679_v9, %v687_v16 }
 0x278   :  { %v3979_v35 = vpop.f32.mrf.mxu0  ;;  %4224 = vmatmul.mubr.bf16.vlgmr.msra.gmra.mxu0 %v6315_v43  ;;  %v943_v61 = vld [vmem:[%s7974_s5 + $0x9f0] sm:$0xff] }
 0x279   :  { %v5697_v39 = vpack.c.bf16 %v4976_v33, %v4975_v30  ;;  %v3980_v19 = vadd.f32 %v3979_v35, %v1160_v28  ;;  %v4020_v20 = vpop.f32.mrf.mxu1  ;;  %4265 = vmatmul.mubr.bf16.vlgmr.msra.gmra.mxu1 %v6319_v46  ;;  %4274 = vmatpush1.bf16.msra.mxu0 %v5308_v63  ;;  %v5260_v28 = vcombine.low %v695_v57, %v703_v48  ;;  %v663_v30 = vld [vmem:[%s7974_s5 + $0x130] sm:$0xff] }
 0x27a   :  { %4305 = vmatprep.mubr.bf16.mxu0 %v6307_v40  ;;  %4315 = vmatpush1.bf16.msra.mxu1 %v5564_v3  ;;  %v3981_v42 = vpop.f32.mrf.mxu0  ;;  %v5245_v3 = vcombine.high %v679_v9, %v687_v16  ;;  %v5501_v25 = vcombine.high %v935_v24, %v943_v61  ;;  %v671_v33 = vld [vmem:[%s7974_s5 + $0x170] sm:$0xff] }
 0x27b   :  { %v5038_v51 = vrot.slane %v5697_v39, %v5986_v45  ;;  %v7427_v53 = vadd.f32 %v4020_v20, %v3980_v19  ;;  %4346 = vmatprep.mubr.bf16.mxu1 %v6317_v44  ;;  %v3982_v54 = vadd.f32 %v3981_v42, %v1164_v23  ;;  %v4022_v55 = vpop.f32.mrf.mxu1  ;;  %4275 = vmatprep.subr.bf16.mxu0 %v5293_v31  ;;  %v919_v32 = vld [vmem:[%s7974_s5 + $0x930] sm:$0xff] }
 0x27c   :  { %v3983_v7 = vpop.f32.mrf.mxu0  ;;  %4316 = vmatprep.subr.bf16.mxu1 %v5549_v37  ;;  %v927_v34 = vld [vmem:[%s7974_s5 + $0x970] sm:$0xff]  ;;  %v5500_v37 = vcombine.low %v935_v24, %v943_v61  ;;  %v5229_v39 = vcombine.high %v663_v30, %v671_v33 }
 0x27d   :  { %v7442_v11 = vcombine.low %v5031_v47, %v5038_v51  ;;  %v4469_v12 = vsel %vm481_vm2, %v7427_v53, 0.0  ;;  %v7446_v58 = vadd.f32 %v4022_v55, %v3982_v54  ;;  %v4024_v60 = vpop.f32.mrf.mxu1  ;;  %4276 = vmatpush1.bf16.msra.mxu0 %v5292_v36  ;;  %v5485_v19 = vcombine.high %v919_v32, %v927_v34  ;;  %v647_v20 = vld [vmem:[%s7974_s5 + $0xb0] sm:$0xff] }
 0x27e   :  { %v4470_v62 = vrot.slane %v4469_v12, 4  ;;  %4317 = vmatpush1.bf16.msra.mxu1 %v5548_v41  ;;  %v3984_v52 = vpop.f32.mrf.mxu0  ;;  %4277 = vmatprep.subr.bf16.mxu0 %v5277_v49  ;;  %v655_v41 = vld [vmem:[%s7974_s5 + $0xf0] sm:$0xff]  ;;  %v5228_v51 = vcombine.low %v663_v30, %v671_v33  ;;  %v5484_v57 = vcombine.low %v919_v32, %v927_v34 }
 0x27f   :  { %v4476_v2 = vsel %vm481_vm2, %v7446_v58, 0.0  ;;  %v4025_v56 = vpop.f32.mrf.mxu1  ;;  %4318 = vmatprep.subr.bf16.mxu1 %v5533_v50  ;;  %v903_v49 = vld [vmem:[%s7974_s5 + $0x8b0] sm:$0xff]  ;;  %v5213_v48 = vcombine.high %v647_v20, %v655_v41  ;;  %v5212_v52 = vcombine.low %v647_v20, %v655_v41 }
 0x280   :  { %v4471_v21 = vadd.f32 %v4470_v62, %v4469_v12  ;;  %v4477_v13 = vrot.slane %v4476_v2, 4  ;;  %v911_v50 = vld [vmem:[%s7974_s5 + $0x8f0] sm:$0xff] }
 0x281   :  { %4278 = vmatpush1.bf16.msra.mxu0 %v5276_v59  ;;  %v5469_v7 = vcombine.high %v903_v49, %v911_v50  ;;  %v631_v8 = vld [vmem:[%s7974_s5 + $0x30] sm:$0xff] }
 0x282   :  { %v4472_v63 = vrot.slane %v4471_v21, 2  ;;  %v4478_v26 = vadd.f32 %v4477_v13, %v4476_v2  ;;  %4319 = vmatpush1.bf16.msra.mxu1 %v5532_v0  ;;  %4279 = vmatprep.subr.bf16.mxu0 %v5261_v1  ;;  %v639_v10 = vld [vmem:[%s7974_s5 + $0x70] sm:$0xff]  ;;  %v5468_v0 = vcombine.low %v903_v49, %v911_v50 }
 0x283   :  { %4320 = vmatprep.subr.bf16.mxu1 %v5517_v6  ;;  %v887_v59 = vld [vmem:[%s7974_s5 + $0x830] sm:$0xff]  ;;  %v5196_v61 = vcombine.low %v631_v8, %v639_v10 }
 0x284   :  { %v4473_v23 = vadd.f32 %v4472_v63, %v4471_v21  ;;  %v4479_v31 = vrot.slane %v4478_v26, 2  ;;  %v895_v62 = vld [vmem:[%s7974_s5 + $0x870] sm:$0xff] }
 0x285   :  { %4280 = vmatpush1.bf16.msra.mxu0 %v5260_v28  ;;  %v5453_v56 = vcombine.high %v887_v59, %v895_v62  ;;  %v871_v6 = vld [vmem:[%s7974_s5 + $0x7b0] sm:$0xff]  ;;  %v5452_v63 = vcombine.low %v887_v59, %v895_v62 }
 0x286   :  { %v4474_v35 = vrot.slane %v4473_v23, 1  ;;  %v4480_v36 = vadd.f32 %v4479_v31, %v4478_v26  ;;  %4321 = vmatpush1.bf16.msra.mxu1 %v5516_v29  ;;  %4281 = vmatprep.subr.bf16.mxu0 %v5245_v3  ;;  %v879_v9 = vld [vmem:[%s7974_s5 + $0x7f0] sm:$0xff] }
 0x287   :  { %4322 = vmatprep.subr.bf16.mxu1 %v5501_v25  ;;  %v1135_v13 = vld [vmem:[%s7974_s5 + $0xff0] sm:$0xff]  ;;  %v5437_v26 = vcombine.high %v871_v6, %v879_v9 }
 0x288   :  { %v4475_v47 = vadd.f32 %v4474_v35, %v4473_v23  ;;  %v4481_v42 = vrot.slane %v4480_v36, 1  ;;  %v855_v30 = vld [vmem:[%s7974_s5 + $0x730] sm:$0xff] }
 0x289   :  { %4282 = vmatpush1.bf16.msra.mxu0 %v5244_v4  ;;  %v863_v33 = vld [vmem:[%s7974_s5 + $0x770] sm:$0xff]  ;;  %v5436_v4 = vcombine.low %v871_v6, %v879_v9 }
 0x28a   :  { %v4557_v54 = vmul.f32 0.5, %v4475_v47  ;;  %v4482_v55 = vadd.f32 %v4481_v42, %v4480_v36  ;;  %4323 = vmatpush1.bf16.msra.mxu1 %v5500_v37  ;;  %4283 = vmatprep.subr.bf16.mxu0 %v5229_v39  ;;  %v1111_v23 = vld [vmem:[%s7974_s5 + $0xf30] sm:$0xff]  ;;  %v5421_v36 = vcombine.high %v855_v30, %v863_v33 }
 0x28b   :  { %4324 = vmatprep.subr.bf16.mxu1 %v5485_v19  ;;  %v1119_v31 = vld [vmem:[%s7974_s5 + $0xf70] sm:$0xff] }
 0x28c   :  { %v7493_v12 = vsub.f32 %v7427_v53, %v4557_v54  ;;  %v4558_v60 = vmul.f32 0.5, %v4482_v55  ;;  %v5197_v53 = vcombine.high %v631_v8, %v639_v10  ;;  %v5677_v19 = vcombine.high %v1111_v23, %v1119_v31  ;;  %v839_v20 = vld [vmem:[%s7974_s5 + $0x6b0] sm:$0xff] }
 0x28d   :  { %4284 = vmatpush1.bf16.msra.mxu0 %v5228_v51  ;;  %v847_v41 = vld [vmem:[%s7974_s5 + $0x6f0] sm:$0xff]  ;;  %v5420_v51 = vcombine.low %v855_v30, %v863_v33  ;;  %v5676_v54 = vcombine.low %v1111_v23, %v1119_v31 }
 0x28e   :  { %v4589_v1 = vmul.f32 %v7493_v12, %v7493_v12  ;;  %v7504_v2 = vsub.f32 %v7446_v58, %v4558_v60  ;;  %4325 = vmatpush1.bf16.msra.mxu1 %v5484_v57  ;;  %4285 = vmatprep.subr.bf16.mxu0 %v5213_v48  ;;  %v1127_v58 = vld [vmem:[%s7974_s5 + $0xfb0] sm:$0xff]  ;;  %v5405_v55 = vcombine.high %v839_v20, %v847_v41 }
 0x28f   :  { %4326 = vmatprep.subr.bf16.mxu1 %v5469_v7  ;;  %v5693_v25 = vcombine.high %v1127_v58, %v1135_v13  ;;  %v5692_v35 = vcombine.low %v1127_v58, %v1135_v13  ;;  %v1095_v47 = vld [vmem:[%s7974_s5 + $0xeb0] sm:$0xff] }
 0x290   :  { %v4629_v16 = vsel %vm481_vm2, %v4589_v1, 0.0  ;;  %v4590_v21 = vmul.f32 %v7504_v2, %v7504_v2  ;;  %v1103_v42 = vld [vmem:[%s7974_s5 + $0xef0] sm:$0xff] }
 0x291   :  { %v4630_v24 = vrot.slane %v4629_v16, 4  ;;  %4286 = vmatpush1.bf16.msra.mxu0 %v5212_v52  ;;  %v5661_v7 = vcombine.high %v1095_v47, %v1103_v42  ;;  %v823_v8 = vld [vmem:[%s7974_s5 + $0x630] sm:$0xff]  ;;  %v5660_v1 = vcombine.low %v1095_v47, %v1103_v42 }
 0x292   :  { %v4636_v28 = vsel %vm481_vm2, %v4590_v21, 0.0  ;;  %4327 = vmatpush1.bf16.msra.mxu1 %v5468_v0  ;;  %4287 = vmatprep.subr.bf16.mxu0 %v5197_v53  ;;  %v831_v10 = vld [vmem:[%s7974_s5 + $0x670] sm:$0xff]  ;;  %v5404_v0 = vcombine.low %v839_v20, %v847_v41 }
 0x293   :  { %v4631_v29 = vadd.f32 %v4630_v24, %v4629_v16  ;;  %v4637_v3 = vrot.slane %v4636_v28, 4  ;;  %4328 = vmatprep.subr.bf16.mxu1 %v5453_v56  ;;  %v1079_v60 = vld [vmem:[%s7974_s5 + $0xe30] sm:$0xff]  ;;  %v5389_v53 = vcombine.high %v823_v8, %v831_v10 }
 0x294   :  { %v1087_v59 = vld [vmem:[%s7974_s5 + $0xe70] sm:$0xff] }
 0x295   :  { %v4632_v32 = vrot.slane %v4631_v29, 2  ;;  %v4638_v34 = vadd.f32 %v4637_v3, %v4636_v28  ;;  %4288 = vmatpush1.bf16.msra.mxu0 %v5196_v61  ;;  %v5645_v9 = vcombine.high %v1079_v60, %v1087_v59  ;;  %v807_v16 = vld [vmem:[%s7974_s5 + $0x5b0] sm:$0xff]  ;;  %v5388_v61 = vcombine.low %v823_v8, %v831_v10  ;;  %v7617_v8 = vld [vmem:[%s7980_s8] sm:$0xff] }
 0x296   :  { %4329 = vmatpush1.bf16.msra.mxu1 %v5452_v63  ;;  %4289 = vmatprep.subr.bf16.mxu0 %v5437_v26  ;;  %v815_v21 = vld [vmem:[%s7974_s5 + $0x5f0] sm:$0xff]  ;;  %v5644_v28 = vcombine.low %v1079_v60, %v1087_v59  ;;  %v4896_v10 = vrot.slane %v7617_v8, %v7383_v5 }
 0x297   :  { %v4633_v37 = vadd.f32 %v4632_v32, %v4631_v29  ;;  %v4639_v39 = vrot.slane %v4638_v34, 2  ;;  %4330 = vmatprep.subr.bf16.mxu1 %v5693_v25  ;;  %v1063_v58 = vld [vmem:[%s7974_s5 + $0xdb0] sm:$0xff]  ;;  %v5373_v63 = vcombine.high %v807_v16, %v815_v21  ;;  %v5372_v33 = vcombine.low %v807_v16, %v815_v21 }
 0x298   :  { %v1071_v13 = vld [vmem:[%s7974_s5 + $0xdf0] sm:$0xff]  ;;  %v7639_v16 = vsub.s32 6, %v5977_v38 }
 0x299   :  { %v4634_v49 = vrot.slane %v4633_v37, 1  ;;  %v4640_v50 = vadd.f32 %v4639_v39, %v4638_v34  ;;  %4290 = vmatpush2.bf16.msra.mxu0 %v5436_v4  ;;  %v5629_v26 = vcombine.high %v1063_v58, %v1071_v13  ;;  %v791_v29 = vld [vmem:[%s7974_s5 + $0x530] sm:$0xff]  ;;  %v5628_v23 = vcombine.low %v1063_v58, %v1071_v13 }
 0x29a   :  { %4331 = vmatpush2.bf16.msra.mxu1 %v5692_v35  ;;  %4291 = vmatprep.subr.bf16.mxu0 %v5421_v36  ;;  %v799_v3 = vld [vmem:[%s7974_s5 + $0x570] sm:$0xff] }
 0x29b   :  { %v4635_v57 = vadd.f32 %v4634_v49, %v4633_v37  ;;  %v4641_v48 = vrot.slane %v4640_v50, 1  ;;  %4332 = vmatprep.subr.bf16.mxu1 %v5677_v19  ;;  %v1047_v25 = vld [vmem:[%s7974_s5 + $0xd30] sm:$0xff]  ;;  %v5357_v31 = vcombine.high %v791_v29, %v799_v3  ;;  %v5356_v37 = vcombine.low %v791_v29, %v799_v3 }
 0x29c   :  { %v1055_v30 = vld [vmem:[%s7974_s5 + $0xd70] sm:$0xff]  ;;  %v1168_v29 = vrot.slane %v7397_v27, %v7639_v16 }
 0x29d   :  { %v4717_v62 = vmul.f32 0.5, %v4635_v57  ;;  %v4642_v52 = vadd.f32 %v4641_v48, %v4640_v50  ;;  %4292 = vmatpush2.bf16.msra.mxu0 %v5420_v51  ;;  %v5613_v32 = vcombine.high %v1047_v25, %v1055_v30  ;;  %v775_v34 = vld [vmem:[%s7974_s5 + $0x4b0] sm:$0xff]  ;;  %v5612_v39 = vcombine.low %v1047_v25, %v1055_v30  ;;  %v7609_v50 = vld [vmem:[%s7979_s7] sm:$0xff]  ;;  %v984_v25 = vld [vmem:[%s7974_s5 + $0xb38] sm:$0xff] }
 0x29e   :  { %4333 = vmatpush2.bf16.msra.mxu1 %v5676_v54  ;;  %4293 = vmatprep.subr.bf16.mxu0 %v5405_v55  ;;  %v783_v4 = vld [vmem:[%s7974_s5 + $0x4f0] sm:$0xff]  ;;  %v4798_v51 = vrot.slane %v7609_v50, %v7383_v5  ;;  %v4802_v60 = vrot.slane %v7609_v50, %v7386_v22 }
 0x29f   :  { %v4733_v56 = vadd.f32 1e-05, %v4717_v62  ;;  %v4718_v6 = vmul.f32 0.5, %v4642_v52  ;;  %4334 = vmatprep.subr.bf16.mxu1 %v5661_v7  ;;  %v1031_v35 = vld [vmem:[%s7974_s5 + $0xcb0] sm:$0xff]  ;;  %v5341_v19 = vcombine.high %v775_v34, %v783_v4  ;;  %v5340_v54 = vcombine.low %v775_v34, %v783_v4  ;;  %v744_v62 = vld [vmem:[%s7974_s5 + $0x3b8] sm:$0xff] }
 0x2a0   :  { %v1039_v36 = vld [vmem:[%s7974_s5 + $0xcf0] sm:$0xff]  ;;  %v712_v34 = vld [vmem:[%s7974_s5 + $0x2b8] sm:$0xff] }
 0x2a1   :  { %5797 = vrsqrt.f32 %v4733_v56  ;;  %v4734_v24 = vadd.f32 1e-05, %v4718_v6  ;;  %4294 = vmatpush2.bf16.msra.mxu0 %v5404_v0  ;;  %v5597_v20 = vcombine.high %v1031_v35, %v1039_v36  ;;  %v759_v41 = vld [vmem:[%s7974_s5 + $0x430] sm:$0xff]  ;;  %v5596_v57 = vcombine.low %v1031_v35, %v1039_v36  ;;  %v720_v4 = vld [vmem:[%s7974_s5 + $0x2f8] sm:$0xff] }
 0x2a2   :  { %4335 = vmatpush2.bf16.msra.mxu1 %v5660_v1  ;;  %4295 = vmatprep.subr.bf16.mxu0 %v5389_v53  ;;  %v767_v47 = vld [vmem:[%s7974_s5 + $0x470] sm:$0xff]  ;;  %v4900_v0 = vrot.slane %v7617_v8, %v7386_v22  ;;  %v1000_v1 = vld [vmem:[%s7974_s5 + $0xbb8] sm:$0xff] }
 0x2a3   :  { %5799 = vrsqrt.f32 %v4734_v24  ;;  %4336 = vmatprep.subr.bf16.mxu1 %v5645_v9  ;;  %v1015_v42 = vld [vmem:[%s7974_s5 + $0xc30] sm:$0xff]  ;;  %v5325_v48 = vcombine.high %v759_v41, %v767_v47  ;;  %v1008_v53 = vld [vmem:[%s7974_s5 + $0xbf8] sm:$0xff]  ;;  %v5324_v9 = vcombine.low %v759_v41, %v767_v47 }
 0x2a4   :  { %v1023_v49 = vld [vmem:[%s7974_s5 + $0xc70] sm:$0xff]  ;;  %v5566_v30 = vcombine.low %v1000_v1, %v1008_v53 }
 0x2a5   :  { %4296 = vmatpush2.bf16.msra.mxu0 %v5388_v61  ;;  %v5581_v59 = vcombine.high %v1015_v42, %v1023_v49  ;;  %v5580_v21 = vcombine.low %v1015_v42, %v1023_v49  ;;  %v5567_v61 = vcombine.high %v1000_v1, %v1008_v53  ;;  %v5279_v49 = vcombine.high %v712_v34, %v720_v4 }
 0x2a6   :  { %4337 = vmatpush2.bf16.msra.mxu1 %v5644_v28  ;;  %4297 = vmatprep.subr.bf16.mxu0 %v5373_v63  ;;  %v7642_v28 = vsub.s32 7, %v5977_v38  ;;  %v736_v63 = vld [vmem:[%s7974_s5 + $0x378] sm:$0xff] }
 0x2a7   :  { %4338 = vmatprep.subr.bf16.mxu1 %v5629_v26  ;;  %v992_v38 = vld [vmem:[%s7974_s5 + $0xb78] sm:$0xff] }
 0x2a8   :  { %v5551_v36 = vcombine.high %v984_v25, %v992_v38  ;;  %v5550_v42 = vcombine.low %v984_v25, %v992_v38 }
 0x2a9   :  { %4298 = vmatpush2.bf16.msra.mxu0 %v5372_v33 }
 0x2aa   :  { %4339 = vmatpush2.bf16.msra.mxu1 %v5628_v23  ;;  %4299 = vmatprep.subr.bf16.mxu0 %v5357_v31  ;;  %v1172_v31 = vrot.slane %v7397_v27, %v7642_v28  ;;  %v976_v27 = vld [vmem:[%s7974_s5 + $0xaf8] sm:$0xff] }
 0x2ab   :  { %4340 = vmatprep.subr.bf16.mxu1 %v5613_v32 }
 0x2ad   :  { %4300 = vmatpush2.bf16.msra.mxu0 %v5356_v37  ;;  %v968_v37 = vld [vmem:[%s7974_s5 + $0xab8] sm:$0xff] }
 0x2ae   :  { %v5798_v55 = vpop.eup %5797  ;;  %4341 = vmatpush2.bf16.msra.mxu1 %v5612_v39  ;;  %4301 = vmatprep.subr.bf16.mxu0 %v5341_v19  ;;  %v5534_v1 = vcombine.low %v968_v37, %v976_v27 }
 0x2af   :  { %v4765_v7 = vmul.f32 %v5798_v55, %v7493_v12  ;;  %4342 = vmatprep.subr.bf16.mxu1 %v5597_v20  ;;  %v752_v12 = vld [vmem:[%s7974_s5 + $0x3f8] sm:$0xff] }
 0x2b0   :  { %v5800_v52 = vpop.eup %5799  ;;  %v5311_v58 = vcombine.high %v744_v62, %v752_v12  ;;  %v5310_v3 = vcombine.low %v744_v62, %v752_v12  ;;  %v5278_v12 = vcombine.low %v712_v34, %v720_v4  ;;  %v928_v34 = vld [vmem:[%s7974_s5 + $0x978] sm:$0xff] }
 0x2b1   :  { %v4863_v56 = vmul.f32 %v4798_v51, %v4765_v7  ;;  %v4766_v6 = vmul.f32 %v5800_v52, %v7504_v2  ;;  %4302 = vmatpush2.bf16.msra.mxu0 %v5340_v54  ;;  %v728_v2 = vld [vmem:[%s7974_s5 + $0x338] sm:$0xff] }
 0x2b2   :  { %4343 = vmatpush2.bf16.msra.mxu1 %v5596_v57  ;;  %4303 = vmatprep.subr.bf16.mxu0 %v5325_v48  ;;  %v5295_v32 = vcombine.high %v728_v2, %v736_v63  ;;  %v5294_v41 = vcombine.low %v728_v2, %v736_v63  ;;  %v5535_v57 = vcombine.high %v968_v37, %v976_v27  ;;  %v696_v48 = vld [vmem:[%s7974_s5 + $0x238] sm:$0xff] }
 0x2b3   :  { %v4961_v13 = vadd.f32 %v4896_v10, %v4863_v56  ;;  %v4864_v24 = vmul.f32 %v4802_v60, %v4766_v6  ;;  %4344 = vmatprep.subr.bf16.mxu1 %v5581_v59  ;;  %v952_v10 = vld [vmem:[%s7974_s5 + $0xa38] sm:$0xff] }
 0x2b4   :  { %v944_v2 = vld [vmem:[%s7974_s5 + $0x9f8] sm:$0xff] }
 0x2b5   :  { %v4962_v26 = vadd.f32 %v4900_v0, %v4864_v24  ;;  %4304 = vmatpush2.bf16.msra.mxu0 %v5324_v9  ;;  %v4977_v33 = vmax.f32 %v4961_v13, 0.0 }
 0x2b6   :  { %4345 = vmatpush2.bf16.msra.mxu1 %v5580_v21  ;;  %4355 = vmatprep.subr.bf16.mxu0 %v5311_v58  ;;  %v680_v21 = vld [vmem:[%s7974_s5 + $0x1b8] sm:$0xff] }
 0x2b7   :  { %v4978_v23 = vmax.f32 %v4962_v26, 0.0  ;;  %4396 = vmatprep.subr.bf16.mxu1 %v5567_v61  ;;  %v688_v58 = vld [vmem:[%s7974_s5 + $0x1f8] sm:$0xff] }
 0x2b8   :  { %v4061_v35 = vpop.f32.mrf.mxu0  ;;  %4306 = vmatmul.mubr.bf16.vlgmr.msra.gmra.mxu0 %v6315_v43  ;;  %v936_v61 = vld [vmem:[%s7974_s5 + $0x9b8] sm:$0xff]  ;;  %v5247_v25 = vcombine.high %v680_v21, %v688_v58  ;;  %v5246_v4 = vcombine.low %v680_v21, %v688_v58 }
 0x2b9   :  { %v7673_v39 = vpack.c.bf16 %v4978_v23, %v4977_v33  ;;  %v4062_v19 = vadd.f32 %v4061_v35, %v1168_v29  ;;  %v4102_v20 = vpop.f32.mrf.mxu1  ;;  %4347 = vmatmul.mubr.bf16.vlgmr.msra.gmra.mxu1 %v6319_v46  ;;  %4356 = vmatpush1.bf16.msra.mxu0 %v5310_v3  ;;  %v5503_v38 = vcombine.high %v936_v61, %v944_v2  ;;  %v672_v33 = vld [vmem:[%s7974_s5 + $0x178] sm:$0xff] }
 0x2ba   :  { %4387 = vmatprep.mubr.bf16.mxu0 %v6307_v40  ;;  %4397 = vmatpush1.bf16.msra.mxu1 %v5566_v30  ;;  %v4063_v47 = vpop.f32.mrf.mxu0  ;;  %v704_v40 = vld [vmem:[%s7974_s5 + $0x278] sm:$0xff]  ;;  %v5502_v37 = vcombine.low %v936_v61, %v944_v2 }
 0x2bb   :  { %v7677_v51 = vadd.f32 %v4102_v20, %v4062_v19  ;;  %4428 = vmatprep.mubr.bf16.mxu1 %v6317_v44  ;;  %v4064_v54 = vadd.f32 %v4063_v47, %v1172_v31  ;;  %v4104_v55 = vpop.f32.mrf.mxu1  ;;  %4357 = vmatprep.subr.bf16.mxu0 %v5295_v32  ;;  %v960_v44 = vld [vmem:[%s7974_s5 + $0xa78] sm:$0xff]  ;;  %v5263_v53 = vcombine.high %v696_v48, %v704_v40 }
 0x2bc   :  { %v4065_v7 = vpop.f32.mrf.mxu0  ;;  %4398 = vmatprep.subr.bf16.mxu1 %v5551_v36  ;;  %v5519_v9 = vcombine.high %v952_v10, %v960_v44  ;;  %v5262_v63 = vcombine.low %v696_v48, %v704_v40  ;;  %v5518_v3 = vcombine.low %v952_v10, %v960_v44  ;;  %v664_v30 = vld [vmem:[%s7974_s5 + $0x138] sm:$0xff] }
 0x2bd   :  { %v4483_v60 = vsel %vm481_vm2, %v7677_v51, 0.0  ;;  %v7694_v59 = vadd.f32 %v4104_v55, %v4064_v54  ;;  %v4106_v62 = vpop.f32.mrf.mxu1  ;;  %4358 = vmatpush1.bf16.msra.mxu0 %v5294_v41  ;;  %v920_v32 = vld [vmem:[%s7974_s5 + $0x938] sm:$0xff]  ;;  %v5231_v27 = vcombine.high %v664_v30, %v672_v33  ;;  %v5230_v55 = vcombine.low %v664_v30, %v672_v33 }
 0x2be   :  { %v4484_v52 = vrot.slane %v4483_v60, 4  ;;  %4399 = vmatpush1.bf16.msra.mxu1 %v5550_v42  ;;  %v4066_v0 = vpop.f32.mrf.mxu0  ;;  %4359 = vmatprep.subr.bf16.mxu0 %v5279_v49  ;;  %v5487_v19 = vcombine.high %v920_v32, %v928_v34  ;;  %v648_v20 = vld [vmem:[%s7974_s5 + $0xb8] sm:$0xff]  ;;  %v5486_v40 = vcombine.low %v920_v32, %v928_v34 }
 0x2bf   :  { %v4490_v56 = vsel %vm481_vm2, %v7694_v59, 0.0  ;;  %v4107_v6 = vpop.f32.mrf.mxu1  ;;  %4400 = vmatprep.subr.bf16.mxu1 %v5535_v57  ;;  %v656_v41 = vld [vmem:[%s7974_s5 + $0xf8] sm:$0xff] }
 0x2c0   :  { %v4485_v13 = vadd.f32 %v4484_v52, %v4483_v60  ;;  %v4491_v24 = vrot.slane %v4490_v56, 4  ;;  %v904_v49 = vld [vmem:[%s7974_s5 + $0x8b8] sm:$0xff]  ;;  %v5215_v7 = vcombine.high %v648_v20, %v656_v41 }
 0x2c1   :  { %4360 = vmatpush1.bf16.msra.mxu0 %v5278_v12  ;;  %v912_v54 = vld [vmem:[%s7974_s5 + $0x8f8] sm:$0xff] }
 0x2c2   :  { %v4486_v26 = vrot.slane %v4485_v13, 2  ;;  %v4492_v29 = vadd.f32 %v4491_v24, %v4490_v56  ;;  %4401 = vmatpush1.bf16.msra.mxu1 %v5534_v1  ;;  %4361 = vmatprep.subr.bf16.mxu0 %v5263_v53  ;;  %v5471_v10 = vcombine.high %v904_v49, %v912_v54  ;;  %v632_v44 = vld [vmem:[%s7974_s5 + $0x38] sm:$0xff]  ;;  %v5214_v1 = vcombine.low %v648_v20, %v656_v41 }
 0x2c3   :  { %4402 = vmatprep.subr.bf16.mxu1 %v5519_v9  ;;  %v640_v60 = vld [vmem:[%s7974_s5 + $0x78] sm:$0xff]  ;;  %v5470_v53 = vcombine.low %v904_v49, %v912_v54 }
 0x2c4   :  { %v4487_v23 = vadd.f32 %v4486_v26, %v4485_v13  ;;  %v4493_v31 = vrot.slane %v4492_v29, 2  ;;  %v888_v52 = vld [vmem:[%s7974_s5 + $0x838] sm:$0xff] }
 0x2c5   :  { %4362 = vmatpush1.bf16.msra.mxu0 %v5262_v63  ;;  %v896_v0 = vld [vmem:[%s7974_s5 + $0x878] sm:$0xff]  ;;  %v5198_v63 = vcombine.low %v632_v44, %v640_v60 }
 0x2c6   :  { %v4488_v35 = vrot.slane %v4487_v23, 1  ;;  %v4494_v36 = vadd.f32 %v4493_v31, %v4492_v29  ;;  %4403 = vmatpush1.bf16.msra.mxu1 %v5518_v3  ;;  %4363 = vmatprep.subr.bf16.mxu0 %v5247_v25  ;;  %v5455_v9 = vcombine.high %v888_v52, %v896_v0  ;;  %v872_v21 = vld [vmem:[%s7974_s5 + $0x7b8] sm:$0xff]  ;;  %v5454_v29 = vcombine.low %v888_v52, %v896_v0 }
 0x2c7   :  { %4404 = vmatprep.subr.bf16.mxu1 %v5503_v38  ;;  %v880_v58 = vld [vmem:[%s7974_s5 + $0x7f8] sm:$0xff] }
 0x2c8   :  { %v4489_v47 = vadd.f32 %v4488_v35, %v4487_v23  ;;  %v4495_v42 = vrot.slane %v4494_v36, 1  ;;  %v1136_v61 = vld [vmem:[%s7974_s5 + $0xff8] sm:$0xff]  ;;  %v5439_v3 = vcombine.high %v872_v21, %v880_v58  ;;  %v5438_v35 = vcombine.low %v872_v21, %v880_v58 }
 0x2c9   :  { %4364 = vmatpush1.bf16.msra.mxu0 %v5246_v4  ;;  %v856_v33 = vld [vmem:[%s7974_s5 + $0x738] sm:$0xff] }
 0x2ca   :  { %v4559_v57 = vmul.f32 0.5, %v4489_v47  ;;  %v4496_v48 = vadd.f32 %v4495_v42, %v4494_v36  ;;  %4405 = vmatpush1.bf16.msra.mxu1 %v5502_v37  ;;  %4365 = vmatprep.subr.bf16.mxu0 %v5231_v27  ;;  %v864_v23 = vld [vmem:[%s7974_s5 + $0x778] sm:$0xff] }
 0x2cb   :  { %4406 = vmatprep.subr.bf16.mxu1 %v5487_v19  ;;  %v1112_v31 = vld [vmem:[%s7974_s5 + $0xf38] sm:$0xff]  ;;  %v5423_v37 = vcombine.high %v856_v33, %v864_v23 }
 0x2cc   :  { %v7741_v62 = vsub.f32 %v7677_v51, %v4559_v57  ;;  %v4560_v12 = vmul.f32 0.5, %v4496_v48  ;;  %v5199_v51 = vcombine.high %v632_v44, %v640_v60  ;;  %v1120_v32 = vld [vmem:[%s7974_s5 + $0xf78] sm:$0xff]  ;;  %v5422_v57 = vcombine.low %v856_v33, %v864_v23 }
 0x2cd   :  { %4366 = vmatpush1.bf16.msra.mxu0 %v5230_v55  ;;  %v5679_v20 = vcombine.high %v1112_v31, %v1120_v32  ;;  %v840_v41 = vld [vmem:[%s7974_s5 + $0x6b8] sm:$0xff]  ;;  %v5678_v48 = vcombine.low %v1112_v31, %v1120_v32 }
 0x2ce   :  { %v4591_v56 = vmul.f32 %v7741_v62, %v7741_v62  ;;  %v7752_v6 = vsub.f32 %v7694_v59, %v4560_v12  ;;  %4407 = vmatpush1.bf16.msra.mxu1 %v5486_v40  ;;  %4367 = vmatprep.subr.bf16.mxu0 %v5215_v7  ;;  %v1128_v59 = vld [vmem:[%s7974_s5 + $0xfb8] sm:$0xff] }
 0x2cf   :  { %4408 = vmatprep.subr.bf16.mxu1 %v5471_v10  ;;  %v5695_v30 = vcombine.high %v1128_v59, %v1136_v61  ;;  %v5694_v36 = vcombine.low %v1128_v59, %v1136_v61  ;;  %v848_v47 = vld [vmem:[%s7974_s5 + $0x6f8] sm:$0xff] }
 0x2d0   :  { %v4643_v13 = vsel %vm481_vm2, %v4591_v56, 0.0  ;;  %v4592_v24 = vmul.f32 %v7752_v6, %v7752_v6  ;;  %v1096_v42 = vld [vmem:[%s7974_s5 + $0xeb8] sm:$0xff]  ;;  %v5407_v40 = vcombine.high %v840_v41, %v848_v47  ;;  %v5406_v56 = vcombine.low %v840_v41, %v848_v47 }
 0x2d1   :  { %v4644_v2 = vrot.slane %v4643_v13, 4  ;;  %4368 = vmatpush1.bf16.msra.mxu0 %v5214_v1  ;;  %v1104_v49 = vld [vmem:[%s7974_s5 + $0xef8] sm:$0xff] }
 0x2d2   :  { %v4650_v26 = vsel %vm481_vm2, %v4592_v24, 0.0  ;;  %4409 = vmatpush1.bf16.msra.mxu1 %v5470_v53  ;;  %4369 = vmatprep.subr.bf16.mxu0 %v5199_v51  ;;  %v5663_v44 = vcombine.high %v1096_v42, %v1104_v49  ;;  %v824_v60 = vld [vmem:[%s7974_s5 + $0x638] sm:$0xff]  ;;  %v5662_v51 = vcombine.low %v1096_v42, %v1104_v49 }
 0x2d3   :  { %v4645_v25 = vadd.f32 %v4644_v2, %v4643_v13  ;;  %v4651_v38 = vrot.slane %v4650_v26, 4  ;;  %4410 = vmatprep.subr.bf16.mxu1 %v5455_v9  ;;  %v832_v12 = vld [vmem:[%s7974_s5 + $0x678] sm:$0xff] }
 0x2d4   :  { %v1080_v52 = vld [vmem:[%s7974_s5 + $0xe38] sm:$0xff]  ;;  %v5391_v9 = vcombine.high %v824_v60, %v832_v12 }
 0x2d5   :  { %v4646_v34 = vrot.slane %v4645_v25, 2  ;;  %v4652_v4 = vadd.f32 %v4651_v38, %v4650_v26  ;;  %4370 = vmatpush1.bf16.msra.mxu0 %v5198_v63  ;;  %v1088_v0 = vld [vmem:[%s7974_s5 + $0xe78] sm:$0xff]  ;;  %v5390_v26 = vcombine.low %v824_v60, %v832_v12  ;;  %v4904_v60 = vrot.slane %v7617_v8, %v7639_v16 }
 0x2d6   :  { %4411 = vmatpush1.bf16.msra.mxu1 %v5454_v29  ;;  %4371 = vmatprep.subr.bf16.mxu0 %v5439_v3  ;;  %v5647_v13 = vcombine.high %v1080_v52, %v1088_v0  ;;  %v808_v24 = vld [vmem:[%s7974_s5 + $0x5b8] sm:$0xff]  ;;  %v5646_v29 = vcombine.low %v1080_v52, %v1088_v0  ;;  %v4810_v12 = vrot.slane %v7609_v50, %v7642_v28 }
 0x2d7   :  { %v4647_v27 = vadd.f32 %v4646_v34, %v4645_v25  ;;  %v4653_v19 = vrot.slane %v4652_v4, 2  ;;  %4412 = vmatprep.subr.bf16.mxu1 %v5695_v30  ;;  %v816_v59 = vld [vmem:[%s7974_s5 + $0x5f8] sm:$0xff] }
 0x2d8   :  { %v1064_v61 = vld [vmem:[%s7974_s5 + $0xdb8] sm:$0xff]  ;;  %v5375_v3 = vcombine.high %v808_v24, %v816_v59  ;;  %v5374_v31 = vcombine.low %v808_v24, %v816_v59 }
 0x2d9   :  { %v4648_v54 = vrot.slane %v4647_v27, 1  ;;  %v4654_v55 = vadd.f32 %v4653_v19, %v4652_v4  ;;  %4372 = vmatpush2.bf16.msra.mxu0 %v5438_v35  ;;  %v1072_v2 = vld [vmem:[%s7974_s5 + $0xdf8] sm:$0xff] }
 0x2da   :  { %4413 = vmatpush2.bf16.msra.mxu1 %v5694_v36  ;;  %4373 = vmatprep.subr.bf16.mxu0 %v5423_v37  ;;  %v5631_v25 = vcombine.high %v1064_v61, %v1072_v2  ;;  %v792_v38 = vld [vmem:[%s7974_s5 + $0x538] sm:$0xff]  ;;  %v5630_v32 = vcombine.low %v1064_v61, %v1072_v2 }
 0x2db   :  { %v4649_v7 = vadd.f32 %v4648_v54, %v4647_v27  ;;  %v4655_v10 = vrot.slane %v4654_v55, 1  ;;  %4414 = vmatprep.subr.bf16.mxu1 %v5679_v20  ;;  %v800_v30 = vld [vmem:[%s7974_s5 + $0x578] sm:$0xff] }
 0x2dc   :  { %v1048_v33 = vld [vmem:[%s7974_s5 + $0xd38] sm:$0xff]  ;;  %v5359_v34 = vcombine.high %v792_v38, %v800_v30  ;;  %v5358_v19 = vcombine.low %v792_v38, %v800_v30 }
 0x2dd   :  { %v4719_v1 = vmul.f32 0.5, %v4649_v7  ;;  %v4656_v53 = vadd.f32 %v4655_v10, %v4654_v55  ;;  %4374 = vmatpush2.bf16.msra.mxu0 %v5422_v57  ;;  %v1056_v23 = vld [vmem:[%s7974_s5 + $0xd78] sm:$0xff]  ;;  %v4806_v57 = vrot.slane %v7609_v50, %v7639_v16 }
 0x2de   :  { %4415 = vmatpush2.bf16.msra.mxu1 %v5678_v48  ;;  %4375 = vmatprep.subr.bf16.mxu0 %v5407_v40  ;;  %v5615_v4 = vcombine.high %v1048_v33, %v1056_v23  ;;  %v776_v35 = vld [vmem:[%s7974_s5 + $0x4b8] sm:$0xff]  ;;  %v5614_v20 = vcombine.low %v1048_v33, %v1056_v23 }
 0x2df   :  { %v4735_v21 = vadd.f32 1e-05, %v4719_v1  ;;  %v4720_v58 = vmul.f32 0.5, %v4656_v53  ;;  %4416 = vmatprep.subr.bf16.mxu1 %v5663_v44  ;;  %v784_v36 = vld [vmem:[%s7974_s5 + $0x4f8] sm:$0xff] }
 0x2e0   :  { %v1032_v37 = vld [vmem:[%s7974_s5 + $0xcb8] sm:$0xff]  ;;  %v5343_v41 = vcombine.high %v776_v35, %v784_v36  ;;  %v5342_v48 = vcombine.low %v776_v35, %v784_v36 }
 0x2e1   :  { %5801 = vrsqrt.f32 %v4735_v21  ;;  %v4736_v63 = vadd.f32 1e-05, %v4720_v58  ;;  %4376 = vmatpush2.bf16.msra.mxu0 %v5406_v56  ;;  %v1040_v27 = vld [vmem:[%s7974_s5 + $0xcf8] sm:$0xff]  ;;  %v4908_v56 = vrot.slane %v7617_v8, %v7642_v28 }
 0x2e2   :  { %4417 = vmatpush2.bf16.msra.mxu1 %v5662_v51  ;;  %4377 = vmatprep.subr.bf16.mxu0 %v5391_v9  ;;  %v5599_v47 = vcombine.high %v1032_v37, %v1040_v27  ;;  %v760_v42 = vld [vmem:[%s7974_s5 + $0x438] sm:$0xff]  ;;  %v5598_v7 = vcombine.low %v1032_v37, %v1040_v27  ;;  %v7867_v9 = vld [vmem:[%s7978_s6 + $0x8] sm:$0xff] }
 0x2e3   :  { %5803 = vrsqrt.f32 %v4736_v63  ;;  %4418 = vmatprep.subr.bf16.mxu1 %v5647_v13  ;;  %v768_v49 = vld [vmem:[%s7974_s5 + $0x478] sm:$0xff]  ;;  %v1180_v24 = vrot.slane %v7867_v9, %v6265_v17 }
 0x2e4   :  { %v1016_v54 = vld [vmem:[%s7974_s5 + $0xc38] sm:$0xff]  ;;  %v5327_v10 = vcombine.high %v760_v42, %v768_v49  ;;  %v5326_v51 = vcombine.low %v760_v42, %v768_v49 }
 0x2e5   :  { %4378 = vmatpush2.bf16.msra.mxu0 %v5390_v26  ;;  %v1024_v55 = vld [vmem:[%s7974_s5 + $0xc78] sm:$0xff] }
 0x2e6   :  { %4419 = vmatpush2.bf16.msra.mxu1 %v5646_v29  ;;  %4379 = vmatprep.subr.bf16.mxu0 %v5375_v3  ;;  %v5583_v52 = vcombine.high %v1016_v54, %v1024_v55  ;;  %v5045_v29 = vrot.slane %v7673_v39, %v5986_v45 }
 0x2e7   :  { %4420 = vmatprep.subr.bf16.mxu1 %v5631_v25 }
 0x2e9   :  { %4380 = vmatpush2.bf16.msra.mxu0 %v5374_v31 }
 0x2ea   :  { %4421 = vmatpush2.bf16.msra.mxu1 %v5630_v32  ;;  %4381 = vmatprep.subr.bf16.mxu0 %v5359_v34 }
 0x2eb   :  { %4422 = vmatprep.subr.bf16.mxu1 %v5615_v4 }
 0x2ed   :  { %4382 = vmatpush2.bf16.msra.mxu0 %v5358_v19 }
 0x2ee   :  { %v5802_v40 = vpop.eup %5801  ;;  %4423 = vmatpush2.bf16.msra.mxu1 %v5614_v20  ;;  %4383 = vmatprep.subr.bf16.mxu0 %v5343_v41 }
 0x2ef   :  { %v4767_v44 = vmul.f32 %v5802_v40, %v7741_v62  ;;  %4424 = vmatprep.subr.bf16.mxu1 %v5599_v47  ;;  %v5582_v62 = vcombine.low %v1016_v54, %v1024_v55 }
 0x2f0   :  { %v5804_v0 = vpop.eup %5803 }
 0x2f1   :  { %v4865_v1 = vmul.f32 %v4806_v57, %v4767_v44  ;;  %v4768_v53 = vmul.f32 %v5804_v0, %v7752_v6  ;;  %4384 = vmatpush2.bf16.msra.mxu0 %v5342_v48  ;;  %v1176_v6 = vrot.slane %v7867_v9, %v6256_v14 }
 0x2f2   :  { %4425 = vmatpush2.bf16.msra.mxu1 %v5598_v7  ;;  %4385 = vmatprep.subr.bf16.mxu0 %v5327_v10 }
 0x2f3   :  { %v4963_v50 = vadd.f32 %v4904_v60, %v4865_v1  ;;  %v4866_v21 = vmul.f32 %v4810_v12, %v4768_v53  ;;  %4426 = vmatprep.subr.bf16.mxu1 %v5583_v52 }
 0x2f5   :  { %v4964_v58 = vadd.f32 %v4908_v56, %v4866_v21  ;;  %4386 = vmatpush2.bf16.msra.mxu0 %v5326_v51  ;;  %v4979_v8 = vmax.f32 %v4963_v50, 0.0 }
 0x2f6   :  { %4427 = vmatpush2.bf16.msra.mxu1 %v5582_v62 }
 0x2f7   :  { %v4980_v13 = vmax.f32 %v4964_v58, 0.0 }
 0x2f8   :  { %v4143_v59 = vpop.f32.mrf.mxu0  ;;  %4388 = vmatmul.mubr.bf16.vlgmr.msra.gmra.mxu0 %v6315_v43 }
 0x2f9   :  { %v5699_v61 = vpack.c.bf16 %v4980_v13, %v4979_v8  ;;  %v4144_v2 = vadd.f32 %v4143_v59, %v1176_v6  ;;  %v4184_v63 = vpop.f32.mrf.mxu1  ;;  %4429 = vmatmul.mubr.bf16.vlgmr.msra.gmra.mxu1 %v6319_v46  ;;  %v5061_v46 = vrot.slane %v7442_v11, %v5986_v45 }
 0x2fa   :  { %v4145_v26 = vpop.f32.mrf.mxu0 }
 0x2fb   :  { %v5052_v3 = vrot.slane %v5699_v61, %v5986_v45  ;;  %v4185_v25 = vadd.f32 %v4184_v63, %v4144_v2  ;;  %v4146_v38 = vadd.f32 %v4145_v26, %v1180_v24  ;;  %v4186_v30 = vpop.f32.mrf.mxu1  ;;  %v7891_v63 = vld [vmem:[%s7979_s7 + $0x8] sm:$0xff] }
 0x2fc   :  { %v4147_v33 = vpop.f32.mrf.mxu0  ;;  %v7896_v26 = vld [vmem:[%s7980_s8 + $0x8] sm:$0xff] }
 0x2fd   :  { %v5054_v23 = vcombine.low %v5045_v29, %v5052_v3  ;;  %v4497_v31 = vsel %vm481_vm2, %v4185_v25, 0.0  ;;  %v4187_v32 = vadd.f32 %v4186_v30, %v4146_v38  ;;  %v4188_v43 = vpop.f32.mrf.mxu1  ;;  %v4814_v29 = vrot.slane %v7891_v63, %v6256_v14 }
 0x2fe   :  { %v4498_v34 = vrot.slane %v4497_v31, 4  ;;  %v4148_v4 = vpop.f32.mrf.mxu0  ;;  %v4912_v38 = vrot.slane %v7896_v26, %v6256_v14  ;;  %v4818_v30 = vrot.slane %v7891_v63, %v6265_v17  ;;  %v1188_v14 = vrot.slane %v7867_v9, %v6268_v18 }
 0x2ff   :  { %v5068_v35 = vrot.slane %v5054_v23, %v5986_v45  ;;  %v4504_v39 = vsel %vm481_vm2, %v4187_v32, 0.0  ;;  %v4189_v36 = vpop.f32.mrf.mxu1 }
 0x300   :  { %v4499_v37 = vadd.f32 %v4498_v34, %v4497_v31  ;;  %v4505_v27 = vrot.slane %v4504_v39, 4 }
 0x301   :  { %v5069_v19 = vcombine.low %v5061_v46, %v5068_v35  ;;  %v1184_v46 = vrot.slane %v7867_v9, %v6259_v15 }
 0x302   :  { %v4500_v20 = vrot.slane %v4499_v37, 2  ;;  %v4506_v41 = vadd.f32 %v4505_v27, %v4504_v39 }
 0x303   :  { %5121 = vst [vmem:[%s7981_s9] sm:$0xff] %v5069_v19 }
 0x304   :  { %v4501_v47 = vadd.f32 %v4500_v20, %v4499_v37  ;;  %v4507_v42 = vrot.slane %v4506_v41, 2 }
 0x306   :  { %v4502_v49 = vrot.slane %v4501_v47, 1  ;;  %v4508_v54 = vadd.f32 %v4507_v42, %v4506_v41 }
 0x308   :  { %v4503_v55 = vadd.f32 %v4502_v49, %v4501_v47  ;;  %v4509_v11 = vrot.slane %v4508_v54, 1 }
 0x30a   :  { %v4561_v57 = vmul.f32 0.5, %v4503_v55  ;;  %v4510_v48 = vadd.f32 %v4509_v11, %v4508_v54 }
 0x30c   :  { %v4577_v40 = vsub.f32 %v4185_v25, %v4561_v57  ;;  %v4562_v7 = vmul.f32 0.5, %v4510_v48 }
 0x30e   :  { %v4593_v10 = vmul.f32 %v4577_v40, %v4577_v40  ;;  %v4578_v44 = vsub.f32 %v4187_v32, %v4562_v7  ;;  %v4916_v32 = vrot.slane %v7896_v26, %v6265_v17 }
 0x310   :  { %v4657_v60 = vsel %vm481_vm2, %v4593_v10, 0.0  ;;  %v4594_v12 = vmul.f32 %v4578_v44, %v4578_v44 }
 0x311   :  { %v4658_v52 = vrot.slane %v4657_v60, 4 }
 0x312   :  { %v4664_v0 = vsel %vm481_vm2, %v4594_v12, 0.0 }
 0x313   :  { %v4659_v1 = vadd.f32 %v4658_v52, %v4657_v60  ;;  %v4665_v53 = vrot.slane %v4664_v0, 4 }
 0x315   :  { %v4660_v56 = vrot.slane %v4659_v1, 2  ;;  %v4666_v51 = vadd.f32 %v4665_v53, %v4664_v0 }
 0x317   :  { %v4661_v62 = vadd.f32 %v4660_v56, %v4659_v1  ;;  %v4667_v50 = vrot.slane %v4666_v51, 2 }
 0x319   :  { %v4662_v21 = vrot.slane %v4661_v62, 1  ;;  %v4668_v58 = vadd.f32 %v4667_v50, %v4666_v51 }
 0x31b   :  { %v4663_v6 = vadd.f32 %v4662_v21, %v4661_v62  ;;  %v4669_v8 = vrot.slane %v4668_v58, 1 }
 0x31d   :  { %v4721_v13 = vmul.f32 0.5, %v4663_v6  ;;  %v4670_v24 = vadd.f32 %v4669_v8, %v4668_v58 }
 0x31f   :  { %v4737_v59 = vadd.f32 1e-05, %v4721_v13  ;;  %v4722_v61 = vmul.f32 0.5, %v4670_v24 }
 0x321   :  { %5805 = vrsqrt.f32 %v4737_v59  ;;  %v4738_v2 = vadd.f32 1e-05, %v4722_v61 }
 0x323   :  { %5807 = vrsqrt.f32 %v4738_v2 }
 0x32e   :  { %v5806_v3 = vpop.eup %5805 }
 0x32f   :  { %v4769_v25 = vmul.f32 %v5806_v3, %v4577_v40 }
 0x330   :  { %v5808_v33 = vpop.eup %5807 }
 0x331   :  { %v4867_v23 = vmul.f32 %v4814_v29, %v4769_v25  ;;  %v4770_v31 = vmul.f32 %v5808_v33, %v4578_v44 }
 0x333   :  { %v4965_v43 = vadd.f32 %v4912_v38, %v4867_v23  ;;  %v4868_v34 = vmul.f32 %v4818_v30, %v4770_v31 }
 0x335   :  { %v4966_v4 = vadd.f32 %v4916_v32, %v4868_v34  ;;  %v4981_v35 = vmax.f32 %v4965_v43, 0.0 }
 0x337   :  { %v4982_v39 = vmax.f32 %v4966_v4, 0.0 }
 0x338   :  { %v4225_v36 = vpop.f32.mrf.mxu0 }
 0x339   :  { %v7910_v37 = vpack.c.bf16 %v4982_v39, %v4981_v35  ;;  %v4226_v27 = vadd.f32 %v4225_v36, %v1184_v46  ;;  %v4266_v19 = vpop.f32.mrf.mxu1  ;;  %v4822_v35 = vrot.slane %v7891_v63, %v6259_v15  ;;  %v4920_v36 = vrot.slane %v7896_v26, %v6259_v15 }
 0x33a   :  { %v4227_v20 = vpop.f32.mrf.mxu0  ;;  %v1196_v15 = vrot.slane %v7867_v9, %v7386_v22 }
 0x33b   :  { %v4267_v41 = vadd.f32 %v4266_v19, %v4226_v27  ;;  %v4228_v47 = vadd.f32 %v4227_v20, %v1188_v14  ;;  %v4268_v17 = vpop.f32.mrf.mxu1  ;;  %v4826_v27 = vrot.slane %v7891_v63, %v6268_v18 }
 0x33c   :  { %v4229_v42 = vpop.f32.mrf.mxu0 }
 0x33d   :  { %v4511_v49 = vsel %vm481_vm2, %v4267_v41, 0.0  ;;  %v4269_v54 = vadd.f32 %v4268_v17, %v4228_v47  ;;  %v4270_v55 = vpop.f32.mrf.mxu1  ;;  %v4924_v47 = vrot.slane %v7896_v26, %v6268_v18 }
 0x33e   :  { %v4512_v11 = vrot.slane %v4511_v49, 4  ;;  %v4230_v57 = vpop.f32.mrf.mxu0 }
 0x33f   :  { %v4518_v48 = vsel %vm481_vm2, %v4269_v54, 0.0  ;;  %v4271_v40 = vpop.f32.mrf.mxu1 }
 0x340   :  { %v4513_v7 = vadd.f32 %v4512_v11, %v4511_v49  ;;  %v4519_v10 = vrot.slane %v4518_v48, 4 }
 0x342   :  { %v4514_v44 = vrot.slane %v4513_v7, 2  ;;  %v4520_v60 = vadd.f32 %v4519_v10, %v4518_v48 }
 0x344   :  { %v4515_v12 = vadd.f32 %v4514_v44, %v4513_v7  ;;  %v4521_v52 = vrot.slane %v4520_v60, 2  ;;  %v5080_v44 = vrot.slane %v7910_v37, %v5986_v45 }
 0x346   :  { %v4516_v0 = vrot.slane %v4515_v12, 1  ;;  %v4522_v1 = vadd.f32 %v4521_v52, %v4520_v60 }
 0x348   :  { %v4517_v53 = vadd.f32 %v4516_v0, %v4515_v12  ;;  %v4523_v56 = vrot.slane %v4522_v1, 1 }
 0x34a   :  { %v4563_v51 = vmul.f32 0.5, %v4517_v53  ;;  %v4524_v62 = vadd.f32 %v4523_v56, %v4522_v1 }
 0x34c   :  { %v4579_v50 = vsub.f32 %v4267_v41, %v4563_v51  ;;  %v4564_v21 = vmul.f32 0.5, %v4524_v62 }
 0x34e   :  { %v4595_v58 = vmul.f32 %v4579_v50, %v4579_v50  ;;  %v4580_v6 = vsub.f32 %v4269_v54, %v4564_v21  ;;  %v1192_v54 = vrot.slane %v7867_v9, %v7383_v5 }
 0x350   :  { %v4671_v8 = vsel %vm481_vm2, %v4595_v58, 0.0  ;;  %v4596_v13 = vmul.f32 %v4580_v6, %v4580_v6 }
 0x351   :  { %v4672_v24 = vrot.slane %v4671_v8, 4 }
 0x352   :  { %v4678_v59 = vsel %vm481_vm2, %v4596_v13, 0.0 }
 0x353   :  { %v4673_v61 = vadd.f32 %v4672_v24, %v4671_v8  ;;  %v4679_v2 = vrot.slane %v4678_v59, 4 }
 0x355   :  { %v4674_v29 = vrot.slane %v4673_v61, 2  ;;  %v4680_v3 = vadd.f32 %v4679_v2, %v4678_v59 }
 0x357   :  { %v4675_v25 = vadd.f32 %v4674_v29, %v4673_v61  ;;  %v4681_v38 = vrot.slane %v4680_v3, 2 }
 0x359   :  { %v4676_v30 = vrot.slane %v4675_v25, 1  ;;  %v4682_v33 = vadd.f32 %v4681_v38, %v4680_v3 }
 0x35b   :  { %v4677_v23 = vadd.f32 %v4676_v30, %v4675_v25  ;;  %v4683_v31 = vrot.slane %v4682_v33, 1 }
 0x35d   :  { %v4723_v32 = vmul.f32 0.5, %v4677_v23  ;;  %v4684_v43 = vadd.f32 %v4683_v31, %v4682_v33 }
 0x35f   :  { %v4739_v34 = vadd.f32 1e-05, %v4723_v32  ;;  %v4724_v4 = vmul.f32 0.5, %v4684_v43 }
 0x361   :  { %5809 = vrsqrt.f32 %v4739_v34  ;;  %v4740_v46 = vadd.f32 1e-05, %v4724_v4 }
 0x363   :  { %5811 = vrsqrt.f32 %v4740_v46 }
 0x36e   :  { %v5810_v39 = vpop.eup %5809 }
 0x36f   :  { %v4771_v14 = vmul.f32 %v5810_v39, %v4579_v50 }
 0x370   :  { %v5812_v19 = vpop.eup %5811 }
 0x371   :  { %v4869_v20 = vmul.f32 %v4822_v35, %v4771_v14  ;;  %v4772_v41 = vmul.f32 %v5812_v19, %v4580_v6 }
 0x373   :  { %v4967_v17 = vadd.f32 %v4920_v36, %v4869_v20  ;;  %v4870_v42 = vmul.f32 %v4826_v27, %v4772_v41 }
 0x375   :  { %v4968_v49 = vadd.f32 %v4924_v47, %v4870_v42  ;;  %v4983_v55 = vmax.f32 %v4967_v17, 0.0 }
 0x377   :  { %v4984_v11 = vmax.f32 %v4968_v49, 0.0 }
 0x378   :  { %v4307_v57 = vpop.f32.mrf.mxu0 }
 0x379   :  { %v5701_v48 = vpack.c.bf16 %v4984_v11, %v4983_v55  ;;  %v4308_v40 = vadd.f32 %v4307_v57, %v1192_v54  ;;  %v4348_v7 = vpop.f32.mrf.mxu1  ;;  %v4830_v11 = vrot.slane %v7891_v63, %v7383_v5 }
 0x37a   :  { %v4309_v10 = vpop.f32.mrf.mxu0 }
 0x37b   :  { %v5087_v18 = vrot.slane %v5701_v48, %v5986_v45  ;;  %v4349_v60 = vadd.f32 %v4348_v7, %v4308_v40  ;;  %v4310_v12 = vadd.f32 %v4309_v10, %v1196_v15  ;;  %v4350_v52 = vpop.f32.mrf.mxu1  ;;  %v4928_v48 = vrot.slane %v7896_v26, %v7383_v5 }
 0x37c   :  { %v4311_v0 = vpop.f32.mrf.mxu0  ;;  %v4834_v40 = vrot.slane %v7891_v63, %v7386_v22  ;;  %v1204_v5 = vrot.slane %v7867_v9, %v7642_v28 }
 0x37d   :  { %v7931_v1 = vcombine.low %v5080_v44, %v5087_v18  ;;  %v4525_v53 = vsel %vm481_vm2, %v4349_v60, 0.0  ;;  %v4351_v56 = vadd.f32 %v4350_v52, %v4310_v12  ;;  %v4352_v51 = vpop.f32.mrf.mxu1  ;;  %v4932_v18 = vrot.slane %v7896_v26, %v7386_v22 }
 0x37e   :  { %v4526_v62 = vrot.slane %v4525_v53, 4  ;;  %v4312_v50 = vpop.f32.mrf.mxu0  ;;  %v1200_v0 = vrot.slane %v7867_v9, %v7639_v16 }
 0x37f   :  { %v4532_v21 = vsel %vm481_vm2, %v4351_v56, 0.0  ;;  %v4353_v58 = vpop.f32.mrf.mxu1 }
 0x380   :  { %v4527_v6 = vadd.f32 %v4526_v62, %v4525_v53  ;;  %v4533_v8 = vrot.slane %v4532_v21, 4 }
 0x382   :  { %v4528_v37 = vrot.slane %v4527_v6, 2  ;;  %v4534_v13 = vadd.f32 %v4533_v8, %v4532_v21 }
 0x384   :  { %v4529_v24 = vadd.f32 %v4528_v37, %v4527_v6  ;;  %v4535_v59 = vrot.slane %v4534_v13, 2 }
 0x386   :  { %v4530_v61 = vrot.slane %v4529_v24, 1  ;;  %v4536_v2 = vadd.f32 %v4535_v59, %v4534_v13 }
 0x388   :  { %v4531_v29 = vadd.f32 %v4530_v61, %v4529_v24  ;;  %v4537_v3 = vrot.slane %v4536_v2, 1 }
 0x38a   :  { %v4565_v25 = vmul.f32 0.5, %v4531_v29  ;;  %v4538_v38 = vadd.f32 %v4537_v3, %v4536_v2 }
 0x38c   :  { %v4581_v30 = vsub.f32 %v4349_v60, %v4565_v25  ;;  %v4566_v33 = vmul.f32 0.5, %v4538_v38 }
 0x38e   :  { %v4597_v23 = vmul.f32 %v4581_v30, %v4581_v30  ;;  %v4582_v31 = vsub.f32 %v4351_v56, %v4566_v33 }
 0x390   :  { %v4685_v32 = vsel %vm481_vm2, %v4597_v23, 0.0  ;;  %v4598_v43 = vmul.f32 %v4582_v31, %v4582_v31 }
 0x391   :  { %v4686_v34 = vrot.slane %v4685_v32, 4 }
 0x392   :  { %v4692_v4 = vsel %vm481_vm2, %v4598_v43, 0.0 }
 0x393   :  { %v4687_v46 = vadd.f32 %v4686_v34, %v4685_v32  ;;  %v4693_v35 = vrot.slane %v4692_v4, 4 }
 0x395   :  { %v4688_v39 = vrot.slane %v4687_v46, 2  ;;  %v4694_v14 = vadd.f32 %v4693_v35, %v4692_v4 }
 0x397   :  { %v4689_v36 = vadd.f32 %v4688_v39, %v4687_v46  ;;  %v4695_v27 = vrot.slane %v4694_v14, 2 }
 0x399   :  { %v4690_v19 = vrot.slane %v4689_v36, 1  ;;  %v4696_v20 = vadd.f32 %v4695_v27, %v4694_v14 }
 0x39b   :  { %v4691_v41 = vadd.f32 %v4690_v19, %v4689_v36  ;;  %v4697_v47 = vrot.slane %v4696_v20, 1 }
 0x39d   :  { %v4725_v17 = vmul.f32 0.5, %v4691_v41  ;;  %v4698_v42 = vadd.f32 %v4697_v47, %v4696_v20 }
 0x39f   :  { %v4741_v49 = vadd.f32 1e-05, %v4725_v17  ;;  %v4726_v54 = vmul.f32 0.5, %v4698_v42 }
 0x3a1   :  { %5813 = vrsqrt.f32 %v4741_v49  ;;  %v4742_v55 = vadd.f32 1e-05, %v4726_v54 }
 0x3a3   :  { %5815 = vrsqrt.f32 %v4742_v55 }
 0x3ae   :  { %v5814_v15 = vpop.eup %5813 }
 0x3af   :  { %v4773_v57 = vmul.f32 %v5814_v15, %v4581_v30 }
 0x3b0   :  { %v5816_v7 = vpop.eup %5815 }
 0x3b1   :  { %v4871_v10 = vmul.f32 %v4830_v11, %v4773_v57  ;;  %v4774_v44 = vmul.f32 %v5816_v7, %v4582_v31 }
 0x3b3   :  { %v4969_v60 = vadd.f32 %v4928_v48, %v4871_v10  ;;  %v4872_v12 = vmul.f32 %v4834_v40, %v4774_v44 }
 0x3b5   :  { %v4970_v52 = vadd.f32 %v4932_v18, %v4872_v12  ;;  %v4985_v53 = vmax.f32 %v4969_v60, 0.0  ;;  %v4838_v60 = vrot.slane %v7891_v63, %v7639_v16 }
 0x3b7   :  { %v4986_v56 = vmax.f32 %v4970_v52, 0.0 }
 0x3b8   :  { %v4389_v51 = vpop.f32.mrf.mxu0 }
 0x3b9   :  { %v7949_v62 = vpack.c.bf16 %v4986_v56, %v4985_v53  ;;  %v4390_v50 = vadd.f32 %v4389_v51, %v1200_v0  ;;  %v4430_v21 = vpop.f32.mrf.mxu1  ;;  %v4936_v0 = vrot.slane %v7896_v26, %v7639_v16  ;;  %v4842_v53 = vrot.slane %v7891_v63, %v7642_v28 }
 0x3ba   :  { %v4391_v58 = vpop.f32.mrf.mxu0  ;;  %v5110_v63 = vrot.slane %v7931_v1, %v5986_v45 }
 0x3bb   :  { %v4431_v6 = vadd.f32 %v4430_v21, %v4390_v50  ;;  %v4392_v8 = vadd.f32 %v4391_v58, %v1204_v5  ;;  %v4432_v22 = vpop.f32.mrf.mxu1  ;;  %v4940_v50 = vrot.slane %v7896_v26, %v7642_v28 }
 0x3bc   :  { %v4393_v37 = vpop.f32.mrf.mxu0 }
 0x3bd   :  { %v4539_v13 = vsel %vm481_vm2, %v4431_v6, 0.0  ;;  %v4433_v24 = vadd.f32 %v4432_v22, %v4392_v8  ;;  %v4434_v59 = vpop.f32.mrf.mxu1 }
 0x3be   :  { %v4540_v61 = vrot.slane %v4539_v13, 4  ;;  %v4394_v2 = vpop.f32.mrf.mxu0 }
 0x3bf   :  { %v4546_v29 = vsel %vm481_vm2, %v4433_v24, 0.0  ;;  %v4435_v3 = vpop.f32.mrf.mxu1 }
 0x3c0   :  { %v4541_v9 = vadd.f32 %v4540_v61, %v4539_v13  ;;  %v4547_v25 = vrot.slane %v4546_v29, 4  ;;  %v5094_v13 = vrot.slane %v7949_v62, %v5986_v45 }
 0x3c2   :  { %v4542_v38 = vrot.slane %v4541_v9, 2  ;;  %v4548_v30 = vadd.f32 %v4547_v25, %v4546_v29 }
 0x3c4   :  { %v4543_v33 = vadd.f32 %v4542_v38, %v4541_v9  ;;  %v4549_v23 = vrot.slane %v4548_v30, 2 }
 0x3c6   :  { %v4544_v31 = vrot.slane %v4543_v33, 1  ;;  %v4550_v32 = vadd.f32 %v4549_v23, %v4548_v30 }
 0x3c8   :  { %v4545_v43 = vadd.f32 %v4544_v31, %v4543_v33  ;;  %v4551_v34 = vrot.slane %v4550_v32, 1 }
 0x3ca   :  { %v4567_v4 = vmul.f32 0.5, %v4545_v43  ;;  %v4552_v46 = vadd.f32 %v4551_v34, %v4550_v32 }
 0x3cc   :  { %v4583_v35 = vsub.f32 %v4431_v6, %v4567_v4  ;;  %v4568_v39 = vmul.f32 0.5, %v4552_v46 }
 0x3ce   :  { %v4599_v14 = vmul.f32 %v4583_v35, %v4583_v35  ;;  %v4584_v36 = vsub.f32 %v4433_v24, %v4568_v39 }
 0x3d0   :  { %v4699_v27 = vsel %vm481_vm2, %v4599_v14, 0.0  ;;  %v4600_v19 = vmul.f32 %v4584_v36, %v4584_v36 }
 0x3d1   :  { %v4700_v20 = vrot.slane %v4699_v27, 4 }
 0x3d2   :  { %v4706_v41 = vsel %vm481_vm2, %v4600_v19, 0.0 }
 0x3d3   :  { %v4701_v47 = vadd.f32 %v4700_v20, %v4699_v27  ;;  %v4707_v17 = vrot.slane %v4706_v41, 4 }
 0x3d5   :  { %v4702_v42 = vrot.slane %v4701_v47, 2  ;;  %v4708_v49 = vadd.f32 %v4707_v17, %v4706_v41 }
 0x3d7   :  { %v4703_v54 = vadd.f32 %v4702_v42, %v4701_v47  ;;  %v4709_v55 = vrot.slane %v4708_v49, 2 }
 0x3d9   :  { %v4704_v11 = vrot.slane %v4703_v54, 1  ;;  %v4710_v15 = vadd.f32 %v4709_v55, %v4708_v49 }
 0x3db   :  { %v4705_v57 = vadd.f32 %v4704_v11, %v4703_v54  ;;  %v4711_v48 = vrot.slane %v4710_v15, 1 }
 0x3dd   :  { %v4727_v40 = vmul.f32 0.5, %v4705_v57  ;;  %v4712_v7 = vadd.f32 %v4711_v48, %v4710_v15 }
 0x3df   :  { %v4743_v10 = vadd.f32 1e-05, %v4727_v40  ;;  %v4728_v44 = vmul.f32 0.5, %v4712_v7 }
 0x3e1   :  { %5817 = vrsqrt.f32 %v4743_v10  ;;  %v4744_v18 = vadd.f32 1e-05, %v4728_v44 }
 0x3e3   :  { %5819 = vrsqrt.f32 %v4744_v18 }
 0x3ee   :  { %v5818_v12 = vpop.eup %5817 }
 0x3ef   :  { %v4775_v52 = vmul.f32 %v5818_v12, %v4583_v35 }
 0x3f0   :  { %v5820_v56 = vpop.eup %5819 }
 0x3f1   :  { %v4873_v5 = vmul.f32 %v4838_v60, %v4775_v52  ;;  %v4776_v51 = vmul.f32 %v5820_v56, %v4584_v36 }
 0x3f3   :  { %v4971_v21 = vadd.f32 %v4936_v0, %v4873_v5  ;;  %v4874_v58 = vmul.f32 %v4842_v53, %v4776_v51 }
 0x3f5   :  { %v4972_v6 = vadd.f32 %v4940_v50, %v4874_v58  ;;  %v4987_v8 = vmax.f32 %v4971_v21, 0.0 }
 0x3f7   :  { %v4988_v22 = vmax.f32 %v4972_v6, 0.0 }
 0x3f9   :  { %v5703_v37 = vpack.c.bf16 %v4988_v22, %v4987_v8 }
 0x3fb   :  { %v5101_v16 = vrot.slane %v5703_v37, %v5986_v45 }
 0x3fd   :  { %v5103_v24 = vcombine.low %v5094_v13, %v5101_v16 }
 0x3ff   :  { %v5117_v59 = vrot.slane %v5103_v24, %v5986_v45 }
 0x401   :  { %v5118_v61 = vcombine.low %v5110_v63, %v5117_v59 }
 0x403   :  { %5122 = vst [vmem:[%s7981_s9 + $0x8] sm:$0xff] %v5118_v61 }

// kernel: decoder_forward.6
= control target key start
LH: loop header
LB: loop body
LE: loop exit
PB: predicated region body
PF: predicated region fallthrough
CT: control target
= control target key end

     0   :  { %s1617_s18 = smov 0   ;;  %s1619_s19 = smov 0   ;;  %s1893_s0 = inlined_call_operand.vmem [shape: bf16[64,128], index: 0, kind: input, shape index: {}]   ;;  %s1894_s1 = inlined_call_operand.vmem [shape: bf16[128,256], index: 1, kind: input, shape index: {}]   ;;  %s1895_s2 = inlined_call_operand.vmem [shape: f32[64,1], index: 2, kind: input, shape index: {}]   ;;  %s1896_s3 = inlined_call_operand.vmem [shape: f32[64,1], index: 3, kind: input, shape index: {}]   ;;  %s1897_s4 = inlined_call_operand.vmem [shape: f32[64,64], index: 4, kind: input, shape index: {}]   ;;  %s1898_s5 = inlined_call_operand.vmem [shape: bf16[64,256], index: 5, kind: output, shape index: {}]  }
   0x1   :  { %s1621_s20 = smov 0  }
   0x2 LB: > { %s27_s21 = sadd.s32 1, %s1578_s19  ;;  %p1306_p0 = scmp.ge.s32.totalorder %s1582_s20, 1  ;;  %s1582_s20 = sphi %s1621_s20, %s15_s20   ;;  %s1578_s19 = sphi %s1619_s19, %s1900_s19   ;;  %s1574_s18 = sphi %s1617_s18, %s1899_s18  }
   0x3   : > { %p29_p1 = scmp.ge.s32.totalorder %s27_s21, 2  ;;  %p210_p2 = scmp.lt.s32.totalorder %s1582_s20, 3 }
   0x5   : > { %s1902_s21 = smov (%p29_p1, %s27_s21), 0  ;;  %p211_p3 = pnand %p1306_p0, %p210_p2 }
   0x6   : > { %p260_p4 = scmp.eq.s32.totalorder (!%p211_p3), %s1574_s18, 0 }
   0x7   : > { %214 = sbr.rel (%p211_p3) target bundleno = 839 (0x347), region = 40 }
   0xc   : > { %265 = sbr.rel (!%p260_p4) target bundleno = 21 (0x15), region = 44  ;;  %vm266_vm0 = vcmask (%p260_p4), 7168   ;;  %v1584_v0 = vmov (%p260_p4), 0.0  }
   0xd   : > { %267 = vst.msk [vmem:[#allocation3] sm:$0xff] (%p260_p4), %vm266_vm0, %v1584_v0  ;;  %268 = vst.msk [vmem:[#allocation3 + $0x8] sm:$0xff] (%p260_p4), %vm266_vm0, %v1584_v0 }
   0xe   : > { %269 = vst.msk [vmem:[#allocation3 + $0x10] sm:$0xff] (%p260_p4), %vm266_vm0, %v1584_v0  ;;  %270 = vst.msk [vmem:[#allocation3 + $0x18] sm:$0xff] (%p260_p4), %vm266_vm0, %v1584_v0 }
   0xf   : > { %271 = vst.msk [vmem:[#allocation3 + $0x20] sm:$0xff] (%p260_p4), %vm266_vm0, %v1584_v0  ;;  %272 = vst.msk [vmem:[#allocation3 + $0x28] sm:$0xff] (%p260_p4), %vm266_vm0, %v1584_v0 }
  0x10   : > { %273 = vst.msk [vmem:[#allocation3 + $0x30] sm:$0xff] (%p260_p4), %vm266_vm0, %v1584_v0  ;;  %274 = vst.msk [vmem:[#allocation3 + $0x38] sm:$0xff] (%p260_p4), %vm266_vm0, %v1584_v0 }
  0x11   : > { %275 = vst.msk [vmem:[#allocation4] sm:$0xff] %vm266_vm0, %v1584_v0  ;;  %276 = vst.msk [vmem:[#allocation4 + $0x8] sm:$0xff] %vm266_vm0, %v1584_v0 }
  0x12   : > { %277 = vst.msk [vmem:[#allocation4 + $0x10] sm:$0xff] %vm266_vm0, %v1584_v0  ;;  %278 = vst.msk [vmem:[#allocation4 + $0x18] sm:$0xff] %vm266_vm0, %v1584_v0 }
  0x13   : > { %279 = vst.msk [vmem:[#allocation4 + $0x20] sm:$0xff] %vm266_vm0, %v1584_v0  ;;  %280 = vst.msk [vmem:[#allocation4 + $0x28] sm:$0xff] %vm266_vm0, %v1584_v0 }
  0x14   : > { %281 = vst.msk [vmem:[#allocation4 + $0x30] sm:$0xff] %vm266_vm0, %v1584_v0  ;;  %282 = vst.msk [vmem:[#allocation4 + $0x38] sm:$0xff] %vm266_vm0, %v1584_v0 }
  0x15 PF: > { %p1308_p5 = scmp.ne.s32.totalorder %s1574_s18, 0 }
  0x17   : > { %285 = sbr.rel (%p1308_p5) target bundleno = 432 (0x1b0), region = 48 }
  0x1c   : > { %v1514_v1 = vld [vmem:[%s1894_s1 + $0x74] ss:$8 sps:$4 sm:$0xff]   ;;  %v1516_v2 = vld [vmem:[%s1894_s1 + $0x70] ss:$8 sps:$4 sm:$0xff]   ;;  %v1585_v3 = vmov 0   ;;  %v1538_v18 = vld [vmem:[%s1893_s0] sm:$0xff]  }
  0x1d   : > { %446 = vmatprep.mubr.bf16.mxu0 %v1585_v3  ;;  %466 = vmatprep.mubr.bf16.mxu1 %v1585_v3  ;;  %v1517_v4 = vld [vmem:[%s1894_s1 + $0x64] ss:$8 sps:$4 sm:$0xff]   ;;  %v1519_v5 = vld [vmem:[%s1894_s1 + $0x60] ss:$8 sps:$4 sm:$0xff]   ;;  %v1520_v6 = vld [vmem:[%s1894_s1 + $0x54] ss:$8 sps:$4 sm:$0xff]  }
  0x1e   : > { %414 = vmatprep.subr.bf16.mxu0 %v1514_v1  ;;  %1471 = vmatprep.subr.bf16.mxu1 %v1514_v1  ;;  %v1522_v7 = vld [vmem:[%s1894_s1 + $0x50] ss:$8 sps:$4 sm:$0xff]   ;;  %v1523_v8 = vld [vmem:[%s1894_s1 + $0x44] ss:$8 sps:$4 sm:$0xff]   ;;  %v1525_v9 = vld [vmem:[%s1894_s1 + $0x40] ss:$8 sps:$4 sm:$0xff]  }
  0x1f   : > { %415 = vmatpush1.bf16.msra.mxu0 %v1516_v2  ;;  %1479 = vmatpush1.bf16.msra.mxu1 %v1516_v2  ;;  %v1526_v10 = vld [vmem:[%s1894_s1 + $0x34] ss:$8 sps:$4 sm:$0xff]   ;;  %v1528_v11 = vld [vmem:[%s1894_s1 + $0x30] ss:$8 sps:$4 sm:$0xff]   ;;  %v1529_v12 = vld [vmem:[%s1894_s1 + $0x24] ss:$8 sps:$4 sm:$0xff]  }
  0x20   : > { %416 = vmatprep.subr.bf16.mxu0 %v1517_v4  ;;  %1472 = vmatprep.subr.bf16.mxu1 %v1517_v4  ;;  %v1531_v13 = vld [vmem:[%s1894_s1 + $0x20] ss:$8 sps:$4 sm:$0xff]   ;;  %v1532_v14 = vld [vmem:[%s1894_s1 + $0x14] ss:$8 sps:$4 sm:$0xff]   ;;  %v1534_v15 = vld [vmem:[%s1894_s1 + $0x10] ss:$8 sps:$4 sm:$0xff]  }
  0x21   : > { %v1535_v16 = vld [vmem:[%s1894_s1 + $0x4] ss:$8 sps:$4 sm:$0xff]   ;;  %v1537_v17 = vld [vmem:[%s1894_s1] ss:$8 sps:$4 sm:$0xff]   ;;  %v1539_v19 = vld [vmem:[%s1893_s0 + $0x10] sm:$0xff]   ;;  %vm586_vm1 = vcmask 7168  }
  0x22   : > { %v1540_v20 = vld [vmem:[%s1893_s0 + $0x8] sm:$0xff]   ;;  %v1541_v21 = vld [vmem:[%s1893_s0 + $0x18] sm:$0xff]  }
  0x23   : > { %417 = vmatpush1.bf16.msra.mxu0 %v1519_v5  ;;  %1480 = vmatpush1.bf16.msra.mxu1 %v1519_v5 }
  0x24   : > { %418 = vmatprep.subr.bf16.mxu0 %v1520_v6  ;;  %1473 = vmatprep.subr.bf16.mxu1 %v1520_v6 }
  0x27   : > { %419 = vmatpush1.bf16.msra.mxu0 %v1522_v7  ;;  %1481 = vmatpush1.bf16.msra.mxu1 %v1522_v7 }
  0x28   : > { %420 = vmatprep.subr.bf16.mxu0 %v1523_v8  ;;  %1474 = vmatprep.subr.bf16.mxu1 %v1523_v8 }
  0x2b   : > { %421 = vmatpush1.bf16.msra.mxu0 %v1525_v9  ;;  %1482 = vmatpush1.bf16.msra.mxu1 %v1525_v9 }
  0x2c   : > { %422 = vmatprep.subr.bf16.mxu0 %v1526_v10  ;;  %1475 = vmatprep.subr.bf16.mxu1 %v1526_v10 }
  0x2f   : > { %423 = vmatpush1.bf16.msra.mxu0 %v1528_v11  ;;  %1483 = vmatpush1.bf16.msra.mxu1 %v1528_v11 }
  0x30   : > { %424 = vmatprep.subr.bf16.mxu0 %v1529_v12  ;;  %1476 = vmatprep.subr.bf16.mxu1 %v1529_v12 }
  0x33   : > { %425 = vmatpush1.bf16.msra.mxu0 %v1531_v13  ;;  %1484 = vmatpush1.bf16.msra.mxu1 %v1531_v13 }
  0x34   : > { %426 = vmatprep.subr.bf16.mxu0 %v1532_v14  ;;  %1477 = vmatprep.subr.bf16.mxu1 %v1532_v14  ;;  %v546_v14 = vld [vmem:[#allocation3] sm:$0xff] }
  0x37   : > { %427 = vmatpush1.bf16.msra.mxu0 %v1534_v15  ;;  %1485 = vmatpush1.bf16.msra.mxu1 %v1534_v15 }
  0x38   : > { %428 = vmatprep.subr.bf16.mxu0 %v1535_v16  ;;  %1478 = vmatprep.subr.bf16.mxu1 %v1535_v16 }
  0x3b   : > { %429 = vmatpush1.bf16.msra.mxu0 %v1537_v17  ;;  %1486 = vmatpush1.bf16.msra.mxu1 %v1537_v17  ;;  %v551_v17 = vld [vmem:[#allocation3 + $0x28] sm:$0xff] }
  0x3e   : > { %447 = vmatmul.mubr.bf16.vlgmr.msra.gmra.mxu0 %v1538_v18  ;;  %467 = vmatmul.mubr.bf16.vlgmr.msra.gmra.mxu1 %v1539_v19  ;;  %v550_v18 = vld [vmem:[#allocation3 + $0x20] sm:$0xff] }
  0x3f   : > { %456 = vmatprep.mubr.bf16.mxu0 %v1585_v3  ;;  %476 = vmatprep.mubr.bf16.mxu1 %v1585_v3 }
  0x46   : > { %457 = vmatmul.mubr.bf16.gmra.mxu0 %v1540_v20  ;;  %477 = vmatmul.mubr.bf16.gmra.mxu1 %v1541_v21 }
  0xfe   : > { %v448_v22 = vpop.f32.mrf.mxu0  ;;  %v468_v23 = vpop.f32.mrf.mxu1 }
  0xff   : > { %v603_v34 = vmul.f32 %v448_v22, %v448_v22  ;;  %v611_v53 = vmul.f32 %v468_v23, %v468_v23 }
 0x100   : > { %v450_v24 = vpop.f32.mrf.mxu0  ;;  %v470_v25 = vpop.f32.mrf.mxu1 }
 0x101   : > { %v1367_v26 = vpack.c.bf16 %v450_v24, %v448_v22  ;;  %v1371_v27 = vpack.c.bf16 %v470_v25, %v468_v23  ;;  %v554_v28 = vadd.f32 %v450_v24, %v448_v22  ;;  %v566_v33 = vadd.f32 %v470_v25, %v468_v23  ;;  %v595_v23 = vld [vmem:[#allocation4] sm:$0xff] }
 0x102   : > { %v452_v29 = vpop.f32.mrf.mxu0  ;;  %v472_v30 = vpop.f32.mrf.mxu1  ;;  %v604_v35 = vmul.f32 %v450_v24, %v450_v24  ;;  %v612_v46 = vmul.f32 %v470_v25, %v470_v25  ;;  %v596_v24 = vld [vmem:[#allocation4 + $0x8] sm:$0xff] }
 0x103   : > { %538 = vst [vmem:[#allocation2 + $0x30] sm:$0xff] %v1367_v26  ;;  %542 = vst [vmem:[#allocation2 + $0x8] sm:$0xff] %v1371_v27  ;;  %555 = vadd.xlane.f32.xlu0 %v554_v28  ;;  %v605_v42 = vmul.f32 %v452_v29, %v452_v29  ;;  %v613_v54 = vmul.f32 %v472_v30, %v472_v30 }
 0x104   : > { %v454_v31 = vpop.f32.mrf.mxu0  ;;  %v474_v32 = vpop.f32.mrf.mxu1  ;;  %v619_v44 = vadd.f32 %v604_v35, %v603_v34  ;;  %v631_v58 = vadd.f32 %v612_v46, %v611_v53  ;;  %v547_v35 = vld [vmem:[#allocation3 + $0x8] sm:$0xff]  ;;  %v601_v53 = vld [vmem:[#allocation4 + $0x30] sm:$0xff] }
 0x105   : > { %v1368_v36 = vpack.c.bf16 %v454_v31, %v452_v29  ;;  %v1372_v37 = vpack.c.bf16 %v474_v32, %v472_v30  ;;  %v569_v38 = vadd.f32 %v474_v32, %v472_v30  ;;  %v606_v39 = vmul.f32 %v454_v31, %v454_v31  ;;  %v600_v30 = vld [vmem:[#allocation4 + $0x28] sm:$0xff] }
 0x106   : > { %v458_v40 = vpop.f32.mrf.mxu0  ;;  %v478_v41 = vpop.f32.mrf.mxu1  ;;  %v614_v50 = vmul.f32 %v474_v32, %v474_v32  ;;  %v557_v61 = vadd.f32 %v454_v31, %v452_v29  ;;  %v599_v29 = vld [vmem:[#allocation4 + $0x20] sm:$0xff] }
 0x107   : > { %539 = vst [vmem:[#allocation2] sm:$0xff] %v1368_v36  ;;  %543 = vst [vmem:[#allocation2 + $0x20] sm:$0xff] %v1372_v37  ;;  %570 = vadd.xlane.f32.xlu1 %v569_v38  ;;  %567 = vadd.xlane.f32.xlu0 %v566_v33  ;;  %v622_v48 = vadd.f32 %v606_v39, %v605_v42  ;;  %v607_v1 = vmul.f32 %v458_v40, %v458_v40  ;;  %v548_v36 = vld [vmem:[#allocation3 + $0x10] sm:$0xff]  ;;  %v549_v42 = vld [vmem:[#allocation3 + $0x18] sm:$0xff] }
 0x108   : > { %v460_v43 = vpop.f32.mrf.mxu0  ;;  %v480_v45 = vpop.f32.mrf.mxu1  ;;  %v634_v59 = vadd.f32 %v614_v50, %v613_v54  ;;  %v615_v3 = vmul.f32 %v478_v41, %v478_v41  ;;  %v598_v54 = vld [vmem:[#allocation4 + $0x18] sm:$0xff] }
 0x109   : > { %v1369_v47 = vpack.c.bf16 %v460_v43, %v458_v40  ;;  %v1373_v49 = vpack.c.bf16 %v480_v45, %v478_v41  ;;  %v560_v62 = vadd.f32 %v460_v43, %v458_v40  ;;  %v572_v63 = vadd.f32 %v480_v45, %v478_v41  ;;  %v552_v41 = vld [vmem:[#allocation3 + $0x30] sm:$0xff] }
 0x10a   : > { %v462_v51 = vpop.f32.mrf.mxu0  ;;  %v482_v52 = vpop.f32.mrf.mxu1  ;;  %v608_v2 = vmul.f32 %v460_v43, %v460_v43  ;;  %v616_v4 = vmul.f32 %v480_v45, %v480_v45 }
 0x10b   : > { %540 = vst [vmem:[#allocation2 + $0x18] sm:$0xff] %v1369_v47  ;;  %620 = vadd.xlane.f32.xlu0 %v619_v44  ;;  %623 = vadd.xlane.f32.xlu1 %v622_v48  ;;  %544 = vst [vmem:[#allocation2 + $0x28] sm:$0xff] %v1373_v49  ;;  %v609_v8 = vmul.f32 %v462_v51, %v462_v51  ;;  %v617_v12 = vmul.f32 %v482_v52, %v482_v52  ;;  %v597_v47 = vld [vmem:[#allocation4 + $0x10] sm:$0xff]  ;;  %v553_v48 = vld [vmem:[#allocation3 + $0x38] sm:$0xff] }
 0x10c   : > { %v464_v55 = vpop.f32.mrf.mxu0  ;;  %v484_v56 = vpop.f32.mrf.mxu1  ;;  %v625_v6 = vadd.f32 %v608_v2, %v607_v1  ;;  %v637_v10 = vadd.f32 %v616_v4, %v615_v3 }
 0x10d   : > { %v1370_v57 = vpack.c.bf16 %v464_v55, %v462_v51  ;;  %v1374_v60 = vpack.c.bf16 %v484_v56, %v482_v52  ;;  %v563_v0 = vadd.f32 %v464_v55, %v462_v51  ;;  %v610_v5 = vmul.f32 %v464_v55, %v464_v55 }
 0x10e   : > { %v575_v7 = vadd.f32 %v484_v56, %v482_v52  ;;  %v618_v9 = vmul.f32 %v484_v56, %v484_v56 }
 0x10f   : > { %541 = vst [vmem:[#allocation2 + $0x10] sm:$0xff] %v1370_v57  ;;  %632 = vadd.xlane.f32.xlu0 %v631_v58  ;;  %635 = vadd.xlane.f32.xlu1 %v634_v59  ;;  %545 = vst [vmem:[#allocation2 + $0x38] sm:$0xff] %v1374_v60  ;;  %v628_v11 = vadd.f32 %v610_v5, %v609_v8  ;;  %v602_v59 = vld [vmem:[#allocation4 + $0x38] sm:$0xff] }
 0x110   : > { %v640_v13 = vadd.f32 %v618_v9, %v617_v12 }
 0x113   : > { %558 = vadd.xlane.f32.xlu0 %v557_v61  ;;  %561 = vadd.xlane.f32.xlu1 %v560_v62 }
 0x117   : > { %573 = vadd.xlane.f32.xlu0 %v572_v63  ;;  %564 = vadd.xlane.f32.xlu1 %v563_v0 }
 0x11b   : > { %626 = vadd.xlane.f32.xlu0 %v625_v6  ;;  %576 = vadd.xlane.f32.xlu1 %v575_v7 }
 0x11f   : > { %638 = vadd.xlane.f32.xlu0 %v637_v10  ;;  %629 = vadd.xlane.f32.xlu1 %v628_v11 }
 0x123   : > { %641 = vadd.xlane.f32.xlu1 %v640_v13 }
 0x18c   : > { %v556_v15 = vpop.xlane.xlu0 %555 }
 0x18d   : > { %v578_v16 = vadd.f32 %v556_v15, %v546_v14 }
 0x18f   : > { %587 = vst.msk [vmem:[#allocation3] sm:$0xff] %vm586_vm1, %v578_v16 }
 0x190   : > { %v571_v19 = vpop.xlane.xlu1 %570  ;;  %v568_v20 = vpop.xlane.xlu0 %567 }
 0x191   : > { %v583_v21 = vadd.f32 %v571_v19, %v551_v17  ;;  %v582_v22 = vadd.f32 %v568_v20, %v550_v18 }
 0x193   : > { %592 = vst.msk [vmem:[#allocation3 + $0x28] sm:$0xff] %vm586_vm1, %v583_v21  ;;  %591 = vst.msk [vmem:[#allocation3 + $0x20] sm:$0xff] %vm586_vm1, %v582_v22 }
 0x194   : > { %v621_v25 = vpop.xlane.xlu0 %620  ;;  %v624_v26 = vpop.xlane.xlu1 %623 }
 0x195   : > { %v643_v27 = vadd.f32 %v621_v25, %v595_v23  ;;  %v644_v28 = vadd.f32 %v624_v26, %v596_v24 }
 0x197   : > { %651 = vst.msk [vmem:[#allocation4] sm:$0xff] %vm586_vm1, %v643_v27  ;;  %652 = vst.msk [vmem:[#allocation4 + $0x8] sm:$0xff] %vm586_vm1, %v644_v28 }
 0x198   : > { %v633_v31 = vpop.xlane.xlu0 %632  ;;  %v636_v32 = vpop.xlane.xlu1 %635 }
 0x199   : > { %v647_v33 = vadd.f32 %v633_v31, %v599_v29  ;;  %v648_v34 = vadd.f32 %v636_v32, %v600_v30 }
 0x19b   : > { %655 = vst.msk [vmem:[#allocation4 + $0x20] sm:$0xff] %vm586_vm1, %v647_v33  ;;  %656 = vst.msk [vmem:[#allocation4 + $0x28] sm:$0xff] %vm586_vm1, %v648_v34 }
 0x19c   : > { %v559_v37 = vpop.xlane.xlu0 %558  ;;  %v562_v38 = vpop.xlane.xlu1 %561 }
 0x19d   : > { %v579_v39 = vadd.f32 %v559_v37, %v547_v35  ;;  %v580_v40 = vadd.f32 %v562_v38, %v548_v36 }
 0x19f   : > { %588 = vst.msk [vmem:[#allocation3 + $0x8] sm:$0xff] %vm586_vm1, %v579_v39  ;;  %589 = vst.msk [vmem:[#allocation3 + $0x10] sm:$0xff] %vm586_vm1, %v580_v40 }
 0x1a0   : > { %v574_v43 = vpop.xlane.xlu0 %573  ;;  %v565_v44 = vpop.xlane.xlu1 %564 }
 0x1a1   : > { %v584_v45 = vadd.f32 %v574_v43, %v552_v41  ;;  %v581_v46 = vadd.f32 %v565_v44, %v549_v42 }
 0x1a3   : > { %593 = vst.msk [vmem:[#allocation3 + $0x30] sm:$0xff] %vm586_vm1, %v584_v45  ;;  %590 = vst.msk [vmem:[#allocation3 + $0x18] sm:$0xff] %vm586_vm1, %v581_v46 }
 0x1a4   : > { %v627_v49 = vpop.xlane.xlu0 %626  ;;  %v577_v50 = vpop.xlane.xlu1 %576 }
 0x1a5   : > { %v645_v51 = vadd.f32 %v627_v49, %v597_v47  ;;  %v585_v52 = vadd.f32 %v577_v50, %v553_v48 }
 0x1a7   : > { %653 = vst.msk [vmem:[#allocation4 + $0x10] sm:$0xff] %vm586_vm1, %v645_v51  ;;  %594 = vst.msk [vmem:[#allocation3 + $0x38] sm:$0xff] %vm586_vm1, %v585_v52 }
 0x1a8   : > { %v639_v55 = vpop.xlane.xlu0 %638  ;;  %v630_v56 = vpop.xlane.xlu1 %629 }
 0x1a9   : > { %v649_v57 = vadd.f32 %v639_v55, %v601_v53  ;;  %v646_v58 = vadd.f32 %v630_v56, %v598_v54 }
 0x1ab   : > { %657 = vst.msk [vmem:[#allocation4 + $0x30] sm:$0xff] %vm586_vm1, %v649_v57  ;;  %654 = vst.msk [vmem:[#allocation4 + $0x18] sm:$0xff] %vm586_vm1, %v646_v58 }
 0x1ac   : > { %v642_v60 = vpop.xlane.xlu1 %641 }
 0x1ad   : > { %v650_v61 = vadd.f32 %v642_v60, %v602_v59 }
 0x1af   : > { %658 = vst.msk [vmem:[#allocation4 + $0x38] sm:$0xff] %vm586_vm1, %v650_v61 }
 0x1b0 PF: > { %p1337_p6 = scmp.ne.s32.totalorder %s1574_s18, 1 }
 0x1b2   : > { %662 = sbr.rel (%p1337_p6) target bundleno = 839 (0x347), region = 52 }
 0x1b7   : > { %v678_v62 = vld [vmem:[#allocation3 + $0x38] sm:$0xff]  ;;  %v677_v0 = vld [vmem:[#allocation3 + $0x30] sm:$0xff]  ;;  %v676_v2 = vld [vmem:[#allocation3 + $0x28] sm:$0xff]  ;;  %vm679_vm2 = vcmask 523264   ;;  %v1586_v22 = vmov 0  }
 0x1b8   : > { %v824_v63 = vld [vmem:[#allocation4 + $0x38] sm:$0xff]  ;;  %1415 = vmatprep.subr.mxu0 %v678_v62  ;;  %v823_v1 = vld [vmem:[#allocation4 + $0x30] sm:$0xff]  ;;  %v822_v3 = vld [vmem:[#allocation4 + $0x28] sm:$0xff]  ;;  %1542 = vset.pattern.permute.xlu0 %v1586_v22 }
 0x1b9   : > { %1443 = vmatprep.subr.mxu1 %v824_v63  ;;  %1416 = vmatpush3.msra.mxu0 %v678_v62  ;;  %v675_v4 = vld [vmem:[#allocation3 + $0x20] sm:$0xff]  ;;  %v674_v6 = vld [vmem:[#allocation3 + $0x18] sm:$0xff]  ;;  %v673_v8 = vld [vmem:[#allocation3 + $0x10] sm:$0xff] }
 0x1ba   : > { %1444 = vmatpush3.msra.mxu1 %v824_v63  ;;  %1417 = vmatprep.subr.mxu0 %v677_v0  ;;  %v821_v5 = vld [vmem:[#allocation4 + $0x20] sm:$0xff]  ;;  %v820_v7 = vld [vmem:[#allocation4 + $0x18] sm:$0xff]  ;;  %v819_v9 = vld [vmem:[#allocation4 + $0x10] sm:$0xff] }
 0x1bb   : > { %1445 = vmatprep.subr.mxu1 %v823_v1  ;;  %1418 = vmatpush3.msra.mxu0 %v677_v0  ;;  %v672_v10 = vld [vmem:[#allocation3 + $0x8] sm:$0xff]  ;;  %v671_v12 = vld [vmem:[#allocation3] sm:$0xff]  ;;  %v665_v16 = vld [vmem:[%s1897_s4 + $0x10] sm:$0xff] }
 0x1bc   : > { %1446 = vmatpush3.msra.mxu1 %v823_v1  ;;  %1419 = vmatprep.subr.mxu0 %v676_v2  ;;  %v818_v11 = vld [vmem:[#allocation4 + $0x8] sm:$0xff]  ;;  %v817_v13 = vld [vmem:[#allocation4] sm:$0xff]  ;;  %v666_v17 = vld [vmem:[%s1897_s4 + $0x18] sm:$0xff] }
 0x1bd   : > { %1447 = vmatprep.subr.mxu1 %v822_v3  ;;  %1420 = vmatpush3.msra.mxu0 %v676_v2  ;;  %v663_v14 = vld [vmem:[%s1897_s4] sm:$0xff]  ;;  %v664_v15 = vld [vmem:[%s1897_s4 + $0x8] sm:$0xff]  ;;  %v669_v20 = vld [vmem:[%s1897_s4 + $0x30] sm:$0xff] }
 0x1be   : > { %1448 = vmatpush3.msra.mxu1 %v822_v3  ;;  %1421 = vmatprep.subr.mxu0 %v675_v4  ;;  %v667_v18 = vld [vmem:[%s1897_s4 + $0x20] sm:$0xff]  ;;  %v668_v19 = vld [vmem:[%s1897_s4 + $0x28] sm:$0xff]  ;;  %v670_v21 = vld [vmem:[%s1897_s4 + $0x38] sm:$0xff] }
 0x1bf   : > { %1449 = vmatprep.subr.mxu1 %v821_v5  ;;  %1422 = vmatpush3.msra.mxu0 %v675_v4 }
 0x1c0   : > { %1450 = vmatpush3.msra.mxu1 %v821_v5  ;;  %1423 = vmatprep.subr.mxu0 %v674_v6 }
 0x1c1   : > { %1451 = vmatprep.subr.mxu1 %v820_v7  ;;  %1424 = vmatpush3.msra.mxu0 %v674_v6 }
 0x1c2   : > { %1452 = vmatpush3.msra.mxu1 %v820_v7  ;;  %1425 = vmatprep.subr.mxu0 %v673_v8 }
 0x1c3   : > { %1453 = vmatprep.subr.mxu1 %v819_v9  ;;  %1426 = vmatpush3.msra.mxu0 %v673_v8 }
 0x1c4   : > { %1454 = vmatpush3.msra.mxu1 %v819_v9  ;;  %1427 = vmatprep.subr.mxu0 %v672_v10 }
 0x1c5   : > { %1455 = vmatprep.subr.mxu1 %v818_v11  ;;  %1428 = vmatpush3.msra.mxu0 %v672_v10 }
 0x1c6   : > { %1456 = vmatpush3.msra.mxu1 %v818_v11  ;;  %1429 = vmatprep.subr.mxu0 %v671_v12 }
 0x1c7   : > { %1457 = vmatprep.subr.mxu1 %v817_v13  ;;  %1430 = vmatpush3.msra.mxu0 %v671_v12 }
 0x1c8   : > { %1431 = vmatprep.mubr.msk.f32.mxu0 %vm679_vm2, %v663_v14  ;;  %1458 = vmatpush3.msra.mxu1 %v817_v13 }
 0x1c9   : > { %1459 = vmatprep.mubr.msk.f32.mxu1 %vm679_vm2, %v663_v14  ;;  %1432 = vmatmul.mubr.msk.f32.vlgmr.msra.gmra.mxu0 %vm679_vm2, %v664_v15 }
 0x1ca   : > { %1460 = vmatmul.mubr.msk.f32.vlgmr.msra.gmra.mxu1 %vm679_vm2, %v664_v15  ;;  %1434 = vmatprep.mubr.msk.f32.mxu0 %vm679_vm2, %v665_v16 }
 0x1cb   : > { %1462 = vmatprep.mubr.msk.f32.mxu1 %vm679_vm2, %v665_v16  ;;  %1543 = vset.pattern.permute.xlu1 %v1586_v22 }
 0x1cd   : > { %1435 = vmatmul.mubr.msk.f32.gmra.mxu0 %vm679_vm2, %v666_v17 }
 0x1ce   : > { %1463 = vmatmul.mubr.msk.f32.gmra.mxu1 %vm679_vm2, %v666_v17  ;;  %1437 = vmatprep.mubr.msk.f32.mxu0 %vm679_vm2, %v667_v18 }
 0x1cf   : > { %1465 = vmatprep.mubr.msk.f32.mxu1 %vm679_vm2, %v667_v18 }
 0x1d1   : > { %1438 = vmatmul.mubr.msk.f32.gmra.mxu0 %vm679_vm2, %v668_v19 }
 0x1d2   : > { %1466 = vmatmul.mubr.msk.f32.gmra.mxu1 %vm679_vm2, %v668_v19  ;;  %1440 = vmatprep.mubr.msk.f32.mxu0 %vm679_vm2, %v669_v20 }
 0x1d3   : > { %1468 = vmatprep.mubr.msk.f32.mxu1 %vm679_vm2, %v669_v20  ;;  %v963_v20 = vld [vmem:[%s1895_s2 + $0x8] sm:$0xff] }
 0x1d5   : > { %1441 = vmatmul.mubr.msk.f32.gmra.mxu0 %vm679_vm2, %v670_v21 }
 0x1d6   : > { %1469 = vmatmul.mubr.msk.f32.gmra.mxu1 %vm679_vm2, %v670_v21 }
 0x289   : > { %v1433_v23 = vpop.f32.mrf.mxu0 }
 0x28a   : > { %v1461_v24 = vpop.f32.mrf.mxu1  ;;  %v1772_v25 = vmul.f32 0.0017301039, %v1433_v23  ;;  %v962_v23 = vld [vmem:[%s1895_s2] sm:$0xff] }
 0x28b   : > { %v931_v26 = vmul.f32 0.0017301039, %v1461_v24  ;;  %v770_v27 = vpop.f32.mrf.mxu0 }
 0x28c   : > { %v891_v28 = vpop.f32.mrf.mxu1  ;;  %v939_v29 = vmul.f32 %v1772_v25, %v1772_v25  ;;  %v1776_v30 = vmul.f32 0.0017301039, %v770_v27 }
 0x28d   : > { %v930_v31 = vmul.f32 0.0017301039, %v891_v28  ;;  %v1436_v32 = vpop.f32.mrf.mxu0  ;;  %v965_v28 = vld [vmem:[%s1895_s2 + $0x18] sm:$0xff] }
 0x28e   : > { %v1464_v33 = vpop.f32.mrf.mxu1  ;;  %v947_v34 = vsub.f32 %v931_v26, %v939_v29  ;;  %v938_v35 = vmul.f32 %v1776_v30, %v1776_v30  ;;  %v1780_v36 = vmul.f32 0.0017301039, %v1436_v32 }
 0x28f   : > { %v933_v37 = vmul.f32 0.0017301039, %v1464_v33  ;;  %v780_v38 = vpop.f32.mrf.mxu0 }
 0x290   : > { %v901_v39 = vpop.f32.mrf.mxu1  ;;  %v955_v40 = vmax.f32 %v947_v34, 0.0  ;;  %v946_v41 = vsub.f32 %v930_v31, %v938_v35  ;;  %v941_v42 = vmul.f32 %v1780_v36, %v1780_v36  ;;  %v1784_v43 = vmul.f32 0.0017301039, %v780_v38  ;;  %v994_v38 = vld [vmem:[%s1896_s3] sm:$0xff] }
 0x291   : > { %v932_v44 = vmul.f32 0.0017301039, %v901_v39  ;;  %v1439_v45 = vpop.f32.mrf.mxu0  ;;  %v995_v39 = vld [vmem:[%s1896_s3 + $0x8] sm:$0xff] }
 0x292   : > { %v1467_v46 = vpop.f32.mrf.mxu1  ;;  %v971_v47 = vadd.f32 1e-05, %v955_v40  ;;  %v954_v48 = vmax.f32 %v946_v41, 0.0  ;;  %v949_v49 = vsub.f32 %v933_v37, %v941_v42  ;;  %v940_v50 = vmul.f32 %v1784_v43, %v1784_v43  ;;  %v964_v40 = vld [vmem:[%s1895_s2 + $0x10] sm:$0xff] }
 0x293   : > { %v1788_v51 = vmul.f32 0.0017301039, %v1439_v45  ;;  %v790_v52 = vpop.f32.mrf.mxu0  ;;  %v935_v53 = vmul.f32 0.0017301039, %v1467_v46 }
 0x294   : > { %v911_v54 = vpop.f32.mrf.mxu1  ;;  %1544 = vrsqrt.f32 %v971_v47  ;;  %v970_v55 = vadd.f32 1e-05, %v954_v48  ;;  %v957_v56 = vmax.f32 %v949_v49, 0.0  ;;  %v948_v57 = vsub.f32 %v932_v44, %v940_v50  ;;  %v967_v48 = vld [vmem:[%s1895_s2 + $0x28] sm:$0xff]  ;;  %v996_v49 = vld [vmem:[%s1896_s3 + $0x10] sm:$0xff] }
 0x295   : > { %v943_v58 = vmul.f32 %v1788_v51, %v1788_v51  ;;  %v1792_v59 = vmul.f32 0.0017301039, %v790_v52  ;;  %v1442_v60 = vpop.f32.mrf.mxu0  ;;  %v934_v61 = vmul.f32 0.0017301039, %v911_v54 }
 0x296   : > { %v1470_v62 = vpop.f32.mrf.mxu1  ;;  %1546 = vrsqrt.f32 %v970_v55  ;;  %v973_v63 = vadd.f32 1e-05, %v957_v56  ;;  %v956_v0 = vmax.f32 %v948_v57, 0.0  ;;  %v1794_v1 = vmul.f32 0.0017301039, %v1442_v60  ;;  %v968_v55 = vld [vmem:[%s1895_s2 + $0x30] sm:$0xff] }
 0x297   : > { %v942_v2 = vmul.f32 %v1792_v59, %v1792_v59  ;;  %v951_v3 = vsub.f32 %v935_v53, %v943_v58  ;;  %v800_v4 = vpop.f32.mrf.mxu0  ;;  %v937_v10 = vmul.f32 0.0017301039, %v1470_v62 }
 0x298   : > { %v921_v5 = vpop.f32.mrf.mxu1  ;;  %1548 = vrsqrt.f32 %v973_v63  ;;  %v972_v6 = vadd.f32 1e-05, %v956_v0  ;;  %v1798_v7 = vmul.f32 0.0017301039, %v800_v4  ;;  %v945_v8 = vmul.f32 %v1794_v1, %v1794_v1 }
 0x299   : > { %v950_v9 = vsub.f32 %v934_v61, %v942_v2  ;;  %v936_v11 = vmul.f32 0.0017301039, %v921_v5  ;;  %v959_v12 = vmax.f32 %v951_v3, 0.0  ;;  %v998_v61 = vld [vmem:[%s1896_s3 + $0x20] sm:$0xff]  ;;  %v1000_v3 = vld [vmem:[%s1896_s3 + $0x30] sm:$0xff] }
 0x29a   : > { %1550 = vrsqrt.f32 %v972_v6  ;;  %v944_v13 = vmul.f32 %v1798_v7, %v1798_v7  ;;  %v953_v17 = vsub.f32 %v937_v10, %v945_v8  ;;  %v1022_v8 = vld [vmem:[#allocation2] sm:$0xff]  ;;  %v1021_v10 = vld [vmem:[#allocation2 + $0x30] sm:$0xff] }
 0x29b   : > { %v958_v14 = vmax.f32 %v950_v9, 0.0  ;;  %v975_v18 = vadd.f32 1e-05, %v959_v12  ;;  %v1032_v12 = vunpack.c.h.bf16 %v1022_v8 }
 0x29c   : > { %v952_v15 = vsub.f32 %v936_v11, %v944_v13  ;;  %v961_v22 = vmax.f32 %v953_v17, 0.0  ;;  %v1031_v11 = vunpack.c.l.bf16 %v1022_v8  ;;  %v1029_v13 = vunpack.c.l.bf16 %v1021_v10 }
 0x29d   : > { %v974_v16 = vadd.f32 1e-05, %v958_v14  ;;  %v1030_v14 = vunpack.c.h.bf16 %v1021_v10 }
 0x29e   : > { %v960_v19 = vmax.f32 %v952_v15, 0.0  ;;  %v977_v32 = vadd.f32 1e-05, %v961_v22 }
 0x29f   : > { %1552 = vrsqrt.f32 %v974_v16 }
 0x2a0   : > { %1554 = vrsqrt.f32 %v975_v18  ;;  %v976_v24 = vadd.f32 1e-05, %v960_v19 }
 0x2a1   : > { %v1545_v21 = vpop.eup %1544 }
 0x2a2   : > { %v987_v26 = vmul.f32 %v1545_v21, %v963_v20  ;;  %1556 = vrsqrt.f32 %v976_v24  ;;  %v1023_v20 = vld [vmem:[#allocation2 + $0x18] sm:$0xff] }
 0x2a3   : > { %v1547_v27 = vpop.eup %1546  ;;  %1558 = vrsqrt.f32 %v977_v32 }
 0x2a4   : > { %1052 = vperm.xlu0 %1542, %v987_v26   ;;  %v986_v29 = vmul.f32 %v1547_v27, %v962_v23  ;;  %v1003_v33 = vmul.f32 %v987_v26, %v1772_v25 }
 0x2a5   : > { %v1549_v31 = vpop.eup %1548 }
 0x2a6   : > { %v989_v34 = vmul.f32 %v1549_v31, %v965_v28  ;;  %v1002_v35 = vmul.f32 %v986_v29, %v1776_v30  ;;  %v1011_v41 = vsub.f32 %v995_v39, %v1003_v33  ;;  %v966_v30 = vld [vmem:[%s1895_s2 + $0x20] sm:$0xff]  ;;  %v1033_v28 = vunpack.c.l.bf16 %v1023_v20 }
 0x2a7   : > { %v1551_v37 = vpop.eup %1550 }
 0x2a8   : > { %1047 = vperm.xlu0 %1542, %v986_v29   ;;  %1062 = vperm.xlu1 %1543, %v989_v34   ;;  %v1010_v25 = vsub.f32 %v994_v38, %v1002_v35  ;;  %v988_v42 = vmul.f32 %v1551_v37, %v964_v40  ;;  %v1005_v50 = vmul.f32 %v989_v34, %v1780_v36  ;;  %v969_v36 = vld [vmem:[%s1895_s2 + $0x38] sm:$0xff]  ;;  %v1034_v29 = vunpack.c.h.bf16 %v1023_v20  ;;  %v1024_v35 = vld [vmem:[#allocation2 + $0x10] sm:$0xff] }
 0x2aa   : > { %v1004_v46 = vmul.f32 %v988_v42, %v1784_v43  ;;  %v997_v43 = vld [vmem:[%s1896_s3 + $0x18] sm:$0xff] }
 0x2ab   : > { %v1013_v56 = vsub.f32 %v997_v43, %v1005_v50 }
 0x2ac   : > { %v1553_v44 = vpop.eup %1552  ;;  %1103 = vperm.xlu0 %1542, %v1010_v25   ;;  %1108 = vperm.xlu1 %1543, %v1011_v41   ;;  %v1012_v53 = vsub.f32 %v996_v49, %v1004_v46  ;;  %v1035_v25 = vunpack.c.l.bf16 %v1024_v35  ;;  %v1036_v41 = vunpack.c.h.bf16 %v1024_v35 }
 0x2ad   : > { %v990_v45 = vmul.f32 %v1553_v44, %v966_v30  ;;  %v1555_v47 = vpop.eup %1554  ;;  %v1025_v44 = vld [vmem:[#allocation2 + $0x8] sm:$0xff] }
 0x2ae   : > { %v991_v52 = vmul.f32 %v1555_v47, %v967_v48  ;;  %v1037_v49 = vunpack.c.l.bf16 %v1025_v44 }
 0x2af   : > { %v1557_v54 = vpop.eup %1556  ;;  %v1006_v58 = vmul.f32 %v990_v45, %v1792_v59  ;;  %v999_v59 = vld [vmem:[%s1896_s3 + $0x28] sm:$0xff] }
 0x2b0   : > { %1057 = vperm.xlu1 %1543, %v988_v42   ;;  %1067 = vperm.xlu0 %1542, %v990_v45   ;;  %v992_v57 = vmul.f32 %v1557_v54, %v968_v55  ;;  %v1559_v60 = vpop.eup %1558  ;;  %v1007_v0 = vmul.f32 %v991_v52, %v1788_v51  ;;  %v1001_v51 = vld [vmem:[%s1896_s3 + $0x38] sm:$0xff]  ;;  %v1027_v55 = vld [vmem:[#allocation2 + $0x28] sm:$0xff] }
 0x2b1   : > { %v993_v62 = vmul.f32 %v1559_v60, %v969_v36  ;;  %v1014_v63 = vsub.f32 %v998_v61, %v1006_v58 }
 0x2b2   : > { %v1008_v2 = vmul.f32 %v992_v57, %v1798_v7  ;;  %v1015_v4 = vsub.f32 %v999_v59, %v1007_v0  ;;  %v1041_v0 = vunpack.c.l.bf16 %v1027_v55 }
 0x2b3   : > { %v1009_v6 = vmul.f32 %v993_v62, %v1794_v1 }
 0x2b4   : > { %1072 = vperm.xlu1 %1543, %v991_v52   ;;  %1113 = vperm.xlu0 %1542, %v1012_v53   ;;  %v1016_v5 = vsub.f32 %v1000_v3, %v1008_v2  ;;  %v1026_v53 = vld [vmem:[#allocation2 + $0x20] sm:$0xff] }
 0x2b5   : > { %v1017_v7 = vsub.f32 %v1001_v51, %v1009_v6 }
 0x2b8   : > { %1118 = vperm.xlu1 %1543, %v1013_v56   ;;  %1077 = vperm.xlu0 %1542, %v992_v57   ;;  %v1038_v56 = vunpack.c.h.bf16 %v1025_v44 }
 0x2bc   : > { %1082 = vperm.xlu1 %1543, %v993_v62   ;;  %1123 = vperm.xlu0 %1542, %v1014_v63   ;;  %v1039_v62 = vunpack.c.l.bf16 %v1026_v53  ;;  %v1040_v63 = vunpack.c.h.bf16 %v1026_v53 }
 0x2c0   : > { %1128 = vperm.xlu1 %1543, %v1015_v4   ;;  %1133 = vperm.xlu0 %1542, %v1016_v5   ;;  %v1042_v4 = vunpack.c.h.bf16 %v1027_v55  ;;  %v1028_v5 = vld [vmem:[#allocation2 + $0x38] sm:$0xff] }
 0x2c4   : > { %1138 = vperm.xlu1 %1543, %v1017_v7  }
 0x31f   : > { %v1053_v9 = vpop.permute.xlu0 %1052 }
 0x320   : > { %v1087_v17 = vmul.f32 %v1053_v9, %v1031_v11  ;;  %v1088_v18 = vmul.f32 %v1053_v9, %v1032_v12  ;;  %v1043_v11 = vunpack.c.l.bf16 %v1028_v5  ;;  %v1044_v12 = vunpack.c.h.bf16 %v1028_v5 }
 0x323   : > { %v1048_v15 = vpop.permute.xlu0 %1047  ;;  %v1063_v16 = vpop.permute.xlu1 %1062 }
 0x324   : > { %v1085_v1 = vmul.f32 %v1048_v15, %v1029_v13  ;;  %v1086_v19 = vmul.f32 %v1048_v15, %v1030_v14  ;;  %v1091_v50 = vmul.f32 %v1063_v16, %v1035_v25  ;;  %v1092_v52 = vmul.f32 %v1063_v16, %v1036_v41 }
 0x327   : > { %v1104_v21 = vpop.permute.xlu0 %1103  ;;  %v1109_v22 = vpop.permute.xlu1 %1108 }
 0x328   : > { %v1141_v23 = vadd.f32 %v1104_v21, %v1085_v1  ;;  %v1142_v24 = vadd.f32 %v1104_v21, %v1086_v19  ;;  %v1143_v26 = vadd.f32 %v1109_v22, %v1087_v17  ;;  %v1144_v27 = vadd.f32 %v1109_v22, %v1088_v18 }
 0x32a   : > { %v1157_v31 = vmax.f32 %v1141_v23, 0.0  ;;  %v1158_v32 = vmax.f32 %v1142_v24, 0.0  ;;  %v1159_v33 = vmax.f32 %v1143_v26, 0.0  ;;  %v1160_v34 = vmax.f32 %v1144_v27, 0.0 }
 0x32b   : > { %v1058_v37 = vpop.permute.xlu1 %1057  ;;  %v1068_v38 = vpop.permute.xlu0 %1067 }
 0x32c   : > { %v1375_v39 = vpack.c.bf16 %v1158_v32, %v1157_v31  ;;  %v1376_v40 = vpack.c.bf16 %v1160_v34, %v1159_v33  ;;  %v1089_v42 = vmul.f32 %v1058_v37, %v1033_v28  ;;  %v1090_v30 = vmul.f32 %v1058_v37, %v1034_v29 }
 0x32d   : > { %v1093_v2 = vmul.f32 %v1068_v38, %v1037_v49  ;;  %v1094_v6 = vmul.f32 %v1068_v38, %v1038_v56 }
 0x32e   : > { %1221 = vst [vmem:[%s1898_s5] sm:$0xff] %v1375_v39  ;;  %1222 = vst [vmem:[%s1898_s5 + $0x8] sm:$0xff] %v1376_v40 }
 0x32f   : > { %v1073_v45 = vpop.permute.xlu1 %1072  ;;  %v1114_v46 = vpop.permute.xlu0 %1113 }
 0x330   : > { %v1145_v47 = vadd.f32 %v1114_v46, %v1089_v42  ;;  %v1146_v48 = vadd.f32 %v1114_v46, %v1090_v30  ;;  %v1095_v10 = vmul.f32 %v1073_v45, %v1039_v62  ;;  %v1096_v14 = vmul.f32 %v1073_v45, %v1040_v63 }
 0x332   : > { %v1161_v54 = vmax.f32 %v1145_v47, 0.0  ;;  %v1162_v43 = vmax.f32 %v1146_v48, 0.0 }
 0x333   : > { %v1119_v57 = vpop.permute.xlu1 %1118  ;;  %v1078_v58 = vpop.permute.xlu0 %1077 }
 0x334   : > { %v1377_v60 = vpack.c.bf16 %v1162_v43, %v1161_v54  ;;  %v1147_v36 = vadd.f32 %v1119_v57, %v1091_v50  ;;  %v1148_v61 = vadd.f32 %v1119_v57, %v1092_v52  ;;  %v1097_v15 = vmul.f32 %v1078_v58, %v1041_v0 }
 0x335   : > { %v1098_v16 = vmul.f32 %v1078_v58, %v1042_v4 }
 0x336   : > { %1223 = vst [vmem:[%s1898_s5 + $0x10] sm:$0xff] %v1377_v60  ;;  %v1163_v59 = vmax.f32 %v1147_v36, 0.0  ;;  %v1164_v3 = vmax.f32 %v1148_v61, 0.0 }
 0x337   : > { %v1083_v51 = vpop.permute.xlu1 %1082  ;;  %v1124_v7 = vpop.permute.xlu0 %1123 }
 0x338   : > { %v1378_v8 = vpack.c.bf16 %v1164_v3, %v1163_v59  ;;  %v1149_v9 = vadd.f32 %v1124_v7, %v1093_v2  ;;  %v1150_v13 = vadd.f32 %v1124_v7, %v1094_v6  ;;  %v1099_v24 = vmul.f32 %v1083_v51, %v1043_v11 }
 0x339   : > { %v1100_v26 = vmul.f32 %v1083_v51, %v1044_v12 }
 0x33a   : > { %1224 = vst [vmem:[%s1898_s5 + $0x18] sm:$0xff] %v1378_v8  ;;  %v1165_v17 = vmax.f32 %v1149_v9, 0.0  ;;  %v1166_v18 = vmax.f32 %v1150_v13, 0.0 }
 0x33b   : > { %v1129_v1 = vpop.permute.xlu1 %1128  ;;  %v1134_v19 = vpop.permute.xlu0 %1133 }
 0x33c   : > { %v1151_v20 = vadd.f32 %v1129_v1, %v1095_v10  ;;  %v1152_v21 = vadd.f32 %v1129_v1, %v1096_v14  ;;  %v1153_v22 = vadd.f32 %v1134_v19, %v1097_v15  ;;  %v1154_v23 = vadd.f32 %v1134_v19, %v1098_v16 }
 0x33d   : > { %v1379_v27 = vpack.c.bf16 %v1166_v18, %v1165_v17 }
 0x33e   : > { %v1167_v28 = vmax.f32 %v1151_v20, 0.0  ;;  %v1168_v29 = vmax.f32 %v1152_v21, 0.0  ;;  %v1169_v31 = vmax.f32 %v1153_v22, 0.0  ;;  %v1170_v32 = vmax.f32 %v1154_v23, 0.0 }
 0x33f   : > { %1225 = vst [vmem:[%s1898_s5 + $0x20] sm:$0xff] %v1379_v27  ;;  %v1139_v33 = vpop.permute.xlu1 %1138 }
 0x340   : > { %v1380_v34 = vpack.c.bf16 %v1168_v29, %v1167_v28  ;;  %v1381_v35 = vpack.c.bf16 %v1170_v32, %v1169_v31  ;;  %v1155_v37 = vadd.f32 %v1139_v33, %v1099_v24  ;;  %v1156_v38 = vadd.f32 %v1139_v33, %v1100_v26 }
 0x342   : > { %1226 = vst [vmem:[%s1898_s5 + $0x28] sm:$0xff] %v1380_v34  ;;  %1227 = vst [vmem:[%s1898_s5 + $0x30] sm:$0xff] %v1381_v35  ;;  %v1171_v39 = vmax.f32 %v1155_v37, 0.0  ;;  %v1172_v40 = vmax.f32 %v1156_v38, 0.0 }
 0x344   : > { %v1382_v25 = vpack.c.bf16 %v1172_v40, %v1171_v39 }
 0x346   : > { %1228 = vst [vmem:[%s1898_s5 + $0x38] sm:$0xff] %v1382_v25 }
 0x347 PF: > { %s15_s20 = sadd.s32 1, %s1582_s20   ;;  %s1899_s18 = smov %s1578_s19 }
 0x348   : > { %p12_p7 = scmp.ge.s32.totalorder %s15_s20, 4   ;;  %s1900_s19 = smov %s1902_s21 }
 0x34a   :  { %14 = sbr.rel (!%p12_p7) target bundleno = 2 (0x2), region = 84 }

// kernel: decoder_forward.7
= control target key start
LH: loop header
LB: loop body
LE: loop exit
PB: predicated region body
PF: predicated region fallthrough
CT: control target
= control target key end

     0   :  { %s1911_s18 = smov 0   ;;  %s1913_s19 = smov 0   ;;  %s2246_s0 = inlined_call_operand.vmem [shape: bf16[32,144], index: 0, kind: input, shape index: {}]   ;;  %s2247_s1 = inlined_call_operand.vmem [shape: bf16[144,768], index: 1, kind: input, shape index: {}]   ;;  %s2248_s2 = inlined_call_operand.vmem [shape: f32[32,1], index: 2, kind: input, shape index: {}]   ;;  %s2249_s3 = inlined_call_operand.vmem [shape: f32[32,1], index: 3, kind: input, shape index: {}]   ;;  %s2250_s4 = inlined_call_operand.vmem [shape: f32[32,32], index: 4, kind: input, shape index: {}]   ;;  %s2251_s5 = inlined_call_operand.vmem [shape: bf16[32,768], index: 5, kind: output, shape index: {}]  }
   0x1   :  { %s1915_s20 = smov 0  }
   0x2 LB: > { %s27_s21 = sadd.s32 1, %s1873_s19  ;;  %p1541_p0 = scmp.ge.s32.totalorder %s1877_s20, 1  ;;  %s1877_s20 = sphi %s1915_s20, %s15_s20   ;;  %s1873_s19 = sphi %s1913_s19, %s2253_s19   ;;  %s1869_s18 = sphi %s1911_s18, %s2252_s18  }
   0x3   : > { %p29_p1 = scmp.ge.s32.totalorder %s27_s21, 2  ;;  %p210_p2 = scmp.lt.s32.totalorder %s1877_s20, 3 }
   0x5   : > { %s2255_s21 = smov (%p29_p1, %s27_s21), 0  ;;  %p211_p3 = pnand %p1541_p0, %p210_p2 }
   0x6   : > { %p260_p4 = scmp.eq.s32.totalorder (!%p211_p3), %s1869_s18, 0 }
   0x7   : > { %214 = sbr.rel (%p211_p3) target bundleno = 836 (0x344), region = 40 }
   0xc   : > { %265 = sbr.rel (!%p260_p4) target bundleno = 17 (0x11), region = 44  ;;  %vm266_vm0 = vcmask (%p260_p4), 7168   ;;  %v1879_v0 = vmov (%p260_p4), 0.0  }
   0xd   : > { %267 = vst.msk [vmem:[#allocation3] sm:$0xff] (%p260_p4), %vm266_vm0, %v1879_v0  ;;  %268 = vst.msk [vmem:[#allocation3 + $0x8] sm:$0xff] (%p260_p4), %vm266_vm0, %v1879_v0 }
   0xe   : > { %269 = vst.msk [vmem:[#allocation3 + $0x10] sm:$0xff] (%p260_p4), %vm266_vm0, %v1879_v0  ;;  %270 = vst.msk [vmem:[#allocation3 + $0x18] sm:$0xff] (%p260_p4), %vm266_vm0, %v1879_v0 }
   0xf   : > { %271 = vst.msk [vmem:[#allocation4] sm:$0xff] (%p260_p4), %vm266_vm0, %v1879_v0  ;;  %272 = vst.msk [vmem:[#allocation4 + $0x8] sm:$0xff] (%p260_p4), %vm266_vm0, %v1879_v0 }
  0x10   : > { %273 = vst.msk [vmem:[#allocation4 + $0x10] sm:$0xff] (%p260_p4), %vm266_vm0, %v1879_v0  ;;  %274 = vst.msk [vmem:[#allocation4 + $0x18] sm:$0xff] (%p260_p4), %vm266_vm0, %v1879_v0 }
  0x11 PF: > { %p1543_p5 = scmp.ne.s32.totalorder %s1869_s18, 0 }
  0x13   : > { %277 = sbr.rel (%p1543_p5) target bundleno = 448 (0x1c0), region = 48 }
  0x18   : > { %v1758_v1 = vld [vmem:[%s2247_s1 + $0x154] ss:$24 sps:$4 sm:$0xff]   ;;  %v1762_v3 = vld [vmem:[%s2247_s1 + $0x150] ss:$24 sps:$4 sm:$0xff]   ;;  %v1764_v5 = vld [vmem:[%s2247_s1 + $0x124] ss:$24 sps:$4 sm:$0xff]  }
  0x19   : > { %v1760_v2 = vld [vmem:[%s2247_s1 + $0x15c] ss:$24 sps:$4 sm:$0xff]   ;;  %631 = vmatprep.subr.bf16.mxu0 %v1758_v1  ;;  %v1763_v4 = vld [vmem:[%s2247_s1 + $0x158] ss:$24 sps:$4 sm:$0xff]   ;;  %v1766_v6 = vld [vmem:[%s2247_s1 + $0x12c] ss:$24 sps:$4 sm:$0xff]  }
  0x1a   : > { %684 = vmatprep.subr.bf16.mxu1 %v1760_v2  ;;  %632 = vmatpush1.bf16.msra.mxu0 %v1762_v3  ;;  %v1768_v7 = vld [vmem:[%s2247_s1 + $0x120] ss:$24 sps:$4 sm:$0xff]   ;;  %v1770_v9 = vld [vmem:[%s2247_s1 + $0xf4] ss:$24 sps:$4 sm:$0xff]   ;;  %v1774_v11 = vld [vmem:[%s2247_s1 + $0xf0] ss:$24 sps:$4 sm:$0xff]  }
  0x1b   : > { %685 = vmatpush1.bf16.msra.mxu1 %v1763_v4  ;;  %633 = vmatprep.subr.bf16.mxu0 %v1764_v5  ;;  %v1769_v8 = vld [vmem:[%s2247_s1 + $0x128] ss:$24 sps:$4 sm:$0xff]   ;;  %v1772_v10 = vld [vmem:[%s2247_s1 + $0xfc] ss:$24 sps:$4 sm:$0xff]   ;;  %v1775_v12 = vld [vmem:[%s2247_s1 + $0xf8] ss:$24 sps:$4 sm:$0xff]  }
  0x1c   : > { %686 = vmatprep.subr.bf16.mxu1 %v1766_v6  ;;  %v1776_v13 = vld [vmem:[%s2247_s1 + $0xc4] ss:$24 sps:$4 sm:$0xff]   ;;  %v1780_v15 = vld [vmem:[%s2247_s1 + $0xc0] ss:$24 sps:$4 sm:$0xff]   ;;  %v1782_v17 = vld [vmem:[%s2247_s1 + $0x94] ss:$24 sps:$4 sm:$0xff]  }
  0x1d   : > { %v1778_v14 = vld [vmem:[%s2247_s1 + $0xcc] ss:$24 sps:$4 sm:$0xff]   ;;  %v1781_v16 = vld [vmem:[%s2247_s1 + $0xc8] ss:$24 sps:$4 sm:$0xff]   ;;  %v1784_v18 = vld [vmem:[%s2247_s1 + $0x9c] ss:$24 sps:$4 sm:$0xff]  }
  0x1e   : > { %634 = vmatpush1.bf16.msra.mxu0 %v1768_v7  ;;  %v1786_v19 = vld [vmem:[%s2247_s1 + $0x90] ss:$24 sps:$4 sm:$0xff]   ;;  %v1788_v21 = vld [vmem:[%s2247_s1 + $0x64] ss:$24 sps:$4 sm:$0xff]   ;;  %v1792_v23 = vld [vmem:[%s2247_s1 + $0x60] ss:$24 sps:$4 sm:$0xff]  }
  0x1f   : > { %687 = vmatpush1.bf16.msra.mxu1 %v1769_v8  ;;  %635 = vmatprep.subr.bf16.mxu0 %v1770_v9  ;;  %v1787_v20 = vld [vmem:[%s2247_s1 + $0x98] ss:$24 sps:$4 sm:$0xff]   ;;  %v1790_v22 = vld [vmem:[%s2247_s1 + $0x6c] ss:$24 sps:$4 sm:$0xff]   ;;  %v1793_v24 = vld [vmem:[%s2247_s1 + $0x68] ss:$24 sps:$4 sm:$0xff]  }
  0x20   : > { %688 = vmatprep.subr.bf16.mxu1 %v1772_v10  ;;  %v1794_v25 = vld [vmem:[%s2247_s1 + $0x34] ss:$24 sps:$4 sm:$0xff]   ;;  %vm624_vm1 = vcmask 130048   ;;  %v1798_v27 = vld [vmem:[%s2247_s1 + $0x30] ss:$24 sps:$4 sm:$0xff]   ;;  %vm913_vm2 = vcmask 7168  }
  0x21   : > { %v1796_v26 = vld [vmem:[%s2247_s1 + $0x3c] ss:$24 sps:$4 sm:$0xff]   ;;  %v1799_v28 = vld [vmem:[%s2247_s1 + $0x38] ss:$24 sps:$4 sm:$0xff]   ;;  %v1812_v30 = vld [vmem:[%s2246_s0 + $0x4] ss:$8 sps:$4 sm:$0xff]  }
  0x22   : > { %636 = vmatpush1.bf16.msra.mxu0 %v1774_v11  ;;  %v1800_v29 = vld [vmem:[%s2247_s1 + $0x4] ss:$24 sps:$4 sm:$0xff]   ;;  %1602 = vmatprep.mubr.msk.bf16.mxu0 %vm624_vm1, %v1812_v30  ;;  %v1804_v32 = vld [vmem:[%s2247_s1] ss:$24 sps:$4 sm:$0xff]   ;;  %v1820_v41 = vld [vmem:[%s2247_s1 + $0x134] ss:$24 sps:$4 sm:$0xff]  }
  0x23   : > { %689 = vmatpush1.bf16.msra.mxu1 %v1775_v12  ;;  %637 = vmatprep.subr.bf16.mxu0 %v1776_v13  ;;  %v1802_v31 = vld [vmem:[%s2247_s1 + $0xc] ss:$24 sps:$4 sm:$0xff]   ;;  %v1805_v33 = vld [vmem:[%s2247_s1 + $0x8] ss:$24 sps:$4 sm:$0xff]   ;;  %v1830_v42 = vld [vmem:[%s2246_s0 + $0x14] ss:$8 sps:$4 sm:$0xff]  }
  0x24   : > { %690 = vmatprep.subr.bf16.mxu1 %v1778_v14  ;;  %1604 = vmatprep.mubr.msk.bf16.mxu1 %vm624_vm1, %v1812_v30  ;;  %v1806_v34 = vld [vmem:[%s2247_s1 + $0x184] ss:$24 sps:$4 sm:$0xff]   ;;  %v1810_v36 = vld [vmem:[%s2247_s1 + $0x180] ss:$24 sps:$4 sm:$0xff]   ;;  %v1818_v43 = vld [vmem:[%s2247_s1 + $0x130] ss:$24 sps:$4 sm:$0xff]  }
  0x25   : > { %v1808_v35 = vld [vmem:[%s2247_s1 + $0x18c] ss:$24 sps:$4 sm:$0xff]   ;;  %v1811_v37 = vld [vmem:[%s2247_s1 + $0x188] ss:$24 sps:$4 sm:$0xff]   ;;  %v1832_v45 = vld [vmem:[%s2246_s0 + $0x10] ss:$8 sps:$4 sm:$0xff]  }
  0x26   : > { %638 = vmatpush1.bf16.msra.mxu0 %v1780_v15  ;;  %v1817_v38 = vld [vmem:[%s2247_s1 + $0x164] ss:$24 sps:$4 sm:$0xff]   ;;  %v2052_v39 = vld [vmem:[%s2246_s0] ss:$8 sps:$4 sm:$0xff]   ;;  %v1826_v47 = vld [vmem:[%s2247_s1 + $0xd4] ss:$24 sps:$4 sm:$0xff]  }
  0x27   : > { %691 = vmatpush1.bf16.msra.mxu1 %v1781_v16  ;;  %639 = vmatprep.subr.bf16.mxu0 %v1782_v17  ;;  %v1815_v40 = vld [vmem:[%s2247_s1 + $0x160] ss:$24 sps:$4 sm:$0xff]   ;;  %v1823_v44 = vld [vmem:[%s2247_s1 + $0x104] ss:$24 sps:$4 sm:$0xff]   ;;  %v1824_v48 = vld [vmem:[%s2247_s1 + $0xd0] ss:$24 sps:$4 sm:$0xff]  }
  0x28   : > { %692 = vmatprep.subr.bf16.mxu1 %v1784_v18  ;;  %v1821_v46 = vld [vmem:[%s2247_s1 + $0x100] ss:$24 sps:$4 sm:$0xff]   ;;  %v1829_v49 = vld [vmem:[%s2247_s1 + $0xa4] ss:$24 sps:$4 sm:$0xff]   ;;  %v1835_v51 = vld [vmem:[%s2247_s1 + $0x74] ss:$24 sps:$4 sm:$0xff]  }
  0x29   : > { %v1827_v50 = vld [vmem:[%s2247_s1 + $0xa0] ss:$24 sps:$4 sm:$0xff]   ;;  %v1833_v52 = vld [vmem:[%s2247_s1 + $0x70] ss:$24 sps:$4 sm:$0xff]   ;;  %v1838_v53 = vld [vmem:[%s2247_s1 + $0x44] ss:$24 sps:$4 sm:$0xff]  }
  0x2a   : > { %640 = vmatpush1.bf16.msra.mxu0 %v1786_v19  ;;  %v1836_v54 = vld [vmem:[%s2247_s1 + $0x40] ss:$24 sps:$4 sm:$0xff]   ;;  %v1841_v55 = vld [vmem:[%s2247_s1 + $0x14] ss:$24 sps:$4 sm:$0xff]   ;;  %v1839_v56 = vld [vmem:[%s2247_s1 + $0x10] ss:$24 sps:$4 sm:$0xff]  }
  0x2b   : > { %693 = vmatpush1.bf16.msra.mxu1 %v1787_v20  ;;  %641 = vmatprep.subr.bf16.mxu0 %v1788_v21  ;;  %v1844_v57 = vld [vmem:[%s2247_s1 + $0x194] ss:$24 sps:$4 sm:$0xff]   ;;  %v1842_v58 = vld [vmem:[%s2247_s1 + $0x190] ss:$24 sps:$4 sm:$0xff]  }
  0x2c   : > { %694 = vmatprep.subr.bf16.mxu1 %v1790_v22 }
  0x2e   : > { %642 = vmatpush1.bf16.msra.mxu0 %v1792_v23 }
  0x2f   : > { %695 = vmatpush1.bf16.msra.mxu1 %v1793_v24  ;;  %643 = vmatprep.subr.bf16.mxu0 %v1794_v25 }
  0x30   : > { %696 = vmatprep.subr.bf16.mxu1 %v1796_v26 }
  0x32   : > { %644 = vmatpush1.bf16.msra.mxu0 %v1798_v27 }
  0x33   : > { %697 = vmatpush1.bf16.msra.mxu1 %v1799_v28  ;;  %645 = vmatprep.subr.bf16.mxu0 %v1800_v29 }
  0x34   : > { %698 = vmatprep.subr.bf16.mxu1 %v1802_v31 }
  0x36   : > { %646 = vmatpush1.bf16.msra.mxu0 %v1804_v32 }
  0x37   : > { %699 = vmatpush1.bf16.msra.mxu1 %v1805_v33  ;;  %661 = vmatprep.subr.bf16.mxu0 %v1806_v34 }
  0x38   : > { %714 = vmatprep.subr.bf16.mxu1 %v1808_v35 }
  0x3a   : > { %662 = vmatpush2.bf16.msra.mxu0 %v1810_v36 }
  0x3b   : > { %715 = vmatpush2.bf16.msra.mxu1 %v1811_v37  ;;  %737 = vmatprep.subr.bf16.mxu0 %v1817_v38 }
  0x3c   : > { %1714 = vmatprep.subr.bf16.mxu1 %v1817_v38 }
  0x3d   : > { %664 = vmatmul.mubr.bf16.vlgmr.msra.gmra.mxu0 %v2052_v39 }
  0x3e   : > { %717 = vmatmul.mubr.bf16.vlgmr.msra.gmra.mxu1 %v2052_v39  ;;  %738 = vmatpush1.bf16.msra.mxu0 %v1815_v40 }
  0x3f   : > { %1723 = vmatpush1.bf16.msra.mxu1 %v1815_v40  ;;  %739 = vmatprep.subr.bf16.mxu0 %v1820_v41 }
  0x40   : > { %1715 = vmatprep.subr.bf16.mxu1 %v1820_v41  ;;  %1603 = vmatprep.mubr.msk.bf16.mxu0 %vm624_vm1, %v1830_v42 }
  0x41   : > { %1605 = vmatprep.mubr.msk.bf16.mxu1 %vm624_vm1, %v1830_v42 }
  0x42   : > { %740 = vmatpush1.bf16.msra.mxu0 %v1818_v43 }
  0x43   : > { %1724 = vmatpush1.bf16.msra.mxu1 %v1818_v43  ;;  %741 = vmatprep.subr.bf16.mxu0 %v1823_v44 }
  0x44   : > { %1716 = vmatprep.subr.bf16.mxu1 %v1823_v44 }
  0x45   : > { %674 = vmatmul.mubr.bf16.gmra.mxu0 %v1832_v45 }
  0x46   : > { %727 = vmatmul.mubr.bf16.gmra.mxu1 %v1832_v45  ;;  %742 = vmatpush1.bf16.msra.mxu0 %v1821_v46 }
  0x47   : > { %1725 = vmatpush1.bf16.msra.mxu1 %v1821_v46  ;;  %743 = vmatprep.subr.bf16.mxu0 %v1826_v47 }
  0x48   : > { %1717 = vmatprep.subr.bf16.mxu1 %v1826_v47  ;;  %1606 = vmatprep.mubr.msk.bf16.mxu0 %vm624_vm1, %v1812_v30 }
  0x49   : > { %1607 = vmatprep.mubr.msk.bf16.mxu1 %vm624_vm1, %v1830_v42 }
  0x4a   : > { %744 = vmatpush1.bf16.msra.mxu0 %v1824_v48 }
  0x4b   : > { %1726 = vmatpush1.bf16.msra.mxu1 %v1824_v48  ;;  %745 = vmatprep.subr.bf16.mxu0 %v1829_v49 }
  0x4c   : > { %1718 = vmatprep.subr.bf16.mxu1 %v1829_v49 }
  0x4e   : > { %746 = vmatpush1.bf16.msra.mxu0 %v1827_v50 }
  0x4f   : > { %1727 = vmatpush1.bf16.msra.mxu1 %v1827_v50  ;;  %747 = vmatprep.subr.bf16.mxu0 %v1835_v51 }
  0x50   : > { %1719 = vmatprep.subr.bf16.mxu1 %v1835_v51 }
  0x52   : > { %748 = vmatpush1.bf16.msra.mxu0 %v1833_v52 }
  0x53   : > { %1728 = vmatpush1.bf16.msra.mxu1 %v1833_v52  ;;  %749 = vmatprep.subr.bf16.mxu0 %v1838_v53 }
  0x54   : > { %1720 = vmatprep.subr.bf16.mxu1 %v1838_v53 }
  0x56   : > { %750 = vmatpush1.bf16.msra.mxu0 %v1836_v54 }
  0x57   : > { %1729 = vmatpush1.bf16.msra.mxu1 %v1836_v54  ;;  %751 = vmatprep.subr.bf16.mxu0 %v1841_v55 }
  0x58   : > { %1721 = vmatprep.subr.bf16.mxu1 %v1841_v55 }
  0x5a   : > { %752 = vmatpush1.bf16.msra.mxu0 %v1839_v56 }
  0x5b   : > { %1730 = vmatpush1.bf16.msra.mxu1 %v1839_v56  ;;  %767 = vmatprep.subr.bf16.mxu0 %v1844_v57 }
  0x5c   : > { %1722 = vmatprep.subr.bf16.mxu1 %v1844_v57 }
  0x5e   : > { %768 = vmatpush2.bf16.msra.mxu0 %v1842_v58 }
  0x5f   : > { %1731 = vmatpush2.bf16.msra.mxu1 %v1842_v58 }
  0x61   : > { %770 = vmatmul.mubr.bf16.vlgmr.msra.gmra.mxu0 %v2052_v39 }
  0x62   : > { %780 = vmatmul.mubr.bf16.vlgmr.msra.gmra.mxu1 %v1832_v45 }
  0xfd   : > { %v665_v59 = vpop.f32.mrf.mxu0 }
  0xfe   : > { %v718_v60 = vpop.f32.mrf.mxu1  ;;  %v922_v19 = vmul.f32 %v665_v59, %v665_v59 }
  0xff   : > { %v667_v61 = vpop.f32.mrf.mxu0  ;;  %v924_v24 = vmul.f32 %v718_v60, %v718_v60 }
 0x100   : > { %v720_v62 = vpop.f32.mrf.mxu1  ;;  %v1646_v63 = vpack.c.bf16 %v667_v61, %v665_v59  ;;  %v923_v20 = vmul.f32 %v667_v61, %v667_v61  ;;  %v881_v21 = vadd.f32 %v667_v61, %v665_v59 }
 0x101   : > { %v1647_v0 = vpack.c.bf16 %v720_v62, %v718_v60  ;;  %v669_v1 = vpop.f32.mrf.mxu0  ;;  %v925_v32 = vmul.f32 %v720_v62, %v720_v62 }
 0x102   : > { %v722_v2 = vpop.f32.mrf.mxu1  ;;  %865 = vst [vmem:[#allocation2 + $0x30] sm:$0xff] %v1646_v63  ;;  %v946_v23 = vadd.f32 %v923_v20, %v922_v19  ;;  %v882_v27 = vadd.f32 %v881_v21, %v718_v60  ;;  %v928_v29 = vmul.f32 %v669_v1, %v669_v1 }
 0x103   : > { %866 = vst [vmem:[#allocation2] sm:$0xff] %v1647_v0  ;;  %v671_v3 = vpop.f32.mrf.mxu0  ;;  %v930_v40 = vmul.f32 %v722_v2, %v722_v2 }
 0x104   : > { %v2118_v4 = vpop.f32.mrf.mxu1  ;;  %v1649_v5 = vpack.c.bf16 %v671_v3, %v669_v1  ;;  %v929_v25 = vmul.f32 %v671_v3, %v671_v3  ;;  %v888_v30 = vadd.f32 %v671_v3, %v669_v1  ;;  %v947_v31 = vadd.f32 %v946_v23, %v924_v24 }
 0x105   : > { %v1650_v6 = vpack.c.bf16 %v2118_v4, %v722_v2  ;;  %v675_v7 = vpop.f32.mrf.mxu0  ;;  %v883_v39 = vadd.f32 %v882_v27, %v720_v62  ;;  %v931_v43 = vmul.f32 %v2118_v4, %v2118_v4 }
 0x106   : > { %v728_v8 = vpop.f32.mrf.mxu1  ;;  %868 = vst [vmem:[#allocation2 + $0x18] sm:$0xff] %v1649_v5  ;;  %v934_v33 = vmul.f32 %v675_v7, %v675_v7  ;;  %v953_v35 = vadd.f32 %v929_v25, %v928_v29  ;;  %v889_v42 = vadd.f32 %v888_v30, %v722_v2  ;;  %v948_v47 = vadd.f32 %v947_v31, %v925_v32  ;;  %v879_v31 = vld [vmem:[#allocation3 + $0x10] sm:$0xff]  ;;  %v877_v32 = vld [vmem:[#allocation3] sm:$0xff] }
 0x107   : > { %869 = vst [vmem:[#allocation2 + $0x50] sm:$0xff] %v1650_v6  ;;  %v677_v9 = vpop.f32.mrf.mxu0  ;;  %v936_v44 = vmul.f32 %v728_v8, %v728_v8 }
 0x108   : > { %v730_v10 = vpop.f32.mrf.mxu1  ;;  %v1652_v11 = vpack.c.bf16 %v677_v9, %v675_v7  ;;  %v895_v22 = vadd.f32 %v677_v9, %v675_v7  ;;  %v935_v34 = vmul.f32 %v677_v9, %v677_v9  ;;  %v954_v57 = vadd.f32 %v953_v35, %v930_v40 }
 0x109   : > { %v679_v12 = vpop.f32.mrf.mxu0  ;;  %v1653_v13 = vpack.c.bf16 %v730_v10, %v728_v8  ;;  %v890_v62 = vadd.f32 %v889_v42, %v2118_v4  ;;  %v937_v63 = vmul.f32 %v730_v10, %v730_v10 }
 0x10a   : > { %v732_v14 = vpop.f32.mrf.mxu1  ;;  %871 = vst [vmem:[#allocation2 + $0x8] sm:$0xff] %v1652_v11  ;;  %v896_v28 = vadd.f32 %v895_v22, %v728_v8  ;;  %v940_v36 = vmul.f32 %v679_v12, %v679_v12  ;;  %v960_v48 = vadd.f32 %v935_v34, %v934_v33 }
 0x10b   : > { %v681_v15 = vpop.f32.mrf.mxu0  ;;  %872 = vst [vmem:[#allocation2 + $0x38] sm:$0xff] %v1653_v13  ;;  %v942_v53 = vmul.f32 %v732_v14, %v732_v14 }
 0x10c   : > { %v734_v16 = vpop.f32.mrf.mxu1  ;;  %v1655_v17 = vpack.c.bf16 %v681_v15, %v679_v12  ;;  %v902_v26 = vadd.f32 %v681_v15, %v679_v12  ;;  %v941_v37 = vmul.f32 %v681_v15, %v681_v15  ;;  %v897_v41 = vadd.f32 %v896_v28, %v730_v10 }
 0x10d   : > { %v1656_v18 = vpack.c.bf16 %v734_v16, %v732_v14  ;;  %v961_v5 = vadd.f32 %v960_v48, %v936_v44  ;;  %v943_v9 = vmul.f32 %v734_v16, %v734_v16  ;;  %v919_v44 = vld [vmem:[#allocation4 + $0x8] sm:$0xff] }
 0x10e   : > { %874 = vst [vmem:[#allocation2 + $0x48] sm:$0xff] %v1655_v17  ;;  %v903_v38 = vadd.f32 %v902_v26, %v732_v14  ;;  %v967_v52 = vadd.f32 %v941_v37, %v940_v36  ;;  %v955_v14 = vadd.f32 %v954_v57, %v931_v43  ;;  %v918_v37 = vld [vmem:[#allocation4] sm:$0xff]  ;;  %v878_v43 = vld [vmem:[#allocation3 + $0x8] sm:$0xff] }
 0x10f   : > { %875 = vst [vmem:[#allocation2 + $0x10] sm:$0xff] %v1656_v18  ;;  %v962_v22 = vadd.f32 %v961_v5, %v937_v63 }
 0x110   : > { %v904_v54 = vadd.f32 %v903_v38, %v734_v16  ;;  %v968_v8 = vadd.f32 %v967_v52, %v942_v53  ;;  %v880_v38 = vld [vmem:[#allocation3 + $0x18] sm:$0xff] }
 0x112   : > { %v969_v23 = vadd.f32 %v968_v8, %v943_v9 }
 0x121   : > { %v771_v45 = vpop.f32.mrf.mxu0 }
 0x122   : > { %v781_v46 = vpop.f32.mrf.mxu1  ;;  %v926_v49 = vmul.f32 %v771_v45, %v771_v45  ;;  %v884_v51 = vadd.f32 %v883_v39, %v771_v45 }
 0x123   : > { %v898_v50 = vadd.f32 %v897_v41, %v781_v46  ;;  %v773_v55 = vpop.f32.mrf.mxu0  ;;  %v938_v11 = vmul.f32 %v781_v46, %v781_v46 }
 0x124   : > { %v783_v56 = vpop.f32.mrf.mxu1  ;;  %v1648_v58 = vpack.c.bf16 %v773_v55, %v771_v45  ;;  %v885_v61 = vadd.f32 %v884_v51, %v773_v55  ;;  %v927_v2 = vmul.f32 %v773_v55, %v773_v55  ;;  %v949_v3 = vadd.f32 %v948_v47, %v926_v49  ;;  %v920_v49 = vld [vmem:[#allocation4 + $0x10] sm:$0xff] }
 0x125   : > { %v1654_v59 = vpack.c.bf16 %v783_v56, %v781_v46  ;;  %v899_v60 = vadd.f32 %v898_v50, %v783_v56  ;;  %v775_v0 = vpop.f32.mrf.mxu0  ;;  %v939_v16 = vmul.f32 %v783_v56, %v783_v56  ;;  %v963_v25 = vadd.f32 %v962_v22, %v938_v11  ;;  %v921_v50 = vld [vmem:[#allocation4 + $0x18] sm:$0xff] }
 0x126   : > { %v785_v1 = vpop.f32.mrf.mxu1  ;;  %867 = vst [vmem:[#allocation2 + $0x58] sm:$0xff] %v1648_v58  ;;  %v932_v6 = vmul.f32 %v775_v0, %v775_v0  ;;  %886 = vadd.xlane.f32.xlu0 %v885_v61  ;;  %v950_v10 = vadd.f32 %v949_v3, %v927_v2  ;;  %v891_v17 = vadd.f32 %v890_v62, %v775_v0 }
 0x127   : > { %873 = vst [vmem:[#allocation2 + $0x28] sm:$0xff] %v1654_v59  ;;  %900 = vadd.xlane.f32.xlu1 %v899_v60  ;;  %v905_v7 = vadd.f32 %v904_v54, %v785_v1  ;;  %v777_v12 = vpop.f32.mrf.mxu0  ;;  %v944_v18 = vmul.f32 %v785_v1, %v785_v1  ;;  %v964_v29 = vadd.f32 %v963_v25, %v939_v16 }
 0x128   : > { %v787_v13 = vpop.f32.mrf.mxu1  ;;  %v1651_v15 = vpack.c.bf16 %v777_v12, %v775_v0  ;;  %v933_v19 = vmul.f32 %v777_v12, %v777_v12  ;;  %v956_v21 = vadd.f32 %v955_v14, %v932_v6  ;;  %v892_v24 = vadd.f32 %v891_v17, %v777_v12 }
 0x129   : > { %v1657_v4 = vpack.c.bf16 %v787_v13, %v785_v1  ;;  %v906_v20 = vadd.f32 %v905_v7, %v787_v13  ;;  %v945_v26 = vmul.f32 %v787_v13, %v787_v13  ;;  %v970_v28 = vadd.f32 %v969_v23, %v944_v18 }
 0x12a   : > { %870 = vst [vmem:[#allocation2 + $0x20] sm:$0xff] %v1651_v15  ;;  %951 = vadd.xlane.f32.xlu0 %v950_v10  ;;  %v957_v27 = vadd.f32 %v956_v21, %v933_v19 }
 0x12b   : > { %876 = vst [vmem:[#allocation2 + $0x40] sm:$0xff] %v1657_v4  ;;  %907 = vadd.xlane.f32.xlu1 %v906_v20  ;;  %v971_v30 = vadd.f32 %v970_v28, %v945_v26 }
 0x12e   : > { %893 = vadd.xlane.f32.xlu0 %v892_v24 }
 0x12f   : > { %958 = vadd.xlane.f32.xlu1 %v957_v27 }
 0x132   : > { %965 = vadd.xlane.f32.xlu0 %v964_v29 }
 0x133   : > { %972 = vadd.xlane.f32.xlu1 %v971_v30 }
 0x1af   : > { %v887_v34 = vpop.xlane.xlu0 %886 }
 0x1b0   : > { %v901_v33 = vpop.xlane.xlu1 %900  ;;  %v909_v36 = vadd.f32 %v887_v34, %v877_v32 }
 0x1b1   : > { %v911_v35 = vadd.f32 %v901_v33, %v879_v31 }
 0x1b2   : > { %914 = vst.msk [vmem:[#allocation3] sm:$0xff] %vm913_vm2, %v909_v36 }
 0x1b3   : > { %916 = vst.msk [vmem:[#allocation3 + $0x10] sm:$0xff] %vm913_vm2, %v911_v35  ;;  %v952_v39 = vpop.xlane.xlu0 %951 }
 0x1b4   : > { %v908_v40 = vpop.xlane.xlu1 %907  ;;  %v974_v41 = vadd.f32 %v952_v39, %v918_v37 }
 0x1b5   : > { %v912_v42 = vadd.f32 %v908_v40, %v880_v38 }
 0x1b6   : > { %978 = vst.msk [vmem:[#allocation4] sm:$0xff] %vm913_vm2, %v974_v41 }
 0x1b7   : > { %917 = vst.msk [vmem:[#allocation3 + $0x18] sm:$0xff] %vm913_vm2, %v912_v42  ;;  %v894_v45 = vpop.xlane.xlu0 %893 }
 0x1b8   : > { %v959_v46 = vpop.xlane.xlu1 %958  ;;  %v910_v47 = vadd.f32 %v894_v45, %v878_v43 }
 0x1b9   : > { %v975_v48 = vadd.f32 %v959_v46, %v919_v44 }
 0x1ba   : > { %915 = vst.msk [vmem:[#allocation3 + $0x8] sm:$0xff] %vm913_vm2, %v910_v47 }
 0x1bb   : > { %979 = vst.msk [vmem:[#allocation4 + $0x8] sm:$0xff] %vm913_vm2, %v975_v48  ;;  %v966_v51 = vpop.xlane.xlu0 %965 }
 0x1bc   : > { %v973_v52 = vpop.xlane.xlu1 %972  ;;  %v976_v53 = vadd.f32 %v966_v51, %v920_v49 }
 0x1bd   : > { %v977_v54 = vadd.f32 %v973_v52, %v921_v50 }
 0x1be   : > { %980 = vst.msk [vmem:[#allocation4 + $0x10] sm:$0xff] %vm913_vm2, %v976_v53 }
 0x1bf   : > { %981 = vst.msk [vmem:[#allocation4 + $0x18] sm:$0xff] %vm913_vm2, %v977_v54 }
 0x1c0 PF: > { %p1620_p6 = scmp.ne.s32.totalorder %s1869_s18, 1 }
 0x1c2   : > { %985 = sbr.rel (%p1620_p6) target bundleno = 836 (0x344), region = 52 }
 0x1c7   : > { %v993_v55 = vld [vmem:[#allocation3 + $0x18] sm:$0xff]  ;;  %v992_v57 = vld [vmem:[#allocation3 + $0x10] sm:$0xff]  ;;  %v991_v59 = vld [vmem:[#allocation3 + $0x8] sm:$0xff]  ;;  %vm994_vm3 = vcmask 261120   ;;  %v1880_v3 = vmov 0  }
 0x1c8   : > { %v1099_v56 = vld [vmem:[#allocation4 + $0x18] sm:$0xff]  ;;  %1686 = vmatprep.subr.mxu0 %v993_v55  ;;  %v1098_v58 = vld [vmem:[#allocation4 + $0x10] sm:$0xff]  ;;  %v1097_v60 = vld [vmem:[#allocation4 + $0x8] sm:$0xff]  ;;  %1845 = vset.pattern.permute.xlu0 %v1880_v3 }
 0x1c9   : > { %1700 = vmatprep.subr.mxu1 %v1099_v56  ;;  %1687 = vmatpush3.msra.mxu0 %v993_v55  ;;  %v990_v61 = vld [vmem:[#allocation3] sm:$0xff]  ;;  %v987_v0 = vld [vmem:[%s2250_s4 + $0x8] sm:$0xff]  ;;  %v988_v1 = vld [vmem:[%s2250_s4 + $0x10] sm:$0xff] }
 0x1ca   : > { %1701 = vmatpush3.msra.mxu1 %v1099_v56  ;;  %1688 = vmatprep.subr.mxu0 %v992_v57  ;;  %v1096_v62 = vld [vmem:[#allocation4] sm:$0xff]  ;;  %v989_v2 = vld [vmem:[%s2250_s4 + $0x18] sm:$0xff]  ;;  %v1202_v36 = vld [vmem:[%s2248_s2 + $0x8] sm:$0xff] }
 0x1cb   : > { %1702 = vmatprep.subr.mxu1 %v1098_v58  ;;  %1689 = vmatpush3.msra.mxu0 %v992_v57  ;;  %v986_v63 = vld [vmem:[%s2250_s4] sm:$0xff]  ;;  %v1204_v41 = vld [vmem:[%s2248_s2 + $0x18] sm:$0xff]  ;;  %v1203_v44 = vld [vmem:[%s2248_s2 + $0x10] sm:$0xff] }
 0x1cc   : > { %1703 = vmatpush3.msra.mxu1 %v1098_v58  ;;  %1690 = vmatprep.subr.mxu0 %v991_v59  ;;  %v1201_v38 = vld [vmem:[%s2248_s2] sm:$0xff]  ;;  %v1218_v50 = vld [vmem:[%s2249_s3 + $0x8] sm:$0xff]  ;;  %v1219_v55 = vld [vmem:[%s2249_s3 + $0x10] sm:$0xff] }
 0x1cd   : > { %1704 = vmatprep.subr.mxu1 %v1097_v60  ;;  %1691 = vmatpush3.msra.mxu0 %v991_v59  ;;  %v1217_v49 = vld [vmem:[%s2249_s3] sm:$0xff]  ;;  %v1220_v58 = vld [vmem:[%s2249_s3 + $0x18] sm:$0xff] }
 0x1ce   : > { %1705 = vmatpush3.msra.mxu1 %v1097_v60  ;;  %1692 = vmatprep.subr.mxu0 %v990_v61  ;;  %v1235_v60 = vld [vmem:[#allocation2 + $0x18] sm:$0xff] }
 0x1cf   : > { %1706 = vmatprep.subr.mxu1 %v1096_v62  ;;  %1693 = vmatpush3.msra.mxu0 %v990_v61  ;;  %v1236_v61 = vld [vmem:[#allocation2 + $0x50] sm:$0xff] }
 0x1d0   : > { %1694 = vmatprep.mubr.msk.f32.mxu0 %vm994_vm3, %v986_v63  ;;  %1707 = vmatpush3.msra.mxu1 %v1096_v62  ;;  %v1237_v62 = vld [vmem:[#allocation2 + $0x20] sm:$0xff] }
 0x1d1   : > { %1708 = vmatprep.mubr.msk.f32.mxu1 %vm994_vm3, %v986_v63  ;;  %1695 = vmatmul.mubr.msk.f32.vlgmr.msra.gmra.mxu0 %vm994_vm3, %v987_v0  ;;  %v1232_v63 = vld [vmem:[#allocation2 + $0x30] sm:$0xff] }
 0x1d2   : > { %1709 = vmatmul.mubr.msk.f32.vlgmr.msra.gmra.mxu1 %vm994_vm3, %v987_v0  ;;  %1697 = vmatprep.mubr.msk.f32.mxu0 %vm994_vm3, %v988_v1  ;;  %v1233_v0 = vld [vmem:[#allocation2] sm:$0xff] }
 0x1d3   : > { %1711 = vmatprep.mubr.msk.f32.mxu1 %vm994_vm3, %v988_v1  ;;  %1846 = vset.pattern.permute.xlu1 %v1880_v3  ;;  %v1250_v1 = vunpack.c.l.bf16 %v1235_v60  ;;  %v1234_v3 = vld [vmem:[#allocation2 + $0x58] sm:$0xff] }
 0x1d5   : > { %1698 = vmatmul.mubr.msk.f32.gmra.mxu0 %vm994_vm3, %v989_v2 }
 0x1d6   : > { %1712 = vmatmul.mubr.msk.f32.gmra.mxu1 %vm994_vm3, %v989_v2  ;;  %v1251_v2 = vunpack.c.h.bf16 %v1235_v60 }
 0x291   : > { %v1696_v5 = vpop.f32.mrf.mxu0 }
 0x292   : > { %v1710_v6 = vpop.f32.mrf.mxu1  ;;  %v1093_v7 = vmul.f32 0.0003652301, %v1696_v5  ;;  %v1241_v5 = vld [vmem:[#allocation2 + $0x48] sm:$0xff] }
 0x293   : > { %v1186_v8 = vmul.f32 0.0003652301, %v1710_v6  ;;  %v1073_v9 = vpop.f32.mrf.mxu0  ;;  %v1252_v6 = vunpack.c.l.bf16 %v1236_v61 }
 0x294   : > { %v1166_v11 = vpop.f32.mrf.mxu1  ;;  %v1190_v12 = vmul.f32 %v1093_v7, %v1093_v7  ;;  %v1092_v13 = vmul.f32 0.0003652301, %v1073_v9  ;;  %v1255_v9 = vunpack.c.h.bf16 %v1237_v62 }
 0x295   : > { %v1185_v14 = vmul.f32 0.0003652301, %v1166_v11  ;;  %v1699_v15 = vpop.f32.mrf.mxu0  ;;  %v1242_v11 = vld [vmem:[#allocation2 + $0x10] sm:$0xff] }
 0x296   : > { %v1713_v4 = vpop.f32.mrf.mxu1  ;;  %v1194_v10 = vsub.f32 %v1186_v8, %v1190_v12  ;;  %v1189_v17 = vmul.f32 %v1092_v13, %v1092_v13  ;;  %v1095_v18 = vmul.f32 0.0003652301, %v1699_v15  ;;  %v1254_v8 = vunpack.c.l.bf16 %v1237_v62  ;;  %v1243_v12 = vld [vmem:[#allocation2 + $0x40] sm:$0xff] }
 0x297   : > { %v1188_v19 = vmul.f32 0.0003652301, %v1713_v4  ;;  %v1083_v20 = vpop.f32.mrf.mxu0  ;;  %v1245_v15 = vunpack.c.h.bf16 %v1232_v63  ;;  %v1246_v4 = vunpack.c.l.bf16 %v1233_v0 }
 0x298   : > { %v1176_v21 = vpop.f32.mrf.mxu1  ;;  %v1198_v22 = vmax.f32 %v1194_v10, 0.0  ;;  %v1193_v23 = vsub.f32 %v1185_v14, %v1189_v17  ;;  %v1192_v24 = vmul.f32 %v1095_v18, %v1095_v18  ;;  %v1094_v16 = vmul.f32 0.0003652301, %v1083_v20  ;;  %v2177_v17 = vld [vmem:[#allocation2 + $0x8] sm:$0xff] }
 0x299   : > { %v1187_v25 = vmul.f32 0.0003652301, %v1176_v21  ;;  %v1244_v14 = vunpack.c.l.bf16 %v1232_v63  ;;  %v1247_v10 = vunpack.c.h.bf16 %v1233_v0  ;;  %v1249_v20 = vunpack.c.h.bf16 %v1234_v3  ;;  %v2181_v21 = vld [vmem:[#allocation2 + $0x28] sm:$0xff] }
 0x29a   : > { %v1206_v26 = vadd.f32 1e-05, %v1198_v22  ;;  %v1197_v27 = vmax.f32 %v1193_v23, 0.0  ;;  %v1196_v28 = vsub.f32 %v1188_v19, %v1192_v24  ;;  %v1191_v29 = vmul.f32 %v1094_v16, %v1094_v16 }
 0x29b   : > { %v1248_v19 = vunpack.c.l.bf16 %v1234_v3  ;;  %v1262_v22 = vunpack.c.l.bf16 %v1241_v5  ;;  %v1263_v23 = vunpack.c.h.bf16 %v1241_v5  ;;  %v1264_v24 = vunpack.c.l.bf16 %v1242_v11 }
 0x29c   : > { %1847 = vrsqrt.f32 %v1206_v26  ;;  %v1205_v30 = vadd.f32 1e-05, %v1197_v27  ;;  %v1200_v31 = vmax.f32 %v1196_v28, 0.0  ;;  %v1195_v32 = vsub.f32 %v1187_v25, %v1191_v29 }
 0x29d   : > { %v1266_v25 = vunpack.c.l.bf16 %v1243_v12  ;;  %v1267_v26 = vunpack.c.h.bf16 %v1243_v12  ;;  %v1256_v27 = vunpack.c.l.bf16 %v2177_v17  ;;  %v1257_v28 = vunpack.c.h.bf16 %v2177_v17 }
 0x29e   : > { %1849 = vrsqrt.f32 %v1205_v30  ;;  %v1208_v33 = vadd.f32 1e-05, %v1200_v31  ;;  %v1199_v34 = vmax.f32 %v1195_v32, 0.0 }
 0x2a0   : > { %1851 = vrsqrt.f32 %v1208_v33  ;;  %v1207_v35 = vadd.f32 1e-05, %v1199_v34 }
 0x2a2   : > { %1853 = vrsqrt.f32 %v1207_v35  ;;  %v1260_v35 = vunpack.c.l.bf16 %v2181_v21 }
 0x2a9   : > { %v1848_v37 = vpop.eup %1847 }
 0x2aa   : > { %v1214_v39 = vmul.f32 %v1848_v37, %v1202_v36  ;;  %v1261_v36 = vunpack.c.h.bf16 %v2181_v21 }
 0x2ab   : > { %v1850_v40 = vpop.eup %1849 }
 0x2ac   : > { %1275 = vperm.xlu0 %1845, %v1214_v39   ;;  %v1213_v42 = vmul.f32 %v1850_v40, %v1201_v38  ;;  %v1222_v45 = vmul.f32 %v1214_v39, %v1093_v7  ;;  %v1253_v7 = vunpack.c.h.bf16 %v1236_v61 }
 0x2ad   : > { %v1852_v43 = vpop.eup %1851 }
 0x2ae   : > { %v1216_v46 = vmul.f32 %v1852_v43, %v1204_v41  ;;  %v1221_v47 = vmul.f32 %v1213_v42, %v1092_v13  ;;  %v1226_v53 = vsub.f32 %v1218_v50, %v1222_v45 }
 0x2af   : > { %v1854_v48 = vpop.eup %1853 }
 0x2b0   : > { %1270 = vperm.xlu0 %1845, %v1213_v42   ;;  %1285 = vperm.xlu1 %1846, %v1216_v46   ;;  %v1215_v51 = vmul.f32 %v1854_v48, %v1203_v44  ;;  %v1225_v52 = vsub.f32 %v1217_v49, %v1221_v47  ;;  %v1224_v56 = vmul.f32 %v1216_v46, %v1095_v18  ;;  %v2179_v18 = vld [vmem:[#allocation2 + $0x38] sm:$0xff] }
 0x2b1   : > { %v1258_v29 = vunpack.c.l.bf16 %v2179_v18  ;;  %v1259_v30 = vunpack.c.h.bf16 %v2179_v18 }
 0x2b2   : > { %v1223_v54 = vmul.f32 %v1215_v51, %v1094_v16  ;;  %v1228_v59 = vsub.f32 %v1220_v58, %v1224_v56  ;;  %v1265_v16 = vunpack.c.h.bf16 %v1242_v11 }
 0x2b4   : > { %1314 = vperm.xlu0 %1845, %v1225_v52   ;;  %1319 = vperm.xlu1 %1846, %v1226_v53   ;;  %v1227_v57 = vsub.f32 %v1219_v55, %v1223_v54 }
 0x2b8   : > { %1280 = vperm.xlu1 %1846, %v1215_v51   ;;  %1324 = vperm.xlu0 %1845, %v1227_v57  }
 0x2bc   : > { %1329 = vperm.xlu1 %1846, %v1228_v59  }
 0x327   : > { %v1276_v13 = vpop.permute.xlu0 %1275 }
 0x328   : > { %v1294_v31 = vmul.f32 %v1276_v13, %v1250_v1  ;;  %v1295_v32 = vmul.f32 %v1276_v13, %v1251_v2  ;;  %v1296_v37 = vmul.f32 %v1276_v13, %v1252_v6  ;;  %v1297_v38 = vmul.f32 %v1276_v13, %v1253_v7 }
 0x329   : > { %v1298_v39 = vmul.f32 %v1276_v13, %v1254_v8  ;;  %v1299_v40 = vmul.f32 %v1276_v13, %v1255_v9 }
 0x32b   : > { %v1271_v33 = vpop.permute.xlu0 %1270  ;;  %v1286_v34 = vpop.permute.xlu1 %1285 }
 0x32c   : > { %v1288_v41 = vmul.f32 %v1271_v33, %v1244_v14  ;;  %v1289_v42 = vmul.f32 %v1271_v33, %v1245_v15  ;;  %v1290_v43 = vmul.f32 %v1271_v33, %v1246_v4  ;;  %v1291_v44 = vmul.f32 %v1271_v33, %v1247_v10 }
 0x32d   : > { %v1292_v45 = vmul.f32 %v1271_v33, %v1248_v19  ;;  %v1293_v46 = vmul.f32 %v1271_v33, %v1249_v20  ;;  %v1306_v47 = vmul.f32 %v1286_v34, %v1262_v22  ;;  %v1307_v48 = vmul.f32 %v1286_v34, %v1263_v23 }
 0x32e   : > { %v2189_v51 = vmul.f32 %v1286_v34, %v1264_v24  ;;  %v2191_v52 = vmul.f32 %v1286_v34, %v1265_v16  ;;  %v2193_v53 = vmul.f32 %v1286_v34, %v1266_v25  ;;  %v2195_v54 = vmul.f32 %v1286_v34, %v1267_v26 }
 0x32f   : > { %v1315_v49 = vpop.permute.xlu0 %1314  ;;  %v1320_v50 = vpop.permute.xlu1 %1319 }
 0x330   : > { %v1332_v55 = vadd.f32 %v1315_v49, %v1288_v41  ;;  %v1333_v56 = vadd.f32 %v1315_v49, %v1289_v42  ;;  %v1334_v57 = vadd.f32 %v1315_v49, %v1290_v43  ;;  %v1335_v58 = vadd.f32 %v1315_v49, %v1291_v44 }
 0x331   : > { %v1336_v59 = vadd.f32 %v1315_v49, %v1292_v45  ;;  %v1337_v60 = vadd.f32 %v1315_v49, %v1293_v46  ;;  %v1338_v61 = vadd.f32 %v1320_v50, %v1294_v31  ;;  %v1339_v62 = vadd.f32 %v1320_v50, %v1295_v32 }
 0x332   : > { %v1356_v63 = vmax.f32 %v1332_v55, 0.0  ;;  %v1357_v0 = vmax.f32 %v1333_v56, 0.0  ;;  %v1358_v1 = vmax.f32 %v1334_v57, 0.0  ;;  %v1359_v2 = vmax.f32 %v1335_v58, 0.0 }
 0x333   : > { %v1360_v3 = vmax.f32 %v1336_v59, 0.0  ;;  %v1361_v5 = vmax.f32 %v1337_v60, 0.0  ;;  %v1340_v6 = vadd.f32 %v1320_v50, %v1296_v37  ;;  %v1341_v7 = vadd.f32 %v1320_v50, %v1297_v38  ;;  %v1281_v8 = vpop.permute.xlu1 %1280  ;;  %v1325_v33 = vpop.permute.xlu0 %1324 }
 0x334   : > { %v1658_v9 = vpack.c.bf16 %v1357_v0, %v1356_v63  ;;  %v1659_v11 = vpack.c.bf16 %v1359_v2, %v1358_v1  ;;  %v1342_v12 = vadd.f32 %v1320_v50, %v1298_v39  ;;  %v1343_v13 = vadd.f32 %v1320_v50, %v1299_v40 }
 0x335   : > { %v1660_v14 = vpack.c.bf16 %v1361_v5, %v1360_v3  ;;  %v1362_v15 = vmax.f32 %v1338_v61, 0.0  ;;  %v1363_v4 = vmax.f32 %v1339_v62, 0.0  ;;  %v1364_v10 = vmax.f32 %v1340_v6, 0.0 }
 0x336   : > { %1452 = vst [vmem:[%s2251_s5] sm:$0xff] %v1658_v9  ;;  %1453 = vst [vmem:[%s2251_s5 + $0x8] sm:$0xff] %v1659_v11  ;;  %v1365_v17 = vmax.f32 %v1341_v7, 0.0  ;;  %v1366_v18 = vmax.f32 %v1342_v12, 0.0  ;;  %v1367_v19 = vmax.f32 %v1343_v13, 0.0  ;;  %v1300_v20 = vmul.f32 %v1281_v8, %v1256_v27 }
 0x337   : > { %1454 = vst [vmem:[%s2251_s5 + $0x10] sm:$0xff] %v1660_v14  ;;  %v1661_v21 = vpack.c.bf16 %v1363_v4, %v1362_v15  ;;  %v1301_v22 = vmul.f32 %v1281_v8, %v1257_v28  ;;  %v1302_v23 = vmul.f32 %v1281_v8, %v1258_v29  ;;  %v1303_v24 = vmul.f32 %v1281_v8, %v1259_v30  ;;  %v1330_v16 = vpop.permute.xlu1 %1329 }
 0x338   : > { %v1662_v25 = vpack.c.bf16 %v1365_v17, %v1364_v10  ;;  %v1663_v26 = vpack.c.bf16 %v1367_v19, %v1366_v18  ;;  %v1304_v31 = vmul.f32 %v1281_v8, %v1260_v35  ;;  %v1305_v32 = vmul.f32 %v1281_v8, %v1261_v36 }
 0x339   : > { %1455 = vst [vmem:[%s2251_s5 + $0x18] sm:$0xff] %v1661_v21  ;;  %v1344_v34 = vadd.f32 %v1325_v33, %v1300_v20  ;;  %v1345_v27 = vadd.f32 %v1325_v33, %v1301_v22  ;;  %v1346_v37 = vadd.f32 %v1325_v33, %v1302_v23  ;;  %v1347_v38 = vadd.f32 %v1325_v33, %v1303_v24 }
 0x33a   : > { %1456 = vst [vmem:[%s2251_s5 + $0x20] sm:$0xff] %v1662_v25  ;;  %1457 = vst [vmem:[%s2251_s5 + $0x28] sm:$0xff] %v1663_v26  ;;  %v1348_v28 = vadd.f32 %v1325_v33, %v1304_v31  ;;  %v1349_v29 = vadd.f32 %v1325_v33, %v1305_v32  ;;  %v1350_v30 = vadd.f32 %v1330_v16, %v1306_v47 }
 0x33b   : > { %v1351_v35 = vadd.f32 %v1330_v16, %v1307_v48  ;;  %v1368_v36 = vmax.f32 %v1344_v34, 0.0  ;;  %v1369_v39 = vmax.f32 %v1345_v27, 0.0  ;;  %v1370_v40 = vmax.f32 %v1346_v37, 0.0 }
 0x33c   : > { %v1371_v41 = vmax.f32 %v1347_v38, 0.0  ;;  %v1372_v42 = vmax.f32 %v1348_v28, 0.0  ;;  %v1373_v43 = vmax.f32 %v1349_v29, 0.0  ;;  %v1352_v44 = vadd.f32 %v1330_v16, %v2189_v51 }
 0x33d   : > { %v1353_v45 = vadd.f32 %v1330_v16, %v2191_v52  ;;  %v1664_v46 = vpack.c.bf16 %v1369_v39, %v1368_v36  ;;  %v1354_v50 = vadd.f32 %v1330_v16, %v2193_v53  ;;  %v1355_v55 = vadd.f32 %v1330_v16, %v2195_v54 }
 0x33e   : > { %v1665_v49 = vpack.c.bf16 %v1371_v41, %v1370_v40  ;;  %v1666_v56 = vpack.c.bf16 %v1373_v43, %v1372_v42  ;;  %v1374_v57 = vmax.f32 %v1350_v30, 0.0  ;;  %v1375_v47 = vmax.f32 %v1351_v35, 0.0 }
 0x33f   : > { %v1376_v48 = vmax.f32 %v1352_v44, 0.0  ;;  %1458 = vst [vmem:[%s2251_s5 + $0x30] sm:$0xff] %v1664_v46  ;;  %v1377_v51 = vmax.f32 %v1353_v45, 0.0  ;;  %v1378_v52 = vmax.f32 %v1354_v50, 0.0  ;;  %v1379_v58 = vmax.f32 %v1355_v55, 0.0 }
 0x340   : > { %1459 = vst [vmem:[%s2251_s5 + $0x38] sm:$0xff] %v1665_v49  ;;  %1460 = vst [vmem:[%s2251_s5 + $0x40] sm:$0xff] %v1666_v56  ;;  %v1667_v53 = vpack.c.bf16 %v1375_v47, %v1374_v57 }
 0x341   : > { %v1668_v54 = vpack.c.bf16 %v1377_v51, %v1376_v48  ;;  %v1669_v59 = vpack.c.bf16 %v1379_v58, %v1378_v52 }
 0x342   : > { %1461 = vst [vmem:[%s2251_s5 + $0x48] sm:$0xff] %v1667_v53 }
 0x343   : > { %1462 = vst [vmem:[%s2251_s5 + $0x50] sm:$0xff] %v1668_v54  ;;  %1463 = vst [vmem:[%s2251_s5 + $0x58] sm:$0xff] %v1669_v59 }
 0x344 PF: > { %s15_s20 = sadd.s32 1, %s1877_s20   ;;  %s2252_s18 = smov %s1873_s19 }
 0x345   : > { %p12_p7 = scmp.ge.s32.totalorder %s15_s20, 4   ;;  %s2253_s19 = smov %s2255_s21 }
 0x347   :  { %14 = sbr.rel (!%p12_p7) target bundleno = 2 (0x2), region = 84 }

// kernel: decoder_forward.8
= control target key start
LH: loop header
LB: loop body
LE: loop exit
PB: predicated region body
PF: predicated region fallthrough
CT: control target
= control target key end

     0   :  { %s2421_s0 = inlined_call_operand.vmem [shape: bf16[27,32], index: 0, kind: input, shape index: {}]   ;;  %s2422_s1 = inlined_call_operand.vmem [shape: bf16[32,3072], index: 1, kind: input, shape index: {}]   ;;  %s2423_s2 = inlined_call_operand.vmem [shape: f32[27,1], index: 2, kind: input, shape index: {}]   ;;  %s2424_s3 = inlined_call_operand.vmem [shape: f32[27,1], index: 3, kind: input, shape index: {}]   ;;  %s2425_s4 = inlined_call_operand.vmem [shape: f32[27,27], index: 4, kind: input, shape index: {}]   ;;  %s2426_s5 = inlined_call_operand.vmem [shape: bf16[27,3072], index: 5, kind: output, shape index: {}]  }
   0x1   :  { %2428 = sst [smem:[#allocation7_spill]] %s2424_s3 }
   0x2   :  { %2429 = sst [smem:[#allocation8_spill]] %s2426_s5 }
   0x3   :  { %s1960_s18 = smov 0   ;;  %s1962_s19 = smov 0  }
   0x4   :  { %s1964_s20 = smov 0   ;;  %s1966_s21 = smov 0  }
   0x5   :  { %s1968_s22 = smov 0   ;;  %s1970_s23 = smov 0  }
   0x6   :  { %s1972_s24 = smov 0   ;;  %s1974_s25 = smov 0  }
   0x7   :  { %s1976_s26 = smov 0  }
   0x8 LB: > { %s1596_s27 = sadd.s32 4294967295, %s1925_s26   ;;  %s24_s28 = sadd.s32 1, %s1917_s24  ;;  %s1925_s26 = sphi %s1976_s26, %s15_s26   ;;  %s1921_s25 = sphi %s1974_s25, %s2453_s25   ;;  %s1917_s24 = sphi %s1972_s24, %s2452_s24   ;;  %s1913_s23 = sphi %s1970_s23, %s2451_s23   ;;  %s1909_s22 = sphi %s1968_s22, %s2450_s22   ;;  %s1905_s21 = sphi %s1966_s21, %s2449_s21   ;;  %s1901_s20 = sphi %s1964_s20, %s2448_s20   ;;  %s1897_s19 = sphi %s1962_s19, %s2447_s19   ;;  %s1893_s18 = sphi %s1960_s18, %s2446_s18  }
   0x9   : > { %p25_p0 = scmp.ge.s32.totalorder %s24_s28, 3  ;;  %s27_s29 = sadd.s32 1, %s1921_s25 }
   0xa   : > { %s52_s30 = ssub.s32 1, %s1921_s25  ;;  %s1598_s6 = sshll.u32 %s1921_s25, 1 }
   0xb   : > { %s2455_s28 = smov (%p25_p0, %s24_s28), 0  ;;  %s2457_s29 = smov (!%p25_p0, %s27_s29), %s1921_s25 }
   0xc   : > { %s53_s7 = smul.u32 %s1917_s24, %s52_s30  ;;  %s63_s8 = sadd.s32 1, %s1905_s21 }
   0xd   : > { %p29_p1 = scmp.ge.s32.totalorder %s2457_s29, 2  ;;  %p70_p2 = scmp.ne.s32.totalorder %s1905_s21, %s1901_s20 }
   0xe   : > { %s55_s9 = sadd.s32 %s1598_s6, %s53_s7  ;;  %p71_p3 = scmp.eq.s32.totalorder %s1925_s26, 0 }
   0xf   : > { %s2459_s29 = smov (%p29_p1, %s2457_s29), 0  ;;  %s149_s11 = smul.u32 %s1917_s24, %s1921_s25 }
  0x10   : > { %p2020_p4 = por %p71_p3, %p70_p2  ;;  %s56_s12 = ssub.s32 1, %s2459_s29 }
  0x11   : > { %s1599_s13 = sshll.u32 %s2459_s29, 1  ;;  %s57_s14 = smul.u32 %s56_s12, %s2455_s28 }
  0x12   : > { %s154_s15 = sadd.s32 1, %s1897_s19  ;;  %s150_s16 = smul.u32 %s2459_s29, %s2455_s28 }
  0x13   : > { %p164_p5 = scmp.ne.s32.totalorder %s1897_s19, %s1893_s18  ;;  %s59_s17 = sadd.s32 %s1599_s13, %s57_s14 }
  0x14   : > { %p165_p6 = scmp.eq.s32.totalorder %s1596_s27, 5  ;;  %s60_s30 = ssub.s32 %s55_s9, %s59_s17 }
  0x15   : > { %s151_s6 = ssub.s32 %s149_s11, %s150_s16  ;;  %p61_p7 = scmp.eq.s32.totalorder %s60_s30, 0 }
  0x16   : > { %p152_p8 = scmp.eq.s32.totalorder %s151_s6, 0  ;;  %p2034_p9 = por %p165_p6, %p164_p5 }
  0x17   : > { %s2039_s5 = scalar_select %p61_p7, %s1905_s21, %s63_s8  }
  0x18   : > { %s2042_s3 = scalar_select %p152_p8, %s1897_s19, %s154_s15  }
  0x19   : > { %p1601_p10 = scmp.ge.s32.totalorder %s1925_s26, 6 }
  0x1b   : > { %199 = sbr.rel (%p1601_p10) target bundleno = 44 (0x2c), region = 32 }
  0x20   : > { %202 = sbr.rel (!%p2020_p4) target bundleno = 44 (0x2c), region = 36  ;;  %s204_s27 = sand.u32 (%p2020_p4), 1, %s1905_s21  }
  0x21   : > { %s1688_s12 = sshll.u32 (%p2020_p4), %s55_s9, 5  ;;  %s1602_s11 = sshll.u32 (%p2020_p4), %s204_s27, 7 }
  0x22   : > { %s2051_s16 = scalar_lea.vmem (%p2020_p4), %s2422_s1, %s1688_s12  ;;  %s206_s8 = scalar_lea.vmem (%p2020_p4), [#allocation5], %s1602_s11 }
  0x23   : > { %v226_v0 = vld [vmem:[%s2051_s16] sm:$0xff] (%p2020_p4)  ;;  %v228_v1 = vld [vmem:[%s2051_s16 + $0x8] sm:$0xff] (%p2020_p4)  ;;  %v230_v2 = vld [vmem:[%s2051_s16 + $0x10] sm:$0xff] (%p2020_p4) }
  0x24   : > { %227 = vst [vmem:[%s206_s8] sm:$0xff] (%p2020_p4), %v226_v0  ;;  %229 = vst [vmem:[%s206_s8 + $0x8] sm:$0xff] (%p2020_p4), %v228_v1  ;;  %v232_v3 = vld [vmem:[%s2051_s16 + $0x18] sm:$0xff] (%p2020_p4)  ;;  %v234_v4 = vld [vmem:[%s2051_s16 + $0x60] sm:$0xff] (%p2020_p4) }
  0x25   : > { %231 = vst [vmem:[%s206_s8 + $0x10] sm:$0xff] %v230_v2  ;;  %v236_v5 = vld [vmem:[%s2051_s16 + $0x68] sm:$0xff]  ;;  %233 = vst [vmem:[%s206_s8 + $0x18] sm:$0xff] %v232_v3  ;;  %v238_v6 = vld [vmem:[%s2051_s16 + $0x70] sm:$0xff] }
  0x26   : > { %235 = vst [vmem:[%s206_s8 + $0x20] sm:$0xff] %v234_v4  ;;  %237 = vst [vmem:[%s206_s8 + $0x28] sm:$0xff] %v236_v5  ;;  %v240_v7 = vld [vmem:[%s2051_s16 + $0x78] sm:$0xff]  ;;  %v242_v8 = vld [vmem:[%s2051_s16 + $0xc0] sm:$0xff] }
  0x27   : > { %239 = vst [vmem:[%s206_s8 + $0x30] sm:$0xff] %v238_v6  ;;  %241 = vst [vmem:[%s206_s8 + $0x38] sm:$0xff] %v240_v7  ;;  %v244_v9 = vld [vmem:[%s2051_s16 + $0xc8] sm:$0xff]  ;;  %v246_v10 = vld [vmem:[%s2051_s16 + $0xd0] sm:$0xff] }
  0x28   : > { %243 = vst [vmem:[%s206_s8 + $0x40] sm:$0xff] %v242_v8  ;;  %v248_v11 = vld [vmem:[%s2051_s16 + $0xd8] sm:$0xff]  ;;  %245 = vst [vmem:[%s206_s8 + $0x48] sm:$0xff] %v244_v9  ;;  %v250_v12 = vld [vmem:[%s2051_s16 + $0x120] sm:$0xff] }
  0x29   : > { %247 = vst [vmem:[%s206_s8 + $0x50] sm:$0xff] %v246_v10  ;;  %249 = vst [vmem:[%s206_s8 + $0x58] sm:$0xff] %v248_v11  ;;  %v252_v13 = vld [vmem:[%s2051_s16 + $0x128] sm:$0xff]  ;;  %v254_v14 = vld [vmem:[%s2051_s16 + $0x130] sm:$0xff] }
  0x2a   : > { %251 = vst [vmem:[%s206_s8 + $0x60] sm:$0xff] %v250_v12  ;;  %253 = vst [vmem:[%s206_s8 + $0x68] sm:$0xff] %v252_v13  ;;  %v256_v15 = vld [vmem:[%s2051_s16 + $0x138] sm:$0xff] }
  0x2b   : > { %255 = vst [vmem:[%s206_s8 + $0x70] sm:$0xff] %v254_v14  ;;  %257 = vst [vmem:[%s206_s8 + $0x78] sm:$0xff] %v256_v15 }
  0x2c PF: > { %p1606_p11 = scmp.ge.s32.totalorder %s1925_s26, 1  ;;  %p262_p12 = scmp.lt.s32.totalorder %s1925_s26, 7 }
  0x2e   : > { %p263_p13 = pnand %p1606_p11, %p262_p12 }
  0x2f   : > { %s269_s9 = sand.u32 (!%p263_p13), 1, %s1901_s20   ;;  %s292_s10 = sand.u32 (!%p263_p13), 1, %s1893_s18  }
  0x30   : > { %266 = sbr.rel (%p263_p13) target bundleno = 862 (0x35e), region = 59  ;;  %s1607_s15 = sshll.u32 (!%p263_p13), %s269_s9, 7 }
  0x31   : > { %s1608_s17 = sshll.u32 (!%p263_p13), %s292_s10, 7  ;;  %p303_p0 = scmp.eq.s32.totalorder (!%p263_p13), %s1913_s23, 0 }
  0x32   : > { %p304_p1 = scmp.eq.s32.totalorder (!%p263_p13), %s1909_s22, 0  ;;  %s2075_s30 = scalar_lea.vmem (!%p263_p13), [#allocation5], %s1607_s15 }
  0x33   : > { %s2077_s6 = scalar_lea.vmem (!%p263_p13), [#allocation6], %s1608_s17 }
  0x34   : > { %p305_p2 = pnand (!%p263_p13), %p304_p1, %p303_p0 }
  0x36   : > { %308 = sbr.rel (%p305_p2) target bundleno = 64 (0x40), region = 67 }
  0x3b   : > { %vm309_vm0 = vcmask 7168   ;;  %vm313_vm1 = vcmask 2048   ;;  %v1927_v16 = vmov 0.0  }
  0x3c   : > { %310 = vst.msk [vmem:[#allocation3] sm:$0xff] %vm309_vm0, %v1927_v16  ;;  %311 = vst.msk [vmem:[#allocation3 + $0x8] sm:$0xff] %vm309_vm0, %v1927_v16 }
  0x3d   : > { %312 = vst.msk [vmem:[#allocation3 + $0x10] sm:$0xff] %vm309_vm0, %v1927_v16  ;;  %315 = vst.msk [vmem:[#allocation4] sm:$0xff] %vm309_vm0, %v1927_v16 }
  0x3e   : > { %316 = vst.msk [vmem:[#allocation4 + $0x8] sm:$0xff] %vm309_vm0, %v1927_v16  ;;  %317 = vst.msk [vmem:[#allocation4 + $0x10] sm:$0xff] %vm309_vm0, %v1927_v16 }
  0x3f   : > { %314 = vst.msk [vmem:[#allocation3 + $0x18] sm:$0x7] %vm313_vm1, %v1927_v16  ;;  %318 = vst.msk [vmem:[#allocation4 + $0x18] sm:$0x7] %vm313_vm1, %v1927_v16 }
  0x40 PF: > { %p1609_p3 = scmp.ne.s32.totalorder %s1913_s23, 0 }
  0x41   : > { %s1705_s11 = sshll.u32 (!%p1609_p3), %s1909_s22, 7 }
  0x42   : > { %321 = sbr.rel (%p1609_p3) target bundleno = 460 (0x1cc), region = 71  ;;  %s2111_s13 = scalar_lea.vmem (!%p1609_p3), [#allocation2], %s1705_s11 }
  0x47   : > { %v334_v17 = vld [vmem:[%s2075_s30 + $0x40] sm:$0xff]  ;;  %v335_v19 = vld [vmem:[%s2075_s30 + $0x48] sm:$0xff]  ;;  %v1928_v25 = vmov 0   ;;  %v336_v32 = vld [vmem:[%s2075_s30 + $0x50] sm:$0xff]  ;;  %vm432_vm2 = vcmask 261120   ;;  %vm762_vm3 = vcmask 1041408  }
  0x48   : > { %v338_v18 = vld [vmem:[%s2075_s30 + $0x60] sm:$0xff]  ;;  %v339_v21 = vld [vmem:[%s2075_s30 + $0x68] sm:$0xff]  ;;  %471 = vmatprep.mubr.bf16.mxu0 %v1928_v25  ;;  %524 = vmatprep.mubr.bf16.mxu1 %v1928_v25  ;;  %v340_v34 = vld [vmem:[%s2075_s30 + $0x70] sm:$0xff]  ;;  %vm763_vm4 = vsmask.f32 1280  ;;  %vm765_vm5 = vcmask 1045508  }
  0x49   : > { %v1621_v20 = vcombine.high %v334_v17, %v338_v18  ;;  %v1620_v22 = vcombine.low %v334_v17, %v338_v18  ;;  %v326_v23 = vld [vmem:[%s2075_s30] sm:$0xff]  ;;  %v1623_v26 = vcombine.high %v335_v19, %v339_v21  ;;  %v1622_v27 = vcombine.low %v335_v19, %v339_v21  ;;  %v327_v29 = vld [vmem:[%s2075_s30 + $0x8] sm:$0xff]  ;;  %v337_v35 = vld [vmem:[%s2075_s30 + $0x58] sm:$0xff] }
  0x4a   : > { %v330_v24 = vld [vmem:[%s2075_s30 + $0x20] sm:$0xff]  ;;  %v331_v30 = vld [vmem:[%s2075_s30 + $0x28] sm:$0xff]  ;;  %v341_v36 = vld [vmem:[%s2075_s30 + $0x78] sm:$0xff]  ;;  %v1625_v38 = vcombine.high %v336_v32, %v340_v34  ;;  %v1624_v43 = vcombine.low %v336_v32, %v340_v34  ;;  %vm766_vm6 = vsmask.f32 5376  ;;  %vm812_vm9 = vcmask 1042432  }
  0x4b   : > { %v1613_v28 = vcombine.high %v326_v23, %v330_v24  ;;  %451 = vmatprep.subr.bf16.mxu0 %v1621_v20  ;;  %v1615_v31 = vcombine.high %v327_v29, %v331_v30  ;;  %504 = vmatprep.subr.bf16.mxu1 %v1623_v26  ;;  %v1612_v33 = vcombine.low %v326_v23, %v330_v24  ;;  %v1843_v40 = vld [vmem:[%s2421_s0] sm:$0xff]   ;;  %v328_v41 = vld [vmem:[%s2075_s30 + $0x10] sm:$0xff]  ;;  %v329_v44 = vld [vmem:[%s2075_s30 + $0x18] sm:$0xff]  ;;  %vm834_vm11 = vcmask 7168  }
  0x4c   : > { %452 = vmatpush1.bf16.msra.mxu0 %v1620_v22  ;;  %505 = vmatpush1.bf16.msra.mxu1 %v1622_v27  ;;  %v1614_v37 = vcombine.low %v327_v29, %v331_v30  ;;  %v1627_v39 = vcombine.high %v337_v35, %v341_v36  ;;  %v332_v42 = vld [vmem:[%s2075_s30 + $0x30] sm:$0xff]  ;;  %v333_v45 = vld [vmem:[%s2075_s30 + $0x38] sm:$0xff]  ;;  %v1626_v46 = vcombine.low %v337_v35, %v341_v36  ;;  %v1844_v51 = vld [vmem:[%s2421_s0 + $0x8] sm:$0x3f]   ;;  %vm838_vm12 = vcmask 2048  }
  0x4d   : > { %453 = vmatprep.subr.bf16.mxu0 %v1613_v28  ;;  %506 = vmatprep.subr.bf16.mxu1 %v1615_v31  ;;  %v1617_v47 = vcombine.high %v328_v41, %v332_v42  ;;  %v1619_v48 = vcombine.high %v329_v44, %v333_v45  ;;  %v1616_v49 = vcombine.low %v328_v41, %v332_v42  ;;  %vm2119_vm7 = vmand %vm762_vm3, %vm763_vm4 }
  0x4e   : > { %v1618_v50 = vcombine.low %v329_v44, %v333_v45  ;;  %vm2125_vm8 = vmand %vm765_vm5, %vm766_vm6 }
  0x4f   : > { %vm2135_vm10 = vmor %vm2125_vm8, %vm2119_vm7 }
  0x50   : > { %454 = vmatpush1.bf16.msra.mxu0 %v1612_v33  ;;  %507 = vmatpush1.bf16.msra.mxu1 %v1614_v37  ;;  %v769_v37 = vld [vmem:[%s2111_s13 + $0x60] sm:$0x33] }
  0x51   : > { %557 = vmatprep.subr.bf16.mxu0 %v1625_v38  ;;  %610 = vmatprep.subr.bf16.mxu1 %v1627_v39 }
  0x53   : > { %1628 = vmatmul.mubr.msk.bf16.vlgmr.msra.gmra.mxu0 %vm432_vm2, %v1843_v40  ;;  %1630 = vmatmul.mubr.msk.bf16.vlgmr.msra.gmra.mxu1 %vm432_vm2, %v1843_v40 }
  0x54   : > { %558 = vmatpush1.bf16.msra.mxu0 %v1624_v43  ;;  %611 = vmatpush1.bf16.msra.mxu1 %v1626_v46  ;;  %v772_v43 = vld [vmem:[%s2111_s13 + $0x68] sm:$0x33] }
  0x55   : > { %481 = vmatprep.mubr.bf16.mxu0 %v1928_v25  ;;  %534 = vmatprep.mubr.bf16.mxu1 %v1928_v25 }
  0x56   : > { %559 = vmatprep.subr.bf16.mxu0 %v1617_v47  ;;  %612 = vmatprep.subr.bf16.mxu1 %v1619_v48 }
  0x58   : > { %560 = vmatpush1.bf16.msra.mxu0 %v1616_v49  ;;  %613 = vmatpush1.bf16.msra.mxu1 %v1618_v50 }
  0x5b   : > { %1629 = vmatmul.mubr.msk.bf16.gmra.mxu0 %vm432_vm2, %v1844_v51  ;;  %1631 = vmatmul.mubr.msk.bf16.gmra.mxu1 %vm432_vm2, %v1844_v51 }
  0x5c   : > { %577 = vmatprep.mubr.bf16.mxu0 %v1928_v25  ;;  %630 = vmatprep.mubr.bf16.mxu1 %v1928_v25 }
  0x63   : > { %1632 = vmatmul.mubr.msk.bf16.vlgmr.msra.gmra.mxu0 %vm432_vm2, %v1843_v40  ;;  %1634 = vmatmul.mubr.msk.bf16.vlgmr.msra.gmra.mxu1 %vm432_vm2, %v1843_v40 }
  0x64   : > { %587 = vmatprep.mubr.bf16.mxu0 %v1928_v25  ;;  %640 = vmatprep.mubr.bf16.mxu1 %v1928_v25 }
  0x6b   : > { %1633 = vmatmul.mubr.msk.bf16.gmra.mxu0 %vm432_vm2, %v1844_v51  ;;  %1635 = vmatmul.mubr.msk.bf16.gmra.mxu1 %vm432_vm2, %v1844_v51 }
 0x113   : > { %v473_v52 = vpop.f32.mrf.mxu0  ;;  %v526_v53 = vpop.f32.mrf.mxu1 }
 0x114   : > { %v844_v58 = vmul.f32 %v473_v52, %v473_v52  ;;  %v846_v63 = vmul.f32 %v526_v53, %v526_v53 }
 0x115   : > { %v475_v54 = vpop.f32.mrf.mxu0  ;;  %v528_v57 = vpop.f32.mrf.mxu1 }
 0x116   : > { %v1689_v55 = vpack.c.bf16 %v475_v54, %v473_v52  ;;  %v845_v56 = vmul.f32 %v475_v54, %v475_v54  ;;  %v1690_v59 = vpack.c.bf16 %v528_v57, %v526_v53  ;;  %v785_v61 = vadd.f32 %v475_v54, %v473_v52 }
 0x117   : > { %v477_v60 = vpop.f32.mrf.mxu0  ;;  %v530_v62 = vpop.f32.mrf.mxu1  ;;  %v847_v23 = vmul.f32 %v528_v57, %v528_v57 }
 0x118   : > { %750 = vst [vmem:[%s2111_s13] sm:$0xff] %v1689_v55  ;;  %v876_v0 = vadd.f32 %v845_v56, %v844_v58  ;;  %751 = vst [vmem:[%s2111_s13 + $0x8] sm:$0xff] %v1690_v59  ;;  %v852_v5 = vmul.f32 %v477_v60, %v477_v60  ;;  %v786_v9 = vadd.f32 %v785_v61, %v526_v53 }
 0x119   : > { %v479_v1 = vpop.f32.mrf.mxu0  ;;  %v532_v4 = vpop.f32.mrf.mxu1  ;;  %v854_v12 = vmul.f32 %v530_v62, %v530_v62 }
 0x11a   : > { %v1693_v2 = vpack.c.bf16 %v479_v1, %v477_v60  ;;  %v794_v3 = vadd.f32 %v479_v1, %v477_v60  ;;  %v853_v6 = vmul.f32 %v479_v1, %v479_v1  ;;  %v1694_v7 = vpack.c.bf16 %v532_v4, %v530_v62 }
 0x11b   : > { %v483_v8 = vpop.f32.mrf.mxu0  ;;  %v536_v10 = vpop.f32.mrf.mxu1  ;;  %v877_v11 = vadd.f32 %v876_v0, %v846_v63  ;;  %v787_v31 = vadd.f32 %v786_v9, %v528_v57  ;;  %v855_v34 = vmul.f32 %v532_v4, %v532_v4 }
 0x11c   : > { %754 = vst [vmem:[%s2111_s13 + $0x20] sm:$0xff] %v1693_v2  ;;  %v885_v13 = vadd.f32 %v853_v6, %v852_v5  ;;  %755 = vst [vmem:[%s2111_s13 + $0x28] sm:$0xff] %v1694_v7  ;;  %v795_v14 = vadd.f32 %v794_v3, %v530_v62  ;;  %v860_v17 = vmul.f32 %v483_v8, %v483_v8 }
 0x11d   : > { %v485_v15 = vpop.f32.mrf.mxu0  ;;  %v538_v21 = vpop.f32.mrf.mxu1  ;;  %v862_v24 = vmul.f32 %v536_v10, %v536_v10  ;;  %v878_v32 = vadd.f32 %v877_v11, %v847_v23 }
 0x11e   : > { %v1697_v18 = vpack.c.bf16 %v485_v15, %v483_v8  ;;  %v803_v19 = vadd.f32 %v485_v15, %v483_v8  ;;  %v861_v20 = vmul.f32 %v485_v15, %v485_v15  ;;  %v1698_v25 = vpack.c.bf16 %v538_v21, %v536_v10 }
 0x11f   : > { %v487_v26 = vpop.f32.mrf.mxu0  ;;  %v886_v27 = vadd.f32 %v885_v13, %v854_v12  ;;  %v540_v30 = vpop.f32.mrf.mxu1  ;;  %v796_v33 = vadd.f32 %v795_v14, %v532_v4  ;;  %v863_v39 = vmul.f32 %v538_v21, %v538_v21 }
 0x120   : > { %758 = vst [vmem:[%s2111_s13 + $0x40] sm:$0xff] %v1697_v18  ;;  %v894_v28 = vadd.f32 %v861_v20, %v860_v17  ;;  %v868_v29 = vmul.f32 %v487_v26, %v487_v26  ;;  %759 = vst [vmem:[%s2111_s13 + $0x48] sm:$0xff] %v1698_v25  ;;  %v804_v38 = vadd.f32 %v803_v19, %v536_v10  ;;  %v813_v50 = vsel %vm812_vm9, %v487_v26, 0.0 }
 0x121   : > { %v489_v35 = vpop.f32.mrf.mxu0  ;;  %v870_v40 = vmul.f32 %v540_v30, %v540_v30  ;;  %v542_v42 = vpop.f32.mrf.mxu1  ;;  %v887_v49 = vadd.f32 %v886_v27, %v855_v34  ;;  %v816_v60 = vsel %vm812_vm9, %v540_v30, 0.0 }
 0x122   : > { %v1701_v41 = vpack.c.bf16 %v489_v35, %v487_v26  ;;  %v895_v44 = vadd.f32 %v894_v28, %v862_v24  ;;  %v814_v45 = vsel %vm812_vm9, %v489_v35, 0.0  ;;  %v869_v46 = vmul.f32 %v489_v35, %v489_v35 }
 0x123   : > { %v1702_v47 = vpack.c.bf16 %v542_v42, %v540_v30  ;;  %v579_v48 = vpop.f32.mrf.mxu0  ;;  %v903_v51 = vsel %vm812_vm9, %v868_v29, 0.0  ;;  %v632_v53 = vpop.f32.mrf.mxu1  ;;  %v815_v54 = vadd.f32 %v814_v45, %v813_v50  ;;  %v805_v59 = vadd.f32 %v804_v38, %v538_v21 }
 0x124   : > { %v770_v52 = vsel %vm2135_vm10, %v1701_v41, %v769_v37  ;;  %v904_v55 = vsel %vm812_vm9, %v869_v46, 0.0  ;;  %v788_v57 = vadd.f32 %v787_v31, %v579_v48  ;;  %v848_v62 = vmul.f32 %v579_v48, %v579_v48 }
 0x125   : > { %771 = vst [vmem:[%s2111_s13 + $0x60] sm:$0x33] %v770_v52  ;;  %v773_v56 = vsel %vm2135_vm10, %v1702_v47, %v772_v43  ;;  %v581_v58 = vpop.f32.mrf.mxu0  ;;  %v905_v61 = vadd.f32 %v904_v55, %v903_v51  ;;  %v634_v63 = vpop.f32.mrf.mxu1  ;;  %v896_v0 = vadd.f32 %v895_v44, %v863_v39  ;;  %v906_v1 = vsel %vm812_vm9, %v870_v40, 0.0 }
 0x126   : > { %774 = vst [vmem:[%s2111_s13 + $0x68] sm:$0x33] %v773_v56  ;;  %v1691_v2 = vpack.c.bf16 %v581_v58, %v579_v48  ;;  %v789_v3 = vadd.f32 %v788_v57, %v581_v58  ;;  %v871_v5 = vmul.f32 %v542_v42, %v542_v42  ;;  %v879_v6 = vadd.f32 %v878_v32, %v848_v62  ;;  %v775_v56 = vld [vmem:[%s2111_s13 + $0x70] sm:$0x33]  ;;  %v778_v62 = vld [vmem:[%s2111_s13 + $0x78] sm:$0x33] }
 0x127   : > { %v583_v4 = vpop.f32.mrf.mxu0  ;;  %v849_v7 = vmul.f32 %v581_v58, %v581_v58  ;;  %v1692_v8 = vpack.c.bf16 %v634_v63, %v632_v53  ;;  %v636_v9 = vpop.f32.mrf.mxu1  ;;  %v817_v10 = vadd.f32 %v816_v60, %v815_v54  ;;  %v907_v15 = vadd.f32 %v906_v1, %v905_v61 }
 0x128   : > { %752 = vst [vmem:[%s2111_s13 + $0x10] sm:$0xff] %v1691_v2  ;;  %v797_v11 = vadd.f32 %v796_v33, %v583_v4  ;;  %v856_v12 = vmul.f32 %v583_v4, %v583_v4  ;;  %v790_v14 = vadd.f32 %v789_v3, %v632_v53  ;;  %v850_v16 = vmul.f32 %v632_v53, %v632_v53 }
 0x129   : > { %v585_v13 = vpop.f32.mrf.mxu0  ;;  %753 = vst [vmem:[%s2111_s13 + $0x18] sm:$0xff] %v1692_v8  ;;  %v638_v19 = vpop.f32.mrf.mxu1  ;;  %v818_v25 = vsel %vm812_vm9, %v542_v42, 0.0  ;;  %v908_v26 = vsel %vm812_vm9, %v871_v5, 0.0  ;;  %v880_v29 = vadd.f32 %v879_v6, %v849_v7  ;;  %v858_v31 = vmul.f32 %v636_v9, %v636_v9 }
 0x12a   : > { %v1695_v17 = vpack.c.bf16 %v585_v13, %v583_v4  ;;  %v857_v18 = vmul.f32 %v585_v13, %v585_v13  ;;  %v888_v20 = vadd.f32 %v887_v49, %v856_v12  ;;  %v798_v21 = vadd.f32 %v797_v11, %v585_v13 }
 0x12b   : > { %v1696_v22 = vpack.c.bf16 %v638_v19, %v636_v9  ;;  %v589_v23 = vpop.f32.mrf.mxu0  ;;  %v791_v24 = vadd.f32 %v790_v14, %v634_v63  ;;  %v642_v28 = vpop.f32.mrf.mxu1  ;;  %v819_v30 = vadd.f32 %v818_v25, %v817_v10  ;;  %v909_v35 = vadd.f32 %v908_v26, %v907_v15  ;;  %v840_v26 = vld [vmem:[#allocation4] sm:$0xff] }
 0x12c   : > { %756 = vst [vmem:[%s2111_s13 + $0x30] sm:$0xff] %v1695_v17  ;;  %v806_v27 = vadd.f32 %v805_v59, %v589_v23  ;;  %v864_v32 = vmul.f32 %v589_v23, %v589_v23  ;;  %v889_v34 = vadd.f32 %v888_v20, %v857_v18  ;;  %v851_v39 = vmul.f32 %v634_v63, %v634_v63 }
 0x12d   : > { %757 = vst [vmem:[%s2111_s13 + $0x38] sm:$0xff] %v1696_v22  ;;  %792 = vadd.xlane.f32.xlu0 %v791_v24  ;;  %v591_v33 = vpop.f32.mrf.mxu0  ;;  %v644_v38 = vpop.f32.mrf.mxu1  ;;  %v859_v40 = vmul.f32 %v638_v19, %v638_v19  ;;  %v881_v44 = vadd.f32 %v880_v29, %v850_v16  ;;  %v799_v45 = vadd.f32 %v798_v21, %v636_v9  ;;  %v841_v29 = vld [vmem:[#allocation4 + $0x8] sm:$0xff] }
 0x12e   : > { %v1699_v37 = vpack.c.bf16 %v591_v33, %v589_v23  ;;  %v807_v41 = vadd.f32 %v806_v27, %v591_v33  ;;  %v1700_v42 = vpack.c.bf16 %v644_v38, %v642_v28  ;;  %v866_v46 = vmul.f32 %v642_v28, %v642_v28  ;;  %v781_v23 = vld [vmem:[#allocation3] sm:$0xff] }
 0x12f   : > { %v593_v43 = vpop.f32.mrf.mxu0  ;;  %v646_v49 = vpop.f32.mrf.mxu1  ;;  %v890_v50 = vadd.f32 %v889_v34, %v858_v31  ;;  %v897_v51 = vadd.f32 %v896_v0, %v864_v32  ;;  %v865_v52 = vmul.f32 %v591_v33, %v591_v33  ;;  %v882_v54 = vadd.f32 %v881_v44, %v851_v39 }
 0x130   : > { %760 = vst [vmem:[%s2111_s13 + $0x50] sm:$0xff] %v1699_v37  ;;  %v820_v47 = vsel %vm812_vm9, %v593_v43, 0.0  ;;  %v872_v48 = vmul.f32 %v593_v43, %v593_v43  ;;  %761 = vst [vmem:[%s2111_s13 + $0x58] sm:$0xff] %v1700_v42  ;;  %v800_v0 = vadd.f32 %v799_v45, %v638_v19  ;;  %v808_v2 = vadd.f32 %v807_v41, %v642_v28  ;;  %v842_v37 = vld [vmem:[#allocation4 + $0x10] sm:$0xff]  ;;  %v784_v42 = vld [vmem:[#allocation3 + $0x18] sm:$0x7] }
 0x131   : > { %v821_v53 = vadd.f32 %v820_v47, %v819_v30  ;;  %v595_v55 = vpop.f32.mrf.mxu0  ;;  %v648_v61 = vpop.f32.mrf.mxu1  ;;  %883 = vadd.xlane.f32.xlu0 %v882_v54  ;;  %v891_v5 = vadd.f32 %v890_v50, %v859_v40  ;;  %v867_v6 = vmul.f32 %v644_v38, %v644_v38  ;;  %v824_v7 = vsel %vm812_vm9, %v646_v49, 0.0  ;;  %v782_v30 = vld [vmem:[#allocation3 + $0x8] sm:$0xff]  ;;  %v843_v45 = vld [vmem:[#allocation4 + $0x18] sm:$0x7] }
 0x132   : > { %v910_v57 = vsel %vm812_vm9, %v872_v48, 0.0  ;;  %v1703_v58 = vpack.c.bf16 %v595_v55, %v593_v43  ;;  %v822_v59 = vsel %vm812_vm9, %v595_v55, 0.0  ;;  %v873_v60 = vmul.f32 %v595_v55, %v595_v55 }
 0x133   : > { %v823_v63 = vadd.f32 %v822_v59, %v821_v53  ;;  %v1704_v1 = vpack.c.bf16 %v648_v61, %v646_v49  ;;  %v911_v3 = vadd.f32 %v910_v57, %v909_v35  ;;  %v898_v10 = vadd.f32 %v897_v51, %v865_v52  ;;  %892 = vadd.xlane.f32.xlu1 %v891_v5  ;;  %v783_v35 = vld [vmem:[#allocation3 + $0x10] sm:$0xff] }
 0x134   : > { %v776_v4 = vsel %vm2135_vm10, %v1703_v58, %v775_v56  ;;  %v912_v8 = vsel %vm812_vm9, %v873_v60, 0.0  ;;  %v874_v12 = vmul.f32 %v646_v49, %v646_v49  ;;  %v809_v15 = vadd.f32 %v808_v2, %v644_v38 }
 0x135   : > { %777 = vst [vmem:[%s2111_s13 + $0x70] sm:$0x33] %v776_v4  ;;  %v779_v9 = vsel %vm2135_vm10, %v1704_v1, %v778_v62  ;;  %v825_v11 = vadd.f32 %v824_v7, %v823_v63  ;;  %801 = vadd.xlane.f32.xlu0 %v800_v0  ;;  %v899_v13 = vadd.f32 %v898_v10, %v866_v46  ;;  %v826_v16 = vsel %vm812_vm9, %v648_v61, 0.0 }
 0x136   : > { %780 = vst [vmem:[%s2111_s13 + $0x78] sm:$0x33] %v779_v9  ;;  %v913_v14 = vadd.f32 %v912_v8, %v911_v3  ;;  %v875_v19 = vmul.f32 %v648_v61, %v648_v61  ;;  %v914_v20 = vsel %vm812_vm9, %v874_v12, 0.0 }
 0x137   : > { %v900_v17 = vadd.f32 %v899_v13, %v867_v6  ;;  %810 = vadd.xlane.f32.xlu1 %v809_v15  ;;  %v827_v18 = vadd.f32 %v826_v16, %v825_v11 }
 0x138   : > { %v915_v36 = vadd.f32 %v914_v20, %v913_v14  ;;  %v916_v21 = vsel %vm812_vm9, %v875_v19, 0.0 }
 0x139   : > { %901 = vadd.xlane.f32.xlu0 %v900_v17 }
 0x13a   : > { %v917_v22 = vadd.f32 %v916_v21, %v915_v36 }
 0x13b   : > { %828 = vadd.xlane.f32.xlu1 %v827_v18 }
 0x13f   : > { %918 = vadd.xlane.f32.xlu1 %v917_v22 }
 0x1b6   : > { %v793_v24 = vpop.xlane.xlu0 %792 }
 0x1b7   : > { %v830_v25 = vadd.f32 %v793_v24, %v781_v23 }
 0x1b9   : > { %835 = vst.msk [vmem:[#allocation3] sm:$0xff] %vm834_vm11, %v830_v25 }
 0x1ba   : > { %v884_v27 = vpop.xlane.xlu0 %883 }
 0x1bb   : > { %v920_v28 = vadd.f32 %v884_v27, %v840_v26 }
 0x1bc   : > { %v893_v31 = vpop.xlane.xlu1 %892 }
 0x1bd   : > { %924 = vst.msk [vmem:[#allocation4] sm:$0xff] %vm834_vm11, %v920_v28  ;;  %v921_v32 = vadd.f32 %v893_v31, %v841_v29 }
 0x1be   : > { %v802_v33 = vpop.xlane.xlu0 %801 }
 0x1bf   : > { %v831_v34 = vadd.f32 %v802_v33, %v782_v30  ;;  %925 = vst.msk [vmem:[#allocation4 + $0x8] sm:$0xff] %vm834_vm11, %v921_v32 }
 0x1c0   : > { %v811_v38 = vpop.xlane.xlu1 %810 }
 0x1c1   : > { %836 = vst.msk [vmem:[#allocation3 + $0x8] sm:$0xff] %vm834_vm11, %v831_v34  ;;  %v832_v39 = vadd.f32 %v811_v38, %v783_v35 }
 0x1c2   : > { %v902_v40 = vpop.xlane.xlu0 %901 }
 0x1c3   : > { %v922_v41 = vadd.f32 %v902_v40, %v842_v37  ;;  %837 = vst.msk [vmem:[#allocation3 + $0x10] sm:$0xff] %vm834_vm11, %v832_v39 }
 0x1c4   : > { %v829_v43 = vpop.xlane.xlu1 %828 }
 0x1c5   : > { %926 = vst.msk [vmem:[#allocation4 + $0x10] sm:$0xff] %vm834_vm11, %v922_v41  ;;  %v833_v44 = vadd.f32 %v829_v43, %v784_v42 }
 0x1c7   : > { %839 = vst.msk [vmem:[#allocation3 + $0x18] sm:$0x7] %vm838_vm12, %v833_v44 }
 0x1c8   : > { %v919_v46 = vpop.xlane.xlu1 %918 }
 0x1c9   : > { %v923_v47 = vadd.f32 %v919_v46, %v843_v45 }
 0x1cb   : > { %927 = vst.msk [vmem:[#allocation4 + $0x18] sm:$0x7] %vm838_vm12, %v923_v47 }
 0x1cc PF: > { %p1654_p4 = scmp.ne.s32.totalorder %s1913_s23, 1 }
 0x1cd   : > { %s2438_s10 = sld [smem:[#allocation7_spill]] (!%p1654_p4)  ;;  %s1706_s12 = sshll.u32 (!%p1654_p4), %s1909_s22, 7 }
 0x1ce   : > { %931 = sbr.rel (%p1654_p4) target bundleno = 847 (0x34f), region = 75  ;;  %s2229_s11 = scalar_lea.vmem (!%p1654_p4), [#allocation2], %s1706_s12 }
 0x1d3   : > { %v939_v48 = vld [vmem:[#allocation3 + $0x18] sm:$0x7]  ;;  %vm953_vm13 = vcmask 1042432   ;;  %v938_v50 = vld [vmem:[#allocation3 + $0x10] sm:$0xff]  ;;  %v937_v52 = vld [vmem:[#allocation3 + $0x8] sm:$0xff]  ;;  %vm940_vm14 = vcmask 220160  }
 0x1d4   : > { %v1049_v49 = vld [vmem:[#allocation4 + $0x18] sm:$0x7]  ;;  %1740 = vmatprep.subr.msk.mxu0 %vm953_vm13, %v939_v48  ;;  %v1048_v51 = vld [vmem:[#allocation4 + $0x10] sm:$0xff]  ;;  %v1047_v53 = vld [vmem:[#allocation4 + $0x8] sm:$0xff]  ;;  %v1929_v60 = vmov 0   ;;  %vm1445_vm0 = vcmask 1041408  }
 0x1d5   : > { %1754 = vmatprep.subr.msk.mxu1 %vm953_vm13, %v1049_v49  ;;  %1741 = vmatpush3.msk.msra.mxu0 %vm953_vm13, %v939_v48  ;;  %v936_v54 = vld [vmem:[#allocation3] sm:$0xff]  ;;  %v933_v57 = vld [vmem:[%s2425_s4 + $0x8] sm:$0xff]  ;;  %v934_v58 = vld [vmem:[%s2425_s4 + $0x10] sm:$0xff]  ;;  %vm1446_vm15 = vsmask.f32 1280  ;;  %vm1448_vm1 = vcmask 1045508  }
 0x1d6   : > { %1755 = vmatpush3.msk.msra.mxu1 %vm953_vm13, %v1049_v49  ;;  %1742 = vmatprep.subr.mxu0 %v938_v50  ;;  %v1046_v55 = vld [vmem:[#allocation4] sm:$0xff]  ;;  %v935_v59 = vld [vmem:[%s2425_s4 + $0x18] sm:$0x7]  ;;  %v1155_v28 = vld [vmem:[%s2423_s2 + $0x8] sm:$0xff]  ;;  %vm1449_vm2 = vsmask.f32 5376 }
 0x1d7   : > { %1756 = vmatprep.subr.mxu1 %v1048_v51  ;;  %1743 = vmatpush3.msra.mxu0 %v938_v50  ;;  %v932_v56 = vld [vmem:[%s2425_s4] sm:$0xff]  ;;  %v1157_v33 = vld [vmem:[%s2423_s2 + $0x18] sm:$0x7]  ;;  %v1156_v37 = vld [vmem:[%s2423_s2 + $0x10] sm:$0xff] }
 0x1d8   : > { %1757 = vmatpush3.msra.mxu1 %v1048_v51  ;;  %1744 = vmatprep.subr.mxu0 %v937_v52  ;;  %v1154_v30 = vld [vmem:[%s2423_s2] sm:$0xff]  ;;  %v1173_v43 = vld [vmem:[%s2438_s10 + $0x18] sm:$0x7]  ;;  %v1171_v49 = vld [vmem:[%s2438_s10 + $0x8] sm:$0xff] }
 0x1d9   : > { %1758 = vmatprep.subr.mxu1 %v1047_v53  ;;  %1745 = vmatpush3.msra.mxu0 %v937_v52  ;;  %v1170_v44 = vld [vmem:[%s2438_s10] sm:$0xff]  ;;  %v1172_v50 = vld [vmem:[%s2438_s10 + $0x10] sm:$0xff]  ;;  %vm2293_vm3 = vmand %vm1445_vm0, %vm1446_vm15 }
 0x1da   : > { %1759 = vmatpush3.msra.mxu1 %v1047_v53  ;;  %1746 = vmatprep.subr.mxu0 %v936_v54  ;;  %v2232_v53 = vld [vmem:[%s2229_s11] sm:$0xff]  ;;  %vm2299_vm4 = vmand %vm1448_vm1, %vm1449_vm2 }
 0x1db   : > { %1760 = vmatprep.subr.mxu1 %v1046_v55  ;;  %1747 = vmatpush3.msra.mxu0 %v936_v54  ;;  %v2235_v54 = vld [vmem:[%s2229_s11 + $0x8] sm:$0xff]  ;;  %vm2323_vm5 = vmor %vm2299_vm4, %vm2293_vm3 }
 0x1dc   : > { %1748 = vmatprep.mubr.msk.f32.mxu0 %vm940_vm14, %v932_v56  ;;  %1761 = vmatpush3.msra.mxu1 %v1046_v55  ;;  %v2238_v55 = vld [vmem:[%s2229_s11 + $0x10] sm:$0xff] }
 0x1dd   : > { %1762 = vmatprep.mubr.msk.f32.mxu1 %vm940_vm14, %v932_v56  ;;  %1749 = vmatmul.mubr.msk.f32.vlgmr.msra.gmra.mxu0 %vm940_vm14, %v933_v57  ;;  %v2241_v56 = vld [vmem:[%s2229_s11 + $0x18] sm:$0xff] }
 0x1de   : > { %1763 = vmatmul.mubr.msk.f32.vlgmr.msra.gmra.mxu1 %vm940_vm14, %v933_v57  ;;  %1751 = vmatprep.mubr.msk.f32.mxu0 %vm940_vm14, %v934_v58  ;;  %v1189_v57 = vld [vmem:[%s2229_s11 + $0x20] sm:$0xff] }
 0x1df   : > { %1765 = vmatprep.mubr.msk.f32.mxu1 %vm940_vm14, %v934_v58  ;;  %1845 = vset.pattern.permute.xlu1 %v1929_v60  ;;  %v1190_v58 = vld [vmem:[%s2229_s11 + $0x28] sm:$0xff] }
 0x1e0   : > { %1846 = vset.pattern.permute.xlu0 %v1929_v60  ;;  %v1202_v60 = vunpack.c.h.bf16 %v2232_v53 }
 0x1e1   : > { %1752 = vmatmul.mubr.msk.f32.gmra.mxu0 %vm940_vm14, %v935_v59 }
 0x1e2   : > { %1766 = vmatmul.mubr.msk.f32.gmra.mxu1 %vm940_vm14, %v935_v59  ;;  %v1201_v59 = vunpack.c.l.bf16 %v2232_v53 }
 0x29d   : > { %v1750_v61 = vpop.f32.mrf.mxu0 }
 0x29e   : > { %v1764_v62 = vpop.f32.mrf.mxu1  ;;  %v1043_v63 = vmul.f32 3.9157334e-05, %v1750_v61  ;;  %v1203_v61 = vunpack.c.l.bf16 %v2235_v54 }
 0x29f   : > { %v1139_v1 = vmul.f32 3.9157334e-05, %v1764_v62  ;;  %v1023_v0 = vpop.f32.mrf.mxu0  ;;  %v1204_v62 = vunpack.c.h.bf16 %v2235_v54 }
 0x2a0   : > { %v1119_v2 = vpop.f32.mrf.mxu1  ;;  %v1143_v3 = vmul.f32 %v1043_v63, %v1043_v63  ;;  %v1042_v4 = vmul.f32 3.9157334e-05, %v1023_v0  ;;  %v1205_v0 = vunpack.c.l.bf16 %v2238_v55 }
 0x2a1   : > { %v1138_v5 = vmul.f32 3.9157334e-05, %v1119_v2  ;;  %v1753_v6 = vpop.f32.mrf.mxu0  ;;  %v1206_v2 = vunpack.c.h.bf16 %v2238_v55 }
 0x2a2   : > { %v1767_v7 = vpop.f32.mrf.mxu1  ;;  %v1147_v8 = vsub.f32 %v1139_v1, %v1143_v3  ;;  %v1142_v9 = vmul.f32 %v1042_v4, %v1042_v4  ;;  %v1045_v10 = vmul.f32 3.9157334e-05, %v1753_v6  ;;  %v2253_v1 = vld [vmem:[%s2229_s11 + $0x68] sm:$0x33]  ;;  %v1207_v3 = vunpack.c.l.bf16 %v2241_v56  ;;  %v2261_v6 = vld [vmem:[%s2229_s11 + $0x78] sm:$0x33] }
 0x2a3   : > { %v1141_v11 = vmul.f32 3.9157334e-05, %v1767_v7  ;;  %v1033_v12 = vpop.f32.mrf.mxu0  ;;  %v1209_v7 = vunpack.c.l.bf16 %v1189_v57 }
 0x2a4   : > { %v1129_v13 = vpop.f32.mrf.mxu1  ;;  %v1151_v14 = vmax.f32 %v1147_v8, 0.0  ;;  %v1146_v15 = vsub.f32 %v1138_v5, %v1142_v9  ;;  %v1145_v16 = vmul.f32 %v1045_v10, %v1045_v10  ;;  %v1044_v17 = vmul.f32 3.9157334e-05, %v1033_v12  ;;  %v1199_v5 = vld [vmem:[%s2229_s11 + $0x70] sm:$0x33] }
 0x2a5   : > { %v1140_v18 = vmul.f32 3.9157334e-05, %v1129_v13  ;;  %v1210_v8 = vunpack.c.h.bf16 %v1189_v57  ;;  %v1211_v9 = vunpack.c.l.bf16 %v1190_v58  ;;  %v1227_v13 = vunpack.c.l.bf16 %v2253_v1 }
 0x2a6   : > { %v1159_v19 = vadd.f32 1e-05, %v1151_v14  ;;  %v1150_v20 = vmax.f32 %v1146_v15, 0.0  ;;  %v1149_v36 = vsub.f32 %v1141_v11, %v1145_v16  ;;  %v1144_v21 = vmul.f32 %v1044_v17, %v1044_v17  ;;  %v1191_v15 = vld [vmem:[%s2229_s11 + $0x30] sm:$0xff]  ;;  %v1192_v16 = vld [vmem:[%s2229_s11 + $0x38] sm:$0xff] }
 0x2a7   : > { %v1228_v14 = vunpack.c.h.bf16 %v2253_v1 }
 0x2a8   : > { %1847 = vrsqrt.f32 %v1159_v19  ;;  %v1158_v22 = vadd.f32 1e-05, %v1150_v20  ;;  %v1153_v23 = vmax.f32 %v1149_v36, 0.0  ;;  %v1148_v24 = vsub.f32 %v1140_v18, %v1144_v21  ;;  %v1193_v20 = vld [vmem:[%s2229_s11 + $0x40] sm:$0xff]  ;;  %v1194_v36 = vld [vmem:[%s2229_s11 + $0x48] sm:$0xff] }
 0x2a9   : > { %v1230_v18 = vunpack.c.h.bf16 %v1199_v5  ;;  %v1231_v19 = vunpack.c.l.bf16 %v2261_v6  ;;  %v1232_v21 = vunpack.c.h.bf16 %v2261_v6 }
 0x2aa   : > { %1849 = vrsqrt.f32 %v1158_v22  ;;  %v1161_v25 = vadd.f32 1e-05, %v1153_v23  ;;  %v1152_v26 = vmax.f32 %v1148_v24, 0.0  ;;  %v1195_v22 = vld [vmem:[%s2229_s11 + $0x50] sm:$0xff]  ;;  %v1196_v23 = vld [vmem:[%s2229_s11 + $0x58] sm:$0xff] }
 0x2ac   : > { %1851 = vrsqrt.f32 %v1161_v25  ;;  %v1160_v27 = vadd.f32 1e-05, %v1152_v26  ;;  %v1213_v25 = vunpack.c.l.bf16 %v1191_v15  ;;  %v1214_v26 = vunpack.c.h.bf16 %v1191_v15 }
 0x2ae   : > { %1853 = vrsqrt.f32 %v1160_v27  ;;  %v1215_v27 = vunpack.c.l.bf16 %v1192_v16 }
 0x2b5   : > { %v1848_v29 = vpop.eup %1847 }
 0x2b6   : > { %v1167_v31 = vmul.f32 %v1848_v29, %v1155_v28  ;;  %v1216_v28 = vunpack.c.h.bf16 %v1192_v16  ;;  %v1217_v29 = vunpack.c.l.bf16 %v1193_v20 }
 0x2b7   : > { %v1850_v32 = vpop.eup %1849 }
 0x2b8   : > { %1240 = vperm.xlu1 %1845, %v1167_v31   ;;  %v1166_v34 = vmul.f32 %v1850_v32, %v1154_v30  ;;  %v1175_v45 = vmul.f32 %v1167_v31, %v1043_v63  ;;  %v2250_v63 = vld [vmem:[%s2229_s11 + $0x60] sm:$0x33]  ;;  %v1218_v30 = vunpack.c.h.bf16 %v1193_v20  ;;  %v1219_v31 = vunpack.c.l.bf16 %v1194_v36 }
 0x2b9   : > { %v1852_v35 = vpop.eup %1851  ;;  %v1225_v11 = vunpack.c.l.bf16 %v2250_v63  ;;  %v1226_v12 = vunpack.c.h.bf16 %v2250_v63  ;;  %v1220_v32 = vunpack.c.h.bf16 %v1194_v36 }
 0x2ba   : > { %1235 = vperm.xlu0 %1846, %v1166_v34   ;;  %v1169_v38 = vmul.f32 %v1852_v35, %v1157_v33  ;;  %v1174_v40 = vmul.f32 %v1166_v34, %v1042_v4  ;;  %v1179_v51 = vsub.f32 %v1171_v49, %v1175_v45  ;;  %v1208_v4 = vunpack.c.h.bf16 %v2241_v56 }
 0x2bb   : > { %v1854_v39 = vpop.eup %1853  ;;  %v1221_v34 = vunpack.c.l.bf16 %v1195_v22  ;;  %v1222_v35 = vunpack.c.h.bf16 %v1195_v22 }
 0x2bc   : > { %v1168_v41 = vmul.f32 %v1854_v39, %v1156_v37  ;;  %v1177_v42 = vmul.f32 %v1169_v38, %v1045_v10  ;;  %v1178_v47 = vsub.f32 %v1170_v44, %v1174_v40  ;;  %v1212_v10 = vunpack.c.h.bf16 %v1190_v58 }
 0x2bd   : > { %v1223_v37 = vunpack.c.l.bf16 %v1196_v23 }
 0x2be   : > { %1250 = vperm.xlu0 %1846, %v1169_v38   ;;  %1245 = vperm.xlu1 %1845, %v1168_v41   ;;  %v1181_v46 = vsub.f32 %v1173_v43, %v1177_v42  ;;  %v1176_v48 = vmul.f32 %v1168_v41, %v1044_v17  ;;  %v1229_v17 = vunpack.c.l.bf16 %v1199_v5  ;;  %v1224_v38 = vunpack.c.h.bf16 %v1196_v23  ;;  %v1458_v23 = vld [vmem:[%s2077_s6 + $0x70] sm:$0x33] }
 0x2c0   : > { %v1180_v52 = vsub.f32 %v1172_v50, %v1176_v48 }
 0x2c2   : > { %1302 = vperm.xlu0 %1846, %v1181_v46   ;;  %1287 = vperm.xlu1 %1845, %v1178_v47  }
 0x2c6   : > { %1292 = vperm.xlu0 %1846, %v1179_v51   ;;  %1297 = vperm.xlu1 %1845, %v1180_v52  }
 0x333   : > { %v1241_v24 = vpop.permute.xlu1 %1240 }
 0x334   : > { %v2275_v39 = vmul.f32 %v1241_v24, %v1209_v7  ;;  %v2277_v40 = vmul.f32 %v1241_v24, %v1210_v8  ;;  %v2279_v41 = vmul.f32 %v1241_v24, %v1211_v9  ;;  %v2281_v42 = vmul.f32 %v1241_v24, %v1212_v10 }
 0x335   : > { %v1236_v33 = vpop.permute.xlu0 %1235  ;;  %v2283_v43 = vmul.f32 %v1241_v24, %v1213_v25  ;;  %v2285_v44 = vmul.f32 %v1241_v24, %v1214_v26  ;;  %v2287_v45 = vmul.f32 %v1241_v24, %v1215_v27  ;;  %v2289_v46 = vmul.f32 %v1241_v24, %v1216_v28  ;;  %v1461_v24 = vld [vmem:[%s2077_s6 + $0x78] sm:$0x33] }
 0x336   : > { %v1253_v47 = vmul.f32 %v1236_v33, %v1201_v59  ;;  %v1254_v48 = vmul.f32 %v1236_v33, %v1202_v60  ;;  %v1255_v49 = vmul.f32 %v1236_v33, %v1203_v61  ;;  %v1256_v50 = vmul.f32 %v1236_v33, %v1204_v62 }
 0x337   : > { %v1257_v51 = vmul.f32 %v1236_v33, %v1205_v0  ;;  %v1258_v52 = vmul.f32 %v1236_v33, %v1206_v2  ;;  %v1259_v53 = vmul.f32 %v1236_v33, %v1207_v3  ;;  %v1260_v54 = vmul.f32 %v1236_v33, %v1208_v4 }
 0x339   : > { %v1251_v55 = vpop.permute.xlu0 %1250  ;;  %v1246_v56 = vpop.permute.xlu1 %1245 }
 0x33a   : > { %v1277_v57 = vmul.f32 %v1251_v55, %v1225_v11  ;;  %v1278_v58 = vmul.f32 %v1251_v55, %v1226_v12  ;;  %v1279_v63 = vmul.f32 %v1251_v55, %v1227_v13  ;;  %v1280_v1 = vmul.f32 %v1251_v55, %v1228_v14 }
 0x33b   : > { %v1281_v5 = vmul.f32 %v1251_v55, %v1229_v17  ;;  %v1282_v6 = vmul.f32 %v1251_v55, %v1230_v18  ;;  %v1283_v7 = vmul.f32 %v1251_v55, %v1231_v19  ;;  %v1284_v8 = vmul.f32 %v1251_v55, %v1232_v21  ;;  %v1452_v18 = vld [vmem:[%s2077_s6 + $0x60] sm:$0x33]  ;;  %v1455_v19 = vld [vmem:[%s2077_s6 + $0x68] sm:$0x33] }
 0x33c   : > { %v2303_v61 = vmul.f32 %v1246_v56, %v1217_v29  ;;  %v2305_v62 = vmul.f32 %v1246_v56, %v1218_v30  ;;  %v2307_v0 = vmul.f32 %v1246_v56, %v1219_v31  ;;  %v2309_v2 = vmul.f32 %v1246_v56, %v1220_v32 }
 0x33d   : > { %v1303_v3 = vpop.permute.xlu0 %1302  ;;  %v1288_v4 = vpop.permute.xlu1 %1287  ;;  %v2311_v9 = vmul.f32 %v1246_v56, %v1221_v34  ;;  %v2313_v10 = vmul.f32 %v1246_v56, %v1222_v35  ;;  %v2315_v11 = vmul.f32 %v1246_v56, %v1223_v37  ;;  %v2317_v12 = vmul.f32 %v1246_v56, %v1224_v38 }
 0x33e   : > { %v1329_v13 = vadd.f32 %v1303_v3, %v1277_v57  ;;  %v1330_v14 = vadd.f32 %v1303_v3, %v1278_v58  ;;  %v1331_v15 = vadd.f32 %v1303_v3, %v1279_v63  ;;  %v1332_v16 = vadd.f32 %v1303_v3, %v1280_v1 }
 0x33f   : > { %v1333_v20 = vadd.f32 %v1303_v3, %v1281_v5  ;;  %v1334_v36 = vadd.f32 %v1303_v3, %v1282_v6  ;;  %v1335_v21 = vadd.f32 %v1303_v3, %v1283_v7  ;;  %v1336_v22 = vadd.f32 %v1303_v3, %v1284_v8 }
 0x340   : > { %v1719_v25 = vpack.c.bf16 %v1330_v14, %v1329_v13  ;;  %v1720_v26 = vpack.c.bf16 %v1332_v16, %v1331_v15  ;;  %v1305_v27 = vadd.f32 %v1288_v4, %v1253_v47  ;;  %v1306_v28 = vadd.f32 %v1288_v4, %v1254_v48 }
 0x341   : > { %v1721_v29 = vpack.c.bf16 %v1334_v36, %v1333_v20  ;;  %v1722_v30 = vpack.c.bf16 %v1336_v22, %v1335_v21  ;;  %v1307_v31 = vadd.f32 %v1288_v4, %v1255_v49  ;;  %v1308_v32 = vadd.f32 %v1288_v4, %v1256_v50  ;;  %v1293_v33 = vpop.permute.xlu0 %1292  ;;  %v1298_v57 = vpop.permute.xlu1 %1297 }
 0x342   : > { %v1453_v34 = vsel %vm2323_vm5, %v1719_v25, %v1452_v18  ;;  %v1456_v35 = vsel %vm2323_vm5, %v1720_v26, %v1455_v19  ;;  %v1309_v37 = vadd.f32 %v1288_v4, %v1257_v51  ;;  %v1310_v38 = vadd.f32 %v1288_v4, %v1258_v52 }
 0x343   : > { %1454 = vst [vmem:[%s2077_s6 + $0x60] sm:$0x33] %v1453_v34  ;;  %1457 = vst [vmem:[%s2077_s6 + $0x68] sm:$0x33] %v1456_v35  ;;  %v1459_v47 = vsel %vm2323_vm5, %v1721_v29, %v1458_v23  ;;  %v1462_v48 = vsel %vm2323_vm5, %v1722_v30, %v1461_v24  ;;  %v1311_v49 = vadd.f32 %v1288_v4, %v1259_v53 }
 0x344   : > { %v1312_v50 = vadd.f32 %v1288_v4, %v1260_v54  ;;  %1460 = vst [vmem:[%s2077_s6 + $0x70] sm:$0x33] %v1459_v47  ;;  %1463 = vst [vmem:[%s2077_s6 + $0x78] sm:$0x33] %v1462_v48  ;;  %v1707_v55 = vpack.c.bf16 %v1306_v28, %v1305_v27  ;;  %v1708_v56 = vpack.c.bf16 %v1308_v32, %v1307_v31 }
 0x345   : > { %v1709_v51 = vpack.c.bf16 %v1310_v38, %v1309_v37  ;;  %v1313_v52 = vadd.f32 %v1293_v33, %v2275_v39  ;;  %v1314_v63 = vadd.f32 %v1293_v33, %v2277_v40  ;;  %v1315_v1 = vadd.f32 %v1293_v33, %v2279_v41 }
 0x346   : > { %v1710_v58 = vpack.c.bf16 %v1312_v50, %v1311_v49  ;;  %v1316_v5 = vadd.f32 %v1293_v33, %v2281_v42  ;;  %1433 = vst [vmem:[%s2077_s6] sm:$0xff] %v1707_v55  ;;  %1434 = vst [vmem:[%s2077_s6 + $0x8] sm:$0xff] %v1708_v56  ;;  %v1317_v53 = vadd.f32 %v1293_v33, %v2283_v43 }
 0x347   : > { %1435 = vst [vmem:[%s2077_s6 + $0x10] sm:$0xff] %v1709_v51  ;;  %v1318_v54 = vadd.f32 %v1293_v33, %v2285_v44  ;;  %v1319_v6 = vadd.f32 %v1293_v33, %v2287_v45  ;;  %v1320_v39 = vadd.f32 %v1293_v33, %v2289_v46  ;;  %v1711_v40 = vpack.c.bf16 %v1314_v63, %v1313_v52 }
 0x348   : > { %1436 = vst [vmem:[%s2077_s6 + $0x18] sm:$0xff] %v1710_v58  ;;  %v1712_v41 = vpack.c.bf16 %v1316_v5, %v1315_v1  ;;  %v1321_v42 = vadd.f32 %v1298_v57, %v2303_v61  ;;  %v1322_v7 = vadd.f32 %v1298_v57, %v2305_v62  ;;  %v1323_v43 = vadd.f32 %v1298_v57, %v2307_v0 }
 0x349   : > { %v1713_v8 = vpack.c.bf16 %v1318_v54, %v1317_v53  ;;  %v1714_v59 = vpack.c.bf16 %v1320_v39, %v1319_v6  ;;  %v1324_v44 = vadd.f32 %v1298_v57, %v2309_v2  ;;  %1437 = vst [vmem:[%s2077_s6 + $0x20] sm:$0xff] %v1711_v40  ;;  %v1325_v45 = vadd.f32 %v1298_v57, %v2311_v9 }
 0x34a   : > { %1438 = vst [vmem:[%s2077_s6 + $0x28] sm:$0xff] %v1712_v41  ;;  %v1326_v46 = vadd.f32 %v1298_v57, %v2313_v10  ;;  %v1327_v60 = vadd.f32 %v1298_v57, %v2315_v11  ;;  %v1328_v61 = vadd.f32 %v1298_v57, %v2317_v12  ;;  %v1715_v62 = vpack.c.bf16 %v1322_v7, %v1321_v42 }
 0x34b   : > { %1439 = vst [vmem:[%s2077_s6 + $0x30] sm:$0xff] %v1713_v8  ;;  %1440 = vst [vmem:[%s2077_s6 + $0x38] sm:$0xff] %v1714_v59  ;;  %v1716_v3 = vpack.c.bf16 %v1324_v44, %v1323_v43 }
 0x34c   : > { %v1717_v4 = vpack.c.bf16 %v1326_v46, %v1325_v45  ;;  %v1718_v0 = vpack.c.bf16 %v1328_v61, %v1327_v60  ;;  %1441 = vst [vmem:[%s2077_s6 + $0x40] sm:$0xff] %v1715_v62 }
 0x34d   : > { %1442 = vst [vmem:[%s2077_s6 + $0x48] sm:$0xff] %v1716_v3 }
 0x34e   : > { %1443 = vst [vmem:[%s2077_s6 + $0x50] sm:$0xff] %v1717_v4  ;;  %1444 = vst [vmem:[%s2077_s6 + $0x58] sm:$0xff] %v1718_v0 }
 0x34f PF: > { %1470 = sbr.rel (!%p2034_p9) target bundleno = 862 (0x35e), region = 79  ;;  %v1487_v2 = vld [vmem:[%s2077_s6] sm:$0xff] (%p2034_p9)  ;;  %v1489_v9 = vld [vmem:[%s2077_s6 + $0x8] sm:$0xff] (%p2034_p9)  ;;  %v1491_v10 = vld [vmem:[%s2077_s6 + $0x10] sm:$0xff] (%p2034_p9)  ;;  %s2445_s8 = sld [smem:[#allocation8_spill]] (%p2034_p9) }
 0x350   : > { %s1471_s13 = smul.u32 (%p2034_p9), %s1909_s22, %s1913_s23  ;;  %v1493_v11 = vld [vmem:[%s2077_s6 + $0x18] sm:$0xff] (%p2034_p9)  ;;  %v1495_v12 = vld [vmem:[%s2077_s6 + $0x20] sm:$0xff] (%p2034_p9)  ;;  %v1513_v36 = vld [vmem:[%s2077_s6 + $0x68] sm:$0xff] (%p2034_p9) }
 0x351   : > { %v1497_v13 = vld [vmem:[%s2077_s6 + $0x28] sm:$0xff] (%p2034_p9)  ;;  %v1511_v20 = vld [vmem:[%s2077_s6 + $0x60] sm:$0xff] (%p2034_p9)  ;;  %v1515_v21 = vld [vmem:[%s2077_s6 + $0x70] sm:$0xff] (%p2034_p9) }
 0x352   : > { %s1723_s7 = sshll.u32 (%p2034_p9), %s1471_s13, 5  ;;  %v1499_v14 = vld [vmem:[%s2077_s6 + $0x30] sm:$0xff] (%p2034_p9)  ;;  %v1501_v15 = vld [vmem:[%s2077_s6 + $0x38] sm:$0xff] (%p2034_p9) }
 0x353   : > { %v1503_v16 = vld [vmem:[%s2077_s6 + $0x40] sm:$0xff] (%p2034_p9)  ;;  %v1517_v22 = vld [vmem:[%s2077_s6 + $0x78] sm:$0xff] (%p2034_p9) }
 0x354   : > { %v1505_v17 = vld [vmem:[%s2077_s6 + $0x48] sm:$0xff] }
 0x355   : > { %s1474_s9 = scalar_lea.vmem %s2445_s8, %s1723_s7  ;;  %v1507_v18 = vld [vmem:[%s2077_s6 + $0x50] sm:$0xff]  ;;  %v1509_v19 = vld [vmem:[%s2077_s6 + $0x58] sm:$0xff] }
 0x356   : > { %1488 = vst [vmem:[%s1474_s9] sm:$0xff] %v1487_v2  ;;  %1490 = vst [vmem:[%s1474_s9 + $0x8] sm:$0xff] %v1489_v9 }
 0x357   : > { %1492 = vst [vmem:[%s1474_s9 + $0x10] sm:$0xff] %v1491_v10  ;;  %1494 = vst [vmem:[%s1474_s9 + $0x18] sm:$0xff] %v1493_v11 }
 0x358   : > { %1496 = vst [vmem:[%s1474_s9 + $0x60] sm:$0xff] %v1495_v12  ;;  %1498 = vst [vmem:[%s1474_s9 + $0x68] sm:$0xff] %v1497_v13 }
 0x359   : > { %1500 = vst [vmem:[%s1474_s9 + $0x70] sm:$0xff] %v1499_v14  ;;  %1502 = vst [vmem:[%s1474_s9 + $0x78] sm:$0xff] %v1501_v15 }
 0x35a   : > { %1504 = vst [vmem:[%s1474_s9 + $0xc0] sm:$0xff] %v1503_v16  ;;  %1506 = vst [vmem:[%s1474_s9 + $0xc8] sm:$0xff] %v1505_v17 }
 0x35b   : > { %1508 = vst [vmem:[%s1474_s9 + $0xd0] sm:$0xff] %v1507_v18  ;;  %1510 = vst [vmem:[%s1474_s9 + $0xd8] sm:$0xff] %v1509_v19 }
 0x35c   : > { %1512 = vst [vmem:[%s1474_s9 + $0x120] sm:$0xff] %v1511_v20  ;;  %1514 = vst [vmem:[%s1474_s9 + $0x128] sm:$0xff] %v1513_v36 }
 0x35d   : > { %1516 = vst [vmem:[%s1474_s9 + $0x130] sm:$0xff] %v1515_v21  ;;  %1518 = vst [vmem:[%s1474_s9 + $0x138] sm:$0xff] %v1517_v22 }
 0x35e PF: > { %s15_s26 = sadd.s32 1, %s1925_s26   ;;  %s2446_s18 = smov %s1897_s19 }
 0x35f   : > { %p12_p5 = scmp.ge.s32.totalorder %s15_s26, 8   ;;  %s2447_s19 = smov %s2042_s3 }
 0x360   : > { %s2448_s20 = smov %s1905_s21  ;;  %s2449_s21 = smov %s2039_s5 }
 0x361   : > { %s2450_s22 = smov %s1917_s24  ;;  %s2451_s23 = smov %s1921_s25 }
 0x362   : > { %s2452_s24 = smov %s2455_s28  ;;  %s2453_s25 = smov %s2459_s29 }
 0x363   :  { %14 = sbr.rel (!%p12_p5) target bundleno = 8 (0x8), region = 135 }

// kernel: decoder_forward.9
= control target key start
LH: loop header
LB: loop body
LE: loop exit
PB: predicated region body
PF: predicated region fallthrough
CT: control target
= control target key end

     0   :  { %s1103_s12 = smov 0   ;;  %s1286_s0 = inlined_call_operand.vmem [shape: bf16[6,128,128], index: 0, kind: input, shape index: {}]   ;;  %s1287_s1 = inlined_call_operand.vmem [shape: bf16[224,128], index: 1, kind: input, shape index: {}]   ;;  %s1288_s2 = inlined_call_operand.vmem [shape: bf16[128,256], index: 2, kind: input, shape index: {}]   ;;  %s1289_s3 = inlined_call_operand.vmem [shape: f32[6,224,256], index: 3, kind: output, shape index: {}]  }
   0x1 LB: > { %s887_s13 = sadd.s32 4294967295, %s1080_s12   ;;  %p891_p0 = scmp.ge.s32.totalorder %s1080_s12, 1  ;;  %s1080_s12 = sphi %s1103_s12, %s13_s12  }
   0x2   : > { %p137_p1 = scmp.lt.s32.totalorder %s1080_s12, 7 }
   0x4   : > { %p138_p2 = pnand %p891_p0, %p137_p1 }
   0x5   : > { %p161_p3 = scmp.lt.s32.totalorder (!%p138_p2), %s887_s13, 5 }
   0x6   : > { %141 = sbr.rel (%p138_p2) target bundleno = 536 (0x218), region = 32 }
   0xb   : > { %v1036_v0 = vld [vmem:[%s1287_s1] sm:$0xff]   ;;  %s1291_s13 = smov (!%p161_p3, %s887_s13), 5  ;;  %v1052_v7 = vld [vmem:[%s1288_s2 + $0x74] ss:$8 sps:$4 sm:$0xff]   ;;  %v1050_v8 = vld [vmem:[%s1288_s2 + $0x70] ss:$8 sps:$4 sm:$0xff]  }
   0xc   : > { %974 = vmatprep.mubr.bf16.mxu0 %v1036_v0  ;;  %s935_s16 = sshll.u32 %s1291_s13, 6  ;;  %v1055_v9 = vld [vmem:[%s1288_s2 + $0x64] ss:$8 sps:$4 sm:$0xff]   ;;  %1002 = vmatprep.subr.bf16.mxu1 %v1052_v7  ;;  %v1053_v11 = vld [vmem:[%s1288_s2 + $0x60] ss:$8 sps:$4 sm:$0xff]   ;;  %v1038_v18 = vld [vmem:[%s1287_s1 + $0x10] sm:$0xff]  }
   0xd   : > { %s165_s19 = scalar_lea.vmem %s1286_s0, %s935_s16  ;;  %1010 = vmatpush1.bf16.msra.mxu1 %v1050_v8  ;;  %v1058_v13 = vld [vmem:[%s1288_s2 + $0x54] ss:$8 sps:$4 sm:$0xff]   ;;  %v1056_v14 = vld [vmem:[%s1288_s2 + $0x50] ss:$8 sps:$4 sm:$0xff]   ;;  %v1061_v15 = vld [vmem:[%s1288_s2 + $0x44] ss:$8 sps:$4 sm:$0xff]  }
   0xe   : > { %v1028_v1 = vld [vmem:[%s165_s19 + $0x38] sm:$0xff]   ;;  %v1029_v2 = vld [vmem:[%s165_s19 + $0x30] sm:$0xff]   ;;  %v1030_v3 = vld [vmem:[%s165_s19 + $0x28] sm:$0xff]   ;;  %1003 = vmatprep.subr.bf16.mxu1 %v1055_v9  ;;  %v1082_v38 = vmov 0   ;;  %s1018_s28 = smul.u32 448, %s1291_s13 }
   0xf   : > { %958 = vmatprep.subr.bf16.mxu0 %v1028_v1  ;;  %v1031_v4 = vld [vmem:[%s165_s19 + $0x20] sm:$0xff]   ;;  %v1032_v5 = vld [vmem:[%s165_s19 + $0x18] sm:$0xff]   ;;  %v1033_v6 = vld [vmem:[%s165_s19 + $0x10] sm:$0xff]   ;;  %665 = vmatprep.mubr.bf16.mxu1 %v1082_v38 }
  0x10   : > { %959 = vmatpush3.bf16.msra.mxu0 %v1028_v1  ;;  %v1034_v10 = vld [vmem:[%s165_s19 + $0x8] sm:$0xff]   ;;  %v1035_v12 = vld [vmem:[%s165_s19] sm:$0xff]   ;;  %v1064_v19 = vld [vmem:[%s1288_s2 + $0x34] ss:$8 sps:$4 sm:$0xff]   ;;  %s1225_s4 = scalar_lea.vmem %s1289_s3, %s1018_s28 }
  0x11   : > { %960 = vmatprep.subr.bf16.mxu0 %v1029_v2  ;;  %1011 = vmatpush1.bf16.msra.mxu1 %v1053_v11  ;;  %v1037_v16 = vld [vmem:[%s1287_s1 + $0x8] sm:$0xff]   ;;  %v1062_v20 = vld [vmem:[%s1288_s2 + $0x30] ss:$8 sps:$4 sm:$0xff]   ;;  %v1040_v24 = vld [vmem:[%s1287_s1 + $0x20] sm:$0xff]  }
  0x12   : > { %1004 = vmatprep.subr.bf16.mxu1 %v1058_v13  ;;  %v1059_v17 = vld [vmem:[%s1288_s2 + $0x40] ss:$8 sps:$4 sm:$0xff]   ;;  %v1067_v21 = vld [vmem:[%s1288_s2 + $0x24] ss:$8 sps:$4 sm:$0xff]   ;;  %v1039_v22 = vld [vmem:[%s1287_s1 + $0x18] sm:$0xff]  }
  0x13   : > { %v1065_v23 = vld [vmem:[%s1288_s2 + $0x20] ss:$8 sps:$4 sm:$0xff]   ;;  %v1042_v26 = vld [vmem:[%s1287_s1 + $0x30] sm:$0xff]   ;;  %v1043_v27 = vld [vmem:[%s1287_s1 + $0x38] sm:$0xff]  }
  0x14   : > { %961 = vmatpush3.bf16.msra.mxu0 %v1029_v2  ;;  %v1041_v25 = vld [vmem:[%s1287_s1 + $0x28] sm:$0xff]   ;;  %v1044_v28 = vld [vmem:[%s1287_s1 + $0x40] sm:$0xff]   ;;  %v1046_v30 = vld [vmem:[%s1287_s1 + $0x50] sm:$0xff]  }
  0x15   : > { %962 = vmatprep.subr.bf16.mxu0 %v1030_v3  ;;  %1012 = vmatpush1.bf16.msra.mxu1 %v1056_v14  ;;  %v1045_v29 = vld [vmem:[%s1287_s1 + $0x48] sm:$0xff]   ;;  %v1047_v31 = vld [vmem:[%s1287_s1 + $0x58] sm:$0xff]   ;;  %v1048_v32 = vld [vmem:[%s1287_s1 + $0x60] sm:$0xff]  }
  0x16   : > { %1005 = vmatprep.subr.bf16.mxu1 %v1061_v15  ;;  %v1049_v33 = vld [vmem:[%s1287_s1 + $0x68] sm:$0xff]   ;;  %v1070_v34 = vld [vmem:[%s1288_s2 + $0x14] ss:$8 sps:$4 sm:$0xff]   ;;  %v1068_v35 = vld [vmem:[%s1288_s2 + $0x10] ss:$8 sps:$4 sm:$0xff]  }
  0x17   : > { %v1073_v36 = vld [vmem:[%s1288_s2 + $0x4] ss:$8 sps:$4 sm:$0xff]   ;;  %v1071_v37 = vld [vmem:[%s1288_s2] ss:$8 sps:$4 sm:$0xff]  }
  0x18   : > { %963 = vmatpush3.bf16.msra.mxu0 %v1030_v3 }
  0x19   : > { %964 = vmatprep.subr.bf16.mxu0 %v1031_v4  ;;  %1013 = vmatpush1.bf16.msra.mxu1 %v1059_v17 }
  0x1a   : > { %1006 = vmatprep.subr.bf16.mxu1 %v1064_v19 }
  0x1c   : > { %965 = vmatpush3.bf16.msra.mxu0 %v1031_v4 }
  0x1d   : > { %966 = vmatprep.subr.bf16.mxu0 %v1032_v5  ;;  %1014 = vmatpush1.bf16.msra.mxu1 %v1062_v20 }
  0x1e   : > { %1007 = vmatprep.subr.bf16.mxu1 %v1067_v21 }
  0x20   : > { %967 = vmatpush3.bf16.msra.mxu0 %v1032_v5 }
  0x21   : > { %968 = vmatprep.subr.bf16.mxu0 %v1033_v6  ;;  %1015 = vmatpush1.bf16.msra.mxu1 %v1065_v23 }
  0x22   : > { %1008 = vmatprep.subr.bf16.mxu1 %v1070_v34 }
  0x24   : > { %969 = vmatpush3.bf16.msra.mxu0 %v1033_v6 }
  0x25   : > { %970 = vmatprep.subr.bf16.mxu0 %v1034_v10  ;;  %1016 = vmatpush1.bf16.msra.mxu1 %v1068_v35 }
  0x26   : > { %1009 = vmatprep.subr.bf16.mxu1 %v1073_v36 }
  0x28   : > { %971 = vmatpush3.bf16.msra.mxu0 %v1034_v10 }
  0x29   : > { %972 = vmatprep.subr.bf16.mxu0 %v1035_v12  ;;  %1017 = vmatpush1.bf16.msra.mxu1 %v1071_v37 }
  0x2c   : > { %973 = vmatpush3.bf16.msra.mxu0 %v1035_v12 }
  0x2d   : > { %603 = vmatprep.subr.bf16.mxu0 %v1052_v7 }
  0x2f   : > { %975 = vmatmul.mubr.bf16.vlgmr.msra.gmra.mxu0 %v1037_v16 }
  0x30   : > { %978 = vmatprep.mubr.bf16.mxu0 %v1038_v18  ;;  %604 = vmatpush1.bf16.msra.mxu0 %v1050_v8 }
  0x31   : > { %605 = vmatprep.subr.bf16.mxu0 %v1055_v9 }
  0x34   : > { %606 = vmatpush1.bf16.msra.mxu0 %v1053_v11 }
  0x35   : > { %607 = vmatprep.subr.bf16.mxu0 %v1058_v13 }
  0x37   : > { %979 = vmatmul.mubr.bf16.gmra.mxu0 %v1039_v22 }
  0x38   : > { %982 = vmatprep.mubr.bf16.mxu0 %v1040_v24  ;;  %608 = vmatpush1.bf16.msra.mxu0 %v1056_v14 }
  0x39   : > { %609 = vmatprep.subr.bf16.mxu0 %v1061_v15 }
  0x3c   : > { %610 = vmatpush1.bf16.msra.mxu0 %v1059_v17 }
  0x3d   : > { %611 = vmatprep.subr.bf16.mxu0 %v1064_v19 }
  0x3f   : > { %983 = vmatmul.mubr.bf16.gmra.mxu0 %v1041_v25 }
  0x40   : > { %986 = vmatprep.mubr.bf16.mxu0 %v1042_v26  ;;  %612 = vmatpush1.bf16.msra.mxu0 %v1062_v20 }
  0x41   : > { %613 = vmatprep.subr.bf16.mxu0 %v1067_v21 }
  0x44   : > { %614 = vmatpush1.bf16.msra.mxu0 %v1065_v23 }
  0x45   : > { %615 = vmatprep.subr.bf16.mxu0 %v1070_v34 }
  0x47   : > { %987 = vmatmul.mubr.bf16.gmra.mxu0 %v1043_v27 }
  0x48   : > { %990 = vmatprep.mubr.bf16.mxu0 %v1044_v28  ;;  %616 = vmatpush1.bf16.msra.mxu0 %v1068_v35 }
  0x49   : > { %617 = vmatprep.subr.bf16.mxu0 %v1073_v36 }
  0x4c   : > { %618 = vmatpush1.bf16.msra.mxu0 %v1071_v37 }
  0x4f   : > { %991 = vmatmul.mubr.bf16.gmra.mxu0 %v1045_v29 }
  0x50   : > { %994 = vmatprep.mubr.bf16.mxu0 %v1046_v30 }
  0x57   : > { %995 = vmatmul.mubr.bf16.gmra.mxu0 %v1047_v31 }
  0x58   : > { %998 = vmatprep.mubr.bf16.mxu0 %v1048_v32 }
  0x5f   : > { %999 = vmatmul.mubr.bf16.gmra.mxu0 %v1049_v33 }
  0x60   : > { %635 = vmatprep.mubr.bf16.mxu0 %v1082_v38 }
  0xef   : > { %v976_v39 = vpop.f32.mrf.mxu0 }
  0xf1   : > { %v382_v40 = vpop.f32.mrf.mxu0 }
  0xf3   : > { %v977_v41 = vpop.f32.mrf.mxu0 }
  0xf4   : > { %v494_v49 = vpack.c.bf16 %v977_v41, %v976_v39 }
  0xf5   : > { %v385_v42 = vpop.f32.mrf.mxu0 }
  0xf6   : > { %v493_v43 = vpack.c.bf16 %v385_v42, %v382_v40 }
  0xf7   : > { %v980_v44 = vpop.f32.mrf.mxu0 }
  0xf8   : > { %636 = vmatmul.mubr.bf16.vlgmr.msra.gmra.mxu0 %v493_v43 }
  0xf9   : > { %v398_v45 = vpop.f32.mrf.mxu0  ;;  %645 = vmatprep.mubr.bf16.mxu0 %v1082_v38 }
  0xfb   : > { %v981_v46 = vpop.f32.mrf.mxu0 }
  0xfc   : > { %v496_v47 = vpack.c.bf16 %v981_v46, %v980_v44 }
  0xfd   : > { %v401_v48 = vpop.f32.mrf.mxu0 }
  0xfe   : > { %666 = vmatmul.mubr.bf16.vlgmr.msra.gmra.mxu1 %v496_v47  ;;  %v495_v54 = vpack.c.bf16 %v401_v48, %v398_v45 }
  0xff   : > { %v984_v50 = vpop.f32.mrf.mxu0  ;;  %675 = vmatprep.mubr.bf16.mxu1 %v1082_v38 }
 0x100   : > { %646 = vmatmul.mubr.bf16.gmra.mxu0 %v494_v49 }
 0x101   : > { %v414_v51 = vpop.f32.mrf.mxu0  ;;  %655 = vmatprep.mubr.bf16.mxu0 %v1082_v38 }
 0x103   : > { %v985_v52 = vpop.f32.mrf.mxu0 }
 0x104   : > { %v498_v58 = vpack.c.bf16 %v985_v52, %v984_v50 }
 0x105   : > { %v417_v53 = vpop.f32.mrf.mxu0 }
 0x106   : > { %v497_v55 = vpack.c.bf16 %v417_v53, %v414_v51 }
 0x107   : > { %v988_v56 = vpop.f32.mrf.mxu0 }
 0x108   : > { %656 = vmatmul.mubr.bf16.gmra.mxu0 %v495_v54  ;;  %676 = vmatmul.mubr.bf16.gmra.mxu1 %v497_v55 }
 0x109   : > { %685 = vmatprep.mubr.bf16.mxu1 %v1082_v38  ;;  %v430_v57 = vpop.f32.mrf.mxu0 }
 0x10b   : > { %v989_v59 = vpop.f32.mrf.mxu0 }
 0x10c   : > { %v500_v0 = vpack.c.bf16 %v989_v59, %v988_v56 }
 0x10d   : > { %v433_v60 = vpop.f32.mrf.mxu0 }
 0x10e   : > { %v499_v61 = vpack.c.bf16 %v433_v60, %v430_v57 }
 0x10f   : > { %v992_v62 = vpop.f32.mrf.mxu0 }
 0x110   : > { %686 = vmatmul.mubr.bf16.gmra.mxu1 %v498_v58 }
 0x111   : > { %695 = vmatprep.mubr.bf16.mxu1 %v1082_v38  ;;  %v446_v63 = vpop.f32.mrf.mxu0 }
 0x113   : > { %v993_v1 = vpop.f32.mrf.mxu0 }
 0x114   : > { %v502_v6 = vpack.c.bf16 %v993_v1, %v992_v62 }
 0x115   : > { %v449_v2 = vpop.f32.mrf.mxu0 }
 0x116   : > { %v501_v3 = vpack.c.bf16 %v449_v2, %v446_v63 }
 0x117   : > { %v996_v4 = vpop.f32.mrf.mxu0 }
 0x118   : > { %696 = vmatmul.mubr.bf16.gmra.mxu1 %v499_v61 }
 0x119   : > { %705 = vmatprep.mubr.bf16.mxu1 %v1082_v38  ;;  %v462_v5 = vpop.f32.mrf.mxu0 }
 0x11b   : > { %v997_v7 = vpop.f32.mrf.mxu0 }
 0x11c   : > { %v504_v12 = vpack.c.bf16 %v997_v7, %v996_v4 }
 0x11d   : > { %v465_v8 = vpop.f32.mrf.mxu0 }
 0x11e   : > { %v503_v9 = vpack.c.bf16 %v465_v8, %v462_v5 }
 0x11f   : > { %v1000_v10 = vpop.f32.mrf.mxu0 }
 0x120   : > { %706 = vmatmul.mubr.bf16.gmra.mxu1 %v500_v0 }
 0x121   : > { %715 = vmatprep.mubr.bf16.mxu1 %v1082_v38  ;;  %v478_v11 = vpop.f32.mrf.mxu0 }
 0x123   : > { %v1001_v13 = vpop.f32.mrf.mxu0 }
 0x124   : > { %v506_v16 = vpack.c.bf16 %v1001_v13, %v1000_v10 }
 0x125   : > { %v481_v14 = vpop.f32.mrf.mxu0 }
 0x126   : > { %v505_v15 = vpack.c.bf16 %v481_v14, %v478_v11 }
 0x128   : > { %716 = vmatmul.mubr.bf16.gmra.mxu1 %v501_v3 }
 0x129   : > { %725 = vmatprep.mubr.bf16.mxu1 %v1082_v38 }
 0x130   : > { %726 = vmatmul.mubr.bf16.gmra.mxu1 %v502_v6 }
 0x131   : > { %735 = vmatprep.mubr.bf16.mxu1 %v1082_v38 }
 0x138   : > { %736 = vmatmul.mubr.bf16.gmra.mxu1 %v503_v9 }
 0x139   : > { %745 = vmatprep.mubr.bf16.mxu1 %v1082_v38 }
 0x140   : > { %746 = vmatmul.mubr.bf16.gmra.mxu1 %v504_v12 }
 0x141   : > { %755 = vmatprep.mubr.bf16.mxu1 %v1082_v38 }
 0x148   : > { %756 = vmatmul.mubr.bf16.gmra.mxu1 %v505_v15 }
 0x149   : > { %765 = vmatprep.mubr.bf16.mxu1 %v1082_v38 }
 0x150   : > { %766 = vmatmul.mubr.bf16.gmra.mxu1 %v506_v16 }
 0x1b8   : > { %v637_v17 = vpop.f32.mrf.mxu0 }
 0x1b9   : > { %776 = vst [vmem:[%s1225_s4] sm:$0xff] %v637_v17 }
 0x1ba   : > { %v639_v18 = vpop.f32.mrf.mxu0 }
 0x1bb   : > { %777 = vst [vmem:[%s1225_s4 + $0x8] sm:$0xff] %v639_v18 }
 0x1bc   : > { %v641_v19 = vpop.f32.mrf.mxu0 }
 0x1bd   : > { %778 = vst [vmem:[%s1225_s4 + $0x10] sm:$0xff] %v641_v19 }
 0x1be   : > { %v643_v20 = vpop.f32.mrf.mxu0  ;;  %v667_v21 = vpop.f32.mrf.mxu1 }
 0x1bf   : > { %779 = vst [vmem:[%s1225_s4 + $0x18] sm:$0xff] %v643_v20  ;;  %788 = vst [vmem:[%s1225_s4 + $0x60] sm:$0xff] %v667_v21 }
 0x1c0   : > { %v647_v22 = vpop.f32.mrf.mxu0  ;;  %v669_v23 = vpop.f32.mrf.mxu1 }
 0x1c1   : > { %780 = vst [vmem:[%s1225_s4 + $0x20] sm:$0xff] %v647_v22  ;;  %789 = vst [vmem:[%s1225_s4 + $0x68] sm:$0xff] %v669_v23 }
 0x1c2   : > { %v649_v24 = vpop.f32.mrf.mxu0  ;;  %v671_v25 = vpop.f32.mrf.mxu1 }
 0x1c3   : > { %781 = vst [vmem:[%s1225_s4 + $0x28] sm:$0xff] %v649_v24  ;;  %790 = vst [vmem:[%s1225_s4 + $0x70] sm:$0xff] %v671_v25 }
 0x1c4   : > { %v651_v26 = vpop.f32.mrf.mxu0  ;;  %v673_v27 = vpop.f32.mrf.mxu1 }
 0x1c5   : > { %782 = vst [vmem:[%s1225_s4 + $0x30] sm:$0xff] %v651_v26  ;;  %791 = vst [vmem:[%s1225_s4 + $0x78] sm:$0xff] %v673_v27 }
 0x1c6   : > { %v653_v28 = vpop.f32.mrf.mxu0 }
 0x1c7   : > { %783 = vst [vmem:[%s1225_s4 + $0x38] sm:$0xff] %v653_v28 }
 0x1c8   : > { %v657_v29 = vpop.f32.mrf.mxu0  ;;  %v677_v30 = vpop.f32.mrf.mxu1 }
 0x1c9   : > { %784 = vst [vmem:[%s1225_s4 + $0x40] sm:$0xff] %v657_v29  ;;  %792 = vst [vmem:[%s1225_s4 + $0x80] sm:$0xff] %v677_v30 }
 0x1ca   : > { %v659_v31 = vpop.f32.mrf.mxu0  ;;  %v679_v32 = vpop.f32.mrf.mxu1 }
 0x1cb   : > { %785 = vst [vmem:[%s1225_s4 + $0x48] sm:$0xff] %v659_v31  ;;  %793 = vst [vmem:[%s1225_s4 + $0x88] sm:$0xff] %v679_v32 }
 0x1cc   : > { %v661_v33 = vpop.f32.mrf.mxu0  ;;  %v681_v34 = vpop.f32.mrf.mxu1 }
 0x1cd   : > { %786 = vst [vmem:[%s1225_s4 + $0x50] sm:$0xff] %v661_v33  ;;  %794 = vst [vmem:[%s1225_s4 + $0x90] sm:$0xff] %v681_v34 }
 0x1ce   : > { %v663_v35 = vpop.f32.mrf.mxu0  ;;  %v683_v36 = vpop.f32.mrf.mxu1 }
 0x1cf   : > { %787 = vst [vmem:[%s1225_s4 + $0x58] sm:$0xff] %v663_v35  ;;  %795 = vst [vmem:[%s1225_s4 + $0x98] sm:$0xff] %v683_v36 }
 0x1d0   : > { %v687_v37 = vpop.f32.mrf.mxu1 }
 0x1d1   : > { %796 = vst [vmem:[%s1225_s4 + $0xa0] sm:$0xff] %v687_v37 }
 0x1d2   : > { %v689_v38 = vpop.f32.mrf.mxu1 }
 0x1d3   : > { %797 = vst [vmem:[%s1225_s4 + $0xa8] sm:$0xff] %v689_v38 }
 0x1d4   : > { %v691_v39 = vpop.f32.mrf.mxu1 }
 0x1d5   : > { %798 = vst [vmem:[%s1225_s4 + $0xb0] sm:$0xff] %v691_v39 }
 0x1d6   : > { %v693_v40 = vpop.f32.mrf.mxu1 }
 0x1d7   : > { %799 = vst [vmem:[%s1225_s4 + $0xb8] sm:$0xff] %v693_v40 }
 0x1d8   : > { %v697_v41 = vpop.f32.mrf.mxu1 }
 0x1d9   : > { %800 = vst [vmem:[%s1225_s4 + $0xc0] sm:$0xff] %v697_v41 }
 0x1da   : > { %v699_v42 = vpop.f32.mrf.mxu1 }
 0x1db   : > { %801 = vst [vmem:[%s1225_s4 + $0xc8] sm:$0xff] %v699_v42 }
 0x1dc   : > { %v701_v43 = vpop.f32.mrf.mxu1 }
 0x1dd   : > { %802 = vst [vmem:[%s1225_s4 + $0xd0] sm:$0xff] %v701_v43 }
 0x1de   : > { %v703_v44 = vpop.f32.mrf.mxu1 }
 0x1df   : > { %803 = vst [vmem:[%s1225_s4 + $0xd8] sm:$0xff] %v703_v44 }
 0x1e0   : > { %v707_v45 = vpop.f32.mrf.mxu1 }
 0x1e1   : > { %804 = vst [vmem:[%s1225_s4 + $0xe0] sm:$0xff] %v707_v45 }
 0x1e2   : > { %v709_v46 = vpop.f32.mrf.mxu1 }
 0x1e3   : > { %805 = vst [vmem:[%s1225_s4 + $0xe8] sm:$0xff] %v709_v46 }
 0x1e4   : > { %v711_v47 = vpop.f32.mrf.mxu1 }
 0x1e5   : > { %806 = vst [vmem:[%s1225_s4 + $0xf0] sm:$0xff] %v711_v47 }
 0x1e6   : > { %v713_v48 = vpop.f32.mrf.mxu1 }
 0x1e7   : > { %807 = vst [vmem:[%s1225_s4 + $0xf8] sm:$0xff] %v713_v48 }
 0x1e8   : > { %v717_v49 = vpop.f32.mrf.mxu1 }
 0x1e9   : > { %808 = vst [vmem:[%s1225_s4 + $0x100] sm:$0xff] %v717_v49 }
 0x1ea   : > { %v719_v50 = vpop.f32.mrf.mxu1 }
 0x1eb   : > { %809 = vst [vmem:[%s1225_s4 + $0x108] sm:$0xff] %v719_v50 }
 0x1ec   : > { %v721_v51 = vpop.f32.mrf.mxu1 }
 0x1ed   : > { %810 = vst [vmem:[%s1225_s4 + $0x110] sm:$0xff] %v721_v51 }
 0x1ee   : > { %v723_v52 = vpop.f32.mrf.mxu1 }
 0x1ef   : > { %811 = vst [vmem:[%s1225_s4 + $0x118] sm:$0xff] %v723_v52 }
 0x1f0   : > { %v727_v53 = vpop.f32.mrf.mxu1 }
 0x1f1   : > { %812 = vst [vmem:[%s1225_s4 + $0x120] sm:$0xff] %v727_v53 }
 0x1f2   : > { %v729_v54 = vpop.f32.mrf.mxu1 }
 0x1f3   : > { %813 = vst [vmem:[%s1225_s4 + $0x128] sm:$0xff] %v729_v54 }
 0x1f4   : > { %v731_v55 = vpop.f32.mrf.mxu1 }
 0x1f5   : > { %814 = vst [vmem:[%s1225_s4 + $0x130] sm:$0xff] %v731_v55 }
 0x1f6   : > { %v733_v56 = vpop.f32.mrf.mxu1 }
 0x1f7   : > { %815 = vst [vmem:[%s1225_s4 + $0x138] sm:$0xff] %v733_v56 }
 0x1f8   : > { %v737_v57 = vpop.f32.mrf.mxu1 }
 0x1f9   : > { %816 = vst [vmem:[%s1225_s4 + $0x140] sm:$0xff] %v737_v57 }
 0x1fa   : > { %v739_v58 = vpop.f32.mrf.mxu1 }
 0x1fb   : > { %817 = vst [vmem:[%s1225_s4 + $0x148] sm:$0xff] %v739_v58 }
 0x1fc   : > { %v741_v59 = vpop.f32.mrf.mxu1 }
 0x1fd   : > { %818 = vst [vmem:[%s1225_s4 + $0x150] sm:$0xff] %v741_v59 }
 0x1fe   : > { %v743_v60 = vpop.f32.mrf.mxu1 }
 0x1ff   : > { %819 = vst [vmem:[%s1225_s4 + $0x158] sm:$0xff] %v743_v60 }
 0x200   : > { %v747_v61 = vpop.f32.mrf.mxu1 }
 0x201   : > { %820 = vst [vmem:[%s1225_s4 + $0x160] sm:$0xff] %v747_v61 }
 0x202   : > { %v749_v62 = vpop.f32.mrf.mxu1 }
 0x203   : > { %821 = vst [vmem:[%s1225_s4 + $0x168] sm:$0xff] %v749_v62 }
 0x204   : > { %v751_v63 = vpop.f32.mrf.mxu1 }
 0x205   : > { %822 = vst [vmem:[%s1225_s4 + $0x170] sm:$0xff] %v751_v63 }
 0x206   : > { %v753_v0 = vpop.f32.mrf.mxu1 }
 0x207   : > { %823 = vst [vmem:[%s1225_s4 + $0x178] sm:$0xff] %v753_v0 }
 0x208   : > { %v757_v1 = vpop.f32.mrf.mxu1 }
 0x209   : > { %824 = vst [vmem:[%s1225_s4 + $0x180] sm:$0xff] %v757_v1 }
 0x20a   : > { %v759_v2 = vpop.f32.mrf.mxu1 }
 0x20b   : > { %825 = vst [vmem:[%s1225_s4 + $0x188] sm:$0xff] %v759_v2 }
 0x20c   : > { %v761_v3 = vpop.f32.mrf.mxu1 }
 0x20d   : > { %826 = vst [vmem:[%s1225_s4 + $0x190] sm:$0xff] %v761_v3 }
 0x20e   : > { %v763_v4 = vpop.f32.mrf.mxu1 }
 0x20f   : > { %827 = vst [vmem:[%s1225_s4 + $0x198] sm:$0xff] %v763_v4 }
 0x210   : > { %v767_v5 = vpop.f32.mrf.mxu1 }
 0x211   : > { %828 = vst [vmem:[%s1225_s4 + $0x1a0] sm:$0xff] %v767_v5 }
 0x212   : > { %v769_v6 = vpop.f32.mrf.mxu1 }
 0x213   : > { %829 = vst [vmem:[%s1225_s4 + $0x1a8] sm:$0xff] %v769_v6 }
 0x214   : > { %v771_v7 = vpop.f32.mrf.mxu1 }
 0x215   : > { %830 = vst [vmem:[%s1225_s4 + $0x1b0] sm:$0xff] %v771_v7 }
 0x216   : > { %v773_v8 = vpop.f32.mrf.mxu1 }
 0x217   : > { %831 = vst [vmem:[%s1225_s4 + $0x1b8] sm:$0xff] %v773_v8 }
 0x218 PF: > { %s13_s12 = sadd.s32 1, %s1080_s12  }
 0x219   : > { %p10_p4 = scmp.ge.s32.totalorder %s13_s12, 8  }
 0x21b   :  { %12 = sbr.rel (!%p10_p4) target bundleno = 1 (0x1), region = 62 }

</bundles_post_ra>
